<compile_context>
chip_gen: v5e
topology: v5e:2x2
jax: 0.10.0
libtpu: 0.0.40
codegen_flags: <defaults>
</compile_context>

<pallas_src>
import functools
import math

import jax
import jax.numpy as jnp
from jax import lax
from jax.experimental import pallas as pl
from jax.experimental.pallas import tpu as pltpu

_BF16 = jnp.bfloat16
_VMEM_LIMIT = 48 * 1024 * 1024      # safe on v5e/v6e (128 MiB) and v7x (64 MiB)


# ------------------------------ shared math helpers ------------------------------

def _mm(a, b):
    """MXU matmul: bf16 operands, f32 accumulation."""
    return jnp.dot(a.astype(_BF16), b.astype(_BF16),
                   preferred_element_type=jnp.float32)


def _mm_nt(a, b):
    """a @ b.T without materializing the transpose (contract last dim of both)."""
    return lax.dot_general(a.astype(_BF16), b.astype(_BF16),
                           dimension_numbers=(((1,), (1,)), ((), ())),
                           preferred_element_type=jnp.float32)


def _layer_norm(y, g, b, eps=1e-5):
    """LayerNorm over the last axis (PyTorch nn.LayerNorm semantics), f32 math."""
    mu = jnp.mean(y, axis=-1, keepdims=True)
    var = jnp.mean(jnp.square(y - mu), axis=-1, keepdims=True)
    return (y - mu) * lax.rsqrt(var + eps) * g + b


# ------------------------------ in-kernel attention ------------------------------

def _flash_cross_attention(q, kv_ref, kvpos_ref, wk, bk, wv, bv, wo, bo,
                           o_buf_ref, *, nhead, kv_tile):
    """Online-softmax attention over KV tiles.

    q:          (Lq, E) f32, already projected (1/sqrt(Dh) folded into weights).
    kv_ref:     (L, E) VMEM ref; K input = kv + kvpos, V input = kv.
    o_buf_ref:  (Lq, E) f32 VMEM scratch; per-head outputs written at static lane
                offsets, then a single (Lq,E)@(E,E) out-projection.
    Returns (Lq, E) f32 attention output (out-proj bias included).
    """
    Lq, E = q.shape
    L = kv_ref.shape[0]
    Dh = E // nhead

    m = [jnp.full((Lq, 1), -jnp.inf, jnp.float32) for _ in range(nhead)]
    l = [jnp.zeros((Lq, 1), jnp.float32) for _ in range(nhead)]
    acc = [jnp.zeros((Lq, Dh), jnp.float32) for _ in range(nhead)]

    # TODO(synk): at real L (= H*W in the thousands) use lax.fori_loop /
    # pltpu.emit_pipeline here instead of an unrolled python loop.
    for kv0 in range(0, L, kv_tile):
        t = min(kv_tile, L - kv0)
        xkv = kv_ref[kv0:kv0 + t, :]
        kin = xkv + kvpos_ref[kv0:kv0 + t, :]
        kp = _mm(kin, wk) + bk          # (t, E) f32
        vp = _mm(xkv, wv) + bv          # (t, E) f32
        for h in range(nhead):
            c0, c1 = h * Dh, (h + 1) * Dh
            s = _mm_nt(q[:, c0:c1], kp[:, c0:c1])                 # (Lq, t)
            m_new = jnp.maximum(m[h], jnp.max(s, axis=-1, keepdims=True))
            alpha = jnp.exp(m[h] - m_new)
            p = jnp.exp(s - m_new)
            l[h] = alpha * l[h] + jnp.sum(p, axis=-1, keepdims=True)
            acc[h] = alpha * acc[h] + _mm(p, vp[:, c0:c1])
            m[h] = m_new

    for h in range(nhead):
        c0, c1 = h * Dh, (h + 1) * Dh
        o_buf_ref[:, c0:c1] = acc[h] / l[h]        # exact normalization

    return _mm(o_buf_ref[...], wo) + bo            # single full-K out-projection


# --------------------------------- kernels ----------------------------------------

def _encoder_layer_kernel(x_tile_ref, pos_tile_ref, x_full_ref, pos_full_ref,
                          wq_ref, bq_ref, wk_ref, bk_ref, wv_ref, bv_ref,
                          wo_ref, bo_ref, n1g_ref, n1b_ref,
                          w1_ref, b1_ref, w2_ref, b2_ref, n2g_ref, n2b_ref,
                          o_ref, attn_buf_ref, *, nhead, kv_tile, eps):
    """One encoder layer for one (batch, Lq-tile) grid step; K/V stream over KV tiles."""
    x = x_tile_ref[...].astype(jnp.float32)
    q = _mm(x + pos_tile_ref[...], wq_ref[...]) + bq_ref[...]   # scale folded into wq/bq

    attn = _flash_cross_attention(q, x_full_ref, pos_full_ref,
                                  wk_ref[...], bk_ref[...], wv_ref[...], bv_ref[...],
                                  wo_ref[...], bo_ref[...], attn_buf_ref,
                                  nhead=nhead, kv_tile=kv_tile)

    y = _layer_norm(x + attn, n1g_ref[...], n1b_ref[...], eps)            # norm1
    hid = jnp.maximum(_mm(y, w1_ref[...]) + b1_ref[...], 0.0)
    y2 = _mm(hid, w2_ref[...]) + b2_ref[...]
    o_ref[...] = _layer_norm(y + y2, n2g_ref[...], n2b_ref[...], eps).astype(o_ref.dtype)


def _decoder_stack_kernel(*refs, n_layers, nhead, kv_tile, eps):
    """All decoder layers (self-attn removed) + final LayerNorm, fully fused.

    refs layout: qpos, memory, pos, [16 weights per layer] * n_layers,
                 final_norm_g, final_norm_b, out, attn_scratch.
    """
    qpos_ref, mem_ref, pos_ref = refs[0], refs[1], refs[2]
    n_in = 3 + n_layers * 16 + 2
    gN_ref, bN_ref = refs[n_in - 2], refs[n_in - 1]
    o_ref = refs[n_in]
    attn_buf_ref = refs[n_in + 1]

    Q, E = qpos_ref.shape
    qpos = qpos_ref[...].astype(jnp.float32)
    tgt = jnp.zeros((Q, E), jnp.float32)           # tgt = zeros_like(query_embed)

    for layer in range(n_layers):
        (wq, bq, wk, bk, wv, bv, wo, bo,
         n2g, n2b, w1, b1, w2, b2, n3g, n3b) = refs[3 + layer * 16: 3 + (layer + 1) * 16]

        q = _mm(tgt + qpos, wq[...]) + bq[...]
        attn = _flash_cross_attention(q, mem_ref, pos_ref,
                                      wk[...], bk[...], wv[...], bv[...],
                                      wo[...], bo[...], attn_buf_ref,
                                      nhead=nhead, kv_tile=kv_tile)
        y = _layer_norm(tgt + attn, n2g[...], n2b[...], eps)              # norm2
        hid = jnp.maximum(_mm(y, w1[...]) + b1[...], 0.0)
        tgt = _layer_norm(y + _mm(hid, w2[...]) + b2[...], n3g[...], n3b[...], eps)

    o_ref[...] = _layer_norm(tgt, gN_ref[...], bN_ref[...], eps).astype(o_ref.dtype)


# ------------------------------ pallas_call wrappers -------------------------------

_ENC_KEYS = ("w_q", "b_q", "w_k", "b_k", "w_v", "b_v", "w_o", "b_o",
             "norm1_g", "norm1_b", "lin1_w", "lin1_b", "lin2_w", "lin2_b",
             "norm2_g", "norm2_b")
_DEC_KEYS = ("w_q", "b_q", "w_k", "b_k", "w_v", "b_v", "w_o", "b_o",
             "norm2_g", "norm2_b", "lin1_w", "lin1_b", "lin2_w", "lin2_b",
             "norm3_g", "norm3_b")


def _const_specs(arrs):
    # Weights / biases / norm params: whole 2-D block, constant block index
    # (resident across grid steps -> no re-DMA).
    # TODO(synk): on v7x mark these pl.Buffered(1) to save double-buffer VMEM.
    return [pl.BlockSpec(a.shape, lambda *_: (0, 0)) for a in arrs]


def encoder_layer(x2d, pos2d, p, *, B, L, nhead, lq_tile, kv_tile, eps=1e-5):
    """x2d, pos2d: (B*L, E) batch-major. grid = (batch, Lq-tile), both parallel."""
    E = x2d.shape[-1]
    assert L % lq_tile == 0, (L, lq_tile)
    n_lq = L // lq_tile
    weights = [p[k] for k in _ENC_KEYS]

    tile_spec = pl.BlockSpec((lq_tile, E), lambda b, i: (b * n_lq + i, 0))
    full_spec = pl.BlockSpec((L, E), lambda b, i: (b, 0))          # per-batch KV source

    return pl.pallas_call(
        functools.partial(_encoder_layer_kernel, nhead=nhead, kv_tile=kv_tile, eps=eps),
        out_shape=jax.ShapeDtypeStruct((B * L, E), x2d.dtype),
        grid=(B, n_lq),
        in_specs=[tile_spec, tile_spec, full_spec, full_spec] + _const_specs(weights),
        out_specs=tile_spec,
        scratch_shapes=[pltpu.VMEM((lq_tile, E), jnp.float32)],
        compiler_params=pltpu.CompilerParams(
            dimension_semantics=("parallel", "parallel"),
            vmem_limit_bytes=_VMEM_LIMIT),
    )(x2d, pos2d, x2d, pos2d, *weights)


def decoder_stack(qpos2d, mem2d, pos2d, dec_params, norm_g, norm_b, *,
                  B, Q, L, nhead, kv_tile, eps=1e-5):
    """All decoder layers + final LayerNorm in one pallas_call (memory read once)."""
    E = qpos2d.shape[-1]
    weights = []
    for p in dec_params:
        weights += [p[k] for k in _DEC_KEYS]
    weights += [norm_g, norm_b]

    per_batch_q = pl.BlockSpec((Q, E), lambda b: (b, 0))
    per_batch_l = pl.BlockSpec((L, E), lambda b: (b, 0))

    return pl.pallas_call(
        functools.partial(_decoder_stack_kernel, n_layers=len(dec_params),
                          nhead=nhead, kv_tile=kv_tile, eps=eps),
        out_shape=jax.ShapeDtypeStruct((B * Q, E), qpos2d.dtype),
        grid=(B,),
        in_specs=[per_batch_q, per_batch_l, per_batch_l] + _const_specs(weights),
        out_specs=per_batch_q,
        scratch_shapes=[pltpu.VMEM((Q, E), jnp.float32)],
        compiler_params=pltpu.CompilerParams(
            dimension_semantics=("parallel",),
            vmem_limit_bytes=_VMEM_LIMIT),
    )(qpos2d, mem2d, pos2d, *weights)


# ------------------------------ weight preparation ---------------------------------

def _prepare_params(params, nhead):
    """Fold 1/sqrt(Dh) into q projections; cast matmul weights to bf16 (biases/norms f32)."""
    def conv(p):
        q = dict(p)
        E = p["w_q"].shape[0]
        scale = 1.0 / math.sqrt(E // nhead)
        q["w_q"] = (p["w_q"] * scale).astype(_BF16)
        q["b_q"] = p["b_q"] * scale
        for k in ("w_k", "w_v", "w_o", "lin1_w", "lin2_w"):
            q[k] = p[k].astype(_BF16)
        return q

    out = dict(params)
    out["encoder"] = [conv(p) for p in params["encoder"]]
    out["decoder"] = [conv(p) for p in params["decoder"]]
    return out


def _pick_tile(L, cap=512):
    """Largest divisor of L that is <= cap and a multiple of 8 (or L itself)."""
    if L <= cap:
        return L
    for t in range(cap, 7, -1):
        if L % t == 0 and t % 8 == 0:
            return t
    return L


# --------------------------------- forward pass ------------------------------------

def transformer_forward(src, query_embed, pos_embed, params, nhead,
                        *, lq_tile=None, kv_tile=None):
    """Equivalent of Transformer.forward(src, query_embed, pos_embed, mask=None)."""
    bs, c, hh, ww = src.shape
    L = hh * ww
    Q = query_embed.shape[0]
    lq_tile = _pick_tile(L) if lq_tile is None else lq_tile
    kv_tile = min(512, L) if kv_tile is None else kv_tile

    pp = _prepare_params(params, nhead)

    # Batch-major (B*L, E): rows of one batch element are contiguous.
    src2d = jnp.transpose(src.reshape(bs, c, L), (0, 2, 1)).reshape(bs * L, c)
    pos2d = jnp.transpose(pos_embed.reshape(bs, c, L), (0, 2, 1)).reshape(bs * L, c)
    qpos2d = jnp.broadcast_to(query_embed[None], (bs, Q, c)).reshape(bs * Q, c)

    memory = src2d
    for p in pp["encoder"]:
        memory = encoder_layer(memory, pos2d, p, B=bs, L=L, nhead=nhead,
                               lq_tile=lq_tile, kv_tile=kv_tile)

    out = decoder_stack(qpos2d, memory, pos2d, pp["decoder"],
                        pp["dec_norm_g"], pp["dec_norm_b"],
                        B=bs, Q=Q, L=L, nhead=nhead, kv_tile=kv_tile)

    hs = out.reshape(bs, Q, c)[None]                 # (1, bs, Q, c) == hs.transpose(1, 2)
    mem_out = jnp.transpose(memory.reshape(bs, L, c), (0, 2, 1)).reshape(bs, c, hh, ww)
    return hs, mem_out


# ----------------------------- pure-JAX reference ----------------------------------

def _attention_ref(q_in, k_in, v_in, wq, bq, wk, bk, wv, bv, wo, bo, nhead):
    """Standard MHA (scale already folded into wq/bq); bf16 matmuls, f32 accumulation."""
    B, Lq, E = q_in.shape
    Lk = k_in.shape[1]
    Dh = E // nhead

    def split(x, Lx):
        return x.reshape(B, Lx, nhead, Dh).transpose(0, 2, 1, 3)

    q = split(_mm(q_in, wq) + bq, Lq)
    k = split(_mm(k_in, wk) + bk, Lk)
    v = split(_mm(v_in, wv) + bv, Lk)
    s = jnp.einsum("bhqd,bhkd->bhqk", q.astype(_BF16), k.astype(_BF16),
                   preferred_element_type=jnp.float32)
    p = jax.nn.softmax(s, axis=-1)
    o = jnp.einsum("bhqk,bhkd->bhqd", p.astype(_BF16), v.astype(_BF16),
                   preferred_element_type=jnp.float32)
    o = o.transpose(0, 2, 1, 3).reshape(B, Lq, E)
    return _mm(o, wo) + bo


def reference_forward(src, query_embed, pos_embed, params, nhead):
    """Pure-JAX (non-Pallas) reference with the same bf16-MXU / f32-math policy."""
    bs, c, hh, ww = src.shape
    L = hh * ww
    Q = query_embed.shape[0]
    pp = _prepare_params(params, nhead)

    x = jnp.transpose(src.reshape(bs, c, L), (0, 2, 1))
    pos = jnp.transpose(pos_embed.reshape(bs, c, L), (0, 2, 1))
    qpos = jnp.broadcast_to(query_embed[None], (bs, Q, c))

    memory = x
    for p in pp["encoder"]:
        a = _attention_ref(memory + pos, memory + pos, memory,
                           p["w_q"], p["b_q"], p["w_k"], p["b_k"],
                           p["w_v"], p["b_v"], p["w_o"], p["b_o"], nhead)
        y = _layer_norm(memory + a, p["norm1_g"], p["norm1_b"])
        hid = jax.nn.relu(_mm(y, p["lin1_w"]) + p["lin1_b"])
        memory = _layer_norm(y + _mm(hid, p["lin2_w"]) + p["lin2_b"],
                             p["norm2_g"], p["norm2_b"])

    tgt = jnp.zeros((bs, Q, c), jnp.float32)
    for p in pp["decoder"]:
        a = _attention_ref(tgt + qpos, memory + pos, memory,
                           p["w_q"], p["b_q"], p["w_k"], p["b_k"],
                           p["w_v"], p["b_v"], p["w_o"], p["b_o"], nhead)
        y = _layer_norm(tgt + a, p["norm2_g"], p["norm2_b"])
        hid = jax.nn.relu(_mm(y, p["lin1_w"]) + p["lin1_b"])
        tgt = _layer_norm(y + _mm(hid, p["lin2_w"]) + p["lin2_b"],
                          p["norm3_g"], p["norm3_b"])

    out = _layer_norm(tgt, pp["dec_norm_g"], pp["dec_norm_b"])
    hs = out[None]
    mem_out = jnp.transpose(memory, (0, 2, 1)).reshape(bs, c, hh, ww)
    return hs, mem_out


# ----------------------------- parameter init --------------------------------------

def init_params(key, d_model, nhead, dim_ff, num_encoder_layers, num_decoder_layers):
    keys = iter(jax.random.split(key, 256))
    E, F = d_model, dim_ff

    def mat(shape):
        return 0.02 * jax.random.normal(next(keys), shape, jnp.float32)

    def vec(n):                          # biases / norm shifts stored as (1, n) once
        return 0.02 * jax.random.normal(next(keys), (1, n), jnp.float32)

    def gamma(n):
        return 1.0 + 0.05 * jax.random.normal(next(keys), (1, n), jnp.float32)

    def attn_ffn(norm_names):
        p = dict(w_q=mat((E, E)), b_q=vec(E), w_k=mat((E, E)), b_k=vec(E),
                 w_v=mat((E, E)), b_v=vec(E), w_o=mat((E, E)), b_o=vec(E),
                 lin1_w=mat((E, F)), lin1_b=vec(F),
                 lin2_w=mat((F, E)), lin2_b=vec(E))
        for nm in norm_names:
            p[nm + "_g"] = gamma(E)
            p[nm + "_b"] = vec(E)
        return p

    params = dict(
        encoder=[attn_ffn(["norm1", "norm2"]) for _ in range(num_encoder_layers)],
        decoder=[attn_ffn(["norm2", "norm3"]) for _ in range(num_decoder_layers)])
    params["dec_norm_g"] = gamma(E)
    params["dec_norm_b"] = vec(E)
    return params


# ---------------------------------- main --------------------------------------------

if __name__ == "__main__":
    bs, d_model, hh, ww = 2, 32, 8, 8
    nhead, dim_ff = 4, 64
    num_queries = 8
    num_encoder_layers, num_decoder_layers = 1, 2

    root = jax.random.PRNGKey(0)
    k_src, k_pos, k_query, k_params = jax.random.split(root, 4)
    src = jax.random.normal(k_src, (bs, d_model, hh, ww), jnp.float32)
    pos_embed = jax.random.normal(k_pos, (bs, d_model, hh, ww), jnp.float32)
    query_embed = jax.random.normal(k_query, (num_queries, d_model), jnp.float32)

    params = init_params(k_params, d_model, nhead, dim_ff,
                         num_encoder_layers, num_decoder_layers)

    # Small tiles chosen explicitly to exercise BOTH the Lq grid axis and the
    # in-kernel online-softmax KV loop at toy shapes (production default is 512).
    fwd = jax.jit(functools.partial(transformer_forward, nhead=nhead,
                                    lq_tile=32, kv_tile=32))
    hs, memory_out = fwd(src, query_embed, pos_embed, params)
    jax.block_until_ready((hs, memory_out))

    assert hs.shape == (1, bs, num_queries, d_model), hs.shape
    assert memory_out.shape == (bs, d_model, hh, ww), memory_out.shape
    assert bool(jnp.all(jnp.isfinite(hs))) and bool(jnp.all(jnp.isfinite(memory_out)))

    # Correctness check against a pure-JAX reference using the same bf16-MXU /
    # f32-accumulation policy (residual diff = accumulation order + online softmax).
    hs_ref, mem_ref = reference_forward(src, query_embed, pos_embed, params, nhead)
    err_hs = float(jnp.max(jnp.abs(hs - hs_ref)))
    err_mem = float(jnp.max(jnp.abs(memory_out - mem_ref)))
    assert err_hs < 2e-2 and err_mem < 2e-2, (err_hs, err_mem)

    print("KERNEL_OK")
</pallas_src>

<mosaic_0001>
module attributes {stable_mosaic.version = 11 : i64} {
  func.func @_encoder_layer_kernel(%arg0: i32, %arg1: i32, %arg2: memref<32x32xf32, #tpu.memory_space<vmem>>, %arg3: memref<32x32xf32, #tpu.memory_space<vmem>>, %arg4: memref<64x32xf32, #tpu.memory_space<vmem>>, %arg5: memref<64x32xf32, #tpu.memory_space<vmem>>, %arg6: memref<32x32xbf16, #tpu.memory_space<vmem>>, %arg7: memref<1x32xf32, #tpu.memory_space<vmem>>, %arg8: memref<32x32xbf16, #tpu.memory_space<vmem>>, %arg9: memref<1x32xf32, #tpu.memory_space<vmem>>, %arg10: memref<32x32xbf16, #tpu.memory_space<vmem>>, %arg11: memref<1x32xf32, #tpu.memory_space<vmem>>, %arg12: memref<32x32xbf16, #tpu.memory_space<vmem>>, %arg13: memref<1x32xf32, #tpu.memory_space<vmem>>, %arg14: memref<1x32xf32, #tpu.memory_space<vmem>>, %arg15: memref<1x32xf32, #tpu.memory_space<vmem>>, %arg16: memref<32x64xbf16, #tpu.memory_space<vmem>>, %arg17: memref<1x64xf32, #tpu.memory_space<vmem>>, %arg18: memref<64x32xbf16, #tpu.memory_space<vmem>>, %arg19: memref<1x32xf32, #tpu.memory_space<vmem>>, %arg20: memref<1x32xf32, #tpu.memory_space<vmem>>, %arg21: memref<1x32xf32, #tpu.memory_space<vmem>>, %arg22: memref<32x32xf32, #tpu.memory_space<vmem>>, %arg23: memref<32x32xf32, #tpu.memory_space<vmem>>) attributes {dimension_semantics = [#tpu.dimension_semantics<parallel>, #tpu.dimension_semantics<parallel>], iteration_bounds = array<i64: 2, 2>, scalar_prefetch = 0 : i64, scratch_operands = 1 : i64, tpu.core_type = #tpu.core_type<tc>, window_params = [{transform_indices = @transform_0, window_bounds = array<i64: 32, 32>}, {transform_indices = @transform_1, window_bounds = array<i64: 32, 32>}, {transform_indices = @transform_2, window_bounds = array<i64: 64, 32>}, {transform_indices = @transform_3, window_bounds = array<i64: 64, 32>}, {pipeline_mode = #tpu.pipeline_mode<synchronous>, transform_indices = @transform_4, window_bounds = array<i64: 32, 32>}, {pipeline_mode = #tpu.pipeline_mode<synchronous>, transform_indices = @transform_5, window_bounds = array<i64: 1, 32>}, {pipeline_mode = #tpu.pipeline_mode<synchronous>, transform_indices = @transform_6, window_bounds = array<i64: 32, 32>}, {pipeline_mode = #tpu.pipeline_mode<synchronous>, transform_indices = @transform_7, window_bounds = array<i64: 1, 32>}, {pipeline_mode = #tpu.pipeline_mode<synchronous>, transform_indices = @transform_8, window_bounds = array<i64: 32, 32>}, {pipeline_mode = #tpu.pipeline_mode<synchronous>, transform_indices = @transform_9, window_bounds = array<i64: 1, 32>}, {pipeline_mode = #tpu.pipeline_mode<synchronous>, transform_indices = @transform_10, window_bounds = array<i64: 32, 32>}, {pipeline_mode = #tpu.pipeline_mode<synchronous>, transform_indices = @transform_11, window_bounds = array<i64: 1, 32>}, {pipeline_mode = #tpu.pipeline_mode<synchronous>, transform_indices = @transform_12, window_bounds = array<i64: 1, 32>}, {pipeline_mode = #tpu.pipeline_mode<synchronous>, transform_indices = @transform_13, window_bounds = array<i64: 1, 32>}, {pipeline_mode = #tpu.pipeline_mode<synchronous>, transform_indices = @transform_14, window_bounds = array<i64: 32, 64>}, {pipeline_mode = #tpu.pipeline_mode<synchronous>, transform_indices = @transform_15, window_bounds = array<i64: 1, 64>}, {pipeline_mode = #tpu.pipeline_mode<synchronous>, transform_indices = @transform_16, window_bounds = array<i64: 64, 32>}, {pipeline_mode = #tpu.pipeline_mode<synchronous>, transform_indices = @transform_17, window_bounds = array<i64: 1, 32>}, {pipeline_mode = #tpu.pipeline_mode<synchronous>, transform_indices = @transform_18, window_bounds = array<i64: 1, 32>}, {pipeline_mode = #tpu.pipeline_mode<synchronous>, transform_indices = @transform_19, window_bounds = array<i64: 1, 32>}, {transform_indices = @transform_20, window_bounds = array<i64: 32, 32>}]} {
    %c0 = arith.constant 0 : index
    %c0_0 = arith.constant 0 : index
    %0 = vector.load %arg2[%c0, %c0_0] : memref<32x32xf32, #tpu.memory_space<vmem>>, vector<32x32xf32>
    %c0_1 = arith.constant 0 : index
    %c0_2 = arith.constant 0 : index
    %1 = vector.load %arg3[%c0_1, %c0_2] : memref<32x32xf32, #tpu.memory_space<vmem>>, vector<32x32xf32>
    %2 = arith.addf %0, %1 : vector<32x32xf32>
    %c0_3 = arith.constant 0 : index
    %c0_4 = arith.constant 0 : index
    %3 = vector.load %arg6[%c0_3, %c0_4] : memref<32x32xbf16, #tpu.memory_space<vmem>>, vector<32x32xbf16>
    %4 = arith.truncf %2 : vector<32x32xf32> to vector<32x32xbf16>
    %cst = arith.constant dense<0.000000e+00> : vector<32x32xf32>
    %5 = tpu.matmul %4, %3, %cst {dimension_numbers = #tpu.dot_dimension_numbers<[1], [0], [0], [1], [0, 0, 1, 1], [], []>} : vector<32x32xbf16>, vector<32x32xbf16>, vector<32x32xf32> -> vector<32x32xf32>
    %c0_5 = arith.constant 0 : index
    %c0_6 = arith.constant 0 : index
    %6 = vector.load %arg7[%c0_5, %c0_6] : memref<1x32xf32, #tpu.memory_space<vmem>>, vector<1x32xf32>
    %7 = vector.broadcast %6 : vector<1x32xf32> to vector<32x32xf32>
    %8 = arith.addf %5, %7 : vector<32x32xf32>
    %c0_7 = arith.constant 0 : index
    %c0_8 = arith.constant 0 : index
    %9 = vector.load %arg8[%c0_7, %c0_8] : memref<32x32xbf16, #tpu.memory_space<vmem>>, vector<32x32xbf16>
    %c0_9 = arith.constant 0 : index
    %c0_10 = arith.constant 0 : index
    %10 = vector.load %arg9[%c0_9, %c0_10] : memref<1x32xf32, #tpu.memory_space<vmem>>, vector<1x32xf32>
    %c0_11 = arith.constant 0 : index
    %c0_12 = arith.constant 0 : index
    %11 = vector.load %arg10[%c0_11, %c0_12] : memref<32x32xbf16, #tpu.memory_space<vmem>>, vector<32x32xbf16>
    %c0_13 = arith.constant 0 : index
    %c0_14 = arith.constant 0 : index
    %12 = vector.load %arg11[%c0_13, %c0_14] : memref<1x32xf32, #tpu.memory_space<vmem>>, vector<1x32xf32>
    %c0_15 = arith.constant 0 : index
    %c0_16 = arith.constant 0 : index
    %13 = vector.load %arg12[%c0_15, %c0_16] : memref<32x32xbf16, #tpu.memory_space<vmem>>, vector<32x32xbf16>
    %c0_17 = arith.constant 0 : index
    %c0_18 = arith.constant 0 : index
    %14 = vector.load %arg13[%c0_17, %c0_18] : memref<1x32xf32, #tpu.memory_space<vmem>>, vector<1x32xf32>
    %cst_19 = arith.constant 0xFF800000 : f32
    %15 = vector.broadcast %cst_19 : f32 to vector<32x1xf32>
    %cst_20 = arith.constant 0xFF800000 : f32
    %16 = vector.broadcast %cst_20 : f32 to vector<32x1xf32>
    %cst_21 = arith.constant 0xFF800000 : f32
    %17 = vector.broadcast %cst_21 : f32 to vector<32x1xf32>
    %cst_22 = arith.constant 0xFF800000 : f32
    %18 = vector.broadcast %cst_22 : f32 to vector<32x1xf32>
    %cst_23 = arith.constant 0.000000e+00 : f32
    %19 = vector.broadcast %cst_23 : f32 to vector<32x1xf32>
    %cst_24 = arith.constant 0.000000e+00 : f32
    %20 = vector.broadcast %cst_24 : f32 to vector<32x1xf32>
    %cst_25 = arith.constant 0.000000e+00 : f32
    %21 = vector.broadcast %cst_25 : f32 to vector<32x1xf32>
    %cst_26 = arith.constant 0.000000e+00 : f32
    %22 = vector.broadcast %cst_26 : f32 to vector<32x1xf32>
    %cst_27 = arith.constant 0.000000e+00 : f32
    %23 = vector.broadcast %cst_27 : f32 to vector<32x8xf32>
    %cst_28 = arith.constant 0.000000e+00 : f32
    %24 = vector.broadcast %cst_28 : f32 to vector<32x8xf32>
    %cst_29 = arith.constant 0.000000e+00 : f32
    %25 = vector.broadcast %cst_29 : f32 to vector<32x8xf32>
    %cst_30 = arith.constant 0.000000e+00 : f32
    %26 = vector.broadcast %cst_30 : f32 to vector<32x8xf32>
    %c0_31 = arith.constant 0 : index
    %c0_32 = arith.constant 0 : index
    %27 = vector.load %arg4[%c0_31, %c0_32] : memref<64x32xf32, #tpu.memory_space<vmem>>, vector<32x32xf32>
    %c0_33 = arith.constant 0 : index
    %c0_34 = arith.constant 0 : index
    %28 = vector.load %arg5[%c0_33, %c0_34] : memref<64x32xf32, #tpu.memory_space<vmem>>, vector<32x32xf32>
    %29 = arith.addf %27, %28 : vector<32x32xf32>
    %30 = arith.truncf %29 : vector<32x32xf32> to vector<32x32xbf16>
    %cst_35 = arith.constant dense<0.000000e+00> : vector<32x32xf32>
    %31 = tpu.matmul %30, %9, %cst_35 {dimension_numbers = #tpu.dot_dimension_numbers<[1], [0], [0], [1], [0, 0, 1, 1], [], []>} : vector<32x32xbf16>, vector<32x32xbf16>, vector<32x32xf32> -> vector<32x32xf32>
    %32 = vector.broadcast %10 : vector<1x32xf32> to vector<32x32xf32>
    %33 = arith.addf %31, %32 : vector<32x32xf32>
    %34 = arith.truncf %27 : vector<32x32xf32> to vector<32x32xbf16>
    %cst_36 = arith.constant dense<0.000000e+00> : vector<32x32xf32>
    %35 = tpu.matmul %34, %11, %cst_36 {dimension_numbers = #tpu.dot_dimension_numbers<[1], [0], [0], [1], [0, 0, 1, 1], [], []>} : vector<32x32xbf16>, vector<32x32xbf16>, vector<32x32xf32> -> vector<32x32xf32>
    %36 = vector.broadcast %12 : vector<1x32xf32> to vector<32x32xf32>
    %37 = arith.addf %35, %36 : vector<32x32xf32>
    %38 = vector.extract_strided_slice %8 {offsets = [0, 0], sizes = [32, 8], strides = [1, 1]} : vector<32x32xf32> to vector<32x8xf32>
    %39 = vector.extract_strided_slice %33 {offsets = [0, 0], sizes = [32, 8], strides = [1, 1]} : vector<32x32xf32> to vector<32x8xf32>
    %40 = arith.truncf %38 : vector<32x8xf32> to vector<32x8xbf16>
    %41 = arith.truncf %39 : vector<32x8xf32> to vector<32x8xbf16>
    %cst_37 = arith.constant dense<0.000000e+00> : vector<32x32xf32>
    %42 = tpu.matmul %40, %41, %cst_37 {dimension_numbers = #tpu.dot_dimension_numbers<[1], [1], [0], [0], [0, 0, 1, 0], [], []>} : vector<32x8xbf16>, vector<32x8xbf16>, vector<32x32xf32> -> vector<32x32xf32>
    %cst_38 = arith.constant dense<0xFF800000> : vector<32xf32>
    %43 = vector.multi_reduction <maximumf>, %42, %cst_38 [1] : vector<32x32xf32> to vector<32xf32>
    %44 = vector.shape_cast %43 : vector<32xf32> to vector<32x1xf32>
    %45 = arith.maximumf %15, %44 : vector<32x1xf32>
    %46 = arith.subf %15, %45 : vector<32x1xf32>
    %47 = math.exp %46 : vector<32x1xf32>
    %48 = vector.broadcast %45 : vector<32x1xf32> to vector<32x32xf32>
    %49 = arith.subf %42, %48 : vector<32x32xf32>
    %50 = math.exp %49 : vector<32x32xf32>
    %51 = arith.mulf %47, %19 : vector<32x1xf32>
    %cst_39 = arith.constant dense<0.000000e+00> : vector<32xf32>
    %52 = vector.multi_reduction <add>, %50, %cst_39 [1] : vector<32x32xf32> to vector<32xf32>
    %53 = vector.shape_cast %52 : vector<32xf32> to vector<32x1xf32>
    %54 = arith.addf %51, %53 : vector<32x1xf32>
    %55 = vector.broadcast %47 : vector<32x1xf32> to vector<32x8xf32>
    %56 = arith.mulf %55, %23 : vector<32x8xf32>
    %57 = vector.extract_strided_slice %37 {offsets = [0, 0], sizes = [32, 8], strides = [1, 1]} : vector<32x32xf32> to vector<32x8xf32>
    %58 = arith.truncf %50 : vector<32x32xf32> to vector<32x32xbf16>
    %59 = arith.truncf %57 : vector<32x8xf32> to vector<32x8xbf16>
    %cst_40 = arith.constant dense<0.000000e+00> : vector<32x8xf32>
    %60 = tpu.matmul %58, %59, %cst_40 {dimension_numbers = #tpu.dot_dimension_numbers<[1], [0], [0], [1], [0, 0, 1, 1], [], []>} : vector<32x32xbf16>, vector<32x8xbf16>, vector<32x8xf32> -> vector<32x8xf32>
    %61 = arith.addf %56, %60 : vector<32x8xf32>
    %62 = vector.extract_strided_slice %8 {offsets = [0, 8], sizes = [32, 8], strides = [1, 1]} : vector<32x32xf32> to vector<32x8xf32>
    %63 = vector.extract_strided_slice %33 {offsets = [0, 8], sizes = [32, 8], strides = [1, 1]} : vector<32x32xf32> to vector<32x8xf32>
    %64 = arith.truncf %62 : vector<32x8xf32> to vector<32x8xbf16>
    %65 = arith.truncf %63 : vector<32x8xf32> to vector<32x8xbf16>
    %cst_41 = arith.constant dense<0.000000e+00> : vector<32x32xf32>
    %66 = tpu.matmul %64, %65, %cst_41 {dimension_numbers = #tpu.dot_dimension_numbers<[1], [1], [0], [0], [0, 0, 1, 0], [], []>} : vector<32x8xbf16>, vector<32x8xbf16>, vector<32x32xf32> -> vector<32x32xf32>
    %cst_42 = arith.constant dense<0xFF800000> : vector<32xf32>
    %67 = vector.multi_reduction <maximumf>, %66, %cst_42 [1] : vector<32x32xf32> to vector<32xf32>
    %68 = vector.shape_cast %67 : vector<32xf32> to vector<32x1xf32>
    %69 = arith.maximumf %16, %68 : vector<32x1xf32>
    %70 = arith.subf %16, %69 : vector<32x1xf32>
    %71 = math.exp %70 : vector<32x1xf32>
    %72 = vector.broadcast %69 : vector<32x1xf32> to vector<32x32xf32>
    %73 = arith.subf %66, %72 : vector<32x32xf32>
    %74 = math.exp %73 : vector<32x32xf32>
    %75 = arith.mulf %71, %20 : vector<32x1xf32>
    %cst_43 = arith.constant dense<0.000000e+00> : vector<32xf32>
    %76 = vector.multi_reduction <add>, %74, %cst_43 [1] : vector<32x32xf32> to vector<32xf32>
    %77 = vector.shape_cast %76 : vector<32xf32> to vector<32x1xf32>
    %78 = arith.addf %75, %77 : vector<32x1xf32>
    %79 = vector.broadcast %71 : vector<32x1xf32> to vector<32x8xf32>
    %80 = arith.mulf %79, %24 : vector<32x8xf32>
    %81 = vector.extract_strided_slice %37 {offsets = [0, 8], sizes = [32, 8], strides = [1, 1]} : vector<32x32xf32> to vector<32x8xf32>
    %82 = arith.truncf %74 : vector<32x32xf32> to vector<32x32xbf16>
    %83 = arith.truncf %81 : vector<32x8xf32> to vector<32x8xbf16>
    %cst_44 = arith.constant dense<0.000000e+00> : vector<32x8xf32>
    %84 = tpu.matmul %82, %83, %cst_44 {dimension_numbers = #tpu.dot_dimension_numbers<[1], [0], [0], [1], [0, 0, 1, 1], [], []>} : vector<32x32xbf16>, vector<32x8xbf16>, vector<32x8xf32> -> vector<32x8xf32>
    %85 = arith.addf %80, %84 : vector<32x8xf32>
    %86 = vector.extract_strided_slice %8 {offsets = [0, 16], sizes = [32, 8], strides = [1, 1]} : vector<32x32xf32> to vector<32x8xf32>
    %87 = vector.extract_strided_slice %33 {offsets = [0, 16], sizes = [32, 8], strides = [1, 1]} : vector<32x32xf32> to vector<32x8xf32>
    %88 = arith.truncf %86 : vector<32x8xf32> to vector<32x8xbf16>
    %89 = arith.truncf %87 : vector<32x8xf32> to vector<32x8xbf16>
    %cst_45 = arith.constant dense<0.000000e+00> : vector<32x32xf32>
    %90 = tpu.matmul %88, %89, %cst_45 {dimension_numbers = #tpu.dot_dimension_numbers<[1], [1], [0], [0], [0, 0, 1, 0], [], []>} : vector<32x8xbf16>, vector<32x8xbf16>, vector<32x32xf32> -> vector<32x32xf32>
    %cst_46 = arith.constant dense<0xFF800000> : vector<32xf32>
    %91 = vector.multi_reduction <maximumf>, %90, %cst_46 [1] : vector<32x32xf32> to vector<32xf32>
    %92 = vector.shape_cast %91 : vector<32xf32> to vector<32x1xf32>
    %93 = arith.maximumf %17, %92 : vector<32x1xf32>
    %94 = arith.subf %17, %93 : vector<32x1xf32>
    %95 = math.exp %94 : vector<32x1xf32>
    %96 = vector.broadcast %93 : vector<32x1xf32> to vector<32x32xf32>
    %97 = arith.subf %90, %96 : vector<32x32xf32>
    %98 = math.exp %97 : vector<32x32xf32>
    %99 = arith.mulf %95, %21 : vector<32x1xf32>
    %cst_47 = arith.constant dense<0.000000e+00> : vector<32xf32>
    %100 = vector.multi_reduction <add>, %98, %cst_47 [1] : vector<32x32xf32> to vector<32xf32>
    %101 = vector.shape_cast %100 : vector<32xf32> to vector<32x1xf32>
    %102 = arith.addf %99, %101 : vector<32x1xf32>
    %103 = vector.broadcast %95 : vector<32x1xf32> to vector<32x8xf32>
    %104 = arith.mulf %103, %25 : vector<32x8xf32>
    %105 = vector.extract_strided_slice %37 {offsets = [0, 16], sizes = [32, 8], strides = [1, 1]} : vector<32x32xf32> to vector<32x8xf32>
    %106 = arith.truncf %98 : vector<32x32xf32> to vector<32x32xbf16>
    %107 = arith.truncf %105 : vector<32x8xf32> to vector<32x8xbf16>
    %cst_48 = arith.constant dense<0.000000e+00> : vector<32x8xf32>
    %108 = tpu.matmul %106, %107, %cst_48 {dimension_numbers = #tpu.dot_dimension_numbers<[1], [0], [0], [1], [0, 0, 1, 1], [], []>} : vector<32x32xbf16>, vector<32x8xbf16>, vector<32x8xf32> -> vector<32x8xf32>
    %109 = arith.addf %104, %108 : vector<32x8xf32>
    %110 = vector.extract_strided_slice %8 {offsets = [0, 24], sizes = [32, 8], strides = [1, 1]} : vector<32x32xf32> to vector<32x8xf32>
    %111 = vector.extract_strided_slice %33 {offsets = [0, 24], sizes = [32, 8], strides = [1, 1]} : vector<32x32xf32> to vector<32x8xf32>
    %112 = arith.truncf %110 : vector<32x8xf32> to vector<32x8xbf16>
    %113 = arith.truncf %111 : vector<32x8xf32> to vector<32x8xbf16>
    %cst_49 = arith.constant dense<0.000000e+00> : vector<32x32xf32>
    %114 = tpu.matmul %112, %113, %cst_49 {dimension_numbers = #tpu.dot_dimension_numbers<[1], [1], [0], [0], [0, 0, 1, 0], [], []>} : vector<32x8xbf16>, vector<32x8xbf16>, vector<32x32xf32> -> vector<32x32xf32>
    %cst_50 = arith.constant dense<0xFF800000> : vector<32xf32>
    %115 = vector.multi_reduction <maximumf>, %114, %cst_50 [1] : vector<32x32xf32> to vector<32xf32>
    %116 = vector.shape_cast %115 : vector<32xf32> to vector<32x1xf32>
    %117 = arith.maximumf %18, %116 : vector<32x1xf32>
    %118 = arith.subf %18, %117 : vector<32x1xf32>
    %119 = math.exp %118 : vector<32x1xf32>
    %120 = vector.broadcast %117 : vector<32x1xf32> to vector<32x32xf32>
    %121 = arith.subf %114, %120 : vector<32x32xf32>
    %122 = math.exp %121 : vector<32x32xf32>
    %123 = arith.mulf %119, %22 : vector<32x1xf32>
    %cst_51 = arith.constant dense<0.000000e+00> : vector<32xf32>
    %124 = vector.multi_reduction <add>, %122, %cst_51 [1] : vector<32x32xf32> to vector<32xf32>
    %125 = vector.shape_cast %124 : vector<32xf32> to vector<32x1xf32>
    %126 = arith.addf %123, %125 : vector<32x1xf32>
    %127 = vector.broadcast %119 : vector<32x1xf32> to vector<32x8xf32>
    %128 = arith.mulf %127, %26 : vector<32x8xf32>
    %129 = vector.extract_strided_slice %37 {offsets = [0, 24], sizes = [32, 8], strides = [1, 1]} : vector<32x32xf32> to vector<32x8xf32>
    %130 = arith.truncf %122 : vector<32x32xf32> to vector<32x32xbf16>
    %131 = arith.truncf %129 : vector<32x8xf32> to vector<32x8xbf16>
    %cst_52 = arith.constant dense<0.000000e+00> : vector<32x8xf32>
    %132 = tpu.matmul %130, %131, %cst_52 {dimension_numbers = #tpu.dot_dimension_numbers<[1], [0], [0], [1], [0, 0, 1, 1], [], []>} : vector<32x32xbf16>, vector<32x8xbf16>, vector<32x8xf32> -> vector<32x8xf32>
    %133 = arith.addf %128, %132 : vector<32x8xf32>
    %c32 = arith.constant 32 : index
    %c0_53 = arith.constant 0 : index
    %134 = vector.load %arg4[%c32, %c0_53] : memref<64x32xf32, #tpu.memory_space<vmem>>, vector<32x32xf32>
    %c32_54 = arith.constant 32 : index
    %c0_55 = arith.constant 0 : index
    %135 = vector.load %arg5[%c32_54, %c0_55] : memref<64x32xf32, #tpu.memory_space<vmem>>, vector<32x32xf32>
    %136 = arith.addf %134, %135 : vector<32x32xf32>
    %137 = arith.truncf %136 : vector<32x32xf32> to vector<32x32xbf16>
    %cst_56 = arith.constant dense<0.000000e+00> : vector<32x32xf32>
    %138 = tpu.matmul %137, %9, %cst_56 {dimension_numbers = #tpu.dot_dimension_numbers<[1], [0], [0], [1], [0, 0, 1, 1], [], []>} : vector<32x32xbf16>, vector<32x32xbf16>, vector<32x32xf32> -> vector<32x32xf32>
    %139 = vector.broadcast %10 : vector<1x32xf32> to vector<32x32xf32>
    %140 = arith.addf %138, %139 : vector<32x32xf32>
    %141 = arith.truncf %134 : vector<32x32xf32> to vector<32x32xbf16>
    %cst_57 = arith.constant dense<0.000000e+00> : vector<32x32xf32>
    %142 = tpu.matmul %141, %11, %cst_57 {dimension_numbers = #tpu.dot_dimension_numbers<[1], [0], [0], [1], [0, 0, 1, 1], [], []>} : vector<32x32xbf16>, vector<32x32xbf16>, vector<32x32xf32> -> vector<32x32xf32>
    %143 = vector.broadcast %12 : vector<1x32xf32> to vector<32x32xf32>
    %144 = arith.addf %142, %143 : vector<32x32xf32>
    %145 = vector.extract_strided_slice %8 {offsets = [0, 0], sizes = [32, 8], strides = [1, 1]} : vector<32x32xf32> to vector<32x8xf32>
    %146 = vector.extract_strided_slice %140 {offsets = [0, 0], sizes = [32, 8], strides = [1, 1]} : vector<32x32xf32> to vector<32x8xf32>
    %147 = arith.truncf %145 : vector<32x8xf32> to vector<32x8xbf16>
    %148 = arith.truncf %146 : vector<32x8xf32> to vector<32x8xbf16>
    %cst_58 = arith.constant dense<0.000000e+00> : vector<32x32xf32>
    %149 = tpu.matmul %147, %148, %cst_58 {dimension_numbers = #tpu.dot_dimension_numbers<[1], [1], [0], [0], [0, 0, 1, 0], [], []>} : vector<32x8xbf16>, vector<32x8xbf16>, vector<32x32xf32> -> vector<32x32xf32>
    %cst_59 = arith.constant dense<0xFF800000> : vector<32xf32>
    %150 = vector.multi_reduction <maximumf>, %149, %cst_59 [1] : vector<32x32xf32> to vector<32xf32>
    %151 = vector.shape_cast %150 : vector<32xf32> to vector<32x1xf32>
    %152 = arith.maximumf %45, %151 : vector<32x1xf32>
    %153 = arith.subf %45, %152 : vector<32x1xf32>
    %154 = math.exp %153 : vector<32x1xf32>
    %155 = vector.broadcast %152 : vector<32x1xf32> to vector<32x32xf32>
    %156 = arith.subf %149, %155 : vector<32x32xf32>
    %157 = math.exp %156 : vector<32x32xf32>
    %158 = arith.mulf %154, %54 : vector<32x1xf32>
    %cst_60 = arith.constant dense<0.000000e+00> : vector<32xf32>
    %159 = vector.multi_reduction <add>, %157, %cst_60 [1] : vector<32x32xf32> to vector<32xf32>
    %160 = vector.shape_cast %159 : vector<32xf32> to vector<32x1xf32>
    %161 = arith.addf %158, %160 : vector<32x1xf32>
    %162 = vector.broadcast %154 : vector<32x1xf32> to vector<32x8xf32>
    %163 = arith.mulf %162, %61 : vector<32x8xf32>
    %164 = vector.extract_strided_slice %144 {offsets = [0, 0], sizes = [32, 8], strides = [1, 1]} : vector<32x32xf32> to vector<32x8xf32>
    %165 = arith.truncf %157 : vector<32x32xf32> to vector<32x32xbf16>
    %166 = arith.truncf %164 : vector<32x8xf32> to vector<32x8xbf16>
    %cst_61 = arith.constant dense<0.000000e+00> : vector<32x8xf32>
    %167 = tpu.matmul %165, %166, %cst_61 {dimension_numbers = #tpu.dot_dimension_numbers<[1], [0], [0], [1], [0, 0, 1, 1], [], []>} : vector<32x32xbf16>, vector<32x8xbf16>, vector<32x8xf32> -> vector<32x8xf32>
    %168 = arith.addf %163, %167 : vector<32x8xf32>
    %169 = vector.extract_strided_slice %8 {offsets = [0, 8], sizes = [32, 8], strides = [1, 1]} : vector<32x32xf32> to vector<32x8xf32>
    %170 = vector.extract_strided_slice %140 {offsets = [0, 8], sizes = [32, 8], strides = [1, 1]} : vector<32x32xf32> to vector<32x8xf32>
    %171 = arith.truncf %169 : vector<32x8xf32> to vector<32x8xbf16>
    %172 = arith.truncf %170 : vector<32x8xf32> to vector<32x8xbf16>
    %cst_62 = arith.constant dense<0.000000e+00> : vector<32x32xf32>
    %173 = tpu.matmul %171, %172, %cst_62 {dimension_numbers = #tpu.dot_dimension_numbers<[1], [1], [0], [0], [0, 0, 1, 0], [], []>} : vector<32x8xbf16>, vector<32x8xbf16>, vector<32x32xf32> -> vector<32x32xf32>
    %cst_63 = arith.constant dense<0xFF800000> : vector<32xf32>
    %174 = vector.multi_reduction <maximumf>, %173, %cst_63 [1] : vector<32x32xf32> to vector<32xf32>
    %175 = vector.shape_cast %174 : vector<32xf32> to vector<32x1xf32>
    %176 = arith.maximumf %69, %175 : vector<32x1xf32>
    %177 = arith.subf %69, %176 : vector<32x1xf32>
    %178 = math.exp %177 : vector<32x1xf32>
    %179 = vector.broadcast %176 : vector<32x1xf32> to vector<32x32xf32>
    %180 = arith.subf %173, %179 : vector<32x32xf32>
    %181 = math.exp %180 : vector<32x32xf32>
    %182 = arith.mulf %178, %78 : vector<32x1xf32>
    %cst_64 = arith.constant dense<0.000000e+00> : vector<32xf32>
    %183 = vector.multi_reduction <add>, %181, %cst_64 [1] : vector<32x32xf32> to vector<32xf32>
    %184 = vector.shape_cast %183 : vector<32xf32> to vector<32x1xf32>
    %185 = arith.addf %182, %184 : vector<32x1xf32>
    %186 = vector.broadcast %178 : vector<32x1xf32> to vector<32x8xf32>
    %187 = arith.mulf %186, %85 : vector<32x8xf32>
    %188 = vector.extract_strided_slice %144 {offsets = [0, 8], sizes = [32, 8], strides = [1, 1]} : vector<32x32xf32> to vector<32x8xf32>
    %189 = arith.truncf %181 : vector<32x32xf32> to vector<32x32xbf16>
    %190 = arith.truncf %188 : vector<32x8xf32> to vector<32x8xbf16>
    %cst_65 = arith.constant dense<0.000000e+00> : vector<32x8xf32>
    %191 = tpu.matmul %189, %190, %cst_65 {dimension_numbers = #tpu.dot_dimension_numbers<[1], [0], [0], [1], [0, 0, 1, 1], [], []>} : vector<32x32xbf16>, vector<32x8xbf16>, vector<32x8xf32> -> vector<32x8xf32>
    %192 = arith.addf %187, %191 : vector<32x8xf32>
    %193 = vector.extract_strided_slice %8 {offsets = [0, 16], sizes = [32, 8], strides = [1, 1]} : vector<32x32xf32> to vector<32x8xf32>
    %194 = vector.extract_strided_slice %140 {offsets = [0, 16], sizes = [32, 8], strides = [1, 1]} : vector<32x32xf32> to vector<32x8xf32>
    %195 = arith.truncf %193 : vector<32x8xf32> to vector<32x8xbf16>
    %196 = arith.truncf %194 : vector<32x8xf32> to vector<32x8xbf16>
    %cst_66 = arith.constant dense<0.000000e+00> : vector<32x32xf32>
    %197 = tpu.matmul %195, %196, %cst_66 {dimension_numbers = #tpu.dot_dimension_numbers<[1], [1], [0], [0], [0, 0, 1, 0], [], []>} : vector<32x8xbf16>, vector<32x8xbf16>, vector<32x32xf32> -> vector<32x32xf32>
    %cst_67 = arith.constant dense<0xFF800000> : vector<32xf32>
    %198 = vector.multi_reduction <maximumf>, %197, %cst_67 [1] : vector<32x32xf32> to vector<32xf32>
    %199 = vector.shape_cast %198 : vector<32xf32> to vector<32x1xf32>
    %200 = arith.maximumf %93, %199 : vector<32x1xf32>
    %201 = arith.subf %93, %200 : vector<32x1xf32>
    %202 = math.exp %201 : vector<32x1xf32>
    %203 = vector.broadcast %200 : vector<32x1xf32> to vector<32x32xf32>
    %204 = arith.subf %197, %203 : vector<32x32xf32>
    %205 = math.exp %204 : vector<32x32xf32>
    %206 = arith.mulf %202, %102 : vector<32x1xf32>
    %cst_68 = arith.constant dense<0.000000e+00> : vector<32xf32>
    %207 = vector.multi_reduction <add>, %205, %cst_68 [1] : vector<32x32xf32> to vector<32xf32>
    %208 = vector.shape_cast %207 : vector<32xf32> to vector<32x1xf32>
    %209 = arith.addf %206, %208 : vector<32x1xf32>
    %210 = vector.broadcast %202 : vector<32x1xf32> to vector<32x8xf32>
    %211 = arith.mulf %210, %109 : vector<32x8xf32>
    %212 = vector.extract_strided_slice %144 {offsets = [0, 16], sizes = [32, 8], strides = [1, 1]} : vector<32x32xf32> to vector<32x8xf32>
    %213 = arith.truncf %205 : vector<32x32xf32> to vector<32x32xbf16>
    %214 = arith.truncf %212 : vector<32x8xf32> to vector<32x8xbf16>
    %cst_69 = arith.constant dense<0.000000e+00> : vector<32x8xf32>
    %215 = tpu.matmul %213, %214, %cst_69 {dimension_numbers = #tpu.dot_dimension_numbers<[1], [0], [0], [1], [0, 0, 1, 1], [], []>} : vector<32x32xbf16>, vector<32x8xbf16>, vector<32x8xf32> -> vector<32x8xf32>
    %216 = arith.addf %211, %215 : vector<32x8xf32>
    %217 = vector.extract_strided_slice %8 {offsets = [0, 24], sizes = [32, 8], strides = [1, 1]} : vector<32x32xf32> to vector<32x8xf32>
    %218 = vector.extract_strided_slice %140 {offsets = [0, 24], sizes = [32, 8], strides = [1, 1]} : vector<32x32xf32> to vector<32x8xf32>
    %219 = arith.truncf %217 : vector<32x8xf32> to vector<32x8xbf16>
    %220 = arith.truncf %218 : vector<32x8xf32> to vector<32x8xbf16>
    %cst_70 = arith.constant dense<0.000000e+00> : vector<32x32xf32>
    %221 = tpu.matmul %219, %220, %cst_70 {dimension_numbers = #tpu.dot_dimension_numbers<[1], [1], [0], [0], [0, 0, 1, 0], [], []>} : vector<32x8xbf16>, vector<32x8xbf16>, vector<32x32xf32> -> vector<32x32xf32>
    %cst_71 = arith.constant dense<0xFF800000> : vector<32xf32>
    %222 = vector.multi_reduction <maximumf>, %221, %cst_71 [1] : vector<32x32xf32> to vector<32xf32>
    %223 = vector.shape_cast %222 : vector<32xf32> to vector<32x1xf32>
    %224 = arith.maximumf %117, %223 : vector<32x1xf32>
    %225 = arith.subf %117, %224 : vector<32x1xf32>
    %226 = math.exp %225 : vector<32x1xf32>
    %227 = vector.broadcast %224 : vector<32x1xf32> to vector<32x32xf32>
    %228 = arith.subf %221, %227 : vector<32x32xf32>
    %229 = math.exp %228 : vector<32x32xf32>
    %230 = arith.mulf %226, %126 : vector<32x1xf32>
    %cst_72 = arith.constant dense<0.000000e+00> : vector<32xf32>
    %231 = vector.multi_reduction <add>, %229, %cst_72 [1] : vector<32x32xf32> to vector<32xf32>
    %232 = vector.shape_cast %231 : vector<32xf32> to vector<32x1xf32>
    %233 = arith.addf %230, %232 : vector<32x1xf32>
    %234 = vector.broadcast %226 : vector<32x1xf32> to vector<32x8xf32>
    %235 = arith.mulf %234, %133 : vector<32x8xf32>
    %236 = vector.extract_strided_slice %144 {offsets = [0, 24], sizes = [32, 8], strides = [1, 1]} : vector<32x32xf32> to vector<32x8xf32>
    %237 = arith.truncf %229 : vector<32x32xf32> to vector<32x32xbf16>
    %238 = arith.truncf %236 : vector<32x8xf32> to vector<32x8xbf16>
    %cst_73 = arith.constant dense<0.000000e+00> : vector<32x8xf32>
    %239 = tpu.matmul %237, %238, %cst_73 {dimension_numbers = #tpu.dot_dimension_numbers<[1], [0], [0], [1], [0, 0, 1, 1], [], []>} : vector<32x32xbf16>, vector<32x8xbf16>, vector<32x8xf32> -> vector<32x8xf32>
    %240 = arith.addf %235, %239 : vector<32x8xf32>
    %241 = vector.broadcast %161 : vector<32x1xf32> to vector<32x8xf32>
    %242 = arith.divf %168, %241 : vector<32x8xf32>
    %c0_74 = arith.constant 0 : index
    %c0_75 = arith.constant 0 : index
    %243 = vector.load %arg23[%c0_74, %c0_75] : memref<32x32xf32, #tpu.memory_space<vmem>>, vector<32x8xf32>
    tpu.vector_store %arg23[%c0_74, %c0_75], %242 {strides = array<i32>} : memref<32x32xf32, #tpu.memory_space<vmem>>, vector<32x8xf32>,
    %244 = vector.broadcast %185 : vector<32x1xf32> to vector<32x8xf32>
    %245 = arith.divf %192, %244 : vector<32x8xf32>
    %c0_76 = arith.constant 0 : index
    %c8 = arith.constant 8 : index
    %246 = vector.load %arg23[%c0_76, %c8] : memref<32x32xf32, #tpu.memory_space<vmem>>, vector<32x8xf32>
    tpu.vector_store %arg23[%c0_76, %c8], %245 {strides = array<i32>} : memref<32x32xf32, #tpu.memory_space<vmem>>, vector<32x8xf32>,
    %247 = vector.broadcast %209 : vector<32x1xf32> to vector<32x8xf32>
    %248 = arith.divf %216, %247 : vector<32x8xf32>
    %c0_77 = arith.constant 0 : index
    %c16 = arith.constant 16 : index
    %249 = vector.load %arg23[%c0_77, %c16] : memref<32x32xf32, #tpu.memory_space<vmem>>, vector<32x8xf32>
    tpu.vector_store %arg23[%c0_77, %c16], %248 {strides = array<i32>} : memref<32x32xf32, #tpu.memory_space<vmem>>, vector<32x8xf32>,
    %250 = vector.broadcast %233 : vector<32x1xf32> to vector<32x8xf32>
    %251 = arith.divf %240, %250 : vector<32x8xf32>
    %c0_78 = arith.constant 0 : index
    %c24 = arith.constant 24 : index
    %252 = vector.load %arg23[%c0_78, %c24] : memref<32x32xf32, #tpu.memory_space<vmem>>, vector<32x8xf32>
    tpu.vector_store %arg23[%c0_78, %c24], %251 {strides = array<i32>} : memref<32x32xf32, #tpu.memory_space<vmem>>, vector<32x8xf32>,
    %c0_79 = arith.constant 0 : index
    %c0_80 = arith.constant 0 : index
    %253 = vector.load %arg23[%c0_79, %c0_80] : memref<32x32xf32, #tpu.memory_space<vmem>>, vector<32x32xf32>
    %254 = arith.truncf %253 : vector<32x32xf32> to vector<32x32xbf16>
    %cst_81 = arith.constant dense<0.000000e+00> : vector<32x32xf32>
    %255 = tpu.matmul %254, %13, %cst_81 {dimension_numbers = #tpu.dot_dimension_numbers<[1], [0], [0], [1], [0, 0, 1, 1], [], []>} : vector<32x32xbf16>, vector<32x32xbf16>, vector<32x32xf32> -> vector<32x32xf32>
    %256 = vector.broadcast %14 : vector<1x32xf32> to vector<32x32xf32>
    %257 = arith.addf %255, %256 : vector<32x32xf32>
    %258 = arith.addf %0, %257 : vector<32x32xf32>
    %c0_82 = arith.constant 0 : index
    %c0_83 = arith.constant 0 : index
    %259 = vector.load %arg14[%c0_82, %c0_83] : memref<1x32xf32, #tpu.memory_space<vmem>>, vector<1x32xf32>
    %c0_84 = arith.constant 0 : index
    %c0_85 = arith.constant 0 : index
    %260 = vector.load %arg15[%c0_84, %c0_85] : memref<1x32xf32, #tpu.memory_space<vmem>>, vector<1x32xf32>
    %cst_86 = arith.constant dense<0.000000e+00> : vector<32xf32>
    %261 = vector.multi_reduction <add>, %258, %cst_86 [1] : vector<32x32xf32> to vector<32xf32>
    %262 = vector.shape_cast %261 : vector<32xf32> to vector<32x1xf32>
    %cst_87 = arith.constant 3.200000e+01 : f32
    %263 = vector.broadcast %cst_87 : f32 to vector<32x1xf32>
    %264 = arith.divf %262, %263 : vector<32x1xf32>
    %265 = vector.broadcast %264 : vector<32x1xf32> to vector<32x32xf32>
    %266 = arith.subf %258, %265 : vector<32x32xf32>
    %267 = arith.mulf %266, %266 : vector<32x32xf32>
    %cst_88 = arith.constant dense<0.000000e+00> : vector<32xf32>
    %268 = vector.multi_reduction <add>, %267, %cst_88 [1] : vector<32x32xf32> to vector<32xf32>
    %269 = vector.shape_cast %268 : vector<32xf32> to vector<32x1xf32>
    %cst_89 = arith.constant 3.200000e+01 : f32
    %270 = vector.broadcast %cst_89 : f32 to vector<32x1xf32>
    %271 = arith.divf %269, %270 : vector<32x1xf32>
    %272 = vector.broadcast %264 : vector<32x1xf32> to vector<32x32xf32>
    %273 = arith.subf %258, %272 : vector<32x32xf32>
    %cst_90 = arith.constant 9.99999974E-6 : f32
    %274 = vector.broadcast %cst_90 : f32 to vector<32x1xf32>
    %275 = arith.addf %271, %274 : vector<32x1xf32>
    %276 = math.rsqrt %275 : vector<32x1xf32>
    %277 = vector.broadcast %276 : vector<32x1xf32> to vector<32x32xf32>
    %278 = arith.mulf %273, %277 : vector<32x32xf32>
    %279 = vector.broadcast %259 : vector<1x32xf32> to vector<32x32xf32>
    %280 = arith.mulf %278, %279 : vector<32x32xf32>
    %281 = vector.broadcast %260 : vector<1x32xf32> to vector<32x32xf32>
    %282 = arith.addf %280, %281 : vector<32x32xf32>
    %c0_91 = arith.constant 0 : index
    %c0_92 = arith.constant 0 : index
    %283 = vector.load %arg16[%c0_91, %c0_92] : memref<32x64xbf16, #tpu.memory_space<vmem>>, vector<32x64xbf16>
    %284 = arith.truncf %282 : vector<32x32xf32> to vector<32x32xbf16>
    %cst_93 = arith.constant dense<0.000000e+00> : vector<32x64xf32>
    %285 = tpu.matmul %284, %283, %cst_93 {dimension_numbers = #tpu.dot_dimension_numbers<[1], [0], [0], [1], [0, 0, 1, 1], [], []>} : vector<32x32xbf16>, vector<32x64xbf16>, vector<32x64xf32> -> vector<32x64xf32>
    %c0_94 = arith.constant 0 : index
    %c0_95 = arith.constant 0 : index
    %286 = vector.load %arg17[%c0_94, %c0_95] : memref<1x64xf32, #tpu.memory_space<vmem>>, vector<1x64xf32>
    %287 = vector.broadcast %286 : vector<1x64xf32> to vector<32x64xf32>
    %288 = arith.addf %285, %287 : vector<32x64xf32>
    %cst_96 = arith.constant 0.000000e+00 : f32
    %289 = vector.broadcast %cst_96 : f32 to vector<32x64xf32>
    %290 = arith.maximumf %288, %289 : vector<32x64xf32>
    %c0_97 = arith.constant 0 : index
    %c0_98 = arith.constant 0 : index
    %291 = vector.load %arg18[%c0_97, %c0_98] : memref<64x32xbf16, #tpu.memory_space<vmem>>, vector<64x32xbf16>
    %292 = arith.truncf %290 : vector<32x64xf32> to vector<32x64xbf16>
    %cst_99 = arith.constant dense<0.000000e+00> : vector<32x32xf32>
    %293 = tpu.matmul %292, %291, %cst_99 {dimension_numbers = #tpu.dot_dimension_numbers<[1], [0], [0], [1], [0, 0, 1, 1], [], []>} : vector<32x64xbf16>, vector<64x32xbf16>, vector<32x32xf32> -> vector<32x32xf32>
    %c0_100 = arith.constant 0 : index
    %c0_101 = arith.constant 0 : index
    %294 = vector.load %arg19[%c0_100, %c0_101] : memref<1x32xf32, #tpu.memory_space<vmem>>, vector<1x32xf32>
    %295 = vector.broadcast %294 : vector<1x32xf32> to vector<32x32xf32>
    %296 = arith.addf %293, %295 : vector<32x32xf32>
    %297 = arith.addf %282, %296 : vector<32x32xf32>
    %c0_102 = arith.constant 0 : index
    %c0_103 = arith.constant 0 : index
    %298 = vector.load %arg20[%c0_102, %c0_103] : memref<1x32xf32, #tpu.memory_space<vmem>>, vector<1x32xf32>
    %c0_104 = arith.constant 0 : index
    %c0_105 = arith.constant 0 : index
    %299 = vector.load %arg21[%c0_104, %c0_105] : memref<1x32xf32, #tpu.memory_space<vmem>>, vector<1x32xf32>
    %cst_106 = arith.constant dense<0.000000e+00> : vector<32xf32>
    %300 = vector.multi_reduction <add>, %297, %cst_106 [1] : vector<32x32xf32> to vector<32xf32>
    %301 = vector.shape_cast %300 : vector<32xf32> to vector<32x1xf32>
    %cst_107 = arith.constant 3.200000e+01 : f32
    %302 = vector.broadcast %cst_107 : f32 to vector<32x1xf32>
    %303 = arith.divf %301, %302 : vector<32x1xf32>
    %304 = vector.broadcast %303 : vector<32x1xf32> to vector<32x32xf32>
    %305 = arith.subf %297, %304 : vector<32x32xf32>
    %306 = arith.mulf %305, %305 : vector<32x32xf32>
    %cst_108 = arith.constant dense<0.000000e+00> : vector<32xf32>
    %307 = vector.multi_reduction <add>, %306, %cst_108 [1] : vector<32x32xf32> to vector<32xf32>
    %308 = vector.shape_cast %307 : vector<32xf32> to vector<32x1xf32>
    %cst_109 = arith.constant 3.200000e+01 : f32
    %309 = vector.broadcast %cst_109 : f32 to vector<32x1xf32>
    %310 = arith.divf %308, %309 : vector<32x1xf32>
    %311 = vector.broadcast %303 : vector<32x1xf32> to vector<32x32xf32>
    %312 = arith.subf %297, %311 : vector<32x32xf32>
    %cst_110 = arith.constant 9.99999974E-6 : f32
    %313 = vector.broadcast %cst_110 : f32 to vector<32x1xf32>
    %314 = arith.addf %310, %313 : vector<32x1xf32>
    %315 = math.rsqrt %314 : vector<32x1xf32>
    %316 = vector.broadcast %315 : vector<32x1xf32> to vector<32x32xf32>
    %317 = arith.mulf %312, %316 : vector<32x32xf32>
    %318 = vector.broadcast %298 : vector<1x32xf32> to vector<32x32xf32>
    %319 = arith.mulf %317, %318 : vector<32x32xf32>
    %320 = vector.broadcast %299 : vector<1x32xf32> to vector<32x32xf32>
    %321 = arith.addf %319, %320 : vector<32x32xf32>
    %c0_111 = arith.constant 0 : index
    %c0_112 = arith.constant 0 : index
    %322 = vector.load %arg22[%c0_111, %c0_112] : memref<32x32xf32, #tpu.memory_space<vmem>>, vector<32x32xf32>
    tpu.vector_store %arg22[%c0_111, %c0_112], %321 {strides = array<i32>} : memref<32x32xf32, #tpu.memory_space<vmem>>, vector<32x32xf32>,
    return
  }
  func.func @transform_0(%arg0: i32, %arg1: i32) -> (i32, i32) {
    %c2_i32 = arith.constant 2 : i32
    %0 = arith.muli %arg0, %c2_i32 : i32
    %1 = arith.addi %0, %arg1 : i32
    %c0_i32 = arith.constant 0 : i32
    %c0_i32_0 = arith.constant 0 : i32
    return %1, %c0_i32 : i32, i32
  }
  func.func @transform_1(%arg0: i32, %arg1: i32) -> (i32, i32) {
    %c2_i32 = arith.constant 2 : i32
    %0 = arith.muli %arg0, %c2_i32 : i32
    %1 = arith.addi %0, %arg1 : i32
    %c0_i32 = arith.constant 0 : i32
    %c0_i32_0 = arith.constant 0 : i32
    return %1, %c0_i32 : i32, i32
  }
  func.func @transform_2(%arg0: i32, %arg1: i32) -> (i32, i32) {
    %c0_i32 = arith.constant 0 : i32
    %c0_i32_0 = arith.constant 0 : i32
    return %arg0, %c0_i32 : i32, i32
  }
  func.func @transform_3(%arg0: i32, %arg1: i32) -> (i32, i32) {
    %c0_i32 = arith.constant 0 : i32
    %c0_i32_0 = arith.constant 0 : i32
    return %arg0, %c0_i32 : i32, i32
  }
  func.func @transform_4(%arg0: i32, %arg1: i32) -> (i32, i32) {
    %c0_i32 = arith.constant 0 : i32
    %c0_i32_0 = arith.constant 0 : i32
    %c0_i32_1 = arith.constant 0 : i32
    return %c0_i32, %c0_i32_0 : i32, i32
  }
  func.func @transform_5(%arg0: i32, %arg1: i32) -> (i32, i32) {
    %c0_i32 = arith.constant 0 : i32
    %c0_i32_0 = arith.constant 0 : i32
    %c0_i32_1 = arith.constant 0 : i32
    return %c0_i32, %c0_i32_0 : i32, i32
  }
  func.func @transform_6(%arg0: i32, %arg1: i32) -> (i32, i32) {
    %c0_i32 = arith.constant 0 : i32
    %c0_i32_0 = arith.constant 0 : i32
    %c0_i32_1 = arith.constant 0 : i32
    return %c0_i32, %c0_i32_0 : i32, i32
  }
  func.func @transform_7(%arg0: i32, %arg1: i32) -> (i32, i32) {
    %c0_i32 = arith.constant 0 : i32
    %c0_i32_0 = arith.constant 0 : i32
    %c0_i32_1 = arith.constant 0 : i32
    return %c0_i32, %c0_i32_0 : i32, i32
  }
  func.func @transform_8(%arg0: i32, %arg1: i32) -> (i32, i32) {
    %c0_i32 = arith.constant 0 : i32
    %c0_i32_0 = arith.constant 0 : i32
    %c0_i32_1 = arith.constant 0 : i32
    return %c0_i32, %c0_i32_0 : i32, i32
  }
  func.func @transform_9(%arg0: i32, %arg1: i32) -> (i32, i32) {
    %c0_i32 = arith.constant 0 : i32
    %c0_i32_0 = arith.constant 0 : i32
    %c0_i32_1 = arith.constant 0 : i32
    return %c0_i32, %c0_i32_0 : i32, i32
  }
  func.func @transform_10(%arg0: i32, %arg1: i32) -> (i32, i32) {
    %c0_i32 = arith.constant 0 : i32
    %c0_i32_0 = arith.constant 0 : i32
    %c0_i32_1 = arith.constant 0 : i32
    return %c0_i32, %c0_i32_0 : i32, i32
  }
  func.func @transform_11(%arg0: i32, %arg1: i32) -> (i32, i32) {
    %c0_i32 = arith.constant 0 : i32
    %c0_i32_0 = arith.constant 0 : i32
    %c0_i32_1 = arith.constant 0 : i32
    return %c0_i32, %c0_i32_0 : i32, i32
  }
  func.func @transform_12(%arg0: i32, %arg1: i32) -> (i32, i32) {
    %c0_i32 = arith.constant 0 : i32
    %c0_i32_0 = arith.constant 0 : i32
    %c0_i32_1 = arith.constant 0 : i32
    return %c0_i32, %c0_i32_0 : i32, i32
  }
  func.func @transform_13(%arg0: i32, %arg1: i32) -> (i32, i32) {
    %c0_i32 = arith.constant 0 : i32
    %c0_i32_0 = arith.constant 0 : i32
    %c0_i32_1 = arith.constant 0 : i32
    return %c0_i32, %c0_i32_0 : i32, i32
  }
  func.func @transform_14(%arg0: i32, %arg1: i32) -> (i32, i32) {
    %c0_i32 = arith.constant 0 : i32
    %c0_i32_0 = arith.constant 0 : i32
    %c0_i32_1 = arith.constant 0 : i32
    return %c0_i32, %c0_i32_0 : i32, i32
  }
  func.func @transform_15(%arg0: i32, %arg1: i32) -> (i32, i32) {
    %c0_i32 = arith.constant 0 : i32
    %c0_i32_0 = arith.constant 0 : i32
    %c0_i32_1 = arith.constant 0 : i32
    return %c0_i32, %c0_i32_0 : i32, i32
  }
  func.func @transform_16(%arg0: i32, %arg1: i32) -> (i32, i32) {
    %c0_i32 = arith.constant 0 : i32
    %c0_i32_0 = arith.constant 0 : i32
    %c0_i32_1 = arith.constant 0 : i32
    return %c0_i32, %c0_i32_0 : i32, i32
  }
  func.func @transform_17(%arg0: i32, %arg1: i32) -> (i32, i32) {
    %c0_i32 = arith.constant 0 : i32
    %c0_i32_0 = arith.constant 0 : i32
    %c0_i32_1 = arith.constant 0 : i32
    return %c0_i32, %c0_i32_0 : i32, i32
  }
  func.func @transform_18(%arg0: i32, %arg1: i32) -> (i32, i32) {
    %c0_i32 = arith.constant 0 : i32
    %c0_i32_0 = arith.constant 0 : i32
    %c0_i32_1 = arith.constant 0 : i32
    return %c0_i32, %c0_i32_0 : i32, i32
  }
  func.func @transform_19(%arg0: i32, %arg1: i32) -> (i32, i32) {
    %c0_i32 = arith.constant 0 : i32
    %c0_i32_0 = arith.constant 0 : i32
    %c0_i32_1 = arith.constant 0 : i32
    return %c0_i32, %c0_i32_0 : i32, i32
  }
  func.func @transform_20(%arg0: i32, %arg1: i32) -> (i32, i32) {
    %c2_i32 = arith.constant 2 : i32
    %0 = arith.muli %arg0, %c2_i32 : i32
    %1 = arith.addi %0, %arg1 : i32
    %c0_i32 = arith.constant 0 : i32
    %c0_i32_0 = arith.constant 0 : i32
    return %1, %c0_i32 : i32, i32
  }
}

module attributes {stable_mosaic.version = 11 : i64} {
  func.func @_decoder_stack_kernel(%arg0: i32, %arg1: memref<8x32xf32, #tpu.memory_space<vmem>>, %arg2: memref<64x32xf32, #tpu.memory_space<vmem>>, %arg3: memref<64x32xf32, #tpu.memory_space<vmem>>, %arg4: memref<32x32xbf16, #tpu.memory_space<vmem>>, %arg5: memref<1x32xf32, #tpu.memory_space<vmem>>, %arg6: memref<32x32xbf16, #tpu.memory_space<vmem>>, %arg7: memref<1x32xf32, #tpu.memory_space<vmem>>, %arg8: memref<32x32xbf16, #tpu.memory_space<vmem>>, %arg9: memref<1x32xf32, #tpu.memory_space<vmem>>, %arg10: memref<32x32xbf16, #tpu.memory_space<vmem>>, %arg11: memref<1x32xf32, #tpu.memory_space<vmem>>, %arg12: memref<1x32xf32, #tpu.memory_space<vmem>>, %arg13: memref<1x32xf32, #tpu.memory_space<vmem>>, %arg14: memref<32x64xbf16, #tpu.memory_space<vmem>>, %arg15: memref<1x64xf32, #tpu.memory_space<vmem>>, %arg16: memref<64x32xbf16, #tpu.memory_space<vmem>>, %arg17: memref<1x32xf32, #tpu.memory_space<vmem>>, %arg18: memref<1x32xf32, #tpu.memory_space<vmem>>, %arg19: memref<1x32xf32, #tpu.memory_space<vmem>>, %arg20: memref<32x32xbf16, #tpu.memory_space<vmem>>, %arg21: memref<1x32xf32, #tpu.memory_space<vmem>>, %arg22: memref<32x32xbf16, #tpu.memory_space<vmem>>, %arg23: memref<1x32xf32, #tpu.memory_space<vmem>>, %arg24: memref<32x32xbf16, #tpu.memory_space<vmem>>, %arg25: memref<1x32xf32, #tpu.memory_space<vmem>>, %arg26: memref<32x32xbf16, #tpu.memory_space<vmem>>, %arg27: memref<1x32xf32, #tpu.memory_space<vmem>>, %arg28: memref<1x32xf32, #tpu.memory_space<vmem>>, %arg29: memref<1x32xf32, #tpu.memory_space<vmem>>, %arg30: memref<32x64xbf16, #tpu.memory_space<vmem>>, %arg31: memref<1x64xf32, #tpu.memory_space<vmem>>, %arg32: memref<64x32xbf16, #tpu.memory_space<vmem>>, %arg33: memref<1x32xf32, #tpu.memory_space<vmem>>, %arg34: memref<1x32xf32, #tpu.memory_space<vmem>>, %arg35: memref<1x32xf32, #tpu.memory_space<vmem>>, %arg36: memref<1x32xf32, #tpu.memory_space<vmem>>, %arg37: memref<1x32xf32, #tpu.memory_space<vmem>>, %arg38: memref<8x32xf32, #tpu.memory_space<vmem>>, %arg39: memref<8x32xf32, #tpu.memory_space<vmem>>) attributes {dimension_semantics = [#tpu.dimension_semantics<parallel>], iteration_bounds = array<i64: 2>, scalar_prefetch = 0 : i64, scratch_operands = 1 : i64, tpu.core_type = #tpu.core_type<tc>, window_params = [{transform_indices = @transform_0, window_bounds = array<i64: 8, 32>}, {transform_indices = @transform_1, window_bounds = array<i64: 64, 32>}, {transform_indices = @transform_2, window_bounds = array<i64: 64, 32>}, {pipeline_mode = #tpu.pipeline_mode<synchronous>, transform_indices = @transform_3, window_bounds = array<i64: 32, 32>}, {pipeline_mode = #tpu.pipeline_mode<synchronous>, transform_indices = @transform_4, window_bounds = array<i64: 1, 32>}, {pipeline_mode = #tpu.pipeline_mode<synchronous>, transform_indices = @transform_5, window_bounds = array<i64: 32, 32>}, {pipeline_mode = #tpu.pipeline_mode<synchronous>, transform_indices = @transform_6, window_bounds = array<i64: 1, 32>}, {pipeline_mode = #tpu.pipeline_mode<synchronous>, transform_indices = @transform_7, window_bounds = array<i64: 32, 32>}, {pipeline_mode = #tpu.pipeline_mode<synchronous>, transform_indices = @transform_8, window_bounds = array<i64: 1, 32>}, {pipeline_mode = #tpu.pipeline_mode<synchronous>, transform_indices = @transform_9, window_bounds = array<i64: 32, 32>}, {pipeline_mode = #tpu.pipeline_mode<synchronous>, transform_indices = @transform_10, window_bounds = array<i64: 1, 32>}, {pipeline_mode = #tpu.pipeline_mode<synchronous>, transform_indices = @transform_11, window_bounds = array<i64: 1, 32>}, {pipeline_mode = #tpu.pipeline_mode<synchronous>, transform_indices = @transform_12, window_bounds = array<i64: 1, 32>}, {pipeline_mode = #tpu.pipeline_mode<synchronous>, transform_indices = @transform_13, window_bounds = array<i64: 32, 64>}, {pipeline_mode = #tpu.pipeline_mode<synchronous>, transform_indices = @transform_14, window_bounds = array<i64: 1, 64>}, {pipeline_mode = #tpu.pipeline_mode<synchronous>, transform_indices = @transform_15, window_bounds = array<i64: 64, 32>}, {pipeline_mode = #tpu.pipeline_mode<synchronous>, transform_indices = @transform_16, window_bounds = array<i64: 1, 32>}, {pipeline_mode = #tpu.pipeline_mode<synchronous>, transform_indices = @transform_17, window_bounds = array<i64: 1, 32>}, {pipeline_mode = #tpu.pipeline_mode<synchronous>, transform_indices = @transform_18, window_bounds = array<i64: 1, 32>}, {pipeline_mode = #tpu.pipeline_mode<synchronous>, transform_indices = @transform_19, window_bounds = array<i64: 32, 32>}, {pipeline_mode = #tpu.pipeline_mode<synchronous>, transform_indices = @transform_20, window_bounds = array<i64: 1, 32>}, {pipeline_mode = #tpu.pipeline_mode<synchronous>, transform_indices = @transform_21, window_bounds = array<i64: 32, 32>}, {pipeline_mode = #tpu.pipeline_mode<synchronous>, transform_indices = @transform_22, window_bounds = array<i64: 1, 32>}, {pipeline_mode = #tpu.pipeline_mode<synchronous>, transform_indices = @transform_23, window_bounds = array<i64: 32, 32>}, {pipeline_mode = #tpu.pipeline_mode<synchronous>, transform_indices = @transform_24, window_bounds = array<i64: 1, 32>}, {pipeline_mode = #tpu.pipeline_mode<synchronous>, transform_indices = @transform_25, window_bounds = array<i64: 32, 32>}, {pipeline_mode = #tpu.pipeline_mode<synchronous>, transform_indices = @transform_26, window_bounds = array<i64: 1, 32>}, {pipeline_mode = #tpu.pipeline_mode<synchronous>, transform_indices = @transform_27, window_bounds = array<i64: 1, 32>}, {pipeline_mode = #tpu.pipeline_mode<synchronous>, transform_indices = @transform_28, window_bounds = array<i64: 1, 32>}, {pipeline_mode = #tpu.pipeline_mode<synchronous>, transform_indices = @transform_29, window_bounds = array<i64: 32, 64>}, {pipeline_mode = #tpu.pipeline_mode<synchronous>, transform_indices = @transform_30, window_bounds = array<i64: 1, 64>}, {pipeline_mode = #tpu.pipeline_mode<synchronous>, transform_indices = @transform_31, window_bounds = array<i64: 64, 32>}, {pipeline_mode = #tpu.pipeline_mode<synchronous>, transform_indices = @transform_32, window_bounds = array<i64: 1, 32>}, {pipeline_mode = #tpu.pipeline_mode<synchronous>, transform_indices = @transform_33, window_bounds = array<i64: 1, 32>}, {pipeline_mode = #tpu.pipeline_mode<synchronous>, transform_indices = @transform_34, window_bounds = array<i64: 1, 32>}, {pipeline_mode = #tpu.pipeline_mode<synchronous>, transform_indices = @transform_35, window_bounds = array<i64: 1, 32>}, {pipeline_mode = #tpu.pipeline_mode<synchronous>, transform_indices = @transform_36, window_bounds = array<i64: 1, 32>}, {transform_indices = @transform_37, window_bounds = array<i64: 8, 32>}]} {
    %c0 = arith.constant 0 : index
    %c0_0 = arith.constant 0 : index
    %0 = vector.load %arg1[%c0, %c0_0] : memref<8x32xf32, #tpu.memory_space<vmem>>, vector<8x32xf32>
    %cst = arith.constant 0.000000e+00 : f32
    %1 = vector.broadcast %cst : f32 to vector<8x32xf32>
    %2 = arith.addf %1, %0 : vector<8x32xf32>
    %c0_1 = arith.constant 0 : index
    %c0_2 = arith.constant 0 : index
    %3 = vector.load %arg4[%c0_1, %c0_2] : memref<32x32xbf16, #tpu.memory_space<vmem>>, vector<32x32xbf16>
    %4 = arith.truncf %2 : vector<8x32xf32> to vector<8x32xbf16>
    %cst_3 = arith.constant dense<0.000000e+00> : vector<8x32xf32>
    %5 = tpu.matmul %4, %3, %cst_3 {dimension_numbers = #tpu.dot_dimension_numbers<[1], [0], [0], [1], [0, 0, 1, 1], [], []>} : vector<8x32xbf16>, vector<32x32xbf16>, vector<8x32xf32> -> vector<8x32xf32>
    %c0_4 = arith.constant 0 : index
    %c0_5 = arith.constant 0 : index
    %6 = vector.load %arg5[%c0_4, %c0_5] : memref<1x32xf32, #tpu.memory_space<vmem>>, vector<1x32xf32>
    %7 = vector.broadcast %6 : vector<1x32xf32> to vector<8x32xf32>
    %8 = arith.addf %5, %7 : vector<8x32xf32>
    %c0_6 = arith.constant 0 : index
    %c0_7 = arith.constant 0 : index
    %9 = vector.load %arg6[%c0_6, %c0_7] : memref<32x32xbf16, #tpu.memory_space<vmem>>, vector<32x32xbf16>
    %c0_8 = arith.constant 0 : index
    %c0_9 = arith.constant 0 : index
    %10 = vector.load %arg7[%c0_8, %c0_9] : memref<1x32xf32, #tpu.memory_space<vmem>>, vector<1x32xf32>
    %c0_10 = arith.constant 0 : index
    %c0_11 = arith.constant 0 : index
    %11 = vector.load %arg8[%c0_10, %c0_11] : memref<32x32xbf16, #tpu.memory_space<vmem>>, vector<32x32xbf16>
    %c0_12 = arith.constant 0 : index
    %c0_13 = arith.constant 0 : index
    %12 = vector.load %arg9[%c0_12, %c0_13] : memref<1x32xf32, #tpu.memory_space<vmem>>, vector<1x32xf32>
    %c0_14 = arith.constant 0 : index
    %c0_15 = arith.constant 0 : index
    %13 = vector.load %arg10[%c0_14, %c0_15] : memref<32x32xbf16, #tpu.memory_space<vmem>>, vector<32x32xbf16>
    %c0_16 = arith.constant 0 : index
    %c0_17 = arith.constant 0 : index
    %14 = vector.load %arg11[%c0_16, %c0_17] : memref<1x32xf32, #tpu.memory_space<vmem>>, vector<1x32xf32>
    %cst_18 = arith.constant 0xFF800000 : f32
    %15 = vector.broadcast %cst_18 : f32 to vector<8x1xf32>
    %cst_19 = arith.constant 0xFF800000 : f32
    %16 = vector.broadcast %cst_19 : f32 to vector<8x1xf32>
    %cst_20 = arith.constant 0xFF800000 : f32
    %17 = vector.broadcast %cst_20 : f32 to vector<8x1xf32>
    %cst_21 = arith.constant 0xFF800000 : f32
    %18 = vector.broadcast %cst_21 : f32 to vector<8x1xf32>
    %cst_22 = arith.constant 0.000000e+00 : f32
    %19 = vector.broadcast %cst_22 : f32 to vector<8x1xf32>
    %cst_23 = arith.constant 0.000000e+00 : f32
    %20 = vector.broadcast %cst_23 : f32 to vector<8x1xf32>
    %cst_24 = arith.constant 0.000000e+00 : f32
    %21 = vector.broadcast %cst_24 : f32 to vector<8x1xf32>
    %cst_25 = arith.constant 0.000000e+00 : f32
    %22 = vector.broadcast %cst_25 : f32 to vector<8x1xf32>
    %cst_26 = arith.constant 0.000000e+00 : f32
    %23 = vector.broadcast %cst_26 : f32 to vector<8x8xf32>
    %cst_27 = arith.constant 0.000000e+00 : f32
    %24 = vector.broadcast %cst_27 : f32 to vector<8x8xf32>
    %cst_28 = arith.constant 0.000000e+00 : f32
    %25 = vector.broadcast %cst_28 : f32 to vector<8x8xf32>
    %cst_29 = arith.constant 0.000000e+00 : f32
    %26 = vector.broadcast %cst_29 : f32 to vector<8x8xf32>
    %c0_30 = arith.constant 0 : index
    %c0_31 = arith.constant 0 : index
    %27 = vector.load %arg2[%c0_30, %c0_31] : memref<64x32xf32, #tpu.memory_space<vmem>>, vector<32x32xf32>
    %c0_32 = arith.constant 0 : index
    %c0_33 = arith.constant 0 : index
    %28 = vector.load %arg3[%c0_32, %c0_33] : memref<64x32xf32, #tpu.memory_space<vmem>>, vector<32x32xf32>
    %29 = arith.addf %27, %28 : vector<32x32xf32>
    %30 = arith.truncf %29 : vector<32x32xf32> to vector<32x32xbf16>
    %cst_34 = arith.constant dense<0.000000e+00> : vector<32x32xf32>
    %31 = tpu.matmul %30, %9, %cst_34 {dimension_numbers = #tpu.dot_dimension_numbers<[1], [0], [0], [1], [0, 0, 1, 1], [], []>} : vector<32x32xbf16>, vector<32x32xbf16>, vector<32x32xf32> -> vector<32x32xf32>
    %32 = vector.broadcast %10 : vector<1x32xf32> to vector<32x32xf32>
    %33 = arith.addf %31, %32 : vector<32x32xf32>
    %34 = arith.truncf %27 : vector<32x32xf32> to vector<32x32xbf16>
    %cst_35 = arith.constant dense<0.000000e+00> : vector<32x32xf32>
    %35 = tpu.matmul %34, %11, %cst_35 {dimension_numbers = #tpu.dot_dimension_numbers<[1], [0], [0], [1], [0, 0, 1, 1], [], []>} : vector<32x32xbf16>, vector<32x32xbf16>, vector<32x32xf32> -> vector<32x32xf32>
    %36 = vector.broadcast %12 : vector<1x32xf32> to vector<32x32xf32>
    %37 = arith.addf %35, %36 : vector<32x32xf32>
    %38 = vector.extract_strided_slice %8 {offsets = [0, 0], sizes = [8, 8], strides = [1, 1]} : vector<8x32xf32> to vector<8x8xf32>
    %39 = vector.extract_strided_slice %33 {offsets = [0, 0], sizes = [32, 8], strides = [1, 1]} : vector<32x32xf32> to vector<32x8xf32>
    %40 = arith.truncf %38 : vector<8x8xf32> to vector<8x8xbf16>
    %41 = arith.truncf %39 : vector<32x8xf32> to vector<32x8xbf16>
    %cst_36 = arith.constant dense<0.000000e+00> : vector<8x32xf32>
    %42 = tpu.matmul %40, %41, %cst_36 {dimension_numbers = #tpu.dot_dimension_numbers<[1], [1], [0], [0], [0, 0, 1, 0], [], []>} : vector<8x8xbf16>, vector<32x8xbf16>, vector<8x32xf32> -> vector<8x32xf32>
    %cst_37 = arith.constant dense<0xFF800000> : vector<8xf32>
    %43 = vector.multi_reduction <maximumf>, %42, %cst_37 [1] : vector<8x32xf32> to vector<8xf32>
    %44 = vector.shape_cast %43 : vector<8xf32> to vector<8x1xf32>
    %45 = arith.maximumf %15, %44 : vector<8x1xf32>
    %46 = arith.subf %15, %45 : vector<8x1xf32>
    %47 = math.exp %46 : vector<8x1xf32>
    %48 = vector.broadcast %45 : vector<8x1xf32> to vector<8x32xf32>
    %49 = arith.subf %42, %48 : vector<8x32xf32>
    %50 = math.exp %49 : vector<8x32xf32>
    %51 = arith.mulf %47, %19 : vector<8x1xf32>
    %cst_38 = arith.constant dense<0.000000e+00> : vector<8xf32>
    %52 = vector.multi_reduction <add>, %50, %cst_38 [1] : vector<8x32xf32> to vector<8xf32>
    %53 = vector.shape_cast %52 : vector<8xf32> to vector<8x1xf32>
    %54 = arith.addf %51, %53 : vector<8x1xf32>
    %55 = vector.broadcast %47 : vector<8x1xf32> to vector<8x8xf32>
    %56 = arith.mulf %55, %23 : vector<8x8xf32>
    %57 = vector.extract_strided_slice %37 {offsets = [0, 0], sizes = [32, 8], strides = [1, 1]} : vector<32x32xf32> to vector<32x8xf32>
    %58 = arith.truncf %50 : vector<8x32xf32> to vector<8x32xbf16>
    %59 = arith.truncf %57 : vector<32x8xf32> to vector<32x8xbf16>
    %cst_39 = arith.constant dense<0.000000e+00> : vector<8x8xf32>
    %60 = tpu.matmul %58, %59, %cst_39 {dimension_numbers = #tpu.dot_dimension_numbers<[1], [0], [0], [1], [0, 0, 1, 1], [], []>} : vector<8x32xbf16>, vector<32x8xbf16>, vector<8x8xf32> -> vector<8x8xf32>
    %61 = arith.addf %56, %60 : vector<8x8xf32>
    %62 = vector.extract_strided_slice %8 {offsets = [0, 8], sizes = [8, 8], strides = [1, 1]} : vector<8x32xf32> to vector<8x8xf32>
    %63 = vector.extract_strided_slice %33 {offsets = [0, 8], sizes = [32, 8], strides = [1, 1]} : vector<32x32xf32> to vector<32x8xf32>
    %64 = arith.truncf %62 : vector<8x8xf32> to vector<8x8xbf16>
    %65 = arith.truncf %63 : vector<32x8xf32> to vector<32x8xbf16>
    %cst_40 = arith.constant dense<0.000000e+00> : vector<8x32xf32>
    %66 = tpu.matmul %64, %65, %cst_40 {dimension_numbers = #tpu.dot_dimension_numbers<[1], [1], [0], [0], [0, 0, 1, 0], [], []>} : vector<8x8xbf16>, vector<32x8xbf16>, vector<8x32xf32> -> vector<8x32xf32>
    %cst_41 = arith.constant dense<0xFF800000> : vector<8xf32>
    %67 = vector.multi_reduction <maximumf>, %66, %cst_41 [1] : vector<8x32xf32> to vector<8xf32>
    %68 = vector.shape_cast %67 : vector<8xf32> to vector<8x1xf32>
    %69 = arith.maximumf %16, %68 : vector<8x1xf32>
    %70 = arith.subf %16, %69 : vector<8x1xf32>
    %71 = math.exp %70 : vector<8x1xf32>
    %72 = vector.broadcast %69 : vector<8x1xf32> to vector<8x32xf32>
    %73 = arith.subf %66, %72 : vector<8x32xf32>
    %74 = math.exp %73 : vector<8x32xf32>
    %75 = arith.mulf %71, %20 : vector<8x1xf32>
    %cst_42 = arith.constant dense<0.000000e+00> : vector<8xf32>
    %76 = vector.multi_reduction <add>, %74, %cst_42 [1] : vector<8x32xf32> to vector<8xf32>
    %77 = vector.shape_cast %76 : vector<8xf32> to vector<8x1xf32>
    %78 = arith.addf %75, %77 : vector<8x1xf32>
    %79 = vector.broadcast %71 : vector<8x1xf32> to vector<8x8xf32>
    %80 = arith.mulf %79, %24 : vector<8x8xf32>
    %81 = vector.extract_strided_slice %37 {offsets = [0, 8], sizes = [32, 8], strides = [1, 1]} : vector<32x32xf32> to vector<32x8xf32>
    %82 = arith.truncf %74 : vector<8x32xf32> to vector<8x32xbf16>
    %83 = arith.truncf %81 : vector<32x8xf32> to vector<32x8xbf16>
    %cst_43 = arith.constant dense<0.000000e+00> : vector<8x8xf32>
    %84 = tpu.matmul %82, %83, %cst_43 {dimension_numbers = #tpu.dot_dimension_numbers<[1], [0], [0], [1], [0, 0, 1, 1], [], []>} : vector<8x32xbf16>, vector<32x8xbf16>, vector<8x8xf32> -> vector<8x8xf32>
    %85 = arith.addf %80, %84 : vector<8x8xf32>
    %86 = vector.extract_strided_slice %8 {offsets = [0, 16], sizes = [8, 8], strides = [1, 1]} : vector<8x32xf32> to vector<8x8xf32>
    %87 = vector.extract_strided_slice %33 {offsets = [0, 16], sizes = [32, 8], strides = [1, 1]} : vector<32x32xf32> to vector<32x8xf32>
    %88 = arith.truncf %86 : vector<8x8xf32> to vector<8x8xbf16>
    %89 = arith.truncf %87 : vector<32x8xf32> to vector<32x8xbf16>
    %cst_44 = arith.constant dense<0.000000e+00> : vector<8x32xf32>
    %90 = tpu.matmul %88, %89, %cst_44 {dimension_numbers = #tpu.dot_dimension_numbers<[1], [1], [0], [0], [0, 0, 1, 0], [], []>} : vector<8x8xbf16>, vector<32x8xbf16>, vector<8x32xf32> -> vector<8x32xf32>
    %cst_45 = arith.constant dense<0xFF800000> : vector<8xf32>
    %91 = vector.multi_reduction <maximumf>, %90, %cst_45 [1] : vector<8x32xf32> to vector<8xf32>
    %92 = vector.shape_cast %91 : vector<8xf32> to vector<8x1xf32>
    %93 = arith.maximumf %17, %92 : vector<8x1xf32>
    %94 = arith.subf %17, %93 : vector<8x1xf32>
    %95 = math.exp %94 : vector<8x1xf32>
    %96 = vector.broadcast %93 : vector<8x1xf32> to vector<8x32xf32>
    %97 = arith.subf %90, %96 : vector<8x32xf32>
    %98 = math.exp %97 : vector<8x32xf32>
    %99 = arith.mulf %95, %21 : vector<8x1xf32>
    %cst_46 = arith.constant dense<0.000000e+00> : vector<8xf32>
    %100 = vector.multi_reduction <add>, %98, %cst_46 [1] : vector<8x32xf32> to vector<8xf32>
    %101 = vector.shape_cast %100 : vector<8xf32> to vector<8x1xf32>
    %102 = arith.addf %99, %101 : vector<8x1xf32>
    %103 = vector.broadcast %95 : vector<8x1xf32> to vector<8x8xf32>
    %104 = arith.mulf %103, %25 : vector<8x8xf32>
    %105 = vector.extract_strided_slice %37 {offsets = [0, 16], sizes = [32, 8], strides = [1, 1]} : vector<32x32xf32> to vector<32x8xf32>
    %106 = arith.truncf %98 : vector<8x32xf32> to vector<8x32xbf16>
    %107 = arith.truncf %105 : vector<32x8xf32> to vector<32x8xbf16>
    %cst_47 = arith.constant dense<0.000000e+00> : vector<8x8xf32>
    %108 = tpu.matmul %106, %107, %cst_47 {dimension_numbers = #tpu.dot_dimension_numbers<[1], [0], [0], [1], [0, 0, 1, 1], [], []>} : vector<8x32xbf16>, vector<32x8xbf16>, vector<8x8xf32> -> vector<8x8xf32>
    %109 = arith.addf %104, %108 : vector<8x8xf32>
    %110 = vector.extract_strided_slice %8 {offsets = [0, 24], sizes = [8, 8], strides = [1, 1]} : vector<8x32xf32> to vector<8x8xf32>
    %111 = vector.extract_strided_slice %33 {offsets = [0, 24], sizes = [32, 8], strides = [1, 1]} : vector<32x32xf32> to vector<32x8xf32>
    %112 = arith.truncf %110 : vector<8x8xf32> to vector<8x8xbf16>
    %113 = arith.truncf %111 : vector<32x8xf32> to vector<32x8xbf16>
    %cst_48 = arith.constant dense<0.000000e+00> : vector<8x32xf32>
    %114 = tpu.matmul %112, %113, %cst_48 {dimension_numbers = #tpu.dot_dimension_numbers<[1], [1], [0], [0], [0, 0, 1, 0], [], []>} : vector<8x8xbf16>, vector<32x8xbf16>, vector<8x32xf32> -> vector<8x32xf32>
    %cst_49 = arith.constant dense<0xFF800000> : vector<8xf32>
    %115 = vector.multi_reduction <maximumf>, %114, %cst_49 [1] : vector<8x32xf32> to vector<8xf32>
    %116 = vector.shape_cast %115 : vector<8xf32> to vector<8x1xf32>
    %117 = arith.maximumf %18, %116 : vector<8x1xf32>
    %118 = arith.subf %18, %117 : vector<8x1xf32>
    %119 = math.exp %118 : vector<8x1xf32>
    %120 = vector.broadcast %117 : vector<8x1xf32> to vector<8x32xf32>
    %121 = arith.subf %114, %120 : vector<8x32xf32>
    %122 = math.exp %121 : vector<8x32xf32>
    %123 = arith.mulf %119, %22 : vector<8x1xf32>
    %cst_50 = arith.constant dense<0.000000e+00> : vector<8xf32>
    %124 = vector.multi_reduction <add>, %122, %cst_50 [1] : vector<8x32xf32> to vector<8xf32>
    %125 = vector.shape_cast %124 : vector<8xf32> to vector<8x1xf32>
    %126 = arith.addf %123, %125 : vector<8x1xf32>
    %127 = vector.broadcast %119 : vector<8x1xf32> to vector<8x8xf32>
    %128 = arith.mulf %127, %26 : vector<8x8xf32>
    %129 = vector.extract_strided_slice %37 {offsets = [0, 24], sizes = [32, 8], strides = [1, 1]} : vector<32x32xf32> to vector<32x8xf32>
    %130 = arith.truncf %122 : vector<8x32xf32> to vector<8x32xbf16>
    %131 = arith.truncf %129 : vector<32x8xf32> to vector<32x8xbf16>
    %cst_51 = arith.constant dense<0.000000e+00> : vector<8x8xf32>
    %132 = tpu.matmul %130, %131, %cst_51 {dimension_numbers = #tpu.dot_dimension_numbers<[1], [0], [0], [1], [0, 0, 1, 1], [], []>} : vector<8x32xbf16>, vector<32x8xbf16>, vector<8x8xf32> -> vector<8x8xf32>
    %133 = arith.addf %128, %132 : vector<8x8xf32>
    %c32 = arith.constant 32 : index
    %c0_52 = arith.constant 0 : index
    %134 = vector.load %arg2[%c32, %c0_52] : memref<64x32xf32, #tpu.memory_space<vmem>>, vector<32x32xf32>
    %c32_53 = arith.constant 32 : index
    %c0_54 = arith.constant 0 : index
    %135 = vector.load %arg3[%c32_53, %c0_54] : memref<64x32xf32, #tpu.memory_space<vmem>>, vector<32x32xf32>
    %136 = arith.addf %134, %135 : vector<32x32xf32>
    %137 = arith.truncf %136 : vector<32x32xf32> to vector<32x32xbf16>
    %cst_55 = arith.constant dense<0.000000e+00> : vector<32x32xf32>
    %138 = tpu.matmul %137, %9, %cst_55 {dimension_numbers = #tpu.dot_dimension_numbers<[1], [0], [0], [1], [0, 0, 1, 1], [], []>} : vector<32x32xbf16>, vector<32x32xbf16>, vector<32x32xf32> -> vector<32x32xf32>
    %139 = vector.broadcast %10 : vector<1x32xf32> to vector<32x32xf32>
    %140 = arith.addf %138, %139 : vector<32x32xf32>
    %141 = arith.truncf %134 : vector<32x32xf32> to vector<32x32xbf16>
    %cst_56 = arith.constant dense<0.000000e+00> : vector<32x32xf32>
    %142 = tpu.matmul %141, %11, %cst_56 {dimension_numbers = #tpu.dot_dimension_numbers<[1], [0], [0], [1], [0, 0, 1, 1], [], []>} : vector<32x32xbf16>, vector<32x32xbf16>, vector<32x32xf32> -> vector<32x32xf32>
    %143 = vector.broadcast %12 : vector<1x32xf32> to vector<32x32xf32>
    %144 = arith.addf %142, %143 : vector<32x32xf32>
    %145 = vector.extract_strided_slice %8 {offsets = [0, 0], sizes = [8, 8], strides = [1, 1]} : vector<8x32xf32> to vector<8x8xf32>
    %146 = vector.extract_strided_slice %140 {offsets = [0, 0], sizes = [32, 8], strides = [1, 1]} : vector<32x32xf32> to vector<32x8xf32>
    %147 = arith.truncf %145 : vector<8x8xf32> to vector<8x8xbf16>
    %148 = arith.truncf %146 : vector<32x8xf32> to vector<32x8xbf16>
    %cst_57 = arith.constant dense<0.000000e+00> : vector<8x32xf32>
    %149 = tpu.matmul %147, %148, %cst_57 {dimension_numbers = #tpu.dot_dimension_numbers<[1], [1], [0], [0], [0, 0, 1, 0], [], []>} : vector<8x8xbf16>, vector<32x8xbf16>, vector<8x32xf32> -> vector<8x32xf32>
    %cst_58 = arith.constant dense<0xFF800000> : vector<8xf32>
    %150 = vector.multi_reduction <maximumf>, %149, %cst_58 [1] : vector<8x32xf32> to vector<8xf32>
    %151 = vector.shape_cast %150 : vector<8xf32> to vector<8x1xf32>
    %152 = arith.maximumf %45, %151 : vector<8x1xf32>
    %153 = arith.subf %45, %152 : vector<8x1xf32>
    %154 = math.exp %153 : vector<8x1xf32>
    %155 = vector.broadcast %152 : vector<8x1xf32> to vector<8x32xf32>
    %156 = arith.subf %149, %155 : vector<8x32xf32>
    %157 = math.exp %156 : vector<8x32xf32>
    %158 = arith.mulf %154, %54 : vector<8x1xf32>
    %cst_59 = arith.constant dense<0.000000e+00> : vector<8xf32>
    %159 = vector.multi_reduction <add>, %157, %cst_59 [1] : vector<8x32xf32> to vector<8xf32>
    %160 = vector.shape_cast %159 : vector<8xf32> to vector<8x1xf32>
    %161 = arith.addf %158, %160 : vector<8x1xf32>
    %162 = vector.broadcast %154 : vector<8x1xf32> to vector<8x8xf32>
    %163 = arith.mulf %162, %61 : vector<8x8xf32>
    %164 = vector.extract_strided_slice %144 {offsets = [0, 0], sizes = [32, 8], strides = [1, 1]} : vector<32x32xf32> to vector<32x8xf32>
    %165 = arith.truncf %157 : vector<8x32xf32> to vector<8x32xbf16>
    %166 = arith.truncf %164 : vector<32x8xf32> to vector<32x8xbf16>
    %cst_60 = arith.constant dense<0.000000e+00> : vector<8x8xf32>
    %167 = tpu.matmul %165, %166, %cst_60 {dimension_numbers = #tpu.dot_dimension_numbers<[1], [0], [0], [1], [0, 0, 1, 1], [], []>} : vector<8x32xbf16>, vector<32x8xbf16>, vector<8x8xf32> -> vector<8x8xf32>
    %168 = arith.addf %163, %167 : vector<8x8xf32>
    %169 = vector.extract_strided_slice %8 {offsets = [0, 8], sizes = [8, 8], strides = [1, 1]} : vector<8x32xf32> to vector<8x8xf32>
    %170 = vector.extract_strided_slice %140 {offsets = [0, 8], sizes = [32, 8], strides = [1, 1]} : vector<32x32xf32> to vector<32x8xf32>
    %171 = arith.truncf %169 : vector<8x8xf32> to vector<8x8xbf16>
    %172 = arith.truncf %170 : vector<32x8xf32> to vector<32x8xbf16>
    %cst_61 = arith.constant dense<0.000000e+00> : vector<8x32xf32>
    %173 = tpu.matmul %171, %172, %cst_61 {dimension_numbers = #tpu.dot_dimension_numbers<[1], [1], [0], [0], [0, 0, 1, 0], [], []>} : vector<8x8xbf16>, vector<32x8xbf16>, vector<8x32xf32> -> vector<8x32xf32>
    %cst_62 = arith.constant dense<0xFF800000> : vector<8xf32>
    %174 = vector.multi_reduction <maximumf>, %173, %cst_62 [1] : vector<8x32xf32> to vector<8xf32>
    %175 = vector.shape_cast %174 : vector<8xf32> to vector<8x1xf32>
    %176 = arith.maximumf %69, %175 : vector<8x1xf32>
    %177 = arith.subf %69, %176 : vector<8x1xf32>
    %178 = math.exp %177 : vector<8x1xf32>
    %179 = vector.broadcast %176 : vector<8x1xf32> to vector<8x32xf32>
    %180 = arith.subf %173, %179 : vector<8x32xf32>
    %181 = math.exp %180 : vector<8x32xf32>
    %182 = arith.mulf %178, %78 : vector<8x1xf32>
    %cst_63 = arith.constant dense<0.000000e+00> : vector<8xf32>
    %183 = vector.multi_reduction <add>, %181, %cst_63 [1] : vector<8x32xf32> to vector<8xf32>
    %184 = vector.shape_cast %183 : vector<8xf32> to vector<8x1xf32>
    %185 = arith.addf %182, %184 : vector<8x1xf32>
    %186 = vector.broadcast %178 : vector<8x1xf32> to vector<8x8xf32>
    %187 = arith.mulf %186, %85 : vector<8x8xf32>
    %188 = vector.extract_strided_slice %144 {offsets = [0, 8], sizes = [32, 8], strides = [1, 1]} : vector<32x32xf32> to vector<32x8xf32>
    %189 = arith.truncf %181 : vector<8x32xf32> to vector<8x32xbf16>
    %190 = arith.truncf %188 : vector<32x8xf32> to vector<32x8xbf16>
    %cst_64 = arith.constant dense<0.000000e+00> : vector<8x8xf32>
    %191 = tpu.matmul %189, %190, %cst_64 {dimension_numbers = #tpu.dot_dimension_numbers<[1], [0], [0], [1], [0, 0, 1, 1], [], []>} : vector<8x32xbf16>, vector<32x8xbf16>, vector<8x8xf32> -> vector<8x8xf32>
    %192 = arith.addf %187, %191 : vector<8x8xf32>
    %193 = vector.extract_strided_slice %8 {offsets = [0, 16], sizes = [8, 8], strides = [1, 1]} : vector<8x32xf32> to vector<8x8xf32>
    %194 = vector.extract_strided_slice %140 {offsets = [0, 16], sizes = [32, 8], strides = [1, 1]} : vector<32x32xf32> to vector<32x8xf32>
    %195 = arith.truncf %193 : vector<8x8xf32> to vector<8x8xbf16>
    %196 = arith.truncf %194 : vector<32x8xf32> to vector<32x8xbf16>
    %cst_65 = arith.constant dense<0.000000e+00> : vector<8x32xf32>
    %197 = tpu.matmul %195, %196, %cst_65 {dimension_numbers = #tpu.dot_dimension_numbers<[1], [1], [0], [0], [0, 0, 1, 0], [], []>} : vector<8x8xbf16>, vector<32x8xbf16>, vector<8x32xf32> -> vector<8x32xf32>
    %cst_66 = arith.constant dense<0xFF800000> : vector<8xf32>
    %198 = vector.multi_reduction <maximumf>, %197, %cst_66 [1] : vector<8x32xf32> to vector<8xf32>
    %199 = vector.shape_cast %198 : vector<8xf32> to vector<8x1xf32>
    %200 = arith.maximumf %93, %199 : vector<8x1xf32>
    %201 = arith.subf %93, %200 : vector<8x1xf32>
    %202 = math.exp %201 : vector<8x1xf32>
    %203 = vector.broadcast %200 : vector<8x1xf32> to vector<8x32xf32>
    %204 = arith.subf %197, %203 : vector<8x32xf32>
    %205 = math.exp %204 : vector<8x32xf32>
    %206 = arith.mulf %202, %102 : vector<8x1xf32>
    %cst_67 = arith.constant dense<0.000000e+00> : vector<8xf32>
    %207 = vector.multi_reduction <add>, %205, %cst_67 [1] : vector<8x32xf32> to vector<8xf32>
    %208 = vector.shape_cast %207 : vector<8xf32> to vector<8x1xf32>
    %209 = arith.addf %206, %208 : vector<8x1xf32>
    %210 = vector.broadcast %202 : vector<8x1xf32> to vector<8x8xf32>
    %211 = arith.mulf %210, %109 : vector<8x8xf32>
    %212 = vector.extract_strided_slice %144 {offsets = [0, 16], sizes = [32, 8], strides = [1, 1]} : vector<32x32xf32> to vector<32x8xf32>
    %213 = arith.truncf %205 : vector<8x32xf32> to vector<8x32xbf16>
    %214 = arith.truncf %212 : vector<32x8xf32> to vector<32x8xbf16>
    %cst_68 = arith.constant dense<0.000000e+00> : vector<8x8xf32>
    %215 = tpu.matmul %213, %214, %cst_68 {dimension_numbers = #tpu.dot_dimension_numbers<[1], [0], [0], [1], [0, 0, 1, 1], [], []>} : vector<8x32xbf16>, vector<32x8xbf16>, vector<8x8xf32> -> vector<8x8xf32>
    %216 = arith.addf %211, %215 : vector<8x8xf32>
    %217 = vector.extract_strided_slice %8 {offsets = [0, 24], sizes = [8, 8], strides = [1, 1]} : vector<8x32xf32> to vector<8x8xf32>
    %218 = vector.extract_strided_slice %140 {offsets = [0, 24], sizes = [32, 8], strides = [1, 1]} : vector<32x32xf32> to vector<32x8xf32>
    %219 = arith.truncf %217 : vector<8x8xf32> to vector<8x8xbf16>
    %220 = arith.truncf %218 : vector<32x8xf32> to vector<32x8xbf16>
    %cst_69 = arith.constant dense<0.000000e+00> : vector<8x32xf32>
    %221 = tpu.matmul %219, %220, %cst_69 {dimension_numbers = #tpu.dot_dimension_numbers<[1], [1], [0], [0], [0, 0, 1, 0], [], []>} : vector<8x8xbf16>, vector<32x8xbf16>, vector<8x32xf32> -> vector<8x32xf32>
    %cst_70 = arith.constant dense<0xFF800000> : vector<8xf32>
    %222 = vector.multi_reduction <maximumf>, %221, %cst_70 [1] : vector<8x32xf32> to vector<8xf32>
    %223 = vector.shape_cast %222 : vector<8xf32> to vector<8x1xf32>
    %224 = arith.maximumf %117, %223 : vector<8x1xf32>
    %225 = arith.subf %117, %224 : vector<8x1xf32>
    %226 = math.exp %225 : vector<8x1xf32>
    %227 = vector.broadcast %224 : vector<8x1xf32> to vector<8x32xf32>
    %228 = arith.subf %221, %227 : vector<8x32xf32>
    %229 = math.exp %228 : vector<8x32xf32>
    %230 = arith.mulf %226, %126 : vector<8x1xf32>
    %cst_71 = arith.constant dense<0.000000e+00> : vector<8xf32>
    %231 = vector.multi_reduction <add>, %229, %cst_71 [1] : vector<8x32xf32> to vector<8xf32>
    %232 = vector.shape_cast %231 : vector<8xf32> to vector<8x1xf32>
    %233 = arith.addf %230, %232 : vector<8x1xf32>
    %234 = vector.broadcast %226 : vector<8x1xf32> to vector<8x8xf32>
    %235 = arith.mulf %234, %133 : vector<8x8xf32>
    %236 = vector.extract_strided_slice %144 {offsets = [0, 24], sizes = [32, 8], strides = [1, 1]} : vector<32x32xf32> to vector<32x8xf32>
    %237 = arith.truncf %229 : vector<8x32xf32> to vector<8x32xbf16>
    %238 = arith.truncf %236 : vector<32x8xf32> to vector<32x8xbf16>
    %cst_72 = arith.constant dense<0.000000e+00> : vector<8x8xf32>
    %239 = tpu.matmul %237, %238, %cst_72 {dimension_numbers = #tpu.dot_dimension_numbers<[1], [0], [0], [1], [0, 0, 1, 1], [], []>} : vector<8x32xbf16>, vector<32x8xbf16>, vector<8x8xf32> -> vector<8x8xf32>
    %240 = arith.addf %235, %239 : vector<8x8xf32>
    %241 = vector.broadcast %161 : vector<8x1xf32> to vector<8x8xf32>
    %242 = arith.divf %168, %241 : vector<8x8xf32>
    %c0_73 = arith.constant 0 : index
    %c0_74 = arith.constant 0 : index
    %243 = vector.load %arg39[%c0_73, %c0_74] : memref<8x32xf32, #tpu.memory_space<vmem>>, vector<8x8xf32>
    tpu.vector_store %arg39[%c0_73, %c0_74], %242 {strides = array<i32>} : memref<8x32xf32, #tpu.memory_space<vmem>>, vector<8x8xf32>,
    %244 = vector.broadcast %185 : vector<8x1xf32> to vector<8x8xf32>
    %245 = arith.divf %192, %244 : vector<8x8xf32>
    %c0_75 = arith.constant 0 : index
    %c8 = arith.constant 8 : index
    %246 = vector.load %arg39[%c0_75, %c8] : memref<8x32xf32, #tpu.memory_space<vmem>>, vector<8x8xf32>
    tpu.vector_store %arg39[%c0_75, %c8], %245 {strides = array<i32>} : memref<8x32xf32, #tpu.memory_space<vmem>>, vector<8x8xf32>,
    %247 = vector.broadcast %209 : vector<8x1xf32> to vector<8x8xf32>
    %248 = arith.divf %216, %247 : vector<8x8xf32>
    %c0_76 = arith.constant 0 : index
    %c16 = arith.constant 16 : index
    %249 = vector.load %arg39[%c0_76, %c16] : memref<8x32xf32, #tpu.memory_space<vmem>>, vector<8x8xf32>
    tpu.vector_store %arg39[%c0_76, %c16], %248 {strides = array<i32>} : memref<8x32xf32, #tpu.memory_space<vmem>>, vector<8x8xf32>,
    %250 = vector.broadcast %233 : vector<8x1xf32> to vector<8x8xf32>
    %251 = arith.divf %240, %250 : vector<8x8xf32>
    %c0_77 = arith.constant 0 : index
    %c24 = arith.constant 24 : index
    %252 = vector.load %arg39[%c0_77, %c24] : memref<8x32xf32, #tpu.memory_space<vmem>>, vector<8x8xf32>
    tpu.vector_store %arg39[%c0_77, %c24], %251 {strides = array<i32>} : memref<8x32xf32, #tpu.memory_space<vmem>>, vector<8x8xf32>,
    %c0_78 = arith.constant 0 : index
    %c0_79 = arith.constant 0 : index
    %253 = vector.load %arg39[%c0_78, %c0_79] : memref<8x32xf32, #tpu.memory_space<vmem>>, vector<8x32xf32>
    %254 = arith.truncf %253 : vector<8x32xf32> to vector<8x32xbf16>
    %cst_80 = arith.constant dense<0.000000e+00> : vector<8x32xf32>
    %255 = tpu.matmul %254, %13, %cst_80 {dimension_numbers = #tpu.dot_dimension_numbers<[1], [0], [0], [1], [0, 0, 1, 1], [], []>} : vector<8x32xbf16>, vector<32x32xbf16>, vector<8x32xf32> -> vector<8x32xf32>
    %256 = vector.broadcast %14 : vector<1x32xf32> to vector<8x32xf32>
    %257 = arith.addf %255, %256 : vector<8x32xf32>
    %258 = arith.addf %1, %257 : vector<8x32xf32>
    %c0_81 = arith.constant 0 : index
    %c0_82 = arith.constant 0 : index
    %259 = vector.load %arg12[%c0_81, %c0_82] : memref<1x32xf32, #tpu.memory_space<vmem>>, vector<1x32xf32>
    %c0_83 = arith.constant 0 : index
    %c0_84 = arith.constant 0 : index
    %260 = vector.load %arg13[%c0_83, %c0_84] : memref<1x32xf32, #tpu.memory_space<vmem>>, vector<1x32xf32>
    %cst_85 = arith.constant dense<0.000000e+00> : vector<8xf32>
    %261 = vector.multi_reduction <add>, %258, %cst_85 [1] : vector<8x32xf32> to vector<8xf32>
    %262 = vector.shape_cast %261 : vector<8xf32> to vector<8x1xf32>
    %cst_86 = arith.constant 3.200000e+01 : f32
    %263 = vector.broadcast %cst_86 : f32 to vector<8x1xf32>
    %264 = arith.divf %262, %263 : vector<8x1xf32>
    %265 = vector.broadcast %264 : vector<8x1xf32> to vector<8x32xf32>
    %266 = arith.subf %258, %265 : vector<8x32xf32>
    %267 = arith.mulf %266, %266 : vector<8x32xf32>
    %cst_87 = arith.constant dense<0.000000e+00> : vector<8xf32>
    %268 = vector.multi_reduction <add>, %267, %cst_87 [1] : vector<8x32xf32> to vector<8xf32>
    %269 = vector.shape_cast %268 : vector<8xf32> to vector<8x1xf32>
    %cst_88 = arith.constant 3.200000e+01 : f32
    %270 = vector.broadcast %cst_88 : f32 to vector<8x1xf32>
    %271 = arith.divf %269, %270 : vector<8x1xf32>
    %272 = vector.broadcast %264 : vector<8x1xf32> to vector<8x32xf32>
    %273 = arith.subf %258, %272 : vector<8x32xf32>
    %cst_89 = arith.constant 9.99999974E-6 : f32
    %274 = vector.broadcast %cst_89 : f32 to vector<8x1xf32>
    %275 = arith.addf %271, %274 : vector<8x1xf32>
    %276 = math.rsqrt %275 : vector<8x1xf32>
    %277 = vector.broadcast %276 : vector<8x1xf32> to vector<8x32xf32>
    %278 = arith.mulf %273, %277 : vector<8x32xf32>
    %279 = vector.broadcast %259 : vector<1x32xf32> to vector<8x32xf32>
    %280 = arith.mulf %278, %279 : vector<8x32xf32>
    %281 = vector.broadcast %260 : vector<1x32xf32> to vector<8x32xf32>
    %282 = arith.addf %280, %281 : vector<8x32xf32>
    %c0_90 = arith.constant 0 : index
    %c0_91 = arith.constant 0 : index
    %283 = vector.load %arg14[%c0_90, %c0_91] : memref<32x64xbf16, #tpu.memory_space<vmem>>, vector<32x64xbf16>
    %284 = arith.truncf %282 : vector<8x32xf32> to vector<8x32xbf16>
    %cst_92 = arith.constant dense<0.000000e+00> : vector<8x64xf32>
    %285 = tpu.matmul %284, %283, %cst_92 {dimension_numbers = #tpu.dot_dimension_numbers<[1], [0], [0], [1], [0, 0, 1, 1], [], []>} : vector<8x32xbf16>, vector<32x64xbf16>, vector<8x64xf32> -> vector<8x64xf32>
    %c0_93 = arith.constant 0 : index
    %c0_94 = arith.constant 0 : index
    %286 = vector.load %arg15[%c0_93, %c0_94] : memref<1x64xf32, #tpu.memory_space<vmem>>, vector<1x64xf32>
    %287 = vector.broadcast %286 : vector<1x64xf32> to vector<8x64xf32>
    %288 = arith.addf %285, %287 : vector<8x64xf32>
    %cst_95 = arith.constant 0.000000e+00 : f32
    %289 = vector.broadcast %cst_95 : f32 to vector<8x64xf32>
    %290 = arith.maximumf %288, %289 : vector<8x64xf32>
    %c0_96 = arith.constant 0 : index
    %c0_97 = arith.constant 0 : index
    %291 = vector.load %arg16[%c0_96, %c0_97] : memref<64x32xbf16, #tpu.memory_space<vmem>>, vector<64x32xbf16>
    %292 = arith.truncf %290 : vector<8x64xf32> to vector<8x64xbf16>
    %cst_98 = arith.constant dense<0.000000e+00> : vector<8x32xf32>
    %293 = tpu.matmul %292, %291, %cst_98 {dimension_numbers = #tpu.dot_dimension_numbers<[1], [0], [0], [1], [0, 0, 1, 1], [], []>} : vector<8x64xbf16>, vector<64x32xbf16>, vector<8x32xf32> -> vector<8x32xf32>
    %294 = arith.addf %282, %293 : vector<8x32xf32>
    %c0_99 = arith.constant 0 : index
    %c0_100 = arith.constant 0 : index
    %295 = vector.load %arg17[%c0_99, %c0_100] : memref<1x32xf32, #tpu.memory_space<vmem>>, vector<1x32xf32>
    %296 = vector.broadcast %295 : vector<1x32xf32> to vector<8x32xf32>
    %297 = arith.addf %294, %296 : vector<8x32xf32>
    %c0_101 = arith.constant 0 : index
    %c0_102 = arith.constant 0 : index
    %298 = vector.load %arg18[%c0_101, %c0_102] : memref<1x32xf32, #tpu.memory_space<vmem>>, vector<1x32xf32>
    %c0_103 = arith.constant 0 : index
    %c0_104 = arith.constant 0 : index
    %299 = vector.load %arg19[%c0_103, %c0_104] : memref<1x32xf32, #tpu.memory_space<vmem>>, vector<1x32xf32>
    %cst_105 = arith.constant dense<0.000000e+00> : vector<8xf32>
    %300 = vector.multi_reduction <add>, %297, %cst_105 [1] : vector<8x32xf32> to vector<8xf32>
    %301 = vector.shape_cast %300 : vector<8xf32> to vector<8x1xf32>
    %cst_106 = arith.constant 3.200000e+01 : f32
    %302 = vector.broadcast %cst_106 : f32 to vector<8x1xf32>
    %303 = arith.divf %301, %302 : vector<8x1xf32>
    %304 = vector.broadcast %303 : vector<8x1xf32> to vector<8x32xf32>
    %305 = arith.subf %297, %304 : vector<8x32xf32>
    %306 = arith.mulf %305, %305 : vector<8x32xf32>
    %cst_107 = arith.constant dense<0.000000e+00> : vector<8xf32>
    %307 = vector.multi_reduction <add>, %306, %cst_107 [1] : vector<8x32xf32> to vector<8xf32>
    %308 = vector.shape_cast %307 : vector<8xf32> to vector<8x1xf32>
    %cst_108 = arith.constant 3.200000e+01 : f32
    %309 = vector.broadcast %cst_108 : f32 to vector<8x1xf32>
    %310 = arith.divf %308, %309 : vector<8x1xf32>
    %311 = vector.broadcast %303 : vector<8x1xf32> to vector<8x32xf32>
    %312 = arith.subf %297, %311 : vector<8x32xf32>
    %cst_109 = arith.constant 9.99999974E-6 : f32
    %313 = vector.broadcast %cst_109 : f32 to vector<8x1xf32>
    %314 = arith.addf %310, %313 : vector<8x1xf32>
    %315 = math.rsqrt %314 : vector<8x1xf32>
    %316 = vector.broadcast %315 : vector<8x1xf32> to vector<8x32xf32>
    %317 = arith.mulf %312, %316 : vector<8x32xf32>
    %318 = vector.broadcast %298 : vector<1x32xf32> to vector<8x32xf32>
    %319 = arith.mulf %317, %318 : vector<8x32xf32>
    %320 = vector.broadcast %299 : vector<1x32xf32> to vector<8x32xf32>
    %321 = arith.addf %319, %320 : vector<8x32xf32>
    %322 = arith.addf %321, %0 : vector<8x32xf32>
    %c0_110 = arith.constant 0 : index
    %c0_111 = arith.constant 0 : index
    %323 = vector.load %arg20[%c0_110, %c0_111] : memref<32x32xbf16, #tpu.memory_space<vmem>>, vector<32x32xbf16>
    %324 = arith.truncf %322 : vector<8x32xf32> to vector<8x32xbf16>
    %cst_112 = arith.constant dense<0.000000e+00> : vector<8x32xf32>
    %325 = tpu.matmul %324, %323, %cst_112 {dimension_numbers = #tpu.dot_dimension_numbers<[1], [0], [0], [1], [0, 0, 1, 1], [], []>} : vector<8x32xbf16>, vector<32x32xbf16>, vector<8x32xf32> -> vector<8x32xf32>
    %c0_113 = arith.constant 0 : index
    %c0_114 = arith.constant 0 : index
    %326 = vector.load %arg21[%c0_113, %c0_114] : memref<1x32xf32, #tpu.memory_space<vmem>>, vector<1x32xf32>
    %327 = vector.broadcast %326 : vector<1x32xf32> to vector<8x32xf32>
    %328 = arith.addf %325, %327 : vector<8x32xf32>
    %c0_115 = arith.constant 0 : index
    %c0_116 = arith.constant 0 : index
    %329 = vector.load %arg22[%c0_115, %c0_116] : memref<32x32xbf16, #tpu.memory_space<vmem>>, vector<32x32xbf16>
    %c0_117 = arith.constant 0 : index
    %c0_118 = arith.constant 0 : index
    %330 = vector.load %arg23[%c0_117, %c0_118] : memref<1x32xf32, #tpu.memory_space<vmem>>, vector<1x32xf32>
    %c0_119 = arith.constant 0 : index
    %c0_120 = arith.constant 0 : index
    %331 = vector.load %arg24[%c0_119, %c0_120] : memref<32x32xbf16, #tpu.memory_space<vmem>>, vector<32x32xbf16>
    %c0_121 = arith.constant 0 : index
    %c0_122 = arith.constant 0 : index
    %332 = vector.load %arg25[%c0_121, %c0_122] : memref<1x32xf32, #tpu.memory_space<vmem>>, vector<1x32xf32>
    %c0_123 = arith.constant 0 : index
    %c0_124 = arith.constant 0 : index
    %333 = vector.load %arg26[%c0_123, %c0_124] : memref<32x32xbf16, #tpu.memory_space<vmem>>, vector<32x32xbf16>
    %c0_125 = arith.constant 0 : index
    %c0_126 = arith.constant 0 : index
    %334 = vector.load %arg27[%c0_125, %c0_126] : memref<1x32xf32, #tpu.memory_space<vmem>>, vector<1x32xf32>
    %cst_127 = arith.constant 0xFF800000 : f32
    %335 = vector.broadcast %cst_127 : f32 to vector<8x1xf32>
    %cst_128 = arith.constant 0xFF800000 : f32
    %336 = vector.broadcast %cst_128 : f32 to vector<8x1xf32>
    %cst_129 = arith.constant 0xFF800000 : f32
    %337 = vector.broadcast %cst_129 : f32 to vector<8x1xf32>
    %cst_130 = arith.constant 0xFF800000 : f32
    %338 = vector.broadcast %cst_130 : f32 to vector<8x1xf32>
    %cst_131 = arith.constant 0.000000e+00 : f32
    %339 = vector.broadcast %cst_131 : f32 to vector<8x1xf32>
    %cst_132 = arith.constant 0.000000e+00 : f32
    %340 = vector.broadcast %cst_132 : f32 to vector<8x1xf32>
    %cst_133 = arith.constant 0.000000e+00 : f32
    %341 = vector.broadcast %cst_133 : f32 to vector<8x1xf32>
    %cst_134 = arith.constant 0.000000e+00 : f32
    %342 = vector.broadcast %cst_134 : f32 to vector<8x1xf32>
    %cst_135 = arith.constant 0.000000e+00 : f32
    %343 = vector.broadcast %cst_135 : f32 to vector<8x8xf32>
    %cst_136 = arith.constant 0.000000e+00 : f32
    %344 = vector.broadcast %cst_136 : f32 to vector<8x8xf32>
    %cst_137 = arith.constant 0.000000e+00 : f32
    %345 = vector.broadcast %cst_137 : f32 to vector<8x8xf32>
    %cst_138 = arith.constant 0.000000e+00 : f32
    %346 = vector.broadcast %cst_138 : f32 to vector<8x8xf32>
    %c0_139 = arith.constant 0 : index
    %c0_140 = arith.constant 0 : index
    %347 = vector.load %arg2[%c0_139, %c0_140] : memref<64x32xf32, #tpu.memory_space<vmem>>, vector<32x32xf32>
    %c0_141 = arith.constant 0 : index
    %c0_142 = arith.constant 0 : index
    %348 = vector.load %arg3[%c0_141, %c0_142] : memref<64x32xf32, #tpu.memory_space<vmem>>, vector<32x32xf32>
    %349 = arith.addf %347, %348 : vector<32x32xf32>
    %350 = arith.truncf %349 : vector<32x32xf32> to vector<32x32xbf16>
    %cst_143 = arith.constant dense<0.000000e+00> : vector<32x32xf32>
    %351 = tpu.matmul %350, %329, %cst_143 {dimension_numbers = #tpu.dot_dimension_numbers<[1], [0], [0], [1], [0, 0, 1, 1], [], []>} : vector<32x32xbf16>, vector<32x32xbf16>, vector<32x32xf32> -> vector<32x32xf32>
    %352 = vector.broadcast %330 : vector<1x32xf32> to vector<32x32xf32>
    %353 = arith.addf %351, %352 : vector<32x32xf32>
    %354 = arith.truncf %347 : vector<32x32xf32> to vector<32x32xbf16>
    %cst_144 = arith.constant dense<0.000000e+00> : vector<32x32xf32>
    %355 = tpu.matmul %354, %331, %cst_144 {dimension_numbers = #tpu.dot_dimension_numbers<[1], [0], [0], [1], [0, 0, 1, 1], [], []>} : vector<32x32xbf16>, vector<32x32xbf16>, vector<32x32xf32> -> vector<32x32xf32>
    %356 = vector.broadcast %332 : vector<1x32xf32> to vector<32x32xf32>
    %357 = arith.addf %355, %356 : vector<32x32xf32>
    %358 = vector.extract_strided_slice %328 {offsets = [0, 0], sizes = [8, 8], strides = [1, 1]} : vector<8x32xf32> to vector<8x8xf32>
    %359 = vector.extract_strided_slice %353 {offsets = [0, 0], sizes = [32, 8], strides = [1, 1]} : vector<32x32xf32> to vector<32x8xf32>
    %360 = arith.truncf %358 : vector<8x8xf32> to vector<8x8xbf16>
    %361 = arith.truncf %359 : vector<32x8xf32> to vector<32x8xbf16>
    %cst_145 = arith.constant dense<0.000000e+00> : vector<8x32xf32>
    %362 = tpu.matmul %360, %361, %cst_145 {dimension_numbers = #tpu.dot_dimension_numbers<[1], [1], [0], [0], [0, 0, 1, 0], [], []>} : vector<8x8xbf16>, vector<32x8xbf16>, vector<8x32xf32> -> vector<8x32xf32>
    %cst_146 = arith.constant dense<0xFF800000> : vector<8xf32>
    %363 = vector.multi_reduction <maximumf>, %362, %cst_146 [1] : vector<8x32xf32> to vector<8xf32>
    %364 = vector.shape_cast %363 : vector<8xf32> to vector<8x1xf32>
    %365 = arith.maximumf %335, %364 : vector<8x1xf32>
    %366 = arith.subf %335, %365 : vector<8x1xf32>
    %367 = math.exp %366 : vector<8x1xf32>
    %368 = vector.broadcast %365 : vector<8x1xf32> to vector<8x32xf32>
    %369 = arith.subf %362, %368 : vector<8x32xf32>
    %370 = math.exp %369 : vector<8x32xf32>
    %371 = arith.mulf %367, %339 : vector<8x1xf32>
    %cst_147 = arith.constant dense<0.000000e+00> : vector<8xf32>
    %372 = vector.multi_reduction <add>, %370, %cst_147 [1] : vector<8x32xf32> to vector<8xf32>
    %373 = vector.shape_cast %372 : vector<8xf32> to vector<8x1xf32>
    %374 = arith.addf %371, %373 : vector<8x1xf32>
    %375 = vector.broadcast %367 : vector<8x1xf32> to vector<8x8xf32>
    %376 = arith.mulf %375, %343 : vector<8x8xf32>
    %377 = vector.extract_strided_slice %357 {offsets = [0, 0], sizes = [32, 8], strides = [1, 1]} : vector<32x32xf32> to vector<32x8xf32>
    %378 = arith.truncf %370 : vector<8x32xf32> to vector<8x32xbf16>
    %379 = arith.truncf %377 : vector<32x8xf32> to vector<32x8xbf16>
    %cst_148 = arith.constant dense<0.000000e+00> : vector<8x8xf32>
    %380 = tpu.matmul %378, %379, %cst_148 {dimension_numbers = #tpu.dot_dimension_numbers<[1], [0], [0], [1], [0, 0, 1, 1], [], []>} : vector<8x32xbf16>, vector<32x8xbf16>, vector<8x8xf32> -> vector<8x8xf32>
    %381 = arith.addf %376, %380 : vector<8x8xf32>
    %382 = vector.extract_strided_slice %328 {offsets = [0, 8], sizes = [8, 8], strides = [1, 1]} : vector<8x32xf32> to vector<8x8xf32>
    %383 = vector.extract_strided_slice %353 {offsets = [0, 8], sizes = [32, 8], strides = [1, 1]} : vector<32x32xf32> to vector<32x8xf32>
    %384 = arith.truncf %382 : vector<8x8xf32> to vector<8x8xbf16>
    %385 = arith.truncf %383 : vector<32x8xf32> to vector<32x8xbf16>
    %cst_149 = arith.constant dense<0.000000e+00> : vector<8x32xf32>
    %386 = tpu.matmul %384, %385, %cst_149 {dimension_numbers = #tpu.dot_dimension_numbers<[1], [1], [0], [0], [0, 0, 1, 0], [], []>} : vector<8x8xbf16>, vector<32x8xbf16>, vector<8x32xf32> -> vector<8x32xf32>
    %cst_150 = arith.constant dense<0xFF800000> : vector<8xf32>
    %387 = vector.multi_reduction <maximumf>, %386, %cst_150 [1] : vector<8x32xf32> to vector<8xf32>
    %388 = vector.shape_cast %387 : vector<8xf32> to vector<8x1xf32>
    %389 = arith.maximumf %336, %388 : vector<8x1xf32>
    %390 = arith.subf %336, %389 : vector<8x1xf32>
    %391 = math.exp %390 : vector<8x1xf32>
    %392 = vector.broadcast %389 : vector<8x1xf32> to vector<8x32xf32>
    %393 = arith.subf %386, %392 : vector<8x32xf32>
    %394 = math.exp %393 : vector<8x32xf32>
    %395 = arith.mulf %391, %340 : vector<8x1xf32>
    %cst_151 = arith.constant dense<0.000000e+00> : vector<8xf32>
    %396 = vector.multi_reduction <add>, %394, %cst_151 [1] : vector<8x32xf32> to vector<8xf32>
    %397 = vector.shape_cast %396 : vector<8xf32> to vector<8x1xf32>
    %398 = arith.addf %395, %397 : vector<8x1xf32>
    %399 = vector.broadcast %391 : vector<8x1xf32> to vector<8x8xf32>
    %400 = arith.mulf %399, %344 : vector<8x8xf32>
    %401 = vector.extract_strided_slice %357 {offsets = [0, 8], sizes = [32, 8], strides = [1, 1]} : vector<32x32xf32> to vector<32x8xf32>
    %402 = arith.truncf %394 : vector<8x32xf32> to vector<8x32xbf16>
    %403 = arith.truncf %401 : vector<32x8xf32> to vector<32x8xbf16>
    %cst_152 = arith.constant dense<0.000000e+00> : vector<8x8xf32>
    %404 = tpu.matmul %402, %403, %cst_152 {dimension_numbers = #tpu.dot_dimension_numbers<[1], [0], [0], [1], [0, 0, 1, 1], [], []>} : vector<8x32xbf16>, vector<32x8xbf16>, vector<8x8xf32> -> vector<8x8xf32>
    %405 = arith.addf %400, %404 : vector<8x8xf32>
    %406 = vector.extract_strided_slice %328 {offsets = [0, 16], sizes = [8, 8], strides = [1, 1]} : vector<8x32xf32> to vector<8x8xf32>
    %407 = vector.extract_strided_slice %353 {offsets = [0, 16], sizes = [32, 8], strides = [1, 1]} : vector<32x32xf32> to vector<32x8xf32>
    %408 = arith.truncf %406 : vector<8x8xf32> to vector<8x8xbf16>
    %409 = arith.truncf %407 : vector<32x8xf32> to vector<32x8xbf16>
    %cst_153 = arith.constant dense<0.000000e+00> : vector<8x32xf32>
    %410 = tpu.matmul %408, %409, %cst_153 {dimension_numbers = #tpu.dot_dimension_numbers<[1], [1], [0], [0], [0, 0, 1, 0], [], []>} : vector<8x8xbf16>, vector<32x8xbf16>, vector<8x32xf32> -> vector<8x32xf32>
    %cst_154 = arith.constant dense<0xFF800000> : vector<8xf32>
    %411 = vector.multi_reduction <maximumf>, %410, %cst_154 [1] : vector<8x32xf32> to vector<8xf32>
    %412 = vector.shape_cast %411 : vector<8xf32> to vector<8x1xf32>
    %413 = arith.maximumf %337, %412 : vector<8x1xf32>
    %414 = arith.subf %337, %413 : vector<8x1xf32>
    %415 = math.exp %414 : vector<8x1xf32>
    %416 = vector.broadcast %413 : vector<8x1xf32> to vector<8x32xf32>
    %417 = arith.subf %410, %416 : vector<8x32xf32>
    %418 = math.exp %417 : vector<8x32xf32>
    %419 = arith.mulf %415, %341 : vector<8x1xf32>
    %cst_155 = arith.constant dense<0.000000e+00> : vector<8xf32>
    %420 = vector.multi_reduction <add>, %418, %cst_155 [1] : vector<8x32xf32> to vector<8xf32>
    %421 = vector.shape_cast %420 : vector<8xf32> to vector<8x1xf32>
    %422 = arith.addf %419, %421 : vector<8x1xf32>
    %423 = vector.broadcast %415 : vector<8x1xf32> to vector<8x8xf32>
    %424 = arith.mulf %423, %345 : vector<8x8xf32>
    %425 = vector.extract_strided_slice %357 {offsets = [0, 16], sizes = [32, 8], strides = [1, 1]} : vector<32x32xf32> to vector<32x8xf32>
    %426 = arith.truncf %418 : vector<8x32xf32> to vector<8x32xbf16>
    %427 = arith.truncf %425 : vector<32x8xf32> to vector<32x8xbf16>
    %cst_156 = arith.constant dense<0.000000e+00> : vector<8x8xf32>
    %428 = tpu.matmul %426, %427, %cst_156 {dimension_numbers = #tpu.dot_dimension_numbers<[1], [0], [0], [1], [0, 0, 1, 1], [], []>} : vector<8x32xbf16>, vector<32x8xbf16>, vector<8x8xf32> -> vector<8x8xf32>
    %429 = arith.addf %424, %428 : vector<8x8xf32>
    %430 = vector.extract_strided_slice %328 {offsets = [0, 24], sizes = [8, 8], strides = [1, 1]} : vector<8x32xf32> to vector<8x8xf32>
    %431 = vector.extract_strided_slice %353 {offsets = [0, 24], sizes = [32, 8], strides = [1, 1]} : vector<32x32xf32> to vector<32x8xf32>
    %432 = arith.truncf %430 : vector<8x8xf32> to vector<8x8xbf16>
    %433 = arith.truncf %431 : vector<32x8xf32> to vector<32x8xbf16>
    %cst_157 = arith.constant dense<0.000000e+00> : vector<8x32xf32>
    %434 = tpu.matmul %432, %433, %cst_157 {dimension_numbers = #tpu.dot_dimension_numbers<[1], [1], [0], [0], [0, 0, 1, 0], [], []>} : vector<8x8xbf16>, vector<32x8xbf16>, vector<8x32xf32> -> vector<8x32xf32>
    %cst_158 = arith.constant dense<0xFF800000> : vector<8xf32>
    %435 = vector.multi_reduction <maximumf>, %434, %cst_158 [1] : vector<8x32xf32> to vector<8xf32>
    %436 = vector.shape_cast %435 : vector<8xf32> to vector<8x1xf32>
    %437 = arith.maximumf %338, %436 : vector<8x1xf32>
    %438 = arith.subf %338, %437 : vector<8x1xf32>
    %439 = math.exp %438 : vector<8x1xf32>
    %440 = vector.broadcast %437 : vector<8x1xf32> to vector<8x32xf32>
    %441 = arith.subf %434, %440 : vector<8x32xf32>
    %442 = math.exp %441 : vector<8x32xf32>
    %443 = arith.mulf %439, %342 : vector<8x1xf32>
    %cst_159 = arith.constant dense<0.000000e+00> : vector<8xf32>
    %444 = vector.multi_reduction <add>, %442, %cst_159 [1] : vector<8x32xf32> to vector<8xf32>
    %445 = vector.shape_cast %444 : vector<8xf32> to vector<8x1xf32>
    %446 = arith.addf %443, %445 : vector<8x1xf32>
    %447 = vector.broadcast %439 : vector<8x1xf32> to vector<8x8xf32>
    %448 = arith.mulf %447, %346 : vector<8x8xf32>
    %449 = vector.extract_strided_slice %357 {offsets = [0, 24], sizes = [32, 8], strides = [1, 1]} : vector<32x32xf32> to vector<32x8xf32>
    %450 = arith.truncf %442 : vector<8x32xf32> to vector<8x32xbf16>
    %451 = arith.truncf %449 : vector<32x8xf32> to vector<32x8xbf16>
    %cst_160 = arith.constant dense<0.000000e+00> : vector<8x8xf32>
    %452 = tpu.matmul %450, %451, %cst_160 {dimension_numbers = #tpu.dot_dimension_numbers<[1], [0], [0], [1], [0, 0, 1, 1], [], []>} : vector<8x32xbf16>, vector<32x8xbf16>, vector<8x8xf32> -> vector<8x8xf32>
    %453 = arith.addf %448, %452 : vector<8x8xf32>
    %c32_161 = arith.constant 32 : index
    %c0_162 = arith.constant 0 : index
    %454 = vector.load %arg2[%c32_161, %c0_162] : memref<64x32xf32, #tpu.memory_space<vmem>>, vector<32x32xf32>
    %c32_163 = arith.constant 32 : index
    %c0_164 = arith.constant 0 : index
    %455 = vector.load %arg3[%c32_163, %c0_164] : memref<64x32xf32, #tpu.memory_space<vmem>>, vector<32x32xf32>
    %456 = arith.addf %454, %455 : vector<32x32xf32>
    %457 = arith.truncf %456 : vector<32x32xf32> to vector<32x32xbf16>
    %cst_165 = arith.constant dense<0.000000e+00> : vector<32x32xf32>
    %458 = tpu.matmul %457, %329, %cst_165 {dimension_numbers = #tpu.dot_dimension_numbers<[1], [0], [0], [1], [0, 0, 1, 1], [], []>} : vector<32x32xbf16>, vector<32x32xbf16>, vector<32x32xf32> -> vector<32x32xf32>
    %459 = vector.broadcast %330 : vector<1x32xf32> to vector<32x32xf32>
    %460 = arith.addf %458, %459 : vector<32x32xf32>
    %461 = arith.truncf %454 : vector<32x32xf32> to vector<32x32xbf16>
    %cst_166 = arith.constant dense<0.000000e+00> : vector<32x32xf32>
    %462 = tpu.matmul %461, %331, %cst_166 {dimension_numbers = #tpu.dot_dimension_numbers<[1], [0], [0], [1], [0, 0, 1, 1], [], []>} : vector<32x32xbf16>, vector<32x32xbf16>, vector<32x32xf32> -> vector<32x32xf32>
    %463 = vector.broadcast %332 : vector<1x32xf32> to vector<32x32xf32>
    %464 = arith.addf %462, %463 : vector<32x32xf32>
    %465 = vector.extract_strided_slice %328 {offsets = [0, 0], sizes = [8, 8], strides = [1, 1]} : vector<8x32xf32> to vector<8x8xf32>
    %466 = vector.extract_strided_slice %460 {offsets = [0, 0], sizes = [32, 8], strides = [1, 1]} : vector<32x32xf32> to vector<32x8xf32>
    %467 = arith.truncf %465 : vector<8x8xf32> to vector<8x8xbf16>
    %468 = arith.truncf %466 : vector<32x8xf32> to vector<32x8xbf16>
    %cst_167 = arith.constant dense<0.000000e+00> : vector<8x32xf32>
    %469 = tpu.matmul %467, %468, %cst_167 {dimension_numbers = #tpu.dot_dimension_numbers<[1], [1], [0], [0], [0, 0, 1, 0], [], []>} : vector<8x8xbf16>, vector<32x8xbf16>, vector<8x32xf32> -> vector<8x32xf32>
    %cst_168 = arith.constant dense<0xFF800000> : vector<8xf32>
    %470 = vector.multi_reduction <maximumf>, %469, %cst_168 [1] : vector<8x32xf32> to vector<8xf32>
    %471 = vector.shape_cast %470 : vector<8xf32> to vector<8x1xf32>
    %472 = arith.maximumf %365, %471 : vector<8x1xf32>
    %473 = arith.subf %365, %472 : vector<8x1xf32>
    %474 = math.exp %473 : vector<8x1xf32>
    %475 = vector.broadcast %472 : vector<8x1xf32> to vector<8x32xf32>
    %476 = arith.subf %469, %475 : vector<8x32xf32>
    %477 = math.exp %476 : vector<8x32xf32>
    %478 = arith.mulf %474, %374 : vector<8x1xf32>
    %cst_169 = arith.constant dense<0.000000e+00> : vector<8xf32>
    %479 = vector.multi_reduction <add>, %477, %cst_169 [1] : vector<8x32xf32> to vector<8xf32>
    %480 = vector.shape_cast %479 : vector<8xf32> to vector<8x1xf32>
    %481 = arith.addf %478, %480 : vector<8x1xf32>
    %482 = vector.broadcast %474 : vector<8x1xf32> to vector<8x8xf32>
    %483 = arith.mulf %482, %381 : vector<8x8xf32>
    %484 = vector.extract_strided_slice %464 {offsets = [0, 0], sizes = [32, 8], strides = [1, 1]} : vector<32x32xf32> to vector<32x8xf32>
    %485 = arith.truncf %477 : vector<8x32xf32> to vector<8x32xbf16>
    %486 = arith.truncf %484 : vector<32x8xf32> to vector<32x8xbf16>
    %cst_170 = arith.constant dense<0.000000e+00> : vector<8x8xf32>
    %487 = tpu.matmul %485, %486, %cst_170 {dimension_numbers = #tpu.dot_dimension_numbers<[1], [0], [0], [1], [0, 0, 1, 1], [], []>} : vector<8x32xbf16>, vector<32x8xbf16>, vector<8x8xf32> -> vector<8x8xf32>
    %488 = arith.addf %483, %487 : vector<8x8xf32>
    %489 = vector.extract_strided_slice %328 {offsets = [0, 8], sizes = [8, 8], strides = [1, 1]} : vector<8x32xf32> to vector<8x8xf32>
    %490 = vector.extract_strided_slice %460 {offsets = [0, 8], sizes = [32, 8], strides = [1, 1]} : vector<32x32xf32> to vector<32x8xf32>
    %491 = arith.truncf %489 : vector<8x8xf32> to vector<8x8xbf16>
    %492 = arith.truncf %490 : vector<32x8xf32> to vector<32x8xbf16>
    %cst_171 = arith.constant dense<0.000000e+00> : vector<8x32xf32>
    %493 = tpu.matmul %491, %492, %cst_171 {dimension_numbers = #tpu.dot_dimension_numbers<[1], [1], [0], [0], [0, 0, 1, 0], [], []>} : vector<8x8xbf16>, vector<32x8xbf16>, vector<8x32xf32> -> vector<8x32xf32>
    %cst_172 = arith.constant dense<0xFF800000> : vector<8xf32>
    %494 = vector.multi_reduction <maximumf>, %493, %cst_172 [1] : vector<8x32xf32> to vector<8xf32>
    %495 = vector.shape_cast %494 : vector<8xf32> to vector<8x1xf32>
    %496 = arith.maximumf %389, %495 : vector<8x1xf32>
    %497 = arith.subf %389, %496 : vector<8x1xf32>
    %498 = math.exp %497 : vector<8x1xf32>
    %499 = vector.broadcast %496 : vector<8x1xf32> to vector<8x32xf32>
    %500 = arith.subf %493, %499 : vector<8x32xf32>
    %501 = math.exp %500 : vector<8x32xf32>
    %502 = arith.mulf %498, %398 : vector<8x1xf32>
    %cst_173 = arith.constant dense<0.000000e+00> : vector<8xf32>
    %503 = vector.multi_reduction <add>, %501, %cst_173 [1] : vector<8x32xf32> to vector<8xf32>
    %504 = vector.shape_cast %503 : vector<8xf32> to vector<8x1xf32>
    %505 = arith.addf %502, %504 : vector<8x1xf32>
    %506 = vector.broadcast %498 : vector<8x1xf32> to vector<8x8xf32>
    %507 = arith.mulf %506, %405 : vector<8x8xf32>
    %508 = vector.extract_strided_slice %464 {offsets = [0, 8], sizes = [32, 8], strides = [1, 1]} : vector<32x32xf32> to vector<32x8xf32>
    %509 = arith.truncf %501 : vector<8x32xf32> to vector<8x32xbf16>
    %510 = arith.truncf %508 : vector<32x8xf32> to vector<32x8xbf16>
    %cst_174 = arith.constant dense<0.000000e+00> : vector<8x8xf32>
    %511 = tpu.matmul %509, %510, %cst_174 {dimension_numbers = #tpu.dot_dimension_numbers<[1], [0], [0], [1], [0, 0, 1, 1], [], []>} : vector<8x32xbf16>, vector<32x8xbf16>, vector<8x8xf32> -> vector<8x8xf32>
    %512 = arith.addf %507, %511 : vector<8x8xf32>
    %513 = vector.extract_strided_slice %328 {offsets = [0, 16], sizes = [8, 8], strides = [1, 1]} : vector<8x32xf32> to vector<8x8xf32>
    %514 = vector.extract_strided_slice %460 {offsets = [0, 16], sizes = [32, 8], strides = [1, 1]} : vector<32x32xf32> to vector<32x8xf32>
    %515 = arith.truncf %513 : vector<8x8xf32> to vector<8x8xbf16>
    %516 = arith.truncf %514 : vector<32x8xf32> to vector<32x8xbf16>
    %cst_175 = arith.constant dense<0.000000e+00> : vector<8x32xf32>
    %517 = tpu.matmul %515, %516, %cst_175 {dimension_numbers = #tpu.dot_dimension_numbers<[1], [1], [0], [0], [0, 0, 1, 0], [], []>} : vector<8x8xbf16>, vector<32x8xbf16>, vector<8x32xf32> -> vector<8x32xf32>
    %cst_176 = arith.constant dense<0xFF800000> : vector<8xf32>
    %518 = vector.multi_reduction <maximumf>, %517, %cst_176 [1] : vector<8x32xf32> to vector<8xf32>
    %519 = vector.shape_cast %518 : vector<8xf32> to vector<8x1xf32>
    %520 = arith.maximumf %413, %519 : vector<8x1xf32>
    %521 = arith.subf %413, %520 : vector<8x1xf32>
    %522 = math.exp %521 : vector<8x1xf32>
    %523 = vector.broadcast %520 : vector<8x1xf32> to vector<8x32xf32>
    %524 = arith.subf %517, %523 : vector<8x32xf32>
    %525 = math.exp %524 : vector<8x32xf32>
    %526 = arith.mulf %522, %422 : vector<8x1xf32>
    %cst_177 = arith.constant dense<0.000000e+00> : vector<8xf32>
    %527 = vector.multi_reduction <add>, %525, %cst_177 [1] : vector<8x32xf32> to vector<8xf32>
    %528 = vector.shape_cast %527 : vector<8xf32> to vector<8x1xf32>
    %529 = arith.addf %526, %528 : vector<8x1xf32>
    %530 = vector.broadcast %522 : vector<8x1xf32> to vector<8x8xf32>
    %531 = arith.mulf %530, %429 : vector<8x8xf32>
    %532 = vector.extract_strided_slice %464 {offsets = [0, 16], sizes = [32, 8], strides = [1, 1]} : vector<32x32xf32> to vector<32x8xf32>
    %533 = arith.truncf %525 : vector<8x32xf32> to vector<8x32xbf16>
    %534 = arith.truncf %532 : vector<32x8xf32> to vector<32x8xbf16>
    %cst_178 = arith.constant dense<0.000000e+00> : vector<8x8xf32>
    %535 = tpu.matmul %533, %534, %cst_178 {dimension_numbers = #tpu.dot_dimension_numbers<[1], [0], [0], [1], [0, 0, 1, 1], [], []>} : vector<8x32xbf16>, vector<32x8xbf16>, vector<8x8xf32> -> vector<8x8xf32>
    %536 = arith.addf %531, %535 : vector<8x8xf32>
    %537 = vector.extract_strided_slice %328 {offsets = [0, 24], sizes = [8, 8], strides = [1, 1]} : vector<8x32xf32> to vector<8x8xf32>
    %538 = vector.extract_strided_slice %460 {offsets = [0, 24], sizes = [32, 8], strides = [1, 1]} : vector<32x32xf32> to vector<32x8xf32>
    %539 = arith.truncf %537 : vector<8x8xf32> to vector<8x8xbf16>
    %540 = arith.truncf %538 : vector<32x8xf32> to vector<32x8xbf16>
    %cst_179 = arith.constant dense<0.000000e+00> : vector<8x32xf32>
    %541 = tpu.matmul %539, %540, %cst_179 {dimension_numbers = #tpu.dot_dimension_numbers<[1], [1], [0], [0], [0, 0, 1, 0], [], []>} : vector<8x8xbf16>, vector<32x8xbf16>, vector<8x32xf32> -> vector<8x32xf32>
    %cst_180 = arith.constant dense<0xFF800000> : vector<8xf32>
    %542 = vector.multi_reduction <maximumf>, %541, %cst_180 [1] : vector<8x32xf32> to vector<8xf32>
    %543 = vector.shape_cast %542 : vector<8xf32> to vector<8x1xf32>
    %544 = arith.maximumf %437, %543 : vector<8x1xf32>
    %545 = arith.subf %437, %544 : vector<8x1xf32>
    %546 = math.exp %545 : vector<8x1xf32>
    %547 = vector.broadcast %544 : vector<8x1xf32> to vector<8x32xf32>
    %548 = arith.subf %541, %547 : vector<8x32xf32>
    %549 = math.exp %548 : vector<8x32xf32>
    %550 = arith.mulf %546, %446 : vector<8x1xf32>
    %cst_181 = arith.constant dense<0.000000e+00> : vector<8xf32>
    %551 = vector.multi_reduction <add>, %549, %cst_181 [1] : vector<8x32xf32> to vector<8xf32>
    %552 = vector.shape_cast %551 : vector<8xf32> to vector<8x1xf32>
    %553 = arith.addf %550, %552 : vector<8x1xf32>
    %554 = vector.broadcast %546 : vector<8x1xf32> to vector<8x8xf32>
    %555 = arith.mulf %554, %453 : vector<8x8xf32>
    %556 = vector.extract_strided_slice %464 {offsets = [0, 24], sizes = [32, 8], strides = [1, 1]} : vector<32x32xf32> to vector<32x8xf32>
    %557 = arith.truncf %549 : vector<8x32xf32> to vector<8x32xbf16>
    %558 = arith.truncf %556 : vector<32x8xf32> to vector<32x8xbf16>
    %cst_182 = arith.constant dense<0.000000e+00> : vector<8x8xf32>
    %559 = tpu.matmul %557, %558, %cst_182 {dimension_numbers = #tpu.dot_dimension_numbers<[1], [0], [0], [1], [0, 0, 1, 1], [], []>} : vector<8x32xbf16>, vector<32x8xbf16>, vector<8x8xf32> -> vector<8x8xf32>
    %560 = arith.addf %555, %559 : vector<8x8xf32>
    %561 = vector.broadcast %481 : vector<8x1xf32> to vector<8x8xf32>
    %562 = arith.divf %488, %561 : vector<8x8xf32>
    %c0_183 = arith.constant 0 : index
    %c0_184 = arith.constant 0 : index
    %563 = vector.load %arg39[%c0_183, %c0_184] : memref<8x32xf32, #tpu.memory_space<vmem>>, vector<8x8xf32>
    tpu.vector_store %arg39[%c0_183, %c0_184], %562 {strides = array<i32>} : memref<8x32xf32, #tpu.memory_space<vmem>>, vector<8x8xf32>,
    %564 = vector.broadcast %505 : vector<8x1xf32> to vector<8x8xf32>
    %565 = arith.divf %512, %564 : vector<8x8xf32>
    %c0_185 = arith.constant 0 : index
    %c8_186 = arith.constant 8 : index
    %566 = vector.load %arg39[%c0_185, %c8_186] : memref<8x32xf32, #tpu.memory_space<vmem>>, vector<8x8xf32>
    tpu.vector_store %arg39[%c0_185, %c8_186], %565 {strides = array<i32>} : memref<8x32xf32, #tpu.memory_space<vmem>>, vector<8x8xf32>,
    %567 = vector.broadcast %529 : vector<8x1xf32> to vector<8x8xf32>
    %568 = arith.divf %536, %567 : vector<8x8xf32>
    %c0_187 = arith.constant 0 : index
    %c16_188 = arith.constant 16 : index
    %569 = vector.load %arg39[%c0_187, %c16_188] : memref<8x32xf32, #tpu.memory_space<vmem>>, vector<8x8xf32>
    tpu.vector_store %arg39[%c0_187, %c16_188], %568 {strides = array<i32>} : memref<8x32xf32, #tpu.memory_space<vmem>>, vector<8x8xf32>,
    %570 = vector.broadcast %553 : vector<8x1xf32> to vector<8x8xf32>
    %571 = arith.divf %560, %570 : vector<8x8xf32>
    %c0_189 = arith.constant 0 : index
    %c24_190 = arith.constant 24 : index
    %572 = vector.load %arg39[%c0_189, %c24_190] : memref<8x32xf32, #tpu.memory_space<vmem>>, vector<8x8xf32>
    tpu.vector_store %arg39[%c0_189, %c24_190], %571 {strides = array<i32>} : memref<8x32xf32, #tpu.memory_space<vmem>>, vector<8x8xf32>,
    %c0_191 = arith.constant 0 : index
    %c0_192 = arith.constant 0 : index
    %573 = vector.load %arg39[%c0_191, %c0_192] : memref<8x32xf32, #tpu.memory_space<vmem>>, vector<8x32xf32>
    %574 = arith.truncf %573 : vector<8x32xf32> to vector<8x32xbf16>
    %cst_193 = arith.constant dense<0.000000e+00> : vector<8x32xf32>
    %575 = tpu.matmul %574, %333, %cst_193 {dimension_numbers = #tpu.dot_dimension_numbers<[1], [0], [0], [1], [0, 0, 1, 1], [], []>} : vector<8x32xbf16>, vector<32x32xbf16>, vector<8x32xf32> -> vector<8x32xf32>
    %576 = vector.broadcast %334 : vector<1x32xf32> to vector<8x32xf32>
    %577 = arith.addf %575, %576 : vector<8x32xf32>
    %578 = arith.addf %321, %577 : vector<8x32xf32>
    %c0_194 = arith.constant 0 : index
    %c0_195 = arith.constant 0 : index
    %579 = vector.load %arg28[%c0_194, %c0_195] : memref<1x32xf32, #tpu.memory_space<vmem>>, vector<1x32xf32>
    %c0_196 = arith.constant 0 : index
    %c0_197 = arith.constant 0 : index
    %580 = vector.load %arg29[%c0_196, %c0_197] : memref<1x32xf32, #tpu.memory_space<vmem>>, vector<1x32xf32>
    %cst_198 = arith.constant dense<0.000000e+00> : vector<8xf32>
    %581 = vector.multi_reduction <add>, %578, %cst_198 [1] : vector<8x32xf32> to vector<8xf32>
    %582 = vector.shape_cast %581 : vector<8xf32> to vector<8x1xf32>
    %cst_199 = arith.constant 3.200000e+01 : f32
    %583 = vector.broadcast %cst_199 : f32 to vector<8x1xf32>
    %584 = arith.divf %582, %583 : vector<8x1xf32>
    %585 = vector.broadcast %584 : vector<8x1xf32> to vector<8x32xf32>
    %586 = arith.subf %578, %585 : vector<8x32xf32>
    %587 = arith.mulf %586, %586 : vector<8x32xf32>
    %cst_200 = arith.constant dense<0.000000e+00> : vector<8xf32>
    %588 = vector.multi_reduction <add>, %587, %cst_200 [1] : vector<8x32xf32> to vector<8xf32>
    %589 = vector.shape_cast %588 : vector<8xf32> to vector<8x1xf32>
    %cst_201 = arith.constant 3.200000e+01 : f32
    %590 = vector.broadcast %cst_201 : f32 to vector<8x1xf32>
    %591 = arith.divf %589, %590 : vector<8x1xf32>
    %592 = vector.broadcast %584 : vector<8x1xf32> to vector<8x32xf32>
    %593 = arith.subf %578, %592 : vector<8x32xf32>
    %cst_202 = arith.constant 9.99999974E-6 : f32
    %594 = vector.broadcast %cst_202 : f32 to vector<8x1xf32>
    %595 = arith.addf %591, %594 : vector<8x1xf32>
    %596 = math.rsqrt %595 : vector<8x1xf32>
    %597 = vector.broadcast %596 : vector<8x1xf32> to vector<8x32xf32>
    %598 = arith.mulf %593, %597 : vector<8x32xf32>
    %599 = vector.broadcast %579 : vector<1x32xf32> to vector<8x32xf32>
    %600 = arith.mulf %598, %599 : vector<8x32xf32>
    %601 = vector.broadcast %580 : vector<1x32xf32> to vector<8x32xf32>
    %602 = arith.addf %600, %601 : vector<8x32xf32>
    %c0_203 = arith.constant 0 : index
    %c0_204 = arith.constant 0 : index
    %603 = vector.load %arg30[%c0_203, %c0_204] : memref<32x64xbf16, #tpu.memory_space<vmem>>, vector<32x64xbf16>
    %604 = arith.truncf %602 : vector<8x32xf32> to vector<8x32xbf16>
    %cst_205 = arith.constant dense<0.000000e+00> : vector<8x64xf32>
    %605 = tpu.matmul %604, %603, %cst_205 {dimension_numbers = #tpu.dot_dimension_numbers<[1], [0], [0], [1], [0, 0, 1, 1], [], []>} : vector<8x32xbf16>, vector<32x64xbf16>, vector<8x64xf32> -> vector<8x64xf32>
    %c0_206 = arith.constant 0 : index
    %c0_207 = arith.constant 0 : index
    %606 = vector.load %arg31[%c0_206, %c0_207] : memref<1x64xf32, #tpu.memory_space<vmem>>, vector<1x64xf32>
    %607 = vector.broadcast %606 : vector<1x64xf32> to vector<8x64xf32>
    %608 = arith.addf %605, %607 : vector<8x64xf32>
    %cst_208 = arith.constant 0.000000e+00 : f32
    %609 = vector.broadcast %cst_208 : f32 to vector<8x64xf32>
    %610 = arith.maximumf %608, %609 : vector<8x64xf32>
    %c0_209 = arith.constant 0 : index
    %c0_210 = arith.constant 0 : index
    %611 = vector.load %arg32[%c0_209, %c0_210] : memref<64x32xbf16, #tpu.memory_space<vmem>>, vector<64x32xbf16>
    %612 = arith.truncf %610 : vector<8x64xf32> to vector<8x64xbf16>
    %cst_211 = arith.constant dense<0.000000e+00> : vector<8x32xf32>
    %613 = tpu.matmul %612, %611, %cst_211 {dimension_numbers = #tpu.dot_dimension_numbers<[1], [0], [0], [1], [0, 0, 1, 1], [], []>} : vector<8x64xbf16>, vector<64x32xbf16>, vector<8x32xf32> -> vector<8x32xf32>
    %614 = arith.addf %602, %613 : vector<8x32xf32>
    %c0_212 = arith.constant 0 : index
    %c0_213 = arith.constant 0 : index
    %615 = vector.load %arg33[%c0_212, %c0_213] : memref<1x32xf32, #tpu.memory_space<vmem>>, vector<1x32xf32>
    %616 = vector.broadcast %615 : vector<1x32xf32> to vector<8x32xf32>
    %617 = arith.addf %614, %616 : vector<8x32xf32>
    %c0_214 = arith.constant 0 : index
    %c0_215 = arith.constant 0 : index
    %618 = vector.load %arg34[%c0_214, %c0_215] : memref<1x32xf32, #tpu.memory_space<vmem>>, vector<1x32xf32>
    %c0_216 = arith.constant 0 : index
    %c0_217 = arith.constant 0 : index
    %619 = vector.load %arg35[%c0_216, %c0_217] : memref<1x32xf32, #tpu.memory_space<vmem>>, vector<1x32xf32>
    %cst_218 = arith.constant dense<0.000000e+00> : vector<8xf32>
    %620 = vector.multi_reduction <add>, %617, %cst_218 [1] : vector<8x32xf32> to vector<8xf32>
    %621 = vector.shape_cast %620 : vector<8xf32> to vector<8x1xf32>
    %cst_219 = arith.constant 3.200000e+01 : f32
    %622 = vector.broadcast %cst_219 : f32 to vector<8x1xf32>
    %623 = arith.divf %621, %622 : vector<8x1xf32>
    %624 = vector.broadcast %623 : vector<8x1xf32> to vector<8x32xf32>
    %625 = arith.subf %617, %624 : vector<8x32xf32>
    %626 = arith.mulf %625, %625 : vector<8x32xf32>
    %cst_220 = arith.constant dense<0.000000e+00> : vector<8xf32>
    %627 = vector.multi_reduction <add>, %626, %cst_220 [1] : vector<8x32xf32> to vector<8xf32>
    %628 = vector.shape_cast %627 : vector<8xf32> to vector<8x1xf32>
    %cst_221 = arith.constant 3.200000e+01 : f32
    %629 = vector.broadcast %cst_221 : f32 to vector<8x1xf32>
    %630 = arith.divf %628, %629 : vector<8x1xf32>
    %631 = vector.broadcast %623 : vector<8x1xf32> to vector<8x32xf32>
    %632 = arith.subf %617, %631 : vector<8x32xf32>
    %cst_222 = arith.constant 9.99999974E-6 : f32
    %633 = vector.broadcast %cst_222 : f32 to vector<8x1xf32>
    %634 = arith.addf %630, %633 : vector<8x1xf32>
    %635 = math.rsqrt %634 : vector<8x1xf32>
    %636 = vector.broadcast %635 : vector<8x1xf32> to vector<8x32xf32>
    %637 = arith.mulf %632, %636 : vector<8x32xf32>
    %638 = vector.broadcast %618 : vector<1x32xf32> to vector<8x32xf32>
    %639 = arith.mulf %637, %638 : vector<8x32xf32>
    %640 = vector.broadcast %619 : vector<1x32xf32> to vector<8x32xf32>
    %641 = arith.addf %639, %640 : vector<8x32xf32>
    %c0_223 = arith.constant 0 : index
    %c0_224 = arith.constant 0 : index
    %642 = vector.load %arg36[%c0_223, %c0_224] : memref<1x32xf32, #tpu.memory_space<vmem>>, vector<1x32xf32>
    %c0_225 = arith.constant 0 : index
    %c0_226 = arith.constant 0 : index
    %643 = vector.load %arg37[%c0_225, %c0_226] : memref<1x32xf32, #tpu.memory_space<vmem>>, vector<1x32xf32>
    %cst_227 = arith.constant dense<0.000000e+00> : vector<8xf32>
    %644 = vector.multi_reduction <add>, %641, %cst_227 [1] : vector<8x32xf32> to vector<8xf32>
    %645 = vector.shape_cast %644 : vector<8xf32> to vector<8x1xf32>
    %cst_228 = arith.constant 3.200000e+01 : f32
    %646 = vector.broadcast %cst_228 : f32 to vector<8x1xf32>
    %647 = arith.divf %645, %646 : vector<8x1xf32>
    %648 = vector.broadcast %647 : vector<8x1xf32> to vector<8x32xf32>
    %649 = arith.subf %641, %648 : vector<8x32xf32>
    %650 = arith.mulf %649, %649 : vector<8x32xf32>
    %cst_229 = arith.constant dense<0.000000e+00> : vector<8xf32>
    %651 = vector.multi_reduction <add>, %650, %cst_229 [1] : vector<8x32xf32> to vector<8xf32>
    %652 = vector.shape_cast %651 : vector<8xf32> to vector<8x1xf32>
    %cst_230 = arith.constant 3.200000e+01 : f32
    %653 = vector.broadcast %cst_230 : f32 to vector<8x1xf32>
    %654 = arith.divf %652, %653 : vector<8x1xf32>
    %655 = vector.broadcast %647 : vector<8x1xf32> to vector<8x32xf32>
    %656 = arith.subf %641, %655 : vector<8x32xf32>
    %cst_231 = arith.constant 9.99999974E-6 : f32
    %657 = vector.broadcast %cst_231 : f32 to vector<8x1xf32>
    %658 = arith.addf %654, %657 : vector<8x1xf32>
    %659 = math.rsqrt %658 : vector<8x1xf32>
    %660 = vector.broadcast %659 : vector<8x1xf32> to vector<8x32xf32>
    %661 = arith.mulf %656, %660 : vector<8x32xf32>
    %662 = vector.broadcast %642 : vector<1x32xf32> to vector<8x32xf32>
    %663 = arith.mulf %661, %662 : vector<8x32xf32>
    %664 = vector.broadcast %643 : vector<1x32xf32> to vector<8x32xf32>
    %665 = arith.addf %663, %664 : vector<8x32xf32>
    %c0_232 = arith.constant 0 : index
    %c0_233 = arith.constant 0 : index
    %666 = vector.load %arg38[%c0_232, %c0_233] : memref<8x32xf32, #tpu.memory_space<vmem>>, vector<8x32xf32>
    tpu.vector_store %arg38[%c0_232, %c0_233], %665 {strides = array<i32>} : memref<8x32xf32, #tpu.memory_space<vmem>>, vector<8x32xf32>,
    return
  }
  func.func @transform_0(%arg0: i32) -> (i32, i32) {
    %c0_i32 = arith.constant 0 : i32
    %c0_i32_0 = arith.constant 0 : i32
    return %arg0, %c0_i32 : i32, i32
  }
  func.func @transform_1(%arg0: i32) -> (i32, i32) {
    %c0_i32 = arith.constant 0 : i32
    %c0_i32_0 = arith.constant 0 : i32
    return %arg0, %c0_i32 : i32, i32
  }
  func.func @transform_2(%arg0: i32) -> (i32, i32) {
    %c0_i32 = arith.constant 0 : i32
    %c0_i32_0 = arith.constant 0 : i32
    return %arg0, %c0_i32 : i32, i32
  }
  func.func @transform_3(%arg0: i32) -> (i32, i32) {
    %c0_i32 = arith.constant 0 : i32
    %c0_i32_0 = arith.constant 0 : i32
    %c0_i32_1 = arith.constant 0 : i32
    return %c0_i32, %c0_i32_0 : i32, i32
  }
  func.func @transform_4(%arg0: i32) -> (i32, i32) {
    %c0_i32 = arith.constant 0 : i32
    %c0_i32_0 = arith.constant 0 : i32
    %c0_i32_1 = arith.constant 0 : i32
    return %c0_i32, %c0_i32_0 : i32, i32
  }
  func.func @transform_5(%arg0: i32) -> (i32, i32) {
    %c0_i32 = arith.constant 0 : i32
    %c0_i32_0 = arith.constant 0 : i32
    %c0_i32_1 = arith.constant 0 : i32
    return %c0_i32, %c0_i32_0 : i32, i32
  }
  func.func @transform_6(%arg0: i32) -> (i32, i32) {
    %c0_i32 = arith.constant 0 : i32
    %c0_i32_0 = arith.constant 0 : i32
    %c0_i32_1 = arith.constant 0 : i32
    return %c0_i32, %c0_i32_0 : i32, i32
  }
  func.func @transform_7(%arg0: i32) -> (i32, i32) {
    %c0_i32 = arith.constant 0 : i32
    %c0_i32_0 = arith.constant 0 : i32
    %c0_i32_1 = arith.constant 0 : i32
    return %c0_i32, %c0_i32_0 : i32, i32
  }
  func.func @transform_8(%arg0: i32) -> (i32, i32) {
    %c0_i32 = arith.constant 0 : i32
    %c0_i32_0 = arith.constant 0 : i32
    %c0_i32_1 = arith.constant 0 : i32
    return %c0_i32, %c0_i32_0 : i32, i32
  }
  func.func @transform_9(%arg0: i32) -> (i32, i32) {
    %c0_i32 = arith.constant 0 : i32
    %c0_i32_0 = arith.constant 0 : i32
    %c0_i32_1 = arith.constant 0 : i32
    return %c0_i32, %c0_i32_0 : i32, i32
  }
  func.func @transform_10(%arg0: i32) -> (i32, i32) {
    %c0_i32 = arith.constant 0 : i32
    %c0_i32_0 = arith.constant 0 : i32
    %c0_i32_1 = arith.constant 0 : i32
    return %c0_i32, %c0_i32_0 : i32, i32
  }
  func.func @transform_11(%arg0: i32) -> (i32, i32) {
    %c0_i32 = arith.constant 0 : i32
    %c0_i32_0 = arith.constant 0 : i32
    %c0_i32_1 = arith.constant 0 : i32
    return %c0_i32, %c0_i32_0 : i32, i32
  }
  func.func @transform_12(%arg0: i32) -> (i32, i32) {
    %c0_i32 = arith.constant 0 : i32
    %c0_i32_0 = arith.constant 0 : i32
    %c0_i32_1 = arith.constant 0 : i32
    return %c0_i32, %c0_i32_0 : i32, i32
  }
  func.func @transform_13(%arg0: i32) -> (i32, i32) {
    %c0_i32 = arith.constant 0 : i32
    %c0_i32_0 = arith.constant 0 : i32
    %c0_i32_1 = arith.constant 0 : i32
    return %c0_i32, %c0_i32_0 : i32, i32
  }
  func.func @transform_14(%arg0: i32) -> (i32, i32) {
    %c0_i32 = arith.constant 0 : i32
    %c0_i32_0 = arith.constant 0 : i32
    %c0_i32_1 = arith.constant 0 : i32
    return %c0_i32, %c0_i32_0 : i32, i32
  }
  func.func @transform_15(%arg0: i32) -> (i32, i32) {
    %c0_i32 = arith.constant 0 : i32
    %c0_i32_0 = arith.constant 0 : i32
    %c0_i32_1 = arith.constant 0 : i32
    return %c0_i32, %c0_i32_0 : i32, i32
  }
  func.func @transform_16(%arg0: i32) -> (i32, i32) {
    %c0_i32 = arith.constant 0 : i32
    %c0_i32_0 = arith.constant 0 : i32
    %c0_i32_1 = arith.constant 0 : i32
    return %c0_i32, %c0_i32_0 : i32, i32
  }
  func.func @transform_17(%arg0: i32) -> (i32, i32) {
    %c0_i32 = arith.constant 0 : i32
    %c0_i32_0 = arith.constant 0 : i32
    %c0_i32_1 = arith.constant 0 : i32
    return %c0_i32, %c0_i32_0 : i32, i32
  }
  func.func @transform_18(%arg0: i32) -> (i32, i32) {
    %c0_i32 = arith.constant 0 : i32
    %c0_i32_0 = arith.constant 0 : i32
    %c0_i32_1 = arith.constant 0 : i32
    return %c0_i32, %c0_i32_0 : i32, i32
  }
  func.func @transform_19(%arg0: i32) -> (i32, i32) {
    %c0_i32 = arith.constant 0 : i32
    %c0_i32_0 = arith.constant 0 : i32
    %c0_i32_1 = arith.constant 0 : i32
    return %c0_i32, %c0_i32_0 : i32, i32
  }
  func.func @transform_20(%arg0: i32) -> (i32, i32) {
    %c0_i32 = arith.constant 0 : i32
    %c0_i32_0 = arith.constant 0 : i32
    %c0_i32_1 = arith.constant 0 : i32
    return %c0_i32, %c0_i32_0 : i32, i32
  }
  func.func @transform_21(%arg0: i32) -> (i32, i32) {
    %c0_i32 = arith.constant 0 : i32
    %c0_i32_0 = arith.constant 0 : i32
    %c0_i32_1 = arith.constant 0 : i32
    return %c0_i32, %c0_i32_0 : i32, i32
  }
  func.func @transform_22(%arg0: i32) -> (i32, i32) {
    %c0_i32 = arith.constant 0 : i32
    %c0_i32_0 = arith.constant 0 : i32
    %c0_i32_1 = arith.constant 0 : i32
    return %c0_i32, %c0_i32_0 : i32, i32
  }
  func.func @transform_23(%arg0: i32) -> (i32, i32) {
    %c0_i32 = arith.constant 0 : i32
    %c0_i32_0 = arith.constant 0 : i32
    %c0_i32_1 = arith.constant 0 : i32
    return %c0_i32, %c0_i32_0 : i32, i32
  }
  func.func @transform_24(%arg0: i32) -> (i32, i32) {
    %c0_i32 = arith.constant 0 : i32
    %c0_i32_0 = arith.constant 0 : i32
    %c0_i32_1 = arith.constant 0 : i32
    return %c0_i32, %c0_i32_0 : i32, i32
  }
  func.func @transform_25(%arg0: i32) -> (i32, i32) {
    %c0_i32 = arith.constant 0 : i32
    %c0_i32_0 = arith.constant 0 : i32
    %c0_i32_1 = arith.constant 0 : i32
    return %c0_i32, %c0_i32_0 : i32, i32
  }
  func.func @transform_26(%arg0: i32) -> (i32, i32) {
    %c0_i32 = arith.constant 0 : i32
    %c0_i32_0 = arith.constant 0 : i32
    %c0_i32_1 = arith.constant 0 : i32
    return %c0_i32, %c0_i32_0 : i32, i32
  }
  func.func @transform_27(%arg0: i32) -> (i32, i32) {
    %c0_i32 = arith.constant 0 : i32
    %c0_i32_0 = arith.constant 0 : i32
    %c0_i32_1 = arith.constant 0 : i32
    return %c0_i32, %c0_i32_0 : i32, i32
  }
  func.func @transform_28(%arg0: i32) -> (i32, i32) {
    %c0_i32 = arith.constant 0 : i32
    %c0_i32_0 = arith.constant 0 : i32
    %c0_i32_1 = arith.constant 0 : i32
    return %c0_i32, %c0_i32_0 : i32, i32
  }
  func.func @transform_29(%arg0: i32) -> (i32, i32) {
    %c0_i32 = arith.constant 0 : i32
    %c0_i32_0 = arith.constant 0 : i32
    %c0_i32_1 = arith.constant 0 : i32
    return %c0_i32, %c0_i32_0 : i32, i32
  }
  func.func @transform_30(%arg0: i32) -> (i32, i32) {
    %c0_i32 = arith.constant 0 : i32
    %c0_i32_0 = arith.constant 0 : i32
    %c0_i32_1 = arith.constant 0 : i32
    return %c0_i32, %c0_i32_0 : i32, i32
  }
  func.func @transform_31(%arg0: i32) -> (i32, i32) {
    %c0_i32 = arith.constant 0 : i32
    %c0_i32_0 = arith.constant 0 : i32
    %c0_i32_1 = arith.constant 0 : i32
    return %c0_i32, %c0_i32_0 : i32, i32
  }
  func.func @transform_32(%arg0: i32) -> (i32, i32) {
    %c0_i32 = arith.constant 0 : i32
    %c0_i32_0 = arith.constant 0 : i32
    %c0_i32_1 = arith.constant 0 : i32
    return %c0_i32, %c0_i32_0 : i32, i32
  }
  func.func @transform_33(%arg0: i32) -> (i32, i32) {
    %c0_i32 = arith.constant 0 : i32
    %c0_i32_0 = arith.constant 0 : i32
    %c0_i32_1 = arith.constant 0 : i32
    return %c0_i32, %c0_i32_0 : i32, i32
  }
  func.func @transform_34(%arg0: i32) -> (i32, i32) {
    %c0_i32 = arith.constant 0 : i32
    %c0_i32_0 = arith.constant 0 : i32
    %c0_i32_1 = arith.constant 0 : i32
    return %c0_i32, %c0_i32_0 : i32, i32
  }
  func.func @transform_35(%arg0: i32) -> (i32, i32) {
    %c0_i32 = arith.constant 0 : i32
    %c0_i32_0 = arith.constant 0 : i32
    %c0_i32_1 = arith.constant 0 : i32
    return %c0_i32, %c0_i32_0 : i32, i32
  }
  func.func @transform_36(%arg0: i32) -> (i32, i32) {
    %c0_i32 = arith.constant 0 : i32
    %c0_i32_0 = arith.constant 0 : i32
    %c0_i32_1 = arith.constant 0 : i32
    return %c0_i32, %c0_i32_0 : i32, i32
  }
  func.func @transform_37(%arg0: i32) -> (i32, i32) {
    %c0_i32 = arith.constant 0 : i32
    %c0_i32_0 = arith.constant 0 : i32
    return %arg0, %c0_i32 : i32, i32
  }
}

</mosaic_0001>

<bundles_post_ra>
// kernel: transformer_forward.3
= control target key start
LH: loop header
LB: loop body
LE: loop exit
PB: predicated region body
PF: predicated region fallthrough
CT: control target
= control target key end

     0   :  { %s3888_s6 = smov 1   ;;  %s3889_s10 = smov 2   ;;  %s4921_s0 = inlined_call_operand.smem [shape: u32[38], index: -1, kind: input, shape index: {}] }
   0x1   :  { %s3942_s5 = sld [smem:[%s4921_s0]]   ;;  %s3890_s14 = smov 3  }
   0x2   :  { %s3947_s9 = sld [smem:[%s4921_s0 + %s3888_s6]]   ;;  %s3891_s18 = smov 4  }
   0x3   :  { %s3952_s13 = sld [smem:[%s4921_s0 + %s3889_s10]]   ;;  %s3892_s22 = smov 5  }
   0x4   :  { %s3957_s17 = sld [smem:[%s4921_s0 + %s3890_s14]]   ;;  %s3893_s26 = smov 6  }
   0x5   :  { %s3962_s21 = sld [smem:[%s4921_s0 + %s3891_s18]]   ;;  %s3894_s30 = smov 7  }
   0x6   :  { %s3967_s25 = sld [smem:[%s4921_s0 + %s3892_s22]]   ;;  %s3895_s4 = smov 8  }
   0x7   :  { %4942 = sst [smem:[#allocation9_spill]] %s3942_s5  ;;  %s3896_s10 = smov 9  }
   0x8   :  { %s3972_s29 = sld [smem:[%s4921_s0 + %s3893_s26]]   ;;  %s3897_s15 = smov 10  }
   0x9   :  { %s3977_s3 = sld [smem:[%s4921_s0 + %s3894_s30]]   ;;  %s3898_s20 = smov 11  }
   0xa   :  { %s3982_s8 = sld [smem:[%s4921_s0 + %s3895_s4]]   ;;  %s3899_s26 = smov 12  }
   0xb   :  { %s3987_s14 = sld [smem:[%s4921_s0 + %s3896_s10]]   ;;  %s3900_s1 = smov 13  }
   0xc   :  { %s3992_s19 = sld [smem:[%s4921_s0 + %s3897_s15]]   ;;  %s3901_s7 = smov 14  }
   0xd   :  { %s3997_s24 = sld [smem:[%s4921_s0 + %s3898_s20]]   ;;  %s3902_s15 = smov 15  }
   0xe   :  { %s4002_s30 = sld [smem:[%s4921_s0 + %s3899_s26]]   ;;  %s3903_s22 = smov 16  }
   0xf   :  { %4943 = sst [smem:[#allocation10_spill]] %s3977_s3  ;;  %s3904_s28 = smov 17  }
  0x10   :  { %s4007_s6 = sld [smem:[%s4921_s0 + %s3900_s1]]  }
  0x11   :  { %s4012_s12 = sld [smem:[%s4921_s0 + %s3901_s7]]   ;;  %s3905_s7 = smov 18  }
  0x12   :  { %s4017_s20 = sld [smem:[%s4921_s0 + %s3902_s15]]   ;;  %s3906_s15 = smov 19  }
  0x13   :  { %s4022_s27 = sld [smem:[%s4921_s0 + %s3903_s22]]   ;;  %s3907_s22 = smov 20  }
  0x14   :  { %4944 = sst [smem:[#allocation11_spill]] %s4002_s30 }
  0x15   :  { %s4027_s4 = sld [smem:[%s4921_s0 + %s3904_s28]]   ;;  %s3908_s28 = smov 21  }
  0x16   :  { %4945 = sst [smem:[#allocation12_spill]] %s4007_s6 }
  0x17   :  { %4946 = sst [smem:[#allocation13_spill]] %s4012_s12 }
  0x18   :  { %s4032_s12 = sld [smem:[%s4921_s0 + %s3905_s7]]   ;;  %s3909_s7 = smov 22  }
  0x19   :  { %4947 = sst [smem:[#allocation14_spill]] %s4022_s27 }
  0x1a   :  { %s4037_s30 = sld [smem:[%s4921_s0 + %s3906_s15]]   ;;  %s3910_s15 = smov 23  }
  0x1b   :  { %4948 = sst [smem:[#allocation15_spill]] %s4027_s4 }
  0x1c   :  { %s4042_s27 = sld [smem:[%s4921_s0 + %s3907_s22]]   ;;  %s3911_s22 = smov 24  }
  0x1d   :  { %s4047_s4 = sld [smem:[%s4921_s0 + %s3908_s28]]   ;;  %s3912_s28 = smov 25  }
  0x1e   :  { %4949 = sst [smem:[#allocation16_spill]] %s4032_s12 }
  0x1f   :  { %s4052_s12 = sld [smem:[%s4921_s0 + %s3909_s7]]   ;;  %s3913_s7 = smov 26  }
  0x20   :  { %4950 = sst [smem:[#allocation17_spill]] %s4037_s30 }
  0x21   :  { %s4057_s30 = sld [smem:[%s4921_s0 + %s3910_s15]]   ;;  %s3914_s15 = smov 27  }
  0x22   :  { %4951 = sst [smem:[#allocation18_spill]] %s4042_s27 }
  0x23   :  { %4952 = sst [smem:[#allocation19_spill]] %s4047_s4 }
  0x24   :  { %s4062_s27 = sld [smem:[%s4921_s0 + %s3911_s22]]   ;;  %s3915_s22 = smov 28  }
  0x25   :  { %4953 = sst [smem:[#allocation20_spill]] %s4052_s12 }
  0x26   :  { %s4067_s4 = sld [smem:[%s4921_s0 + %s3912_s28]]   ;;  %s3916_s28 = smov 29  }
  0x27   :  { %4954 = sst [smem:[#allocation21_spill]] %s4057_s30 }
  0x28   :  { %s4072_s12 = sld [smem:[%s4921_s0 + %s3913_s7]]   ;;  %s3917_s7 = smov 30  }
  0x29   :  { %s4077_s30 = sld [smem:[%s4921_s0 + %s3914_s15]]   ;;  %s3918_s15 = smov 31  }
  0x2a   :  { %4955 = sst [smem:[#allocation22_spill]] %s4062_s27 }
  0x2b   :  { %s4082_s27 = sld [smem:[%s4921_s0 + %s3915_s22]]   ;;  %s3919_s22 = smov 32  }
  0x2c   :  { %4956 = sst [smem:[#allocation23_spill]] %s4067_s4 }
  0x2d   :  { %s4087_s4 = sld [smem:[%s4921_s0 + %s3916_s28]]   ;;  %s3920_s28 = smov 33  }
  0x2e   :  { %4957 = sst [smem:[#allocation24_spill]] %s4072_s12 }
  0x2f   :  { %4958 = sst [smem:[#allocation25_spill]] %s4077_s30 }
  0x30   :  { %s4092_s12 = sld [smem:[%s4921_s0 + %s3917_s7]]   ;;  %s3921_s7 = smov 34  }
  0x31   :  { %4959 = sst [smem:[#allocation26_spill]] %s4082_s27 }
  0x32   :  { %s4097_s30 = sld [smem:[%s4921_s0 + %s3918_s15]]   ;;  %s3922_s15 = smov 35  }
  0x33   :  { %4960 = sst [smem:[#allocation27_spill]] %s4087_s4 }
  0x34   :  { %s4102_s27 = sld [smem:[%s4921_s0 + %s3919_s22]]   ;;  %s3923_s22 = smov 36  }
  0x35   :  { %s4107_s4 = sld [smem:[%s4921_s0 + %s3920_s28]]   ;;  %s3924_s28 = smov 37  }
  0x36   :  { %4961 = sst [smem:[#allocation28_spill]] %s4092_s12 }
  0x37   :  { %s4112_s12 = sld [smem:[%s4921_s0 + %s3921_s7]]  }
  0x38   :  { %4962 = sst [smem:[#allocation29_spill]] %s4097_s30 }
  0x39   :  { %s4117_s30 = sld [smem:[%s4921_s0 + %s3922_s15]]  }
  0x3a   :  { %4963 = sst [smem:[#allocation30_spill]] %s4102_s27 }
  0x3b   :  { %4964 = sst [smem:[#allocation31_spill]] %s4107_s4 }
  0x3c   :  { %s4122_s27 = sld [smem:[%s4921_s0 + %s3923_s22]]  }
  0x3d   :  { %s4127_s4 = sld [smem:[%s4921_s0 + %s3924_s28]]  }
  0x3f   :  { %4965 = sst [smem:[#allocation32_spill]] %s4117_s30 }
  0x42   :  { %4966 = sst [smem:[#allocation33_spill]] %s4122_s27 }
  0x43   :  { %4967 = sst [smem:[#allocation34_spill]] %s4127_s4 }
  0x44   :  { %80 = vsyncpa [#allocation4], 0 }
  0x45   :  { %82 = vsyncpa [#allocation4 + $0x1], 0 }
  0x46   :  { %83 = vsyncpa [#allocation5], 0 }
  0x47   :  { %85 = vsyncpa [#allocation5 + $0x1], 0  ;;  %s4129_s7 = smov 0   ;;  %s4131_s10 = smov 0  }
  0x48   :  { %s4133_s11 = smov 0   ;;  %s4135_s15 = smov 0  }
  0x49 LB: > { %s4968_s6 = sld [smem:[#allocation12_spill]]  ;;  %s4150_s0 = sadd.s32 4294967295, %s3886_s15   ;;  %s3878_s10 = sphi %s4131_s10, %s5018_s10   ;;  %s3874_s7 = sphi %s4129_s7, %s5017_s7   ;;  %s3886_s15 = sphi %s4135_s15, %s5014_s15   ;;  %s3882_s11 = sphi %s4133_s11, %s5016_s11  }
  0x4a   : > { %s4969_s3 = sld [smem:[#allocation10_spill]]  ;;  %s3370_s16 = sadd.s32 4294967294, %s3886_s15  }
  0x4b   : > { %4970 = sst [smem:[#allocation35_spill]] %s3874_s7  ;;  %s4154_s18 = sadd.s32 1, %s3886_s15  }
  0x4c   : > { %4971 = sst [smem:[#allocation36_spill]] %s3882_s11  ;;  %s150_s22 = sadd.s32 1, %s3882_s11 }
  0x4d   : > { %4972 = sst [smem:[#allocation37_spill]] %s4154_s18  ;;  %s147_s23 = ssub.s32 %s3886_s15, %s4154_s18 }
  0x4e   : > { %p157_p0 = scmp.ne.s32.totalorder %s3882_s11, %s3878_s10  ;;  %p148_p1 = scmp.eq.s32.totalorder %s147_s23, 0 }
  0x4f   : > { %p158_p2 = scmp.eq.s32.totalorder %s3886_s15, 0  ;;  %p163_p3 = scmp.ne.s32.totalorder %s3878_s10, %s3874_s7 }
  0x50   : > { %p164_p4 = scmp.eq.s32.totalorder %s4150_s0, 0  ;;  %p901_p7 = scmp.eq.s32.totalorder %s4150_s0, 1 }
  0x51   : > { %s4166_s26 = scalar_select %p148_p1, %s3882_s11, %s150_s22  }
  0x52   : > { %p4168_p5 = por %p158_p2, %p157_p0  ;;  %p4172_p6 = por %p164_p4, %p163_p3 }
  0x53   : > { %4973 = sst [smem:[#allocation38_spill]] %s4166_s26  ;;  %p907_p8 = scmp.eq.s32.totalorder %s3370_s16, 1 }
  0x54   : > { %p3595_p10 = scmp.lt.s32.totalorder %s3886_s15, 2  ;;  %p4179_p11 = por %p901_p7, %p157_p0 }
  0x55   : > { %p4183_p12 = por %p907_p8, %p163_p3  ;;  %s1045_s23 = sand.u32 1, %s3882_s11  }
  0x56   : > { %s4976_s2 = scalar_select %p4179_p11, 1, 0 }
  0x57   : > { %s4978_s22 = scalar_select %p4183_p12, 1, 0 }
  0x58   : > { %4977 = sst [smem:[#allocation39_spill]] %s4976_s2  ;;  %s3554_s26 = sshll.u32 %s3886_s15, 6 }
  0x59   : > { %4979 = sst [smem:[#allocation40_spill]] %s4978_s22  ;;  %s3373_s18 = sshll.u32 %s1045_s23, 6 }
  0x5a   : > { %s1054_s7 = scalar_lea.hbm %s3952_s13, %s3554_s26  ;;  %s1049_s4 = scalar_lea.vmem [#allocation3], %s3373_s18 }
  0x5b   : > { %s1055_s27 = sshll.u32 %s1054_s7, 4  ;;  %s1057_s16 = sshll.u32 %s1049_s4, 4  ;;  %s1056_s27 = int_to_ptr.hbm [resolvable:$true] %s1055_s27  ;;  %s1058_s16 = int_to_ptr.vmem [resolvable:$true] %s1057_s16 }
  0x5c   : > { %p4192_p13 = pnand %p3595_p10, %p4168_p5  ;;  %p3376_p0 = scmp.ge.s32.totalorder %s3886_s15, 1 }
  0x5d   : > { %p1065_p1 = scmp.lt.s32.totalorder %s3886_s15, 3  ;;  %s1046_s22 = scalar_lea.sflag [#allocation4], %s1045_s23 }
  0x5e   : > { %s3790_s11 = sshra.s32 %s1056_s27, 4  ;;  %p3794_p3 = pneg %p4192_p13  ;;  %s3791_s11 = int_to_ptr.hbm [resolvable:$true] %s3790_s11 }
  0x5f   : > { %s3792_s2 = scalar_lea.hbm %s3791_s11, 64  ;;  %s3797_s4 = scalar_lea.hbm %s3952_s13, 128 }
  0x60   : > { %p3793_p2 = scmp.ne.s32.totalorder %s3791_s11, %s3792_s2  ;;  %p3798_p8 = scmp.lt.s32.totalorder %s3791_s11, %s3952_s13 }
  0x61   : > { %p3799_p9 = scmp.lt.s32.totalorder %s3797_s4, %s3792_s2 }
  0x62   : > { %p3795_p4 = pnand %p3794_p3, %p3793_p2 }
  0x63   : > { %p3800_p12 = por %p3799_p9, %p3798_p8 }
  0x64   : > { %p3796_p7 = pneg %p3795_p4 }
  0x66   : > { %p3801_p5 = pnand %p3800_p12, %p3796_p7 }
  0x68   : > { %3804 = shalt.err (!%p3801_p5)
}
  0x69   : > { %s3925_s7 = smov 128   ;;  %s3926_s18 = smov 8  }
  0x6a   : > { %3590 = dma.hbm_to_vmem [thread:$0]  (!%p4192_p13), %s1056_s27, 1024, %s1058_s16, %s1046_s22, %s3925_s7, %s3925_s7, %s3926_s18  }
  0x6b   : > { %p1066_p10 = pnand %p3376_p0, %p1065_p1 }
  0x6c   : > { %s4209_s26 = sand.u32 (!%p1066_p10), 1, %s3878_s10  }
  0x6d   : > { %1069 = sbr.rel (%p1066_p10) target bundleno = 4540 (0x11bc), region = 168  ;;  %s3377_s11 = sshll.u32 (!%p1066_p10), %s4209_s26, 6 }
  0x6e   : > { %s1072_s28 = scalar_lea.sflag (!%p1066_p10), [#allocation4], %s4209_s26  ;;  %s4213_s2 = scalar_lea.vmem (!%p1066_p10), [#allocation3], %s3377_s11 }
  0x72   : > { %3865 = dma.done.wait (%p4172_p6), %s1072_s28, 1024  }
  0x73   : > { %3867 = vsyncadd (%p4172_p6), %s1072_s28, 4294966272  ;;  %s4981_s5 = sld [smem:[#allocation9_spill]]  ;;  %s4220_s30 = sshll.u32 %s4150_s0, 3  ;;  %v4230_v0 = vld [vmem:[%s3967_s25 + $0x8] sm:$0xff]  ;;  %v1248_v4 = vld [vmem:[%s4213_s2 + $0x8] sm:$0xff]  ;;  %vm1211_vm0 = vcmask 261120  }
  0x74   : > { %p1176_p9 = scmp.lt.s32.totalorder %s4150_s0, 1  ;;  %p1181_p12 = scmp.lt.s32.totalorder %s4220_s30, 15  ;;  %v1247_v3 = vld [vmem:[%s4213_s2] sm:$0xff]  ;;  %1284 = vmatpush.bf16.msra.mxu1 %v4230_v0  ;;  %v4245_v5 = vld [vmem:[%s3967_s25] sm:$0xff]  ;;  %v1249_v15 = vld [vmem:[%s4213_s2 + $0x10] sm:$0xff]  ;;  %vm1342_vm1 = vcmask 64512  }
  0x75   : > { %v3556_v8 = vld [vmem:[%s3957_s17 + $0x8] sm:$0xff]  ;;  %v3555_v9 = vld [vmem:[%s3957_s17] sm:$0xff]  ;;  %s3928_s4 = smov 120   ;;  %s3929_s7 = smov 104   ;;  %v1607_v59 = vld [vmem:[%s4213_s2 + $0x28] sm:$0xff] }
  0x76   : > { %s5020_s0 = smov (!%p1176_p9, %s4150_s0), 1  ;;  %1221 = vmatpush.bf16.msra.mxu0 %v3556_v8  ;;  %v1250_v16 = vld [vmem:[%s4213_s2 + $0x18] sm:$0xff]  ;;  %v4287_v38 = vld [vmem:[%s4969_s3 + $0x8] sm:$0xff]  ;;  %s4937_s18 = smov 8  }
  0x77   : > { %s1182_s27 = scalar_select %p1181_p12, %s4220_s30, 15  ;;  %v3676_v20 = vld [vmem:[%s3962_s21] ss:$0 sm:$0xff]  ;;  %1326 = vmatpush.bf16.msra.mxu2 %v4287_v38  ;;  %v1606_v58 = vld [vmem:[%s4213_s2 + $0x20] sm:$0xff] }
  0x78   : > { %s3379_s22 = sshll.u32 %s5020_s0, 3  ;;  %1285 = vmatpush.bf16.msra.mxu1 %v4245_v5  ;;  %v4262_v24 = vld [vmem:[%s3972_s29] ss:$0 sm:$0xff]  ;;  %s3927_s0 = smov 112  }
  0x79   : > { %s3381_s1 = sshll.u32 %s1182_s27, 3  ;;  %s4241_s16 = scalar_lea.vmem %s4981_s5, %s3379_s22  ;;  %v4291_v39 = vld [vmem:[%s4969_s3] sm:$0xff] }
  0x7a   : > { %s4227_s23 = scalar_lea.vmem %s3947_s9, %s3381_s1  ;;  %v1188_v10 = vld [vmem:[%s4241_s16] sm:$0xff]  ;;  %1222 = vmatpush.bf16.msra.mxu0 %v3555_v9  ;;  %s3931_s11 = smov 16  }
  0x7b   : > { %v4233_v1 = vld [vmem:[%s4227_s23] sm:$0xff]  ;;  %v4236_v2 = vld [vmem:[%s4227_s23 + $0x8] sm:$0xff]  ;;  %v1194_v12 = vpack.c.bf16 %v1188_v10, %v1188_v10  ;;  %v1245_v13 = vld [vmem:[%s4227_s23 + $0x10] sm:$0xff]  ;;  %1327 = vmatpush.bf16.msra.mxu2 %v4291_v39  ;;  %s4936_s28 = smov 24   ;;  %s4982_s27 = sld [smem:[#allocation11_spill]] }
  0x7c   : > { %v1251_v6 = vadd.f32 %v1247_v3, %v4233_v1  ;;  %v1252_v7 = vadd.f32 %v1248_v4, %v4236_v2  ;;  %v1246_v14 = vld [vmem:[%s4227_s23 + $0x18] sm:$0xff]  ;;  %v1253_v17 = vadd.f32 %v1249_v15, %v1245_v13  ;;  %v1297_v40 = vpack.c.bf16 %v4236_v2, %v4233_v1  ;;  %v4315_v56 = vld [vmem:[%s4227_s23 + $0x20] sm:$0xff]  ;;  %v4318_v57 = vld [vmem:[%s4227_s23 + $0x28] sm:$0xff]  ;;  %s4983_s1 = sld [smem:[#allocation13_spill]]  ;;  %s3224_s5 = scalar_lea.sflag [#allocation5], %s4209_s26 }
  0x7d   : > { %3390 = vmatmul.msk.bf16.vlgmr.msra.gmra.mxu0 %vm1211_vm0, %v1194_v12  ;;  %v1254_v18 = vadd.f32 %v1250_v16, %v1246_v14  ;;  %v1298_v41 = vpack.c.bf16 %v1246_v14, %v1245_v13  ;;  %v1610_v60 = vadd.f32 %v1606_v58, %v4315_v56  ;;  %v1611_v61 = vadd.f32 %v1607_v59, %v4318_v57  ;;  %v4332_v1 = vld [vmem:[%s4227_s23 + $0x30] sm:$0xff]  ;;  %v4335_v2 = vld [vmem:[%s4227_s23 + $0x38] sm:$0xff]  ;;  %v1609_v4 = vld [vmem:[%s4213_s2 + $0x38] sm:$0xff]  ;;  %s4984_s22 = sld [smem:[#allocation14_spill]] }
  0x7e   : > { %v1255_v11 = vpack.c.bf16 %v1252_v7, %v1251_v6  ;;  %3409 = vmatmul.msk.bf16.vlgmr.msra.gmra.mxu2 %vm1211_vm0, %v1297_v40  ;;  %v1608_v3 = vld [vmem:[%s4213_s2 + $0x30] sm:$0xff]  ;;  %v1613_v7 = vadd.f32 %v1609_v4, %v4335_v2  ;;  %v4343_v12 = vld [vmem:[%s3982_s8] ss:$0 sm:$0xff] }
  0x7f   : > { %v1256_v19 = vpack.c.bf16 %v1254_v18, %v1253_v17  ;;  %v1614_v62 = vpack.c.bf16 %v1611_v61, %v1610_v60  ;;  %v1612_v6 = vadd.f32 %v1608_v3, %v4332_v1  ;;  %v1642_v3 = vpack.c.bf16 %v4335_v2, %v4332_v1 }
  0x80   : > { %3399 = vmatmul.msk.bf16.vlgmr.msra.gmra.mxu1 %vm1211_vm0, %v1255_v11 }
  0x81   : > { %v1615_v8 = vpack.c.bf16 %v1613_v7, %v1612_v6 }
  0x8e   : > { %3410 = vmatmul.msk.bf16.gmra.mxu2 %vm1211_vm0, %v1298_v41 }
  0x90   : > { %3400 = vmatmul.msk.bf16.gmra.mxu1 %vm1211_vm0, %v1256_v19 }
  0xfa   : > { %v1224_v22 = vpop.f32.mrf.mxu0 }
  0xfb   : > { %v1225_v23 = vadd.f32 %v3676_v20, %v1224_v22 }
  0xfd   : > { %v1287_v21 = vpop.f32.mrf.mxu1  ;;  %v4264_v25 = vpack.c.bf16 %v1225_v23, %v1225_v23 }
  0xfe   : > { %v1288_v27 = vadd.f32 %v4262_v24, %v1287_v21 }
  0xff   : > { %1470 = vrot.lane.b32.xlu1 %v4264_v25, %s3927_s0 }
 0x101   : > { %v1329_v9 = vpop.f32.mrf.mxu2 }
 0x102   : > { %v1226_v29 = vpop.f32.mrf.mxu0  ;;  %v1330_v15 = vadd.f32 %v4343_v12, %v1329_v9 }
 0x105   : > { %v1289_v26 = vpop.f32.mrf.mxu1 }
 0x106   : > { %v1290_v28 = vadd.f32 %v4262_v24, %v1289_v26 }
 0x108   : > { %v1340_v30 = vpack.c.bf16 %v1290_v28, %v1288_v27 }
 0x109   : > { %v1331_v10 = vpop.f32.mrf.mxu2 }
 0x10a   : > { %1404 = vrot.lane.b32.xlu2 %v1340_v30, %s3928_s4  ;;  %v1347_v37 = vsel %vm1342_vm1, %v1340_v30, 0  ;;  %v1332_v16 = vadd.f32 %v4343_v12, %v1331_v10 }
 0x10c   : > { %v1380_v19 = vpack.c.bf16 %v1332_v16, %v1330_v15 }
 0x10d   : > { %v1292_v31 = vpop.f32.mrf.mxu1 }
 0x10e   : > { %v1293_v33 = vadd.f32 %v4262_v24, %v1292_v31 }
 0x111   : > { %v1334_v11 = vpop.f32.mrf.mxu2 }
 0x112   : > { %1400 = vrot.lane.b32.xlu2 %v4264_v25, %s3928_s4  ;;  %v1335_v13 = vadd.f32 %v4343_v12, %v1334_v11 }
 0x115   : > { %v1294_v32 = vpop.f32.mrf.mxu1 }
 0x116   : > { %v1295_v34 = vadd.f32 %v4262_v24, %v1294_v32 }
 0x118   : > { %v1341_v35 = vpack.c.bf16 %v1295_v34, %v1293_v33 }
 0x119   : > { %v1336_v14 = vpop.f32.mrf.mxu2 }
 0x11a   : > { %1474 = vrot.lane.b32.xlu0 %v1341_v35, %s3927_s0  ;;  %1406 = vrot.lane.b32.xlu1 %v1341_v35, %s3928_s4  ;;  %v1350_v36 = vsel %vm1342_vm1, %v1341_v35, 0  ;;  %v1337_v17 = vadd.f32 %v4343_v12, %v1336_v14 }
 0x11b   : > { %1358 = vmatpush.bf16.xpose.msra.mxu3 %v1350_v36 }
 0x11c   : > { %v1381_v18 = vpack.c.bf16 %v1337_v17, %v1335_v13 }
 0x11e   : > { %1515 = vrot.lane.b32.xlu2 %v1381_v18, %s3927_s0  ;;  %1391 = vmatpush.bf16.msrb.mxu0 %v1381_v18 }
 0x122   : > { %1472 = vrot.lane.b32.xlu0 %v1340_v30, %s3927_s0  ;;  %1540 = vrot.lane.b32.xlu1 %v1341_v35, %s3929_s7 }
 0x123   : > { %1359 = vmatpush.bf16.xpose.msra.mxu3 %v1347_v37  ;;  %1392 = vmatpush.bf16.msrb.mxu0 %v1380_v19 }
 0x126   : > { %1513 = vrot.lane.b32.xlu2 %v1380_v19, %s3927_s0 }
 0x12a   : > { %1538 = vrot.lane.b32.xlu1 %v1340_v30, %s3929_s7  ;;  %3411 = vmatmul.msk.bf16.vlgmr.msra.gmra.mxu3 %vm1342_vm1, %v4264_v25 }
 0x132   : > { %1536 = vrot.lane.b32.xlu1 %v4264_v25, %s3929_s7 }
 0x164   : > { %v1405_v47 = vpop.permute.xlu2 %1404 }
 0x165   : > { %v1412_v51 = vsel %vm1342_vm1, %v1405_v47, 0 }
 0x16c   : > { %v4307_v53 = vpop.permute.xlu2 %1400 }
 0x171   : > { %v4298_v42 = vpop.permute.xlu1 %1470 }
 0x18c   : > { %v1475_v43 = vpop.permute.xlu0 %1474  ;;  %v1407_v44 = vpop.permute.xlu1 %1406 }
 0x18d   : > { %v1415_v45 = vsel %vm1342_vm1, %v1407_v44, 0  ;;  %v1483_v46 = vsel %vm1342_vm1, %v1475_v43, 0  ;;  %v1516_v44 = vpop.permute.xlu2 %1515 }
 0x18e   : > { %1423 = vmatpush.bf16.xpose.msrb.mxu3 %v1415_v45  ;;  %1491 = vmatpush.bf16.xpose.msrb.mxu1 %v1483_v46 }
 0x18f   : > { %1528 = vmatpush.bf16.msrb.mxu2 %v1516_v44 }
 0x194   : > { %v1473_v48 = vpop.permute.xlu0 %1472  ;;  %v1541_v49 = vpop.permute.xlu1 %1540 }
 0x195   : > { %v1549_v50 = vsel %vm1342_vm1, %v1541_v49, 0  ;;  %v1480_v52 = vsel %vm1342_vm1, %v1473_v48, 0  ;;  %v1514_v46 = vpop.permute.xlu2 %1513 }
 0x196   : > { %1424 = vmatpush.bf16.xpose.msrb.mxu3 %v1412_v51  ;;  %1492 = vmatpush.bf16.xpose.msrb.mxu1 %v1480_v52 }
 0x197   : > { %1529 = vmatpush.bf16.msrb.mxu2 %v1514_v46 }
 0x19b   : > { %1655 = vmatpush.bf16.msra.mxu2 %v4287_v38 }
 0x19c   : > { %v1539_v54 = vpop.permute.xlu1 %1538 }
 0x19d   : > { %v1546_v55 = vsel %vm1342_vm1, %v1539_v54, 0  ;;  %3413 = vmatmul.msk.bf16.vlgmr.msrb.gmra.mxu3 %vm1342_vm1, %v4307_v53  ;;  %3415 = vmatmul.msk.bf16.vlgmr.msrb.gmra.mxu1 %vm1342_vm1, %v4298_v42 }
 0x19e   : > { %1557 = vmatpush.bf16.xpose.msra.mxu3 %v1549_v50  ;;  %1628 = vmatpush.bf16.msra.mxu1 %v4230_v0 }
 0x19f   : > { %1656 = vmatpush.bf16.msra.mxu2 %v4291_v39 }
 0x1a2   : > { %1629 = vmatpush.bf16.msra.mxu1 %v4245_v5 }
 0x1a4   : > { %v4324_v63 = vpop.permute.xlu1 %1536 }
 0x1a6   : > { %1558 = vmatpush.bf16.xpose.msra.mxu3 %v1546_v55  ;;  %v1641_v55 = vpack.c.bf16 %v4318_v57, %v4315_v56 }
 0x1ad   : > { %v4326_v0 = vpop.f32.mrf.mxu3  ;;  %3417 = vmatmul.msk.bf16.vlgmr.msra.gmra.mxu3 %vm1342_vm1, %v4324_v63  ;;  %3419 = vmatmul.msk.bf16.vlgmr.msra.gmra.mxu1 %vm1211_vm0, %v1614_v62 }
 0x1b5   : > { %v1363_v5 = vpop.f32.mrf.mxu3 }
 0x1bd   : > { %3420 = vmatmul.msk.bf16.gmra.mxu1 %vm1211_vm0, %v1615_v8 }
 0x21a   : > { %v1494_v20 = vpop.f32.mrf.mxu1 }
 0x21b   : > { %v1498_v21 = vsel %vm1211_vm0, %v1494_v20, -inf }
 0x21c   : > { %1499 = vmax.xlane.f32.xlu0 %v1498_v21 }
 0x220   : > { %v4352_v22 = vpop.f32.mrf.mxu3 }
 0x221   : > { %v1430_v26 = vsel %vm1211_vm0, %v4352_v22, -inf }
 0x222   : > { %v1496_v23 = vpop.f32.mrf.mxu1 }
 0x224   : > { %1431 = vmax.xlane.f32.xlu0 %v1430_v26 }
 0x228   : > { %v1428_v27 = vpop.f32.mrf.mxu3 }
 0x22a   : > { %v1631_v28 = vpop.f32.mrf.mxu1 }
 0x22b   : > { %v1632_v30 = vadd.f32 %v4262_v24, %v1631_v28 }
 0x230   : > { %v4356_v29 = vpop.f32.mrf.mxu3 }
 0x231   : > { %v1564_v47 = vsel %vm1211_vm0, %v4356_v29, -inf }
 0x232   : > { %v1633_v31 = vpop.f32.mrf.mxu1 }
 0x233   : > { %v1634_v32 = vadd.f32 %v4262_v24, %v1633_v31 }
 0x235   : > { %v1668_v33 = vpack.c.bf16 %v1634_v32, %v1632_v30 }
 0x237   : > { %1727 = vrot.lane.b32.xlu1 %v1668_v33, %s3928_s4  ;;  %v1671_v45 = vsel %vm1342_vm1, %v1668_v33, 0 }
 0x238   : > { %1447 = vrot.lane.b32.xlu0 %v1380_v19, %s3928_s4  ;;  %v1562_v34 = vpop.f32.mrf.mxu3 }
 0x23a   : > { %v1636_v35 = vpop.f32.mrf.mxu1 }
 0x23b   : > { %v1637_v36 = vadd.f32 %v4262_v24, %v1636_v35 }
 0x240   : > { %1581 = vrot.lane.b32.xlu0 %v1381_v18, %s3929_s7 }
 0x242   : > { %v1638_v37 = vpop.f32.mrf.mxu1 }
 0x243   : > { %v1639_v40 = vadd.f32 %v4262_v24, %v1638_v37  ;;  %v1365_v24 = vsel %vm1211_vm0, %v4326_v0, -inf }
 0x245   : > { %v1669_v41 = vpack.c.bf16 %v1639_v40, %v1637_v36 }
 0x247   : > { %1729 = vrot.lane.b32.xlu2 %v1669_v41, %s3928_s4  ;;  %1857 = vrot.lane.b32.xlu1 %v1669_v41, %s3929_s7  ;;  %v1674_v43 = vsel %vm1342_vm1, %v1669_v41, 0 }
 0x248   : > { %1682 = vmatpush.bf16.xpose.msrb.mxu3 %v1674_v43  ;;  %1579 = vrot.lane.b32.xlu0 %v1380_v19, %s3929_s7 }
 0x24f   : > { %1794 = vrot.lane.b32.xlu2 %v1669_v41, %s3927_s0  ;;  %1855 = vrot.lane.b32.xlu1 %v1668_v33, %s3929_s7 }
 0x250   : > { %1683 = vmatpush.bf16.xpose.msrb.mxu3 %v1671_v45 }
 0x257   : > { %1792 = vrot.lane.b32.xlu2 %v1668_v33, %s3927_s0  ;;  %1449 = vrot.lane.b32.xlu1 %v1381_v18, %s3928_s4 }
 0x258   : > { %3423 = vmatmul.msk.bf16.vlgmr.msrb.gmra.mxu3 %vm1342_vm1, %v4264_v25 }
 0x280   : > { %1366 = vmax.xlane.f32.xlu2 %v1365_v24 }
 0x281   : > { %1565 = vmax.xlane.f32.xlu1 %v1564_v47 }
 0x28f   : > { %v4382_v48 = vpop.xlane.xlu0 %1499 }
 0x290   : > { %v1504_v38 = vsub.f32 %v1494_v20, %v4382_v48 }
 0x292   : > { %v1505_v39 = vmul.f32 1.442695, %v1504_v38 }
 0x294   : > { %3697 = vpow2.f32 %v1505_v39 }
 0x297   : > { %v4406_v5 = vpop.xlane.xlu0 %1431 }
 0x29a   : > { %v4385_v49 = vpop.eup %3697 }
 0x29b   : > { %v1512_v50 = vpack.c.bf16 %v4385_v49, %v4385_v49 }
 0x29d   : > { %3416 = vmatmul.msk.bf16.vlgmr.msrb.gmra.mxu2 %vm1211_vm0, %v1512_v50 }
 0x2a1   : > { %v1730_v25 = vpop.permute.xlu2 %1729 }
 0x2a2   : > { %v1735_v51 = vsel %vm1342_vm1, %v1730_v25, 0 }
 0x2a3   : > { %1743 = vmatpush.bf16.xpose.msra.mxu3 %v1735_v51 }
 0x2a9   : > { %v1795_v52 = vpop.permute.xlu2 %1794  ;;  %v1728_v54 = vpop.permute.xlu1 %1727 }
 0x2aa   : > { %v1800_v58 = vsel %vm1342_vm1, %v1795_v52, 0  ;;  %v1732_v59 = vsel %vm1342_vm1, %v1728_v54, 0  ;;  %v1448_v1 = vpop.permute.xlu0 %1447 }
 0x2ab   : > { %1744 = vmatpush.bf16.xpose.msra.mxu3 %v1732_v59  ;;  %1808 = vmatpush.bf16.xpose.msrb.mxu1 %v1800_v58 }
 0x2ad   : > { %3421 = vmatmul.msk.bf16.vlgmr.msra.gmra.mxu2 %vm1211_vm0, %v1641_v55 }
 0x2b1   : > { %v1793_v60 = vpop.permute.xlu2 %1792 }
 0x2b2   : > { %v1797_v61 = vsel %vm1342_vm1, %v1793_v60, 0  ;;  %3425 = vmatmul.msk.bf16.vlgmr.msra.gmra.mxu3 %vm1342_vm1, %v4307_v53  ;;  %v1582_v10 = vpop.permute.xlu0 %1581 }
 0x2b3   : > { %1809 = vmatpush.bf16.xpose.msrb.mxu1 %v1797_v61  ;;  %v1508_v61 = vsel %vm1211_vm0, %v4385_v49, 0.0 }
 0x2b9   : > { %v1858_v62 = vpop.permute.xlu1 %1857 }
 0x2ba   : > { %v1863_v56 = vsel %vm1342_vm1, %v1858_v62, 0  ;;  %3427 = vmatmul.msk.bf16.vlgmr.msrb.gmra.mxu1 %vm1342_vm1, %v4298_v42  ;;  %v1580_v15 = vpop.permute.xlu0 %1579 }
 0x2bb   : > { %1871 = vmatpush.bf16.xpose.msrb.mxu3 %v1863_v56 }
 0x2bd   : > { %3422 = vmatmul.msk.bf16.gmra.mxu2 %vm1211_vm0, %v1642_v3 }
 0x2c1   : > { %v1856_v57 = vpop.permute.xlu1 %1855 }
 0x2c2   : > { %v1860_v4 = vsel %vm1342_vm1, %v1856_v57, 0 }
 0x2c3   : > { %1872 = vmatpush.bf16.xpose.msrb.mxu3 %v1860_v4 }
 0x2c9   : > { %v1450_v53 = vpop.permute.xlu1 %1449 }
 0x2ca   : > { %1462 = vmatpush.bf16.msra.mxu0 %v1450_v53  ;;  %3429 = vmatmul.msk.bf16.vlgmr.msrb.gmra.mxu3 %vm1342_vm1, %v4324_v63  ;;  %v1436_v63 = vsub.f32 %v4352_v22, %v4406_v5 }
 0x2cc   : > { %v1437_v14 = vmul.f32 1.442695, %v1436_v63 }
 0x2ce   : > { %1463 = vmatpush.bf16.msra.mxu0 %v1448_v1 }
 0x2db   : > { %v1685_v2 = vpop.f32.mrf.mxu3 }
 0x2dc   : > { %v1689_v6 = vsel %vm1211_vm0, %v1685_v2, -inf }
 0x2dd   : > { %1690 = vmax.xlane.f32.xlu2 %v1689_v6  ;;  %v1433_v6 = vsub.f32 -inf, %v4406_v5 }
 0x2e3   : > { %v1687_v42 = vpop.f32.mrf.mxu3 }
 0x2f3   : > { %v4411_v7 = vpop.xlane.xlu2 %1366 }
 0x2f4   : > { %v1371_v8 = vsub.f32 %v4326_v0, %v4411_v7  ;;  %v4422_v16 = vpop.xlane.xlu1 %1565  ;;  %v1368_v25 = vsub.f32 -inf, %v4411_v7 }
 0x2f5   : > { %v1570_v17 = vsub.f32 %v4356_v29, %v4422_v16 }
 0x2f6   : > { %v1372_v9 = vmul.f32 1.442695, %v1371_v8  ;;  %v1369_v51 = vmul.f32 1.442695, %v1368_v25 }
 0x2f7   : > { %v1571_v19 = vmul.f32 1.442695, %v1570_v17 }
 0x2f8   : > { %3699 = vpow2.f32 %v1372_v9 }
 0x2f9   : > { %3701 = vpow2.f32 %v1437_v14 }
 0x2fa   : > { %3703 = vpow2.f32 %v1571_v19 }
 0x2fe   : > { %v4415_v11 = vpop.eup %3699 }
 0x2ff   : > { %v1379_v13 = vpack.c.bf16 %v4415_v11, %v4415_v11  ;;  %v3702_v0 = vpop.eup %3701 }
 0x300   : > { %v1444_v18 = vpack.c.bf16 %v3702_v0, %v3702_v0  ;;  %v4427_v20 = vpop.eup %3703  ;;  %v1440_v58 = vsel %vm1211_vm0, %v3702_v0, 0.0 }
 0x301   : > { %3412 = vmatmul.msk.bf16.vlgmr.msrb.gmra.mxu0 %vm1211_vm0, %v1379_v13  ;;  %v1578_v21 = vpack.c.bf16 %v4427_v20, %v4427_v20 }
 0x302   : > { %1594 = vmatpush.bf16.msrb.mxu0 %v1582_v10 }
 0x306   : > { %1595 = vmatpush.bf16.msrb.mxu0 %v1580_v15 }
 0x311   : > { %3414 = vmatmul.msk.bf16.vlgmr.msra.gmra.mxu0 %vm1211_vm0, %v1444_v18 }
 0x320   : > { %v4431_v22 = vpop.f32.mrf.mxu2 }
 0x321   : > { %3418 = vmatmul.msk.bf16.vlgmr.msrb.gmra.mxu0 %vm1211_vm0, %v1578_v21 }
 0x328   : > { %v1533_v23 = vpop.f32.mrf.mxu2 }
 0x330   : > { %v1658_v26 = vpop.f32.mrf.mxu2 }
 0x331   : > { %v1659_v31 = vadd.f32 %v4343_v12, %v1658_v26 }
 0x335   : > { %v4434_v27 = vpop.f32.mrf.mxu3 }
 0x336   : > { %v1750_v28 = vsel %vm1211_vm0, %v4434_v27, -inf }
 0x337   : > { %v4438_v29 = vpop.f32.mrf.mxu1  ;;  %1751 = vmax.xlane.f32.xlu0 %v1750_v28 }
 0x338   : > { %v1660_v30 = vpop.f32.mrf.mxu2 }
 0x339   : > { %v1661_v32 = vadd.f32 %v4343_v12, %v1660_v30  ;;  %v1501_v30 = vsub.f32 -inf, %v4382_v48 }
 0x33b   : > { %v1706_v33 = vpack.c.bf16 %v1661_v32, %v1659_v31  ;;  %v1502_v31 = vmul.f32 1.442695, %v1501_v30 }
 0x33d   : > { %1769 = vrot.lane.b32.xlu1 %v1706_v33, %s3928_s4  ;;  %v1748_v34 = vpop.f32.mrf.mxu3 }
 0x33f   : > { %v1813_v35 = vpop.f32.mrf.mxu1 }
 0x340   : > { %v1663_v36 = vpop.f32.mrf.mxu2 }
 0x341   : > { %v1664_v37 = vadd.f32 %v4343_v12, %v1663_v36 }
 0x348   : > { %v1665_v40 = vpop.f32.mrf.mxu2 }
 0x349   : > { %v1666_v41 = vadd.f32 %v4343_v12, %v1665_v40  ;;  %v1815_v12 = vsel %vm1211_vm0, %v4438_v29, -inf }
 0x34b   : > { %v1707_v43 = vpack.c.bf16 %v1666_v41, %v1664_v37 }
 0x34d   : > { %1717 = vmatpush.bf16.msra.mxu0 %v1707_v43  ;;  %1771 = vrot.lane.b32.xlu2 %v1707_v43, %s3928_s4  ;;  %v4446_v44 = vpop.f32.mrf.mxu3 }
 0x34e   : > { %1834 = vrot.lane.b32.xlu0 %v1707_v43, %s3927_s0  ;;  %v1878_v54 = vsel %vm1211_vm0, %v4446_v44, -inf }
 0x350   : > { %v1691_v45 = vpop.xlane.xlu2 %1690 }
 0x351   : > { %v1692_v46 = vmax.f32 %v4411_v7, %v1691_v45  ;;  %1718 = vmatpush.bf16.msra.mxu0 %v1706_v33 }
 0x353   : > { %v1696_v24 = vsub.f32 %v1685_v2, %v1692_v46  ;;  %v1693_v52 = vsub.f32 %v4411_v7, %v1692_v46  ;;  %v1434_v7 = vmul.f32 1.442695, %v1433_v6 }
 0x355   : > { %v1697_v47 = vmul.f32 1.442695, %v1696_v24  ;;  %v1876_v38 = vpop.f32.mrf.mxu3  ;;  %v1694_v55 = vmul.f32 1.442695, %v1693_v52 }
 0x357   : > { %3705 = vpow2.f32 %v1697_v47 }
 0x358   : > { %3707 = vpow2.f32 %v1369_v51 }
 0x359   : > { %3709 = vpow2.f32 %v1694_v55 }
 0x35a   : > { %3711 = vpow2.f32 %v1434_v7 }
 0x35d   : > { %v3706_v39 = vpop.eup %3705 }
 0x35e   : > { %v1705_v50 = vpack.c.bf16 %v3706_v39, %v3706_v39  ;;  %v3708_v59 = vpop.eup %3707  ;;  %v1700_v56 = vsel %vm1211_vm0, %v3706_v39, 0.0 }
 0x35f   : > { %v4458_v60 = vmul.f32 0.0, %v3708_v59  ;;  %v4464_v57 = vpop.eup %3709 }
 0x360   : > { %3424 = vmatmul.msk.bf16.vlgmr.msra.gmra.mxu0 %vm1211_vm0, %v1705_v50  ;;  %v3712_v17 = vpop.eup %3711 }
 0x361   : > { %v4476_v18 = vmul.f32 0.0, %v3712_v17 }
 0x367   : > { %1816 = vmax.xlane.f32.xlu1 %v1815_v12 }
 0x376   : > { %1879 = vmax.xlane.f32.xlu2 %v1878_v54 }
 0x378   : > { %1441 = vadd.xlane.f32.xlu0 %v1440_v58 }
 0x37e   : > { %v1394_v62 = vpop.f32.mrf.mxu0  ;;  %1509 = vadd.xlane.f32.xlu2 %v1508_v61 }
 0x37f   : > { %v1398_v3 = vadd.f32 %v1394_v62, %v4458_v60 }
 0x380   : > { %1701 = vadd.xlane.f32.xlu0 %v1700_v56  ;;  %1832 = vrot.lane.b32.xlu1 %v1706_v33, %s3927_s0 }
 0x381   : > { %v1704_v4 = vmul.f32 %v4464_v57, %v1398_v3 }
 0x386   : > { %v1396_v53 = vpop.f32.mrf.mxu0 }
 0x387   : > { %v1375_v53 = vsel %vm1211_vm0, %v4415_v11, 0.0 }
 0x388   : > { %1897 = vrot.lane.b32.xlu1 %v1707_v43, %s3929_s7  ;;  %v1567_v43 = vsub.f32 -inf, %v4422_v16 }
 0x38a   : > { %v1568_v24 = vmul.f32 1.442695, %v1567_v43 }
 0x38e   : > { %v1465_v1 = vpop.f32.mrf.mxu0 }
 0x38f   : > { %v1469_v19 = vadd.f32 %v1465_v1, %v4476_v18 }
 0x390   : > { %1895 = vrot.lane.b32.xlu1 %v1706_v33, %s3929_s7 }
 0x396   : > { %v1467_v49 = vpop.f32.mrf.mxu0 }
 0x39e   : > { %v4470_v2 = vpop.f32.mrf.mxu0 }
 0x3a6   : > { %v1599_v42 = vpop.f32.mrf.mxu0 }
 0x3a7   : > { %v1772_v8 = vpop.permute.xlu2 %1771 }
 0x3a8   : > { %1784 = vmatpush.bf16.msrb.mxu0 %v1772_v8 }
 0x3aa   : > { %v1752_v9 = vpop.xlane.xlu0 %1751 }
 0x3ab   : > { %v1753_v10 = vmax.f32 %v4406_v5, %v1752_v9 }
 0x3ad   : > { %v1754_v63 = vsub.f32 %v4406_v5, %v1753_v10  ;;  %v1757_v13 = vsub.f32 %v4434_v27, %v1753_v10  ;;  %v1574_v27 = vsel %vm1211_vm0, %v4427_v20, 0.0 }
 0x3af   : > { %v1755_v14 = vmul.f32 1.442695, %v1754_v63  ;;  %v1758_v15 = vmul.f32 1.442695, %v1757_v13  ;;  %v1770_v0 = vpop.permute.xlu1 %1769 }
 0x3b0   : > { %1785 = vmatpush.bf16.msrb.mxu0 %v1770_v0 }
 0x3b1   : > { %3713 = vpow2.f32 %v1755_v14 }
 0x3b2   : > { %3715 = vpow2.f32 %v1758_v15 }
 0x3b3   : > { %3717 = vpow2.f32 %v1502_v31 }
 0x3b7   : > { %v4479_v21 = vpop.eup %3713 }
 0x3b8   : > { %v3716_v23 = vpop.eup %3715  ;;  %v4482_v26 = vmul.f32 %v4479_v21, %v1469_v19 }
 0x3b9   : > { %v1766_v5 = vpack.c.bf16 %v3716_v23, %v3716_v23  ;;  %v3718_v41 = vpop.eup %3717  ;;  %v1761_v55 = vsel %vm1211_vm0, %v3716_v23, 0.0 }
 0x3ba   : > { %1575 = vadd.xlane.f32.xlu1 %v1574_v27  ;;  %v1507_v45 = vmul.f32 0.0, %v3718_v41 }
 0x3bb   : > { %3426 = vmatmul.msk.bf16.vlgmr.msrb.gmra.mxu0 %vm1211_vm0, %v1766_v5 }
 0x3bc   : > { %v1535_v46 = vadd.f32 %v4431_v22, %v1507_v45 }
 0x3c0   : > { %v1835_v28 = vpop.permute.xlu0 %1834 }
 0x3c1   : > { %1847 = vmatpush.bf16.msrb.mxu2 %v1835_v28 }
 0x3da   : > { %v1817_v32 = vpop.xlane.xlu1 %1816 }
 0x3db   : > { %v1818_v33 = vmax.f32 %v4382_v48, %v1817_v32 }
 0x3dd   : > { %v1819_v34 = vsub.f32 %v4382_v48, %v1818_v33  ;;  %v1822_v35 = vsub.f32 %v4438_v29, %v1818_v33  ;;  %v1720_v36 = vpop.f32.mrf.mxu0 }
 0x3de   : > { %v4491_v20 = vadd.f32 %v1720_v36, %v1704_v4 }
 0x3df   : > { %v1820_v37 = vmul.f32 1.442695, %v1819_v34  ;;  %v1823_v40 = vmul.f32 1.442695, %v1822_v35 }
 0x3e1   : > { %3719 = vpow2.f32 %v1820_v37 }
 0x3e2   : > { %3721 = vpow2.f32 %v1823_v40 }
 0x3e3   : > { %3723 = vpow2.f32 %v1568_v24 }
 0x3e5   : > { %v1722_v47 = vpop.f32.mrf.mxu0 }
 0x3e7   : > { %v3720_v38 = vpop.eup %3719 }
 0x3e8   : > { %v3722_v39 = vpop.eup %3721  ;;  %v4495_v48 = vmul.f32 %v3720_v38, %v1535_v46 }
 0x3e9   : > { %v1826_v29 = vsel %vm1211_vm0, %v3722_v39, 0.0  ;;  %v1880_v50 = vpop.xlane.xlu2 %1879  ;;  %v3724_v22 = vpop.eup %3723  ;;  %v1831_v61 = vpack.c.bf16 %v3722_v39, %v3722_v39 }
 0x3ea   : > { %1827 = vadd.xlane.f32.xlu2 %v1826_v29  ;;  %v1881_v12 = vmax.f32 %v4422_v16, %v1880_v50  ;;  %v1573_v59 = vmul.f32 0.0, %v3724_v22 }
 0x3eb   : > { %v1442_v9 = vpop.xlane.xlu0 %1441 }
 0x3ec   : > { %v1882_v25 = vsub.f32 %v4422_v16, %v1881_v12  ;;  %v1885_v51 = vsub.f32 %v4446_v44, %v1881_v12  ;;  %v1601_v62 = vadd.f32 %v4470_v2, %v1573_v59  ;;  %v1443_v13 = vadd.f32 %v1442_v9, %v4476_v18 }
 0x3ee   : > { %v1883_v52 = vmul.f32 1.442695, %v1882_v25  ;;  %v1886_v54 = vmul.f32 1.442695, %v1885_v51  ;;  %v1760_v14 = vmul.f32 %v4479_v21, %v1443_v13 }
 0x3f0   : > { %3725 = vpow2.f32 %v1883_v52 }
 0x3f1   : > { %3727 = vpow2.f32 %v1886_v54  ;;  %v1510_v42 = vpop.xlane.xlu2 %1509 }
 0x3f2   : > { %1762 = vadd.xlane.f32.xlu2 %v1761_v55  ;;  %v1833_v58 = vpop.permute.xlu1 %1832  ;;  %v1511_v7 = vadd.f32 %v1510_v42, %v1507_v45 }
 0x3f3   : > { %1848 = vmatpush.bf16.msrb.mxu2 %v1833_v58  ;;  %v1702_v25 = vpop.xlane.xlu0 %1701 }
 0x3f4   : > { %v1825_v8 = vmul.f32 %v3720_v38, %v1511_v7 }
 0x3f6   : > { %v3726_v3 = vpop.eup %3725  ;;  %3428 = vmatmul.msk.bf16.vlgmr.msrb.gmra.mxu2 %vm1211_vm0, %v1831_v61 }
 0x3f7   : > { %v3728_v16 = vpop.eup %3727  ;;  %v4504_v56 = vmul.f32 %v3726_v3, %v1601_v62 }
 0x3f8   : > { %v1889_v44 = vsel %vm1211_vm0, %v3728_v16, 0.0  ;;  %v1894_v49 = vpack.c.bf16 %v3728_v16, %v3728_v16 }
 0x3fa   : > { %1890 = vadd.xlane.f32.xlu2 %v1889_v44  ;;  %v1898_v4 = vpop.permute.xlu1 %1897 }
 0x3fb   : > { %1910 = vmatpush.bf16.msra.mxu0 %v1898_v4 }
 0x402   : > { %1376 = vadd.xlane.f32.xlu2 %v1375_v53  ;;  %v1896_v1 = vpop.permute.xlu1 %1895 }
 0x403   : > { %1911 = vmatpush.bf16.msra.mxu0 %v1896_v1 }
 0x406   : > { %3430 = vmatmul.msk.bf16.vlgmr.msra.gmra.mxu0 %vm1211_vm0, %v1894_v49 }
 0x42d   : > { %v1576_v11 = vpop.xlane.xlu1 %1575 }
 0x42e   : > { %v1577_v19 = vadd.f32 %v1576_v11, %v1573_v59 }
 0x430   : > { %v1888_v27 = vmul.f32 %v3726_v3, %v1577_v19 }
 0x438   : > { %v1787_v2 = vpop.f32.mrf.mxu0 }
 0x439   : > { %v1791_v47 = vadd.f32 %v1787_v2, %v4482_v26 }
 0x440   : > { %v1789_v6 = vpop.f32.mrf.mxu0 }
 0x45d   : > { %v1828_v10 = vpop.xlane.xlu2 %1827 }
 0x45e   : > { %v1829_v63 = vadd.f32 %v1828_v10, %v1825_v8 }
 0x460   : > { %3729 = vrcp.f32 %v1829_v63  ;;  %v1966_v40 = vand.u32 2147483648, %v1829_v63  ;;  %vm1960_vm5 = vweird.f32 %v1829_v63  ;;  %v1964_v46 = vand.u32 2147483647, %v1829_v63 }
 0x462   : > { %v1967_v54 = vor.u32 1.1754944e-38, %v1966_v40  ;;  %vm1965_vm9 = vcmp.eq.f32.partialorder %v1964_v46, 8.507059e+37  ;;  %v3564_v46 = vld [vmem:[%s4968_s6 + $0x8] sm:$0xff] }
 0x463   : > { %2100 = vmatpush.bf16.msra.mxu2 %v3564_v46 }
 0x465   : > { %v1763_v15 = vpop.xlane.xlu2 %1762 }
 0x466   : > { %v3730_v0 = vpop.eup %3729  ;;  %v1764_v17 = vadd.f32 %v1763_v15, %v1760_v14  ;;  %v3562_v15 = vld [vmem:[%s3987_s14 + $0x8] sm:$0xff] }
 0x467   : > { %v1956_v23 = vmul.f32 %v3730_v0, %v1829_v63  ;;  %vm1961_vm3 = vweird.f32 %v3730_v0  ;;  %2023 = vmatpush.bf16.msra.mxu1 %v3562_v15 }
 0x468   : > { %3731 = vrcp.f32 %v1764_v17  ;;  %v1945_v18 = vand.u32 2147483648, %v1764_v17  ;;  %v1943_v21 = vand.u32 2147483647, %v1764_v17  ;;  %vm1939_vm4 = vweird.f32 %v1764_v17  ;;  %vm1962_vm7 = vmor %vm1960_vm5, %vm1961_vm3 }
 0x469   : > { %v1957_v5 = vsub.f32 1.0, %v1956_v23  ;;  %vm1974_vm5 = vcmask 195712  }
 0x46a   : > { %v1946_v24 = vor.u32 1.1754944e-38, %v1945_v18  ;;  %vm1944_vm8 = vcmp.eq.f32.partialorder %v1943_v21, 8.507059e+37 }
 0x46b   : > { %v1958_v33 = vmul.f32 %v3730_v0, %v1957_v5  ;;  %v3678_v5 = vld [vmem:[%s3992_s19] ss:$0 sm:$0xff] }
 0x46d   : > { %v1891_v28 = vpop.xlane.xlu2 %1890  ;;  %v1959_v36 = vadd.f32 %v3730_v0, %v1958_v33 }
 0x46e   : > { %v3732_v30 = vpop.eup %3731  ;;  %v1892_v31 = vadd.f32 %v1891_v28, %v1888_v27 }
 0x46f   : > { %v1935_v32 = vmul.f32 %v3732_v30, %v1764_v17  ;;  %vm1940_vm2 = vweird.f32 %v3732_v30  ;;  %v1963_v50 = vsel %vm1962_vm7, %v3730_v0, %v1959_v36  ;;  %v3561_v0 = vld [vmem:[%s3987_s14] sm:$0xff] }
 0x470   : > { %3733 = vrcp.f32 %v1892_v31  ;;  %vm1941_vm6 = vmor %vm1939_vm4, %vm1940_vm2  ;;  %v1968_v58 = vsel %vm1965_vm9, %v1967_v54, %v1963_v50  ;;  %v1987_v61 = vand.u32 2147483648, %v1892_v31  ;;  %vm1981_vm11 = vweird.f32 %v1892_v31  ;;  %2024 = vmatpush.bf16.msra.mxu1 %v3561_v0 }
 0x471   : > { %v1936_v34 = vsub.f32 1.0, %v1935_v32  ;;  %v1985_v62 = vand.u32 2147483647, %v1892_v31  ;;  %vm1953_vm4 = vcmask 130112   ;;  %v3933_v32 = vmov 32.0  }
 0x472   : > { %v1988_v53 = vor.u32 1.1754944e-38, %v1987_v61 }
 0x473   : > { %v1937_v35 = vmul.f32 %v3732_v30, %v1936_v34  ;;  %vm1986_vm13 = vcmp.eq.f32.partialorder %v1985_v62, 8.507059e+37  ;;  %v3566_v62 = vld [vmem:[%s4017_s20 + $0x8] sm:$0xff] }
 0x475   : > { %v1377_v37 = vpop.xlane.xlu2 %1376  ;;  %v1938_v41 = vadd.f32 %v3732_v30, %v1937_v35 }
 0x476   : > { %v3734_v43 = vpop.eup %3733  ;;  %v1378_v45 = vadd.f32 %v1377_v37, %v4458_v60 }
 0x477   : > { %v1977_v38 = vmul.f32 %v3734_v43, %v1892_v31  ;;  %v1942_v39 = vsel %vm1941_vm6, %v3732_v30, %v1938_v41  ;;  %vm1982_vm10 = vweird.f32 %v3734_v43  ;;  %vm1995_vm6 = vcmask 261312  }
 0x478   : > { %v1699_v29 = vmul.f32 %v4464_v57, %v1378_v45  ;;  %v1947_v12 = vsel %vm1944_vm8, %v1946_v24, %v1942_v39  ;;  %vm1983_vm12 = vmor %vm1981_vm11, %vm1982_vm10  ;;  %v3563_v24 = vld [vmem:[%s4968_s6] sm:$0xff]  ;;  %vm2141_vm11 = vcmask 523264  }
 0x479   : > { %v1978_v51 = vsub.f32 1.0, %v1977_v38  ;;  %v1850_v52 = vpop.f32.mrf.mxu2  ;;  %v1948_v22 = vmul.f32 %v1947_v12, %v1791_v47  ;;  %2101 = vmatpush.bf16.msra.mxu2 %v3563_v24  ;;  %v3568_v47 = vld [vmem:[%s4017_s20 + $0x18] sm:$0xff] }
 0x47a   : > { %v1703_v60 = vadd.f32 %v1702_v25, %v1699_v29  ;;  %v1854_v55 = vadd.f32 %v1850_v52, %v4495_v48  ;;  %2149 = vmatpush.bf16.msra.mxu3 %v3568_v47  ;;  %v3567_v29 = vld [vmem:[%s4017_s20 + $0x10] sm:$0xff] }
 0x47b   : > { %1950 = vrot.lane.b32.xlu2 %v1948_v22, %s4937_s18  ;;  %v1979_v26 = vmul.f32 %v3734_v43, %v1978_v51  ;;  %s4989_s18 = sld [smem:[#allocation16_spill]] }
 0x47c   : > { %3735 = vrcp.f32 %v1703_v60  ;;  %v1969_v59 = vmul.f32 %v1968_v58, %v1854_v55  ;;  %v1929_v6 = vand.u32 2147483648, %v1703_v60  ;;  %v1927_v8 = vand.u32 2147483647, %v1703_v60  ;;  %v3680_v58 = vld [vmem:[%s4982_s27] ss:$0 sm:$0xff]  ;;  %s4986_s27 = sld [smem:[#allocation17_spill]] }
 0x47d   : > { %v1980_v57 = vadd.f32 %v3734_v43, %v1979_v26  ;;  %vm1923_vm15 = vweird.f32 %v1703_v60  ;;  %3737 = vrcp.f32 %v3933_v32 }
 0x47e   : > { %1971 = vrot.lane.b32.xlu1 %v1969_v59, %s3931_s11  ;;  %v1930_v10 = vor.u32 1.1754944e-38, %v1929_v6  ;;  %vm1928_vm3 = vcmp.eq.f32.partialorder %v1927_v8, 8.507059e+37  ;;  %2150 = vmatpush.bf16.msra.mxu3 %v3567_v29 }
 0x47f   : > { %v1984_v48 = vsel %vm1983_vm12, %v3734_v43, %v1980_v57 }
 0x480   : > { %v1989_v2 = vsel %vm1986_vm13, %v1988_v53, %v1984_v48 }
 0x481   : > { %v1852_v3 = vpop.f32.mrf.mxu2 }
 0x482   : > { %v3736_v16 = vpop.eup %3735  ;;  %2151 = vmatpush.bf16.msra.mxu3 %v3566_v62  ;;  %v3565_v3 = vld [vmem:[%s4017_s20] sm:$0xff] }
 0x483   : > { %v1919_v44 = vmul.f32 %v3736_v16, %v1703_v60  ;;  %v1913_v4 = vpop.f32.mrf.mxu0  ;;  %vm1924_vm14 = vweird.f32 %v3736_v16  ;;  %v3738_v33 = vpop.eup %3737  ;;  %v3679_v60 = vld [vmem:[%s3997_s24] ss:$0 sm:$0xff] }
 0x484   : > { %v1917_v1 = vadd.f32 %v1913_v4, %v4504_v56  ;;  %vm1925_vm2 = vmor %vm1923_vm15, %vm1924_vm14  ;;  %v2037_v34 = vmul.f32 32.0, %v3738_v33  ;;  %vm2041_vm7 = vweird.f32 %v3738_v33  ;;  %v3789_v62 = vld [vmem:[%s4241_s16] sm:$0xff]  ;;  %s4991_s16 = sld [smem:[#allocation18_spill]] }
 0x485   : > { %v1920_v49 = vsub.f32 1.0, %v1919_v44 }
 0x486   : > { %v1990_v42 = vmul.f32 %v1989_v2, %v1917_v1  ;;  %v2038_v18 = vsub.f32 1.0, %v2037_v34  ;;  %2152 = vmatpush.bf16.msra.mxu3 %v3565_v3 }
 0x487   : > { %v1921_v7 = vmul.f32 %v3736_v16, %v1920_v49  ;;  %v3682_v49 = vld [vmem:[%s4984_s22] ss:$0 sm:$0xff]  ;;  %s4988_s22 = sld [smem:[#allocation15_spill]] }
 0x488   : > { %1992 = vrot.lane.b32.xlu0 %v1990_v42, %s4936_s28  ;;  %v2039_v35 = vmul.f32 %v3738_v33, %v2038_v18  ;;  %s4985_s28 = sld [smem:[#allocation19_spill]]  ;;  %v3570_v18 = vld [vmem:[%s4986_s27 + $0x8] sm:$0xff] }
 0x489   : > { %v1922_v9 = vadd.f32 %v3736_v16, %v1921_v7  ;;  %2227 = vmatpush.bf16.msrb.mxu0 %v3570_v18  ;;  %v4654_v18 = vld [vmem:[%s4227_s23 + $0x30] sm:$0xff] }
 0x48a   : > { %v2040_v21 = vadd.f32 %v3738_v33, %v2039_v35  ;;  %v3569_v35 = vld [vmem:[%s4986_s27] sm:$0xff] }
 0x48b   : > { %v1915_v63 = vpop.f32.mrf.mxu0  ;;  %v1926_v13 = vsel %vm1925_vm2, %v3736_v16, %v1922_v9  ;;  %v3681_v16 = vld [vmem:[%s4983_s1] ss:$0 sm:$0xff]  ;;  %s4987_s1 = sld [smem:[#allocation20_spill]] }
 0x48c   : > { %v1931_v56 = vsel %vm1928_vm3, %v1930_v10, %v1926_v13  ;;  %v4530_v36 = vsel %vm2041_vm7, %v3738_v33, %v2040_v21  ;;  %v4552_v10 = vld [vmem:[%s4227_s23] sm:$0xff]  ;;  %v4555_v63 = vld [vmem:[%s4227_s23 + $0x8] sm:$0xff] }
 0x48d   : > { %v1932_v14 = vmul.f32 %v1931_v56, %v4491_v20  ;;  %v2253_v13 = vld [vmem:[%s4213_s2] sm:$0xff]  ;;  %v2254_v56 = vld [vmem:[%s4213_s2 + $0x8] sm:$0xff]  ;;  %2228 = vmatpush.bf16.msrb.mxu0 %v3569_v35  ;;  %v4657_v35 = vld [vmem:[%s4227_s23 + $0x38] sm:$0xff] }
 0x48e   : > { %v4549_v9 = vld [vmem:[%s4985_s28 + $0x8] sm:$0xff]  ;;  %v2258_v15 = vadd.f32 %v2254_v56, %v4555_v63 }
 0x48f   : > { %1933 = vst.msk [vmem:[#allocation2] sm:$0xff] %vm1342_vm1, %v1932_v14  ;;  %2290 = vmatpush.bf16.msrb.mxu1 %v4549_v9  ;;  %v4561_v14 = vld [vmem:[%s4985_s28] sm:$0xff] }
 0x493   : > { %2291 = vmatpush.bf16.msrb.mxu1 %v4561_v14 }
 0x4d5   : > { %v1951_v11 = vpop.permute.xlu2 %1950 }
 0x4d6   : > { %1954 = vst.msk [vmem:[#allocation2] sm:$0xff] %vm1953_vm4, %v1951_v11  ;;  %v2257_v11 = vadd.f32 %v2253_v13, %v4552_v10  ;;  %v3686_v13 = vld [vmem:[%s4991_s16] ss:$0 sm:$0xff] }
 0x4d8   : > { %v2261_v0 = vpack.c.bf16 %v2258_v15, %v2257_v11 }
 0x4f0   : > { %v1972_v17 = vpop.permute.xlu1 %1971 }
 0x4f1   : > { %1975 = vst.msk [vmem:[#allocation2] sm:$0xff] %vm1974_vm5, %v1972_v17  ;;  %v4568_v17 = vld [vmem:[%s4227_s23 + $0x10] sm:$0xff] }
 0x4fa   : > { %v1993_v19 = vpop.permute.xlu0 %1992 }
 0x4fb   : > { %1996 = vst.msk [vmem:[#allocation2] sm:$0xff] %vm1995_vm6, %v1993_v19  ;;  %v4571_v19 = vld [vmem:[%s4227_s23 + $0x18] sm:$0xff] }
 0x502   : > { %v1997_v20 = vld [vmem:[#allocation2] sm:$0xff] }
 0x503   : > { %v1998_v23 = vpack.c.bf16 %v1997_v20, %v1997_v20  ;;  %v2255_v20 = vld [vmem:[%s4213_s2 + $0x10] sm:$0xff] }
 0x505   : > { %3439 = vmatmul.msk.bf16.vlgmr.msra.gmra.mxu1 %vm1211_vm0, %v1998_v23  ;;  %v2256_v23 = vld [vmem:[%s4213_s2 + $0x18] sm:$0xff] }
 0x515   : > { %3483 = vmatmul.msk.bf16.vlgmr.msrb.gmra.mxu1 %vm1211_vm0, %v2261_v0 }
 0x582   : > { %v2026_v27 = vpop.f32.mrf.mxu1 }
 0x583   : > { %v2027_v28 = vadd.f32 %v3678_v5, %v2026_v27  ;;  %v2259_v5 = vadd.f32 %v2255_v20, %v4568_v17  ;;  %v2260_v27 = vadd.f32 %v2256_v23, %v4571_v19 }
 0x585   : > { %v2033_v30 = vsel %vm1211_vm0, %v2027_v28, 0.0 }
 0x586   : > { %2034 = vadd.xlane.f32.xlu0 %v2033_v30 }
 0x58a   : > { %v2028_v31 = vpop.f32.mrf.mxu1 }
 0x5f9   : > { %v2035_v37 = vpop.xlane.xlu0 %2034 }
 0x5fa   : > { %v2043_v40 = vmul.f32 %v4530_v36, %v2035_v37 }
 0x5fc   : > { %v2044_v41 = vsub.f32 %v2027_v28, %v2043_v40  ;;  %v2262_v28 = vpack.c.bf16 %v2260_v27, %v2259_v5  ;;  %v2293_v40 = vpop.f32.mrf.mxu1  ;;  %v4643_v5 = vld [vmem:[%s4227_s23 + $0x20] sm:$0xff]  ;;  %v4646_v27 = vld [vmem:[%s4227_s23 + $0x28] sm:$0xff]  ;;  %s4994_s23 = smov 24  }
 0x5fe   : > { %v2045_v43 = vmul.f32 %v2044_v41, %v2044_v41  ;;  %3484 = vmatmul.msk.bf16.gmra.mxu1 %vm1211_vm0, %v2262_v28  ;;  %v2611_v28 = vld [vmem:[%s4213_s2 + $0x20] sm:$0xff] }
 0x600   : > { %v2046_v45 = vsel %vm1211_vm0, %v2045_v43, 0.0  ;;  %v4584_v43 = vld [vmem:[%s4987_s1] ss:$0 sm:$0xff]  ;;  %s4990_s1 = sld [smem:[#allocation21_spill]] }
 0x601   : > { %2047 = vadd.xlane.f32.xlu2 %v2046_v45  ;;  %v2294_v45 = vadd.f32 %v4584_v43, %v2293_v40 }
 0x604   : > { %v2295_v46 = vpop.f32.mrf.mxu1 }
 0x605   : > { %v2296_v24 = vadd.f32 %v4584_v43, %v2295_v46 }
 0x674   : > { %v2048_v38 = vpop.xlane.xlu2 %2047 }
 0x675   : > { %v2049_v39 = vmul.f32 %v2048_v38, %v4530_v36 }
 0x677   : > { %v2050_v50 = vadd.f32 1e-05, %v2049_v39  ;;  %v2346_v39 = vpack.c.bf16 %v2296_v24, %v2294_v45 }
 0x679   : > { %3739 = vrsqrt.f32 %v2050_v50  ;;  %vm2057_vm9 = vweird.f32 %v2050_v50 }
 0x67f   : > { %v3740_v12 = vpop.eup %3739 }
 0x680   : > { %v2052_v25 = vmul.f32 %v3740_v12, %v2050_v50  ;;  %vm2058_vm8 = vweird.f32 %v3740_v12 }
 0x681   : > { %vm2059_vm10 = vmor %vm2057_vm9, %vm2058_vm8 }
 0x682   : > { %v2053_v51 = vmul.f32 %v3740_v12, %v2052_v25 }
 0x684   : > { %v2054_v52 = vmul.f32 0.5, %v2053_v51 }
 0x686   : > { %v2055_v54 = vsub.f32 1.5, %v2054_v52  ;;  %v3683_v52 = vld [vmem:[%s4988_s22] ss:$0 sm:$0xff] }
 0x688   : > { %v2056_v22 = vmul.f32 %v3740_v12, %v2055_v54 }
 0x68a   : > { %v2060_v55 = vsel %vm2059_vm10, %v3740_v12, %v2056_v22  ;;  %v2298_v12 = vpop.f32.mrf.mxu1  ;;  %v3684_v22 = vld [vmem:[%s4989_s18] ss:$0 sm:$0xff]  ;;  %s4992_s18 = sld [smem:[#allocation22_spill]] }
 0x68b   : > { %v2061_v26 = vmul.f32 %v2060_v55, %v2044_v41  ;;  %v2299_v55 = vadd.f32 %v4584_v43, %v2298_v12 }
 0x68d   : > { %v2065_v59 = vmul.f32 %v3679_v60, %v2061_v26 }
 0x68f   : > { %v2069_v57 = vadd.f32 %v3680_v58, %v2065_v59 }
 0x691   : > { %v2074_v61 = vpack.c.bf16 %v2069_v57, %v2069_v57 }
 0x692   : > { %v2300_v26 = vpop.f32.mrf.mxu1 }
 0x693   : > { %3448 = vmatmul.msk.bf16.vlgmr.msra.gmra.mxu2 %vm1211_vm0, %v2074_v61  ;;  %v2301_v59 = vadd.f32 %v4584_v43, %v2300_v26 }
 0x695   : > { %v2347_v61 = vpack.c.bf16 %v2301_v59, %v2299_v55 }
 0x697   : > { %2479 = vrot.lane.b32.xlu0 %v2347_v61, %s3927_s0 }
 0x69f   : > { %2411 = vrot.lane.b32.xlu0 %v2347_v61, %s3928_s4 }
 0x6a7   : > { %2409 = vrot.lane.b32.xlu0 %v2346_v39, %s3928_s4 }
 0x6af   : > { %2545 = vrot.lane.b32.xlu0 %v2347_v61, %s3929_s7 }
 0x6b7   : > { %2543 = vrot.lane.b32.xlu0 %v2346_v39, %s3929_s7 }
 0x716   : > { %v2103_v48 = vpop.f32.mrf.mxu2 }
 0x717   : > { %v2104_v44 = vadd.f32 %v3681_v16, %v2103_v48  ;;  %v2355_v16 = vsel %vm1342_vm1, %v2347_v61, 0 }
 0x718   : > { %2363 = vmatpush.bf16.xpose.msrb.mxu3 %v2355_v16 }
 0x719   : > { %v2107_v4 = vmax.f32 %v2104_v44, 0.0  ;;  %v2352_v44 = vsel %vm1342_vm1, %v2346_v39, 0 }
 0x71b   : > { %v2116_v53 = vpack.c.bf16 %v2107_v4, %v2107_v4  ;;  %v4606_v4 = vld [vmem:[%s4990_s1 + $0x8] sm:$0xff] }
 0x71c   : > { %2332 = vmatpush.bf16.msrb.mxu2 %v4606_v4 }
 0x71d   : > { %3465 = vmatmul.msk.bf16.vlgmr.msra.gmra.mxu3 %vm2141_vm11, %v2116_v53  ;;  %v4610_v53 = vld [vmem:[%s4990_s1] sm:$0xff] }
 0x71e   : > { %v2105_v1 = vpop.f32.mrf.mxu2 }
 0x71f   : > { %v2303_v1 = vpack.c.bf16 %v4555_v63, %v4552_v10  ;;  %v2304_v10 = vpack.c.bf16 %v4571_v19, %v4568_v17 }
 0x720   : > { %2364 = vmatpush.bf16.xpose.msrb.mxu3 %v2352_v44  ;;  %2333 = vmatpush.bf16.msrb.mxu2 %v4610_v53 }
 0x723   : > { %3493 = vmatmul.msk.bf16.vlgmr.msrb.gmra.mxu2 %vm1211_vm0, %v2303_v1 }
 0x733   : > { %3494 = vmatmul.msk.bf16.gmra.mxu2 %vm1211_vm0, %v2304_v10 }
 0x7a0   : > { %v2154_v2 = vpop.f32.mrf.mxu3 }
 0x7a1   : > { %v2158_v6 = vadd.f32 %v2154_v2, %v2069_v57 }
 0x7a3   : > { %v2163_v42 = vadd.f32 %v3682_v49, %v2158_v6  ;;  %v2480_v49 = vpop.permute.xlu0 %2479 }
 0x7a4   : > { %v2488_v2 = vsel %vm1342_vm1, %v2480_v49, 0 }
 0x7a5   : > { %v2166_v7 = vsel %vm1211_vm0, %v2163_v42, 0.0  ;;  %2496 = vmatpush.bf16.xpose.msra.mxu1 %v2488_v2 }
 0x7a6   : > { %2167 = vadd.xlane.f32.xlu1 %v2166_v7 }
 0x7a8   : > { %v2156_v8 = vpop.f32.mrf.mxu3 }
 0x7ab   : > { %v2412_v7 = vpop.permute.xlu0 %2411 }
 0x7ac   : > { %v2420_v8 = vsel %vm1342_vm1, %v2412_v7, 0 }
 0x7ad   : > { %2428 = vmatpush.bf16.xpose.msra.mxu3 %v2420_v8 }
 0x7b3   : > { %v2410_v11 = vpop.permute.xlu0 %2409 }
 0x7b4   : > { %v2417_v0 = vsel %vm1342_vm1, %v2410_v11, 0 }
 0x7b5   : > { %2429 = vmatpush.bf16.xpose.msra.mxu3 %v2417_v0 }
 0x7bf   : > { %2477 = vrot.lane.b32.xlu1 %v2346_v39, %s3927_s0  ;;  %v4671_v39 = vld [vmem:[%s4992_s18] ss:$0 sm:$0xff]  ;;  %s5001_s18 = sld [smem:[#allocation25_spill]] }
 0x819   : > { %v2168_v30 = vpop.xlane.xlu1 %2167 }
 0x81a   : > { %v2169_v31 = vmul.f32 %v2168_v30, %v4530_v36  ;;  %v2612_v30 = vld [vmem:[%s4213_s2 + $0x28] sm:$0xff] }
 0x81c   : > { %v2170_v32 = vsub.f32 %v2163_v42, %v2169_v31  ;;  %v2615_v31 = vadd.f32 %v2611_v28, %v4643_v5  ;;  %v2646_v28 = vpack.c.bf16 %v4646_v27, %v4643_v5 }
 0x81e   : > { %v2171_v33 = vmul.f32 %v2170_v32, %v2170_v32 }
 0x820   : > { %v2172_v34 = vsel %vm1211_vm0, %v2171_v33, 0.0 }
 0x821   : > { %2173 = vadd.xlane.f32.xlu2 %v2172_v34  ;;  %v2335_v34 = vpop.f32.mrf.mxu2 }
 0x829   : > { %v2337_v46 = vpop.f32.mrf.mxu2 }
 0x831   : > { %v2478_v6 = vpop.permute.xlu1 %2477 }
 0x832   : > { %v2485_v42 = vsel %vm1342_vm1, %v2478_v6, 0 }
 0x833   : > { %2497 = vmatpush.bf16.xpose.msra.mxu1 %v2485_v42 }
 0x83b   : > { %2633 = vmatpush.bf16.msrb.mxu1 %v4549_v9 }
 0x83f   : > { %2634 = vmatpush.bf16.msrb.mxu1 %v4561_v14  ;;  %v2546_v14 = vpop.permute.xlu0 %2545 }
 0x840   : > { %v2554_v17 = vsel %vm1342_vm1, %v2546_v14, 0 }
 0x847   : > { %v2544_v19 = vpop.permute.xlu0 %2543 }
 0x848   : > { %v2551_v20 = vsel %vm1342_vm1, %v2544_v19, 0 }
 0x894   : > { %v2174_v21 = vpop.xlane.xlu2 %2173 }
 0x895   : > { %v2175_v37 = vmul.f32 %v2174_v21, %v4530_v36  ;;  %v2613_v21 = vld [vmem:[%s4213_s2 + $0x30] sm:$0xff] }
 0x897   : > { %v2176_v41 = vadd.f32 1e-05, %v2175_v37  ;;  %v2614_v37 = vld [vmem:[%s4213_s2 + $0x38] sm:$0xff]  ;;  %s4993_s2 = smov 8  }
 0x898   : > { %v2618_v45 = vadd.f32 %v2614_v37, %v4657_v35 }
 0x899   : > { %3741 = vrsqrt.f32 %v2176_v41  ;;  %vm2183_vm13 = vweird.f32 %v2176_v41 }
 0x89f   : > { %v3742_v47 = vpop.eup %3741 }
 0x8a0   : > { %v2178_v38 = vmul.f32 %v3742_v47, %v2176_v41  ;;  %vm2184_vm12 = vweird.f32 %v3742_v47  ;;  %v2617_v41 = vadd.f32 %v2613_v21, %v4654_v18 }
 0x8a1   : > { %vm2185_vm14 = vmor %vm2183_vm13, %vm2184_vm12 }
 0x8a2   : > { %v2179_v29 = vmul.f32 %v3742_v47, %v2178_v38  ;;  %v2620_v24 = vpack.c.bf16 %v2618_v45, %v2617_v41 }
 0x8a4   : > { %v2180_v50 = vmul.f32 0.5, %v2179_v29 }
 0x8a6   : > { %v2181_v25 = vsub.f32 1.5, %v2180_v50 }
 0x8a8   : > { %v2182_v51 = vmul.f32 %v3742_v47, %v2181_v25  ;;  %v2336_v25 = vadd.f32 %v4671_v39, %v2335_v34 }
 0x8aa   : > { %v2186_v54 = vsel %vm2185_vm14, %v3742_v47, %v2182_v51  ;;  %v2340_v47 = vpop.f32.mrf.mxu2  ;;  %v2338_v51 = vadd.f32 %v4671_v39, %v2337_v46 }
 0x8ab   : > { %v2187_v60 = vmul.f32 %v2186_v54, %v2170_v32  ;;  %v2616_v32 = vadd.f32 %v2612_v30, %v4646_v27  ;;  %v2341_v50 = vadd.f32 %v4671_v39, %v2340_v47 }
 0x8ad   : > { %v2191_v58 = vmul.f32 %v3683_v52, %v2187_v60  ;;  %v2619_v33 = vpack.c.bf16 %v2616_v32, %v2615_v31  ;;  %v2385_v60 = vpack.c.bf16 %v2338_v51, %v2336_v25  ;;  %v2647_v32 = vpack.c.bf16 %v4657_v35, %v4654_v18 }
 0x8af   : > { %v4593_v57 = vadd.f32 %v3684_v22, %v2191_v58 }
 0x8b1   : > { %v2196_v3 = vadd.f32 %v3789_v62, %v4593_v57 }
 0x8b2   : > { %v2342_v12 = vpop.f32.mrf.mxu2 }
 0x8b3   : > { %v2201_v48 = vpack.c.bf16 %v2196_v3, %v2196_v3  ;;  %v2343_v52 = vadd.f32 %v4671_v39, %v2342_v12 }
 0x8b5   : > { %3474 = vmatmul.msk.bf16.vlgmr.msrb.gmra.mxu0 %vm1211_vm0, %v2201_v48  ;;  %v2386_v54 = vpack.c.bf16 %v2343_v52, %v2341_v50 }
 0x8b7   : > { %2396 = vmatpush.bf16.msra.mxu0 %v2386_v54 }
 0x8bb   : > { %2397 = vmatpush.bf16.msra.mxu0 %v2385_v60 }
 0x932   : > { %v2230_v63 = vpop.f32.mrf.mxu0 }
 0x933   : > { %v2231_v56 = vadd.f32 %v3686_v13, %v2230_v63 }
 0x935   : > { %v4625_v15 = vpack.c.bf16 %v2231_v56, %v2231_v56 }
 0x937   : > { %2541 = vrot.lane.b32.xlu0 %v4625_v15, %s3929_s7  ;;  %2405 = vrot.lane.b32.xlu1 %v4625_v15, %s3928_s4 }
 0x938   : > { %2475 = vrot.lane.b32.xlu2 %v4625_v15, %s3927_s0  ;;  %3495 = vmatmul.msk.bf16.vlgmr.msrb.gmra.mxu3 %vm1342_vm1, %v4625_v15 }
 0x939   : > { %2562 = vmatpush.bf16.xpose.msrb.mxu3 %v2554_v17 }
 0x93a   : > { %v2232_v9 = vpop.f32.mrf.mxu0 }
 0x93f   : > { %2520 = vrot.lane.b32.xlu1 %v2386_v54, %s3927_s0 }
 0x941   : > { %2563 = vmatpush.bf16.xpose.msrb.mxu3 %v2551_v20 }
 0x947   : > { %2518 = vrot.lane.b32.xlu1 %v2385_v60, %s3927_s0 }
 0x992   : > { %v4638_v23 = vpop.permute.xlu2 %2475 }
 0x993   : > { %3499 = vmatmul.msk.bf16.vlgmr.msra.gmra.mxu1 %vm1342_vm1, %v4638_v23 }
 0x9a3   : > { %3503 = vmatmul.msk.bf16.vlgmr.msrb.gmra.mxu1 %vm1211_vm0, %v2619_v33 }
 0x9a9   : > { %v4661_v40 = vpop.permute.xlu1 %2405  ;;  %v4668_v38 = vpop.permute.xlu0 %2541 }
 0x9aa   : > { %3497 = vmatmul.msk.bf16.vlgmr.msra.gmra.mxu3 %vm1342_vm1, %v4661_v40 }
 0x9b1   : > { %v2521_v49 = vpop.permute.xlu1 %2520 }
 0x9b2   : > { %2533 = vmatpush.bf16.msra.mxu2 %v2521_v49 }
 0x9b3   : > { %3504 = vmatmul.msk.bf16.gmra.mxu1 %vm1211_vm0, %v2620_v24 }
 0x9b9   : > { %v2519_v56 = vpop.permute.xlu1 %2518 }
 0x9ba   : > { %3501 = vmatmul.msk.bf16.vlgmr.msrb.gmra.mxu3 %vm1342_vm1, %v4668_v38  ;;  %2534 = vmatpush.bf16.msra.mxu2 %v2519_v56 }
 0x9bb   : > { %v4675_v29 = vpop.f32.mrf.mxu3 }
 0x9bc   : > { %v2370_v11 = vsel %vm1211_vm0, %v4675_v29, -inf }
 0x9be   : > { %2660 = vmatpush.bf16.msrb.mxu2 %v4606_v4 }
 0x9c2   : > { %2661 = vmatpush.bf16.msrb.mxu2 %v4610_v53 }
 0x9c3   : > { %v2368_v22 = vpop.f32.mrf.mxu3 }
 0xa10   : > { %v2499_v55 = vpop.f32.mrf.mxu1 }
 0xa11   : > { %v2503_v58 = vsel %vm1211_vm0, %v2499_v55, -inf }
 0xa12   : > { %2504 = vmax.xlane.f32.xlu2 %v2503_v58 }
 0xa18   : > { %v2501_v26 = vpop.f32.mrf.mxu1 }
 0xa20   : > { %v2636_v59 = vpop.f32.mrf.mxu1 }
 0xa21   : > { %v2637_v61 = vadd.f32 %v4584_v43, %v2636_v59 }
 0xa28   : > { %v2638_v62 = vpop.f32.mrf.mxu1 }
 0xa29   : > { %v2639_v3 = vadd.f32 %v4584_v43, %v2638_v62 }
 0xa2b   : > { %v2673_v16 = vpack.c.bf16 %v2639_v3, %v2637_v61 }
 0xa2d   : > { %2860 = vrot.lane.b32.xlu2 %v2673_v16, %s3929_s7  ;;  %2732 = vrot.lane.b32.xlu0 %v2673_v16, %s3928_s4  ;;  %v4688_v48 = vpop.f32.mrf.mxu3  ;;  %v2676_v63 = vsel %vm1342_vm1, %v2673_v16, 0 }
 0xa2e   : > { %v2435_v0 = vsel %vm1211_vm0, %v4688_v48, -inf }
 0xa30   : > { %v2641_v44 = vpop.f32.mrf.mxu1 }
 0xa31   : > { %v2642_v2 = vadd.f32 %v4584_v43, %v2641_v44 }
 0xa35   : > { %2454 = vrot.lane.b32.xlu2 %v2386_v54, %s3928_s4  ;;  %v2433_v1 = vpop.f32.mrf.mxu3 }
 0xa38   : > { %v2643_v6 = vpop.f32.mrf.mxu1 }
 0xa39   : > { %v2644_v42 = vadd.f32 %v4584_v43, %v2643_v6 }
 0xa3b   : > { %v2674_v7 = vpack.c.bf16 %v2644_v42, %v2642_v2 }
 0xa3d   : > { %2734 = vrot.lane.b32.xlu1 %v2674_v7, %s3928_s4  ;;  %2452 = vrot.lane.b32.xlu2 %v2385_v60, %s3928_s4  ;;  %v4695_v8 = vpop.f32.mrf.mxu3  ;;  %v2679_v13 = vsel %vm1342_vm1, %v2674_v7, 0 }
 0xa3e   : > { %2862 = vrot.lane.b32.xlu0 %v2674_v7, %s3929_s7  ;;  %2687 = vmatpush.bf16.xpose.msra.mxu3 %v2679_v13  ;;  %v2569_v43 = vsel %vm1211_vm0, %v4695_v8, -inf }
 0xa45   : > { %2799 = vrot.lane.b32.xlu1 %v2674_v7, %s3927_s0  ;;  %v2567_v10 = vpop.f32.mrf.mxu3 }
 0xa46   : > { %2688 = vmatpush.bf16.xpose.msra.mxu3 %v2676_v63 }
 0xa4d   : > { %2797 = vrot.lane.b32.xlu1 %v2673_v16, %s3927_s0  ;;  %3507 = vmatmul.msk.bf16.vlgmr.msra.gmra.mxu3 %vm1342_vm1, %v4625_v15 }
 0xa66   : > { %2570 = vmax.xlane.f32.xlu2 %v2569_v43 }
 0xa68   : > { %2371 = vmax.xlane.f32.xlu0 %v2370_v11 }
 0xa77   : > { %2436 = vmax.xlane.f32.xlu1 %v2435_v0 }
 0xa7c   : > { %2586 = vrot.lane.b32.xlu0 %v2386_v54, %s3929_s7 }
 0xa85   : > { %v4713_v4 = vpop.xlane.xlu2 %2504 }
 0xa86   : > { %v2509_v15 = vsub.f32 %v2499_v55, %v4713_v4 }
 0xa88   : > { %v2510_v9 = vmul.f32 1.442695, %v2509_v15 }
 0xa8a   : > { %3743 = vpow2.f32 %v2510_v9 }
 0xa8d   : > { %v2861_v53 = vpop.permute.xlu2 %2860 }
 0xa8e   : > { %v2865_v18 = vsel %vm1342_vm1, %v2861_v53, 0 }
 0xa90   : > { %v4716_v14 = vpop.eup %3743  ;;  %2584 = vrot.lane.b32.xlu1 %v2385_v60, %s3929_s7 }
 0xa91   : > { %v2517_v17 = vpack.c.bf16 %v4716_v14, %v4716_v14 }
 0xa93   : > { %3500 = vmatmul.msk.bf16.vlgmr.msra.gmra.mxu2 %vm1211_vm0, %v2517_v17 }
 0xa95   : > { %v2455_v19 = vpop.permute.xlu2 %2454 }
 0xa96   : > { %2467 = vmatpush.bf16.msrb.mxu0 %v2455_v19 }
 0xa9d   : > { %v2453_v20 = vpop.permute.xlu2 %2452 }
 0xa9e   : > { %2468 = vmatpush.bf16.msrb.mxu0 %v2453_v20 }
 0xa9f   : > { %v2733_v30 = vpop.permute.xlu0 %2732 }
 0xaa0   : > { %v2737_v41 = vsel %vm1342_vm1, %v2733_v30, 0 }
 0xaa3   : > { %3505 = vmatmul.msk.bf16.vlgmr.msrb.gmra.mxu2 %vm1211_vm0, %v2646_v28 }
 0xaaf   : > { %v2735_v31 = vpop.permute.xlu1 %2734 }
 0xab0   : > { %v2740_v33 = vsel %vm1342_vm1, %v2735_v31, 0  ;;  %v2863_v34 = vpop.permute.xlu0 %2862 }
 0xab1   : > { %2748 = vmatpush.bf16.xpose.msrb.mxu3 %v2740_v33  ;;  %v2868_v21 = vsel %vm1342_vm1, %v2863_v34, 0 }
 0xab3   : > { %3506 = vmatmul.msk.bf16.gmra.mxu2 %vm1211_vm0, %v2647_v32 }
 0xab7   : > { %v2800_v37 = vpop.permute.xlu1 %2799 }
 0xab8   : > { %v2805_v5 = vsel %vm1342_vm1, %v2800_v37, 0 }
 0xab9   : > { %2749 = vmatpush.bf16.xpose.msrb.mxu3 %v2737_v41  ;;  %2813 = vmatpush.bf16.xpose.msra.mxu1 %v2805_v5 }
 0xabf   : > { %v2798_v27 = vpop.permute.xlu1 %2797 }
 0xac0   : > { %v2802_v45 = vsel %vm1342_vm1, %v2798_v27, 0  ;;  %3509 = vmatmul.msk.bf16.vlgmr.msrb.gmra.mxu3 %vm1342_vm1, %v4661_v40 }
 0xac1   : > { %2876 = vmatpush.bf16.xpose.msra.mxu3 %v2868_v21  ;;  %2814 = vmatpush.bf16.xpose.msra.mxu1 %v2802_v45 }
 0xac8   : > { %3511 = vmatmul.msk.bf16.vlgmr.msra.gmra.mxu1 %vm1342_vm1, %v4638_v23 }
 0xac9   : > { %2877 = vmatpush.bf16.xpose.msra.mxu3 %v2865_v18 }
 0xad0   : > { %v2690_v35 = vpop.f32.mrf.mxu3  ;;  %3513 = vmatmul.msk.bf16.vlgmr.msra.gmra.mxu3 %vm1342_vm1, %v4668_v38 }
 0xad1   : > { %v2694_v46 = vsel %vm1211_vm0, %v2690_v35, -inf }
 0xad2   : > { %2695 = vmax.xlane.f32.xlu0 %v2694_v46 }
 0xad8   : > { %v2692_v24 = vpop.f32.mrf.mxu3 }
 0xad9   : > { %v4754_v54 = vpop.xlane.xlu2 %2570 }
 0xada   : > { %v2575_v22 = vsub.f32 %v4695_v8, %v4754_v54 }
 0xadb   : > { %v4741_v47 = vpop.xlane.xlu0 %2371 }
 0xadc   : > { %v2376_v40 = vsub.f32 %v4675_v29, %v4741_v47  ;;  %v2576_v55 = vmul.f32 1.442695, %v2575_v22  ;;  %v2373_v19 = vsub.f32 -inf, %v4741_v47 }
 0xade   : > { %v2377_v50 = vmul.f32 1.442695, %v2376_v40  ;;  %v2374_v20 = vmul.f32 1.442695, %v2373_v19  ;;  %v2513_v40 = vsel %vm1211_vm0, %v4716_v14, 0.0 }
 0xae0   : > { %3745 = vpow2.f32 %v2377_v50 }
 0xae6   : > { %v4745_v12 = vpop.eup %3745 }
 0xae7   : > { %v2384_v23 = vpack.c.bf16 %v4745_v12, %v4745_v12 }
 0xae9   : > { %3496 = vmatmul.msk.bf16.vlgmr.msra.gmra.mxu0 %vm1211_vm0, %v2384_v23 }
 0xaea   : > { %v4750_v25 = vpop.xlane.xlu1 %2436 }
 0xaeb   : > { %v2441_v38 = vsub.f32 %v4688_v48, %v4750_v25 }
 0xaed   : > { %v2442_v51 = vmul.f32 1.442695, %v2441_v38 }
 0xaee   : > { %v2587_v52 = vpop.permute.xlu0 %2586 }
 0xaef   : > { %3747 = vpow2.f32 %v2442_v51  ;;  %2599 = vmatpush.bf16.msra.mxu0 %v2587_v52  ;;  %v2438_v51 = vsub.f32 -inf, %v4750_v25 }
 0xaf0   : > { %3749 = vpow2.f32 %v2576_v55 }
 0xaf1   : > { %v2439_v52 = vmul.f32 1.442695, %v2438_v51 }
 0xaf5   : > { %v4756_v29 = vpop.eup %3747 }
 0xaf6   : > { %v2449_v60 = vpack.c.bf16 %v4756_v29, %v4756_v29  ;;  %v3750_v26 = vpop.eup %3749  ;;  %v2445_v45 = vsel %vm1211_vm0, %v4756_v29, 0.0 }
 0xaf7   : > { %v2583_v59 = vpack.c.bf16 %v3750_v26, %v3750_v26  ;;  %v2579_v18 = vsel %vm1211_vm0, %v3750_v26, 0.0 }
 0xaf9   : > { %3498 = vmatmul.msk.bf16.vlgmr.msrb.gmra.mxu0 %vm1211_vm0, %v2449_v60 }
 0xb02   : > { %v2585_v58 = vpop.permute.xlu1 %2584 }
 0xb03   : > { %2600 = vmatpush.bf16.msra.mxu0 %v2585_v58 }
 0xb09   : > { %3502 = vmatmul.msk.bf16.vlgmr.msra.gmra.mxu0 %vm1211_vm0, %v2583_v59 }
 0xb16   : > { %v4764_v61 = vpop.f32.mrf.mxu2 }
 0xb1e   : > { %v2538_v62 = vpop.f32.mrf.mxu2 }
 0xb26   : > { %v2663_v3 = vpop.f32.mrf.mxu2 }
 0xb27   : > { %v2664_v48 = vadd.f32 %v4671_v39, %v2663_v3  ;;  %v2572_v3 = vsub.f32 -inf, %v4754_v54 }
 0xb2e   : > { %v2665_v16 = vpop.f32.mrf.mxu2 }
 0xb2f   : > { %v2666_v44 = vadd.f32 %v4671_v39, %v2665_v16 }
 0xb31   : > { %v2711_v1 = vpack.c.bf16 %v2666_v44, %v2664_v48 }
 0xb33   : > { %2774 = vrot.lane.b32.xlu0 %v2711_v1, %s3928_s4 }
 0xb36   : > { %v2668_v49 = vpop.f32.mrf.mxu2 }
 0xb37   : > { %v2669_v6 = vadd.f32 %v4671_v39, %v2668_v49 }
 0xb3b   : > { %2837 = vrot.lane.b32.xlu0 %v2711_v1, %s3927_s0 }
 0xb3e   : > { %v2670_v2 = vpop.f32.mrf.mxu2 }
 0xb3f   : > { %v2671_v42 = vadd.f32 %v4671_v39, %v2670_v2 }
 0xb41   : > { %v2712_v7 = vpack.c.bf16 %v2671_v42, %v2669_v6 }
 0xb43   : > { %2722 = vmatpush.bf16.msrb.mxu0 %v2712_v7  ;;  %2776 = vrot.lane.b32.xlu2 %v2712_v7, %s3928_s4  ;;  %v2751_v8 = vpop.f32.mrf.mxu3  ;;  %s4996_s4 = sld [smem:[#allocation24_spill]] }
 0xb44   : > { %2902 = vrot.lane.b32.xlu0 %v2712_v7, %s3929_s7  ;;  %v2755_v13 = vsel %vm1211_vm0, %v2751_v8, -inf }
 0xb45   : > { %v4775_v10 = vpop.f32.mrf.mxu1  ;;  %v2696_v63 = vpop.xlane.xlu0 %2695  ;;  %2756 = vmax.xlane.f32.xlu1 %v2755_v13 }
 0xb46   : > { %v2697_v56 = vmax.f32 %v4741_v47, %v2696_v63  ;;  %v2820_v5 = vsel %vm1211_vm0, %v4775_v10, -inf }
 0xb47   : > { %2723 = vmatpush.bf16.msrb.mxu0 %v2711_v1 }
 0xb48   : > { %v2701_v43 = vsub.f32 %v2690_v35, %v2697_v56  ;;  %v2698_v28 = vsub.f32 %v4741_v47, %v2697_v56 }
 0xb4a   : > { %v2702_v11 = vmul.f32 1.442695, %v2701_v43  ;;  %v2699_v31 = vmul.f32 1.442695, %v2698_v28 }
 0xb4b   : > { %v2753_v0 = vpop.f32.mrf.mxu3 }
 0xb4c   : > { %2900 = vrot.lane.b32.xlu0 %v2711_v1, %s3929_s7  ;;  %3751 = vpow2.f32 %v2702_v11  ;;  %v2573_v1 = vmul.f32 1.442695, %v2572_v3  ;;  %s4997_s7 = sld [smem:[#allocation27_spill]] }
 0xb4d   : > { %v2818_v39 = vpop.f32.mrf.mxu1  ;;  %3753 = vpow2.f32 %v2374_v20 }
 0xb4e   : > { %3755 = vpow2.f32 %v2699_v31 }
 0xb4f   : > { %3757 = vpow2.f32 %v2439_v52 }
 0xb52   : > { %v4779_v15 = vpop.eup %3751  ;;  %s4998_s22 = smov %s4997_s7 }
 0xb53   : > { %v4781_v9 = vpop.f32.mrf.mxu3  ;;  %v2710_v53 = vpack.c.bf16 %v4779_v15, %v4779_v15  ;;  %v3754_v32 = vpop.eup %3753 }
 0xb54   : > { %v2883_v17 = vsel %vm1211_vm0, %v4781_v9, -inf  ;;  %v4790_v33 = vmul.f32 0.0, %v3754_v32  ;;  %v4793_v37 = vpop.eup %3755 }
 0xb55   : > { %2884 = vmax.xlane.f32.xlu1 %v2883_v17  ;;  %3508 = vmatmul.msk.bf16.vlgmr.msrb.gmra.mxu0 %vm1211_vm0, %v2710_v53  ;;  %v3758_v62 = vpop.eup %3757 }
 0xb56   : > { %v4808_v16 = vmul.f32 0.0, %v3758_v62 }
 0xb5b   : > { %v2881_v30 = vpop.f32.mrf.mxu3 }
 0xb66   : > { %v2399_v34 = vpop.f32.mrf.mxu0 }
 0xb67   : > { %v2403_v21 = vadd.f32 %v2399_v34, %v4790_v33 }
 0xb69   : > { %v2709_v41 = vmul.f32 %v4793_v37, %v2403_v21 }
 0xb6c   : > { %2821 = vmax.xlane.f32.xlu2 %v2820_v5 }
 0xb6e   : > { %v2401_v27 = vpop.f32.mrf.mxu0  ;;  %2839 = vrot.lane.b32.xlu1 %v2712_v7, %s3927_s0  ;;  %s4995_s0 = sld [smem:[#allocation23_spill]] }
 0xb74   : > { %2446 = vadd.xlane.f32.xlu2 %v2445_v45 }
 0xb76   : > { %v2470_v35 = vpop.f32.mrf.mxu0  ;;  %2580 = vadd.xlane.f32.xlu0 %v2579_v18 }
 0xb77   : > { %v2474_v48 = vadd.f32 %v2470_v35, %v4808_v16 }
 0xb7e   : > { %v2472_v46 = vpop.f32.mrf.mxu0 }
 0xb86   : > { %v2602_v24 = vpop.f32.mrf.mxu0 }
 0xb8e   : > { %v2604_v47 = vpop.f32.mrf.mxu0 }
 0xb98   : > { %2514 = vadd.xlane.f32.xlu1 %v2513_v40 }
 0xb9d   : > { %v2777_v50 = vpop.permute.xlu2 %2776 }
 0xb9e   : > { %2789 = vmatpush.bf16.msra.mxu0 %v2777_v50  ;;  %v2380_v50 = vsel %vm1211_vm0, %v4745_v12, 0.0 }
 0xba5   : > { %v2775_v23 = vpop.permute.xlu0 %2774 }
 0xba6   : > { %2790 = vmatpush.bf16.msra.mxu0 %v2775_v23 }
 0xbad   : > { %v2838_v38 = vpop.permute.xlu0 %2837 }
 0xbb6   : > { %v2903_v29 = vpop.permute.xlu0 %2902 }
 0xbb7   : > { %2915 = vmatpush.bf16.msrb.mxu0 %v2903_v29 }
 0xbb8   : > { %v2757_v22 = vpop.xlane.xlu1 %2756 }
 0xbb9   : > { %v2758_v60 = vmax.f32 %v4750_v25, %v2757_v22 }
 0xbbb   : > { %v2759_v55 = vsub.f32 %v4750_v25, %v2758_v60  ;;  %v2762_v58 = vsub.f32 %v2751_v8, %v2758_v60 }
 0xbbd   : > { %v2760_v26 = vmul.f32 1.442695, %v2759_v55  ;;  %v2763_v14 = vmul.f32 1.442695, %v2762_v58 }
 0xbbe   : > { %v2901_v59 = vpop.permute.xlu0 %2900 }
 0xbbf   : > { %3759 = vpow2.f32 %v2760_v26  ;;  %2916 = vmatpush.bf16.msrb.mxu0 %v2901_v59 }
 0xbc0   : > { %3761 = vpow2.f32 %v2763_v14 }
 0xbc1   : > { %3763 = vpow2.f32 %v2573_v1 }
 0xbc5   : > { %v4811_v44 = vpop.eup %3759 }
 0xbc6   : > { %v3762_v49 = vpop.eup %3761  ;;  %v4814_v25 = vmul.f32 %v4811_v44, %v2474_v48 }
 0xbc7   : > { %v2771_v2 = vpack.c.bf16 %v3762_v49, %v3762_v49  ;;  %v3764_v56 = vpop.eup %3763 }
 0xbc8   : > { %v2885_v6 = vpop.xlane.xlu1 %2884  ;;  %v2578_v43 = vmul.f32 0.0, %v3764_v56 }
 0xbc9   : > { %3510 = vmatmul.msk.bf16.vlgmr.msra.gmra.mxu0 %vm1211_vm0, %v2771_v2  ;;  %v2886_v42 = vmax.f32 %v4754_v54, %v2885_v6 }
 0xbca   : > { %v2606_v0 = vadd.f32 %v2602_v24, %v2578_v43 }
 0xbcb   : > { %v2887_v7 = vsub.f32 %v4754_v54, %v2886_v42  ;;  %v2890_v8 = vsub.f32 %v4781_v9, %v2886_v42  ;;  %v2506_v54 = vsub.f32 -inf, %v4713_v4 }
 0xbcd   : > { %v2888_v13 = vmul.f32 1.442695, %v2887_v7  ;;  %v2891_v63 = vmul.f32 1.442695, %v2890_v8  ;;  %v2507_v28 = vmul.f32 1.442695, %v2506_v54 }
 0xbcf   : > { %3765 = vpow2.f32 %v2888_v13 }
 0xbd0   : > { %3767 = vpow2.f32 %v2891_v63 }
 0xbd1   : > { %3769 = vpow2.f32 %v2507_v28 }
 0xbd2   : > { %v2725_v11 = vpop.f32.mrf.mxu0 }
 0xbd3   : > { %v4820_v39 = vadd.f32 %v2725_v11, %v2709_v41 }
 0xbd5   : > { %v4822_v53 = vpop.eup %3765 }
 0xbd6   : > { %v3768_v17 = vpop.eup %3767  ;;  %v4825_v19 = vmul.f32 %v4822_v53, %v2606_v0 }
 0xbd7   : > { %v2899_v20 = vpack.c.bf16 %v3768_v17, %v3768_v17  ;;  %v3770_v27 = vpop.eup %3769 }
 0xbd8   : > { %v2512_v45 = vmul.f32 0.0, %v3770_v27 }
 0xbd9   : > { %3514 = vmatmul.msk.bf16.vlgmr.msrb.gmra.mxu0 %vm1211_vm0, %v2899_v20 }
 0xbda   : > { %v2727_v9 = vpop.f32.mrf.mxu0  ;;  %v2540_v18 = vadd.f32 %v4764_v61, %v2512_v45  ;;  %v2705_v61 = vsel %vm1211_vm0, %v4779_v15, 0.0 }
 0xbdf   : > { %v2822_v30 = vpop.xlane.xlu2 %2821 }
 0xbe0   : > { %v2823_v31 = vmax.f32 %v4713_v4, %v2822_v30  ;;  %v2840_v32 = vpop.permute.xlu1 %2839 }
 0xbe1   : > { %2852 = vmatpush.bf16.msra.mxu2 %v2840_v32 }
 0xbe2   : > { %v2824_v34 = vsub.f32 %v4713_v4, %v2823_v31  ;;  %v2827_v21 = vsub.f32 %v4775_v10, %v2823_v31  ;;  %v2766_v4 = vsel %vm1211_vm0, %v3762_v49, 0.0  ;;  %v2894_v10 = vsel %vm1211_vm0, %v3768_v17, 0.0 }
 0xbe4   : > { %v2825_v41 = vmul.f32 1.442695, %v2824_v34  ;;  %v2828_v5 = vmul.f32 1.442695, %v2827_v21 }
 0xbe5   : > { %2853 = vmatpush.bf16.msra.mxu2 %v2838_v38 }
 0xbe6   : > { %3771 = vpow2.f32 %v2825_v41 }
 0xbe7   : > { %3773 = vpow2.f32 %v2828_v5  ;;  %v2447_v52 = vpop.xlane.xlu2 %2446 }
 0xbe8   : > { %v2448_v14 = vadd.f32 %v2447_v52, %v4808_v16 }
 0xbe9   : > { %v2581_v59 = vpop.xlane.xlu0 %2580 }
 0xbea   : > { %v2765_v12 = vmul.f32 %v4811_v44, %v2448_v14  ;;  %v2582_v1 = vadd.f32 %v2581_v59, %v2578_v43  ;;  %v3576_v59 = vld [vmem:[%s4995_s0 + $0x8] sm:$0xff] }
 0xbeb   : > { %3025 = vmatpush.bf16.msrb.mxu1 %v3576_v59 }
 0xbec   : > { %v3772_v35 = vpop.eup %3771  ;;  %v2893_v7 = vmul.f32 %v4822_v53, %v2582_v1 }
 0xbed   : > { %v3774_v46 = vpop.eup %3773  ;;  %v2835_v24 = vmul.f32 %v3772_v35, %v2540_v18 }
 0xbee   : > { %v2836_v47 = vpack.c.bf16 %v3774_v46, %v3774_v46  ;;  %v2831_v40 = vsel %vm1211_vm0, %v3774_v46, 0.0 }
 0xbef   : > { %2832 = vadd.xlane.f32.xlu2 %v2831_v40 }
 0xbf0   : > { %3512 = vmatmul.msk.bf16.vlgmr.msra.gmra.mxu2 %vm1211_vm0, %v2836_v47 }
 0xbf7   : > { %2767 = vadd.xlane.f32.xlu2 %v2766_v4 }
 0xbff   : > { %2895 = vadd.xlane.f32.xlu2 %v2894_v10 }
 0xc07   : > { %2381 = vadd.xlane.f32.xlu2 %v2380_v50 }
 0xc0b   : > { %v2515_v29 = vpop.xlane.xlu1 %2514 }
 0xc0c   : > { %v2516_v22 = vadd.f32 %v2515_v29, %v2512_v45 }
 0xc0e   : > { %v2830_v55 = vmul.f32 %v3772_v35, %v2516_v22 }
 0xc0f   : > { %2706 = vadd.xlane.f32.xlu2 %v2705_v61 }
 0xc46   : > { %v2792_v23 = vpop.f32.mrf.mxu0 }
 0xc47   : > { %v2796_v41 = vadd.f32 %v2792_v23, %v4814_v25 }
 0xc4e   : > { %v2794_v38 = vpop.f32.mrf.mxu0 }
 0xc56   : > { %v4841_v51 = vpop.f32.mrf.mxu0 }
 0xc5e   : > { %v2920_v60 = vpop.f32.mrf.mxu0 }
 0xc62   : > { %v2833_v58 = vpop.xlane.xlu2 %2832 }
 0xc63   : > { %v2834_v26 = vadd.f32 %v2833_v58, %v2830_v55 }
 0xc65   : > { %3775 = vrcp.f32 %v2834_v26  ;;  %v2970_v2 = vand.u32 2147483648, %v2834_v26  ;;  %v2968_v42 = vand.u32 2147483647, %v2834_v26  ;;  %vm2964_vm2 = vweird.f32 %v2834_v26 }
 0xc67   : > { %v2971_v56 = vor.u32 1.1754944e-38, %v2970_v2  ;;  %vm2969_vm7 = vcmp.eq.f32.partialorder %v2968_v42, 8.507059e+37 }
 0xc6a   : > { %v2768_v62 = vpop.xlane.xlu2 %2767 }
 0xc6b   : > { %v3776_v15 = vpop.eup %3775  ;;  %v2769_v3 = vadd.f32 %v2768_v62, %v2765_v12  ;;  %v3575_v62 = vld [vmem:[%s4995_s0] sm:$0xff] }
 0xc6c   : > { %v2960_v48 = vmul.f32 %v3776_v15, %v2834_v26  ;;  %vm2965_vm15 = vweird.f32 %v3776_v15  ;;  %3026 = vmatpush.bf16.msrb.mxu1 %v3575_v62 }
 0xc6d   : > { %3777 = vrcp.f32 %v2769_v3  ;;  %vm2966_vm3 = vmor %vm2964_vm2, %vm2965_vm15  ;;  %v2950_v9 = vand.u32 2147483648, %v2769_v3  ;;  %v2948_v28 = vand.u32 2147483647, %v2769_v3  ;;  %vm2944_vm9 = vweird.f32 %v2769_v3 }
 0xc6e   : > { %v2961_v49 = vsub.f32 1.0, %v2960_v48 }
 0xc6f   : > { %v2951_v21 = vor.u32 1.1754944e-38, %v2950_v9  ;;  %vm2949_vm12 = vcmp.eq.f32.partialorder %v2948_v28, 8.507059e+37 }
 0xc70   : > { %v2962_v6 = vmul.f32 %v3776_v15, %v2961_v49 }
 0xc72   : > { %v2896_v8 = vpop.xlane.xlu2 %2895  ;;  %v2963_v13 = vadd.f32 %v3776_v15, %v2962_v6 }
 0xc73   : > { %v3778_v16 = vpop.eup %3777  ;;  %v2897_v63 = vadd.f32 %v2896_v8, %v2893_v7  ;;  %v2855_v44 = vpop.f32.mrf.mxu2 }
 0xc74   : > { %v2940_v11 = vmul.f32 %v3778_v16, %v2769_v3  ;;  %v2859_v0 = vadd.f32 %v2855_v44, %v2835_v24  ;;  %v2967_v17 = vsel %vm2966_vm3, %v3776_v15, %v2963_v13  ;;  %vm2945_vm8 = vweird.f32 %v3778_v16 }
 0xc75   : > { %3779 = vrcp.f32 %v2897_v63  ;;  %v2972_v43 = vsel %vm2969_vm7, %v2971_v56, %v2967_v17  ;;  %vm2946_vm10 = vmor %vm2944_vm9, %vm2945_vm8  ;;  %v2990_v47 = vand.u32 2147483648, %v2897_v63  ;;  %v2988_v4 = vand.u32 2147483647, %v2897_v63 }
 0xc76   : > { %v2941_v20 = vsub.f32 1.0, %v2940_v11  ;;  %v2973_v54 = vmul.f32 %v2972_v43, %v2859_v0  ;;  %vm2984_vm14 = vweird.f32 %v2897_v63  ;;  %v3578_v11 = vld [vmem:[%s4997_s7 + $0x8] sm:$0xff]  ;;  %v3577_v0 = vld [vmem:[%s4998_s22] sm:$0xff]  ;;  %s5005_s7 = sld [smem:[#allocation31_spill]] }
 0xc77   : > { %v2991_v23 = vor.u32 1.1754944e-38, %v2990_v47  ;;  %vm2989_vm2 = vcmp.eq.f32.partialorder %v2988_v4, 8.507059e+37  ;;  %3095 = vmatpush.bf16.msrb.mxu2 %v3578_v11 }
 0xc78   : > { %2975 = vrot.lane.b32.xlu0 %v2973_v54, %s3931_s11  ;;  %v2942_v53 = vmul.f32 %v3778_v16, %v2941_v20  ;;  %s4999_s11 = sld [smem:[#allocation29_spill]] }
 0xc7a   : > { %v2382_v30 = vpop.xlane.xlu2 %2381  ;;  %v2943_v31 = vadd.f32 %v3778_v16, %v2942_v53 }
 0xc7b   : > { %v3780_v32 = vpop.eup %3779  ;;  %v2857_v34 = vpop.f32.mrf.mxu2  ;;  %v2383_v45 = vadd.f32 %v2382_v30, %v4790_v33  ;;  %v2922_v33 = vadd.f32 %v4841_v51, %v4825_v19  ;;  %3096 = vmatpush.bf16.msrb.mxu2 %v3577_v0 }
 0xc7c   : > { %v2980_v5 = vmul.f32 %v3780_v32, %v2897_v63  ;;  %v2947_v27 = vsel %vm2946_vm10, %v3778_v16, %v2943_v31  ;;  %vm2985_vm13 = vweird.f32 %v3780_v32  ;;  %v3689_v34 = vld [vmem:[%s5001_s18] ss:$0 sm:$0xff]  ;;  %s5007_s18 = sld [smem:[#allocation34_spill]] }
 0xc7d   : > { %v2952_v18 = vsel %vm2949_vm12, %v2951_v21, %v2947_v27  ;;  %v2704_v40 = vmul.f32 %v4793_v37, %v2383_v45  ;;  %vm2986_vm15 = vmor %vm2984_vm14, %vm2985_vm13 }
 0xc7e   : > { %v2981_v35 = vsub.f32 1.0, %v2980_v5  ;;  %v2953_v46 = vmul.f32 %v2952_v18, %v2796_v41  ;;  %s5000_s16 = smov %s4999_s11  ;;  %v3582_v17 = vld [vmem:[%s4999_s11 + $0x18] sm:$0xff]  ;;  %s5006_s11 = sld [smem:[#allocation32_spill]] }
 0xc7f   : > { %3143 = vmatpush.bf16.msrb.mxu3 %v3582_v17  ;;  %v3581_v20 = vld [vmem:[%s5000_s16 + $0x10] sm:$0xff] }
 0xc80   : > { %2955 = vrot.lane.b32.xlu1 %v2953_v46, %s4993_s2  ;;  %v2982_v24 = vmul.f32 %v3780_v32, %v2981_v35  ;;  %s5002_s2 = sld [smem:[#allocation26_spill]]  ;;  %v3580_v35 = vld [vmem:[%s5000_s16 + $0x8] sm:$0xff]  ;;  %v3579_v46 = vld [vmem:[%s5000_s16] sm:$0xff] }
 0xc82   : > { %v2707_v10 = vpop.xlane.xlu2 %2706  ;;  %v2983_v50 = vadd.f32 %v3780_v32, %v2982_v24 }
 0xc83   : > { %v2708_v25 = vadd.f32 %v2707_v10, %v2704_v40  ;;  %3144 = vmatpush.bf16.msrb.mxu3 %v3581_v20 }
 0xc84   : > { %v2987_v61 = vsel %vm2986_vm15, %v3780_v32, %v2983_v50 }
 0xc85   : > { %3781 = vrcp.f32 %v2708_v25  ;;  %v2992_v38 = vsel %vm2989_vm2, %v2991_v23, %v2987_v61  ;;  %v2934_v60 = vand.u32 2147483648, %v2708_v25  ;;  %v2932_v58 = vand.u32 2147483647, %v2708_v25 }
 0xc86   : > { %v2993_v52 = vmul.f32 %v2992_v38, %v2922_v33  ;;  %vm2928_vm7 = vweird.f32 %v2708_v25  ;;  %v3690_v41 = vld [vmem:[%s5002_s2] ss:$0 sm:$0xff]  ;;  %s5008_s2 = sld [smem:[#allocation33_spill]] }
 0xc87   : > { %v2935_v14 = vor.u32 1.1754944e-38, %v2934_v60  ;;  %vm2933_vm9 = vcmp.eq.f32.partialorder %v2932_v58, 8.507059e+37  ;;  %3145 = vmatpush.bf16.msrb.mxu3 %v3580_v35 }
 0xc88   : > { %2995 = vrot.lane.b32.xlu2 %v2993_v52, %s4994_s23  ;;  %s5003_s23 = sld [smem:[#allocation28_spill]] }
 0xc8b   : > { %v3782_v29 = vpop.eup %3781  ;;  %3146 = vmatpush.bf16.msrb.mxu3 %v3579_v46 }
 0xc8c   : > { %v2924_v37 = vmul.f32 %v3782_v29, %v2708_v25  ;;  %vm2929_vm3 = vweird.f32 %v3782_v29 }
 0xc8d   : > { %vm2930_vm8 = vmor %vm2928_vm7, %vm2929_vm3 }
 0xc8e   : > { %v2925_v22 = vsub.f32 1.0, %v2924_v37  ;;  %v3691_v24 = vld [vmem:[%s5003_s23] ss:$0 sm:$0xff]  ;;  %s3378_s23 = sshll.u32 %s4209_s26, 3 }
 0xc8f   : > { %s1175_s0 = scalar_lea.vmem [#allocation6], %s3378_s23 }
 0xc90   : > { %v2926_v55 = vmul.f32 %v3782_v29, %v2925_v22  ;;  %s3236_s1 = sshll.u32 %s1175_s0, 4  ;;  %s3237_s1 = int_to_ptr.vmem [resolvable:$true] %s3236_s1 }
 0xc92   : > { %v2927_v26 = vadd.f32 %v3782_v29, %v2926_v55 }
 0xc94   : > { %v2931_v19 = vsel %vm2930_vm8, %v3782_v29, %v2927_v26 }
 0xc95   : > { %v2936_v51 = vsel %vm2933_vm9, %v2935_v14, %v2931_v19 }
 0xc96   : > { %v2937_v12 = vmul.f32 %v2936_v51, %v4820_v39  ;;  %v3688_v39 = vld [vmem:[%s4996_s4] ss:$0 sm:$0xff]  ;;  %s5004_s4 = sld [smem:[#allocation30_spill]] }
 0xc98   : > { %2938 = vst.msk [vmem:[#allocation2] sm:$0xff] %vm1342_vm1, %v2937_v12 }
 0xc9c   : > { %v3692_v25 = vld [vmem:[%s5004_s4] ss:$0 sm:$0xff]  ;;  %s3234_s4 = scalar_lea.hbm %s5007_s18, %s4220_s30  ;;  %s3840_s30 = scalar_lea.hbm %s5007_s18, 16 }
 0xc9d   : > { %s3238_s3 = sshll.u32 %s3234_s4, 4  ;;  %s3239_s3 = int_to_ptr.hbm [resolvable:$true] %s3238_s3 }
 0xc9e   : > { %s3834_s6 = sshra.s32 %s3239_s3, 4  ;;  %s3835_s6 = int_to_ptr.hbm [resolvable:$true] %s3834_s6 }
 0xc9f   : > { %p3841_p1 = scmp.lt.s32.totalorder %s3835_s6, %s5007_s18 }
 0xce2   : > { %v2996_v48 = vpop.permute.xlu2 %2995 }
 0xcea   : > { %v2976_v3 = vpop.permute.xlu0 %2975 }
 0xcf2   : > { %v2956_v15 = vpop.permute.xlu1 %2955 }
 0xcf3   : > { %2958 = vst.msk [vmem:[#allocation2] sm:$0xff] %vm1953_vm4, %v2956_v15 }
 0xcf4   : > { %2978 = vst.msk [vmem:[#allocation2] sm:$0xff] %vm1974_vm5, %v2976_v3  ;;  %v3693_v3 = vld [vmem:[%s5005_s7] ss:$0 sm:$0xff] }
 0xcf5   : > { %2998 = vst.msk [vmem:[#allocation2] sm:$0xff] %vm1995_vm6, %v2996_v48 }
 0xcfc   : > { %v2999_v1 = vld [vmem:[#allocation2] sm:$0xff] }
 0xcfd   : > { %v3000_v49 = vpack.c.bf16 %v2999_v1, %v2999_v1 }
 0xcff   : > { %3523 = vmatmul.msk.bf16.vlgmr.msrb.gmra.mxu1 %vm1211_vm0, %v3000_v49  ;;  %v3694_v49 = vld [vmem:[%s4112_s12] ss:$0 sm:$0xff] }
 0xd7c   : > { %v3028_v2 = vpop.f32.mrf.mxu1 }
 0xd7d   : > { %v3029_v6 = vadd.f32 %v3688_v39, %v3028_v2 }
 0xd7f   : > { %v3032_v42 = vadd.f32 %v3029_v6, %v4593_v57 }
 0xd81   : > { %v3035_v7 = vsel %vm1211_vm0, %v3032_v42, 0.0 }
 0xd82   : > { %3036 = vadd.xlane.f32.xlu0 %v3035_v7 }
 0xd84   : > { %v3030_v8 = vpop.f32.mrf.mxu1 }
 0xdf5   : > { %v3037_v13 = vpop.xlane.xlu0 %3036 }
 0xdf6   : > { %v3038_v16 = vmul.f32 %v3037_v13, %v4530_v36 }
 0xdf8   : > { %v3039_v63 = vsub.f32 %v3032_v42, %v3038_v16 }
 0xdfa   : > { %v3040_v44 = vmul.f32 %v3039_v63, %v3039_v63 }
 0xdfc   : > { %v3041_v56 = vsel %vm1211_vm0, %v3040_v44, 0.0 }
 0xdfd   : > { %3042 = vadd.xlane.f32.xlu1 %v3041_v56 }
 0xe70   : > { %v3043_v57 = vpop.xlane.xlu1 %3042 }
 0xe71   : > { %v3044_v43 = vmul.f32 %v3043_v57, %v4530_v36 }
 0xe73   : > { %v3045_v54 = vadd.f32 1e-05, %v3044_v43 }
 0xe75   : > { %3783 = vrsqrt.f32 %v3045_v54  ;;  %vm3052_vm4 = vweird.f32 %v3045_v54 }
 0xe7b   : > { %v3784_v9 = vpop.eup %3783 }
 0xe7c   : > { %v3047_v53 = vmul.f32 %v3784_v9, %v3045_v54  ;;  %vm3053_vm1 = vweird.f32 %v3784_v9  ;;  %v3695_v54 = vld [vmem:[%s5006_s11] ss:$0 sm:$0xff]  ;;  %s3836_s11 = scalar_lea.hbm %s3835_s6, 8 }
 0xe7d   : > { %vm3054_vm5 = vmor %vm3052_vm4, %vm3053_vm1  ;;  %p3837_p6 = scmp.ne.s32.totalorder %s3835_s6, %s3836_s11  ;;  %p3842_p2 = scmp.lt.s32.totalorder %s3840_s30, %s3836_s11 }
 0xe7e   : > { %v3048_v28 = vmul.f32 %v3784_v9, %v3047_v53 }
 0xe7f   : > { %p3838_p13 = pnand %p3837_p6, %p4179_p11  ;;  %p3843_p3 = por %p3842_p2, %p3841_p1 }
 0xe80   : > { %v3049_v30 = vmul.f32 0.5, %v3048_v28 }
 0xe81   : > { %p3839_p0 = pneg %p3838_p13 }
 0xe82   : > { %v3050_v31 = vsub.f32 1.5, %v3049_v30 }
 0xe83   : > { %p3844_p4 = pnand %p3843_p3, %p3839_p0 }
 0xe84   : > { %v3051_v32 = vmul.f32 %v3784_v9, %v3050_v31 }
 0xe86   : > { %v3055_v21 = vsel %vm3054_vm5, %v3784_v9, %v3051_v32 }
 0xe87   : > { %v3056_v5 = vmul.f32 %v3055_v21, %v3039_v63 }
 0xe89   : > { %v3060_v27 = vmul.f32 %v3689_v34, %v3056_v5 }
 0xe8b   : > { %v3064_v45 = vadd.f32 %v3690_v41, %v3060_v27 }
 0xe8d   : > { %v3069_v18 = vpack.c.bf16 %v3064_v45, %v3064_v45 }
 0xe8f   : > { %3532 = vmatmul.msk.bf16.vlgmr.msrb.gmra.mxu2 %vm1211_vm0, %v3069_v18 }
 0xf12   : > { %v3098_v47 = vpop.f32.mrf.mxu2 }
 0xf13   : > { %v3099_v40 = vadd.f32 %v3691_v24, %v3098_v47 }
 0xf15   : > { %v3102_v4 = vmax.f32 %v3099_v40, 0.0 }
 0xf17   : > { %v3111_v10 = vpack.c.bf16 %v3102_v4, %v3102_v4 }
 0xf19   : > { %3549 = vmatmul.msk.bf16.vlgmr.msrb.gmra.mxu3 %vm2141_vm11, %v3111_v10 }
 0xf1a   : > { %v3100_v50 = vpop.f32.mrf.mxu2 }
 0xf9c   : > { %v3148_v61 = vpop.f32.mrf.mxu3 }
 0xf9d   : > { %v3152_v23 = vadd.f32 %v3148_v61, %v3064_v45 }
 0xf9f   : > { %v3157_v33 = vadd.f32 %v3692_v25, %v3152_v23 }
 0xfa1   : > { %v3160_v38 = vsel %vm1211_vm0, %v3157_v33, 0.0 }
 0xfa2   : > { %3161 = vadd.xlane.f32.xlu2 %v3160_v38 }
 0xfa4   : > { %v3150_v52 = vpop.f32.mrf.mxu3 }
0x1015   : > { %v3162_v29 = vpop.xlane.xlu2 %3161 }
0x1016   : > { %v3163_v37 = vmul.f32 %v3162_v29, %v4530_v36 }
0x1018   : > { %v3164_v22 = vsub.f32 %v3157_v33, %v3163_v37 }
0x101a   : > { %v3165_v60 = vmul.f32 %v3164_v22, %v3164_v22 }
0x101c   : > { %v3166_v55 = vsel %vm1211_vm0, %v3165_v60, 0.0 }
0x101d   : > { %3167 = vadd.xlane.f32.xlu0 %v3166_v55 }
0x1090   : > { %v3168_v58 = vpop.xlane.xlu0 %3167 }
0x1091   : > { %v3169_v26 = vmul.f32 %v3168_v58, %v4530_v36 }
0x1093   : > { %v3170_v14 = vadd.f32 1e-05, %v3169_v26 }
0x1095   : > { %3785 = vrsqrt.f32 %v3170_v14  ;;  %vm3177_vm11 = vweird.f32 %v3170_v14 }
0x109b   : > { %v3786_v19 = vpop.eup %3785 }
0x109c   : > { %v3172_v51 = vmul.f32 %v3786_v19, %v3170_v14  ;;  %vm3178_vm6 = vweird.f32 %v3786_v19 }
0x109d   : > { %vm3179_vm10 = vmor %vm3177_vm11, %vm3178_vm6 }
0x109e   : > { %v3173_v12 = vmul.f32 %v3786_v19, %v3172_v51 }
0x10a0   : > { %v3174_v59 = vmul.f32 0.5, %v3173_v12 }
0x10a2   : > { %v3175_v62 = vsub.f32 1.5, %v3174_v59 }
0x10a4   : > { %v3176_v15 = vmul.f32 %v3786_v19, %v3175_v62 }
0x10a6   : > { %v3180_v48 = vsel %vm3179_vm10, %v3786_v19, %v3176_v15 }
0x10a7   : > { %v3181_v1 = vmul.f32 %v3180_v48, %v3164_v22 }
0x10a9   : > { %v3185_v39 = vmul.f32 %v3693_v3, %v3181_v1 }
0x10ab   : > { %v3189_v2 = vadd.f32 %v3694_v49, %v3185_v39 }
0x10ad   : > { %v3192_v6 = vsel %vm1211_vm0, %v3189_v2, 0.0 }
0x10ae   : > { %3193 = vadd.xlane.f32.xlu1 %v3192_v6 }
0x1121   : > { %v3194_v42 = vpop.xlane.xlu1 %3193 }
0x1122   : > { %v3195_v7 = vmul.f32 %v3194_v42, %v4530_v36 }
0x1124   : > { %v3196_v8 = vsub.f32 %v3189_v2, %v3195_v7 }
0x1126   : > { %v3197_v13 = vmul.f32 %v3196_v8, %v3196_v8 }
0x1128   : > { %v3198_v16 = vsel %vm1211_vm0, %v3197_v13, 0.0 }
0x1129   : > { %3199 = vadd.xlane.f32.xlu2 %v3198_v16 }
0x119c   : > { %v3200_v63 = vpop.xlane.xlu2 %3199 }
0x119d   : > { %v3201_v44 = vmul.f32 %v3200_v63, %v4530_v36  ;;  %v3696_v36 = vld [vmem:[%s5008_s2] ss:$0 sm:$0xff] }
0x119f   : > { %v3202_v56 = vadd.f32 1e-05, %v3201_v44 }
0x11a1   : > { %3787 = vrsqrt.f32 %v3202_v56  ;;  %vm3209_vm13 = vweird.f32 %v3202_v56 }
0x11a7   : > { %v3788_v11 = vpop.eup %3787 }
0x11a8   : > { %v3204_v0 = vmul.f32 %v3788_v11, %v3202_v56  ;;  %vm3210_vm12 = vweird.f32 %v3788_v11 }
0x11a9   : > { %vm3211_vm14 = vmor %vm3209_vm13, %vm3210_vm12 }
0x11aa   : > { %v3205_v17 = vmul.f32 %v3788_v11, %v3204_v0 }
0x11ac   : > { %v3206_v57 = vmul.f32 0.5, %v3205_v17 }
0x11ae   : > { %v3207_v43 = vsub.f32 1.5, %v3206_v57 }
0x11b0   : > { %v3208_v20 = vmul.f32 %v3788_v11, %v3207_v43 }
0x11b2   : > { %v3212_v9 = vsel %vm3211_vm14, %v3788_v11, %v3208_v20 }
0x11b3   : > { %v3213_v53 = vmul.f32 %v3212_v9, %v3196_v8 }
0x11b5   : > { %v3217_v28 = vmul.f32 %v3695_v54, %v3213_v53 }
0x11b7   : > { %v3221_v30 = vadd.f32 %v3696_v36, %v3217_v28 }
0x11b9   : > { %3222 = vst.msk [vmem:[%s1175_s0] sm:$0xff] %vm1211_vm0, %v3221_v30 }
0x11ba   : > { %3847 = shalt.err (!%p3844_p4)
}
0x11bb   : > { %3585 = dma.vmem_to_hbm [thread:$0]  (%p4179_p11), %s3237_s1, 128, %s3239_s3, %s3224_s5  }
0x11bc PF: > { %s5010_s2 = sld [smem:[#allocation35_spill]]  ;;  %p5013_p8 = scmp.ge.s32.totalorder %s3886_s15, 2 }
0x11bd   : > { %s5011_s0 = sld [smem:[#allocation40_spill]] }
0x11c2   : > { %s3250_s26 = sand.u32 1, %s5010_s2  }
0x11c3   : > { %p5012_p7 = scmp.ne.s32.totalorder %s5011_s0, 0  ;;  %s3251_s23 = scalar_lea.sflag [#allocation5], %s3250_s26 }
0x11c5   : > { %p3592_p5 = pnand %p5013_p8, %p5012_p7 }
0x11c7   : > { %p3593_p10 = pneg %p3592_p5 }
0x11c9   : > { %3869 = dma.done.wait (%p3593_p10), %s3251_s23, 128  }
0x11ca   : > { %3871 = vsyncadd (%p3593_p10), %s3251_s23, 4294967168  ;;  %s5014_s15 = sld [smem:[#allocation37_spill]]  ;;  %s5017_s7 = smov %s3878_s10 }
0x11cb   : > { %s5015_s6 = sld [smem:[#allocation36_spill]] }
0x11cc   : > { %s5016_s11 = sld [smem:[#allocation38_spill]] }
0x11d0   : > { %p88_p9 = scmp.ge.s32.totalorder %s5014_s15, 4  }
0x11d1   : > { %s5018_s10 = smov %s5015_s6 }
0x11d2   :  { %90 = sbr.rel (!%p88_p9) target bundleno = 73 (0x49), region = 256 }
0x11d7   :  { %3257 = vsyncpa [#allocation4], 1 }
0x11d8   :  { %3259 = vsyncpa [#allocation4 + $0x1], 1 }
0x11d9   :  { %3260 = vsyncpa [#allocation5], 1 }
0x11da   :  { %3262 = vsyncpa [#allocation5 + $0x1], 1 }

// kernel: transformer_forward.2
= control target key start
LH: loop header
LB: loop body
LE: loop exit
PB: predicated region body
PF: predicated region fallthrough
CT: control target
= control target key end

     0   :  { %s5124_s0 = inlined_call_operand.hbm [shape: f32[128,32], index: 0, kind: input, shape index: {}, may-alias: {0,2}]   ;;  %s5125_s1 = inlined_call_operand.hbm [shape: f32[128,32], index: 1, kind: input, shape index: {}, may-alias: {1,3}]   ;;  %s5126_s2 = inlined_call_operand.hbm [shape: f32[128,32], index: 2, kind: input, shape index: {}, may-alias: {0,2}]   ;;  %s5127_s3 = inlined_call_operand.hbm [shape: f32[128,32], index: 3, kind: input, shape index: {}, may-alias: {1,3}]   ;;  %s5128_s4 = inlined_call_operand.vmem [shape: bf16[32,32], index: 4, kind: input, shape index: {}]   ;;  %s5129_s5 = inlined_call_operand.vmem [shape: f32[1,32], index: 5, kind: input, shape index: {}]   ;;  %s5130_s6 = inlined_call_operand.vmem [shape: bf16[32,32], index: 6, kind: input, shape index: {}]   ;;  %s5131_s7 = inlined_call_operand.vmem [shape: f32[1,32], index: 7, kind: input, shape index: {}]   ;;  %s5132_s8 = inlined_call_operand.vmem [shape: bf16[32,32], index: 8, kind: input, shape index: {}]   ;;  %s5133_s9 = inlined_call_operand.vmem [shape: f32[1,32], index: 9, kind: input, shape index: {}]   ;;  %s5134_s10 = inlined_call_operand.vmem [shape: bf16[32,32], index: 10, kind: input, shape index: {}]   ;;  %s5135_s11 = inlined_call_operand.vmem [shape: f32[1,32], index: 11, kind: input, shape index: {}]   ;;  %s5136_s12 = inlined_call_operand.vmem [shape: f32[1,32], index: 12, kind: input, shape index: {}]   ;;  %s5137_s13 = inlined_call_operand.vmem [shape: f32[1,32], index: 13, kind: input, shape index: {}]   ;;  %s5138_s14 = inlined_call_operand.vmem [shape: bf16[32,64], index: 14, kind: input, shape index: {}]   ;;  %s5139_s15 = inlined_call_operand.vmem [shape: f32[1,64], index: 15, kind: input, shape index: {}]   ;;  %s5140_s16 = inlined_call_operand.vmem [shape: bf16[64,32], index: 16, kind: input, shape index: {}]   ;;  %s5141_s17 = inlined_call_operand.vmem [shape: f32[1,32], index: 17, kind: input, shape index: {}]   ;;  %s5142_s18 = inlined_call_operand.vmem [shape: f32[1,32], index: 18, kind: input, shape index: {}]   ;;  %s5143_s19 = inlined_call_operand.vmem [shape: f32[1,32], index: 19, kind: input, shape index: {}]   ;;  %s5144_s20 = inlined_call_operand.vmem [shape: f32[128,32], index: 20, kind: output, shape index: {}]  }
   0x1   :  { %5160 = sst [smem:[#allocation29_spill]] %s5124_s0 }
   0x2   :  { %5161 = sst [smem:[#allocation30_spill]] %s5125_s1 }
   0x3   :  { %5162 = sst [smem:[#allocation31_spill]] %s5126_s2 }
   0x4   :  { %5163 = sst [smem:[#allocation32_spill]] %s5127_s3 }
   0x5   :  { %5164 = sst [smem:[#allocation33_spill]] %s5128_s4 }
   0x6   :  { %5165 = sst [smem:[#allocation34_spill]] %s5133_s9 }
   0x7   :  { %5166 = sst [smem:[#allocation35_spill]] %s5134_s10 }
   0x8   :  { %5167 = sst [smem:[#allocation36_spill]] %s5135_s11 }
   0x9   :  { %5168 = sst [smem:[#allocation37_spill]] %s5136_s12 }
   0xa   :  { %5169 = sst [smem:[#allocation38_spill]] %s5137_s13 }
   0xb   :  { %5170 = sst [smem:[#allocation39_spill]] %s5138_s14 }
   0xc   :  { %5171 = sst [smem:[#allocation40_spill]] %s5139_s15 }
   0xd   :  { %5172 = sst [smem:[#allocation41_spill]] %s5140_s16 }
   0xe   :  { %5173 = sst [smem:[#allocation42_spill]] %s5141_s17 }
   0xf   :  { %5174 = sst [smem:[#allocation43_spill]] %s5142_s18 }
  0x10   :  { %5175 = sst [smem:[#allocation44_spill]] %s5143_s19 }
  0x11   :  { %5176 = sst [smem:[#allocation45_spill]] %s5144_s20 }
  0x12   :  { %25 = vsyncpa [#allocation4], 0 }
  0x13   :  { %27 = vsyncpa [#allocation4 + $0x1], 0 }
  0x14   :  { %28 = vsyncpa [#allocation6], 0 }
  0x15   :  { %30 = vsyncpa [#allocation6 + $0x1], 0 }
  0x16   :  { %31 = vsyncpa [#allocation9], 0 }
  0x17   :  { %33 = vsyncpa [#allocation9 + $0x1], 0  ;;  %s3756_s1 = smov 0   ;;  %s3758_s22 = smov 0  }
  0x18   :  { %s3760_s23 = smov 0   ;;  %s3762_s24 = smov 0  }
  0x19   :  { %s3764_s2 = smov 0   ;;  %s3766_s25 = smov 0  }
  0x1a   :  { %s3768_s3 = smov 0   ;;  %s3770_s26 = smov 0  }
  0x1b   :  { %s3772_s27 = smov 0   ;;  %s3774_s28 = smov 0  }
  0x1c   :  { %s3776_s4 = smov 0  }
  0x1d LB: > { %5177 = sst [smem:[#allocation14_spill]] %s3620_s25  ;;  %s5146_s29 = sadd.s32 4294967295, %s3640_s4   ;;  %s3640_s4 = sphi %s3776_s4, %s39_s4   ;;  %s3636_s28 = sphi %s3774_s28, %s5244_s28   ;;  %s3632_s27 = sphi %s3772_s27, %s5243_s27   ;;  %s3628_s26 = sphi %s3770_s26, %s5242_s26   ;;  %s3624_s3 = sphi %s3768_s3, %s5241_s3   ;;  %s3620_s25 = sphi %s3766_s25, %s5240_s25   ;;  %s3616_s2 = sphi %s3764_s2, %s5249_s2   ;;  %s3612_s24 = sphi %s3762_s24, %s5248_s24   ;;  %s3608_s23 = sphi %s3760_s23, %s5247_s23   ;;  %s3604_s22 = sphi %s3758_s22, %s5246_s22   ;;  %s3600_s1 = sphi %s3756_s1, %s5245_s1  }
  0x1e   : > { %5178 = sst [smem:[#allocation15_spill]] %s3624_s3  ;;  %s48_s30 = sadd.s32 1, %s3632_s27 }
  0x1f   : > { %5179 = sst [smem:[#allocation16_spill]] %s3628_s26  ;;  %p49_p0 = scmp.ge.s32.totalorder %s48_s30, 2 }
  0x20   : > { %5180 = sst [smem:[#allocation17_spill]] %s3632_s27  ;;  %s51_s0 = sadd.s32 1, %s3636_s28 }
  0x21   : > { %5181 = sst [smem:[#allocation18_spill]] %s3636_s28  ;;  %s2953_s21 = sshll.u32 %s3636_s28, 1 }
  0x22   : > { %s62_s20 = sadd.s32 1, %s3620_s25  ;;  %s5251_s30 = smov (%p49_p0, %s48_s30), 0 }
  0x23   : > { %5182 = sst [smem:[#allocation19_spill]] %s5251_s30  ;;  %s5253_s0 = smov (!%p49_p0, %s51_s0), %s3636_s28 }
  0x24   : > { %s3818_s19 = sadd.s32 %s3632_s27, %s2953_s21  ;;  %p69_p1 = scmp.ne.s32.totalorder %s3620_s25, %s3616_s2 }
  0x25   : > { %p53_p2 = scmp.ge.s32.totalorder %s5253_s0, 2  ;;  %p70_p3 = scmp.eq.s32.totalorder %s3640_s4, 0 }
  0x26   : > { %p75_p4 = scmp.ne.s32.totalorder %s3616_s2, %s3612_s24  ;;  %p3826_p5 = scmp.eq.s32.totalorder %s5146_s29, 0 }
  0x27   : > { %s5255_s0 = smov (%p53_p2, %s5253_s0), 0  ;;  %p3834_p6 = por %p70_p3, %p69_p1 }
  0x28   : > { %5184 = sst [smem:[#allocation20_spill]] %s5255_s0  ;;  %p3840_p7 = por %p3826_p5, %p75_p4 }
  0x29   : > { %s2954_s29 = sshll.u32 %s5255_s0, 1  ;;  %s115_s27 = ssub.s32 %s3636_s28, %s5255_s0 }
  0x2a   : > { %s58_s3 = sadd.s32 %s2954_s29, %s5251_s30  ;;  %p3848_p8 = scmp.eq.s32.totalorder %s115_s27, 0 }
  0x2b   : > { %s59_s17 = ssub.s32 %s3818_s19, %s58_s3  ;;  %p3128_p10 = scmp.lt.s32.totalorder %s3640_s4, 4 }
  0x2c   : > { %p60_p9 = scmp.eq.s32.totalorder %s59_s17, 0  ;;  %s595_s15 = sand.u32 1, %s3620_s25  }
  0x2d   : > { %s3089_s16 = sshll.u32 %s3818_s19, 5  ;;  %s2961_s12 = sshll.u32 %s595_s15, 5 }
  0x2e   : > { %s3857_s13 = scalar_select %p60_p9, %s3620_s25, %s62_s20  }
  0x2f   : > { %p3863_p11 = pnand %p3128_p10, %p3834_p6  ;;  %s619_s27 = sand.u32 1, %s3640_s4  }
  0x30   : > { %5188 = sst [smem:[#allocation21_spill]] %s3857_s13  ;;  %s623_s17 = scalar_lea.vmem [#allocation5], %s2961_s12 }
  0x31   : > { %s5190_s30 = sld [smem:[#allocation30_spill]]  ;;  %s633_s11 = sshll.u32 %s623_s17, 4  ;;  %s634_s11 = int_to_ptr.vmem [resolvable:$true] %s633_s11 }
  0x32   : > { %p2975_p12 = scmp.ge.s32.totalorder %s3640_s4, 1  ;;  %s3872_s19 = scalar_lea.sflag [#allocation6], %s619_s27 }
  0x33   : > { %s3642_s20 = smov 128   ;;  %s3643_s0 = smov 8  }
  0x34   : > { %p685_p13 = scmp.lt.s32.totalorder %s3640_s4, 5  ;;  %s5192_s29 = sld [smem:[#allocation29_spill]] }
  0x35   : > { %s599_s17 = scalar_lea.vmem [#allocation3], %s2961_s12  ;;  %s596_s9 = scalar_lea.sflag [#allocation4], %s595_s15 }
  0x36   : > { %p3881_p0 = pnand %p2975_p12, %p685_p13  ;;  %s609_s13 = sshll.u32 %s599_s17, 4  ;;  %s610_s13 = int_to_ptr.vmem [resolvable:$true] %s609_s13 }
  0x37   : > { %s630_s3 = scalar_lea.hbm %s5190_s30, %s3089_s16  ;;  %p125_p1 = scmp.ne.s32.totalorder %s3608_s23, %s3604_s22 }
  0x38   : > { %s631_s10 = sshll.u32 %s630_s3, 4  ;;  %p131_p2 = scmp.ne.s32.totalorder %s3604_s22, %s3600_s1  ;;  %s632_s10 = int_to_ptr.hbm [resolvable:$true] %s631_s10 }
  0x39   : > { %3121 = dma.hbm_to_vmem [thread:$0]  (!%p3863_p11), %s632_s10, 512, %s634_s11, %s3872_s19, %s3642_s20, %s3642_s20, %s3643_s0  }
  0x3a   : > { %s606_s3 = scalar_lea.hbm %s5192_s29, %s3089_s16  ;;  %s118_s10 = sadd.s32 1, %s3608_s23 }
  0x3b   : > { %s607_s25 = sshll.u32 %s606_s3, 4  ;;  %s645_s16 = sand.u32 1, %s3608_s23   ;;  %s608_s25 = int_to_ptr.hbm [resolvable:$true] %s607_s25 }
  0x3c   : > { %3118 = dma.hbm_to_vmem [thread:$0]  (!%p3863_p11), %s608_s25, 512, %s610_s13, %s596_s9, %s3642_s20, %s3642_s20, %s3643_s0  }
  0x3d   : > { %s3897_s11 = scalar_select %p3848_p8, %s3608_s23, %s118_s10  }
  0x3e   : > { %s3091_s12 = sshll.u32 %s3636_s28, 6  ;;  %p127_p4 = por %p125_p1, %p70_p3 }
  0x3f   : > { %5193 = sst [smem:[#allocation22_spill]] %s3897_s11  ;;  %p3909_p6 = por %p131_p2, %p3826_p5 }
  0x40   : > { %s2969_s14 = sshll.u32 %s645_s16, 6  ;;  %s5195_s13 = sld [smem:[#allocation31_spill]] }
  0x41   : > { %s647_s27 = scalar_lea.vmem [#allocation7], %s2969_s14  ;;  %p3122_p8 = pnand %p3128_p10, %p127_p4 }
  0x42   : > { %s655_s29 = sshll.u32 %s647_s27, 4  ;;  %s5196_s17 = sld [smem:[#allocation32_spill]]  ;;  %s656_s29 = int_to_ptr.vmem [resolvable:$true] %s655_s29 }
  0x43   : > { %s669_s28 = scalar_lea.vmem [#allocation8], %s2969_s14  ;;  %s666_s21 = scalar_lea.sflag [#allocation9], %s645_s16 }
  0x44   : > { %s677_s11 = sshll.u32 %s669_s28, 4  ;;  %s678_s11 = int_to_ptr.vmem [resolvable:$true] %s677_s11 }
  0x46   : > { %s652_s25 = scalar_lea.hbm %s5195_s13, %s3091_s12 }
  0x47   : > { %s653_s26 = sshll.u32 %s652_s25, 4  ;;  %689 = sbr.rel (%p3881_p0) target bundleno = 2364 (0x93c), region = 100  ;;  %s654_s26 = int_to_ptr.hbm [resolvable:$true] %s653_s26 }
  0x48   : > { %s674_s18 = scalar_lea.hbm %s5196_s17, %s3091_s12 }
  0x49   : > { %3124 = dma.hbm_to_vmem [thread:$0]  (!%p3122_p8), %s654_s26, 1024, %s656_s29, %s3872_s19, %s3642_s20, %s3642_s20, %s3643_s0  }
  0x4a   : > { %s675_s10 = sshll.u32 %s674_s18, 4  ;;  %s676_s10 = int_to_ptr.hbm [resolvable:$true] %s675_s10 }
  0x4b   : > { %3127 = dma.hbm_to_vmem [thread:$0]  (!%p3122_p8), %s676_s10, 1024, %s678_s11, %s666_s21, %s3642_s20, %s3642_s20, %s3643_s0  }
  0x4c   : > { %s691_s12 = sand.u32 1, %s3616_s2  }
  0x4d   : > { %s2976_s9 = sshll.u32 %s691_s12, 5  ;;  %s692_s13 = scalar_lea.sflag [#allocation4], %s691_s12 }
  0x4e   : > { %s3931_s25 = scalar_lea.vmem [#allocation3], %s2976_s9 }
  0x4f   : > { %3583 = dma.done.wait (%p3840_p7), %s692_s13, 512  }
  0x50   : > { %3585 = vsyncadd (%p3840_p7), %s692_s13, 4294966784  ;;  %s5197_s28 = sadd.s32 4294967295, %s3640_s4   ;;  %s3939_s0 = scalar_lea.vmem [#allocation5], %s2976_s9 }
  0x51   : > { %s701_s19 = sand.u32 1, %s5197_s28  }
  0x52   : > { %s702_s20 = scalar_lea.sflag [#allocation6], %s701_s19 }
  0x53   : > { %3587 = dma.done.wait (%p3840_p7), %s702_s20, 512  }
  0x54   : > { %3589 = vsyncadd (%p3840_p7), %s702_s20, 4294966784  ;;  %s713_s30 = sand.u32 1, %s3604_s22  }
  0x55   : > { %s2978_s11 = sshll.u32 %s713_s30, 6 }
  0x56   : > { %s3946_s16 = scalar_lea.vmem [#allocation7], %s2978_s11 }
  0x57   : > { %3591 = dma.done.wait (%p3909_p6), %s702_s20, 1024  }
  0x58   : > { %3593 = vsyncadd (%p3909_p6), %s702_s20, 4294966272  ;;  %s722_s14 = scalar_lea.sflag [#allocation9], %s713_s30  ;;  %s3952_s26 = scalar_lea.vmem [#allocation8], %s2978_s11 }
  0x59   : > { %3595 = dma.done.wait (%p3909_p6), %s722_s14, 1024  }
  0x5a   : > { %3597 = vsyncadd (%p3909_p6), %s722_s14, 4294966272  ;;  %s5198_s29 = sld [smem:[#allocation33_spill]]  ;;  %v3964_v1 = vld [vmem:[%s5130_s6 + $0x8] sm:$0xff]  ;;  %v3972_v3 = vld [vmem:[%s5130_s6] sm:$0xff]  ;;  %vm853_vm0 = vcmask 261120   ;;  %s3644_s20 = smov 112  }
  0x5b   : > { %v819_v4 = vld [vmem:[%s3931_s25] sm:$0xff]  ;;  %v820_v5 = vld [vmem:[%s3931_s25 + $0x8] sm:$0xff]  ;;  %935 = vmatpush.bf16.msra.mxu1 %v3964_v1  ;;  %v821_v21 = vld [vmem:[%s3931_s25 + $0x10] sm:$0xff]  ;;  %vm994_vm1 = vcmask 64512   ;;  %s3645_s11 = smov 120   ;;  %s3646_s14 = smov 104  }
  0x5c   : > { %v823_v6 = vld [vmem:[%s3939_s0] sm:$0xff]  ;;  %v824_v7 = vld [vmem:[%s3939_s0 + $0x8] sm:$0xff]  ;;  %v822_v22 = vld [vmem:[%s3931_s25 + $0x18] sm:$0xff]  ;;  %s5199_s1 = sld [smem:[#allocation34_spill]]  ;;  %s3649_s3 = smov 24  }
  0x5d   : > { %v894_v8 = vld [vmem:[%s3946_s16] sm:$0xff]  ;;  %v827_v9 = vadd.f32 %v823_v6, %v819_v4  ;;  %v828_v10 = vadd.f32 %v824_v7, %v820_v5  ;;  %v895_v11 = vld [vmem:[%s3946_s16 + $0x8] sm:$0xff]  ;;  %v825_v23 = vld [vmem:[%s3939_s0 + $0x10] sm:$0xff]  ;;  %s5224_s18 = sld [smem:[#allocation35_spill]] }
  0x5e   : > { %v898_v12 = vld [vmem:[%s3952_s26] sm:$0xff]  ;;  %v899_v13 = vld [vmem:[%s3952_s26 + $0x8] sm:$0xff]  ;;  %v948_v20 = vpack.c.bf16 %v895_v11, %v894_v8  ;;  %v826_v24 = vld [vmem:[%s3939_s0 + $0x18] sm:$0xff]  ;;  %v829_v29 = vadd.f32 %v825_v23, %v821_v21  ;;  %s5225_s13 = sld [smem:[#allocation36_spill]] }
  0x5f   : > { %v902_v14 = vadd.f32 %v898_v12, %v894_v8  ;;  %v903_v15 = vadd.f32 %v899_v13, %v895_v11  ;;  %v835_v16 = vpack.c.bf16 %v828_v10, %v827_v9  ;;  %936 = vmatpush.bf16.msra.mxu1 %v3972_v3  ;;  %v3987_v18 = vld [vmem:[%s5132_s8 + $0x8] sm:$0xff]  ;;  %v3992_v19 = vld [vmem:[%s5132_s8] sm:$0xff]  ;;  %v896_v25 = vld [vmem:[%s3946_s16 + $0x10] sm:$0xff]  ;;  %v830_v30 = vadd.f32 %v826_v24, %v822_v22  ;;  %s5226_s19 = sld [smem:[#allocation39_spill]] }
  0x60   : > { %v3094_v0 = vld [vmem:[%s5198_s29 + $0x8] sm:$0xff]  ;;  %v3093_v2 = vld [vmem:[%s5198_s29] sm:$0xff]  ;;  %977 = vmatpush.bf16.msra.mxu2 %v3987_v18  ;;  %v897_v26 = vld [vmem:[%s3946_s16 + $0x18] sm:$0xff]  ;;  %s5234_s24 = sld [smem:[#allocation15_spill]] }
  0x61   : > { %866 = vmatpush.bf16.msra.mxu0 %v3094_v0  ;;  %v906_v17 = vpack.c.bf16 %v903_v15, %v902_v14  ;;  %v900_v27 = vld [vmem:[%s3952_s26 + $0x10] sm:$0xff]  ;;  %v901_v28 = vld [vmem:[%s3952_s26 + $0x18] sm:$0xff]  ;;  %v836_v33 = vpack.c.bf16 %v830_v30, %v829_v29  ;;  %v949_v35 = vpack.c.bf16 %v897_v26, %v896_v25  ;;  %v3226_v38 = vld [vmem:[%s5129_s5] ss:$0 sm:$0xff]  ;;  %s5235_s15 = sld [smem:[#allocation43_spill]] }
  0x62   : > { %v904_v31 = vadd.f32 %v900_v27, %v896_v25  ;;  %v905_v32 = vadd.f32 %v901_v28, %v897_v26  ;;  %v4020_v46 = vld [vmem:[%s5131_s7] ss:$0 sm:$0xff]  ;;  %v4085_v26 = vld [vmem:[%s3946_s16 + $0x28] sm:$0xff]  ;;  %s5236_s9 = sld [smem:[#allocation44_spill]] }
  0x63   : > { %3001 = vmatmul.msk.bf16.vlgmr.msra.gmra.mxu1 %vm853_vm0, %v906_v17  ;;  %v4049_v63 = vld [vmem:[%s5199_s1] ss:$0 sm:$0xff]  ;;  %v1522_v28 = vld [vmem:[%s3952_s26 + $0x28] sm:$0xff]  ;;  %s5228_s1 = sld [smem:[#allocation38_spill]] }
  0x64   : > { %978 = vmatpush.bf16.msra.mxu2 %v3992_v19  ;;  %v907_v34 = vpack.c.bf16 %v905_v32, %v904_v31  ;;  %v4082_v25 = vld [vmem:[%s3946_s16 + $0x20] sm:$0xff]  ;;  %v1526_v32 = vadd.f32 %v1522_v28, %v4085_v26  ;;  %s5237_s28 = sld [smem:[#allocation45_spill]] }
  0x65   : > { %867 = vmatpush.bf16.msra.mxu0 %v3093_v2  ;;  %v1521_v27 = vld [vmem:[%s3952_s26 + $0x20] sm:$0xff] }
  0x66   : > { %v1525_v31 = vadd.f32 %v1521_v27, %v4082_v25 }
  0x67   : > { %3011 = vmatmul.msk.bf16.vlgmr.msra.gmra.mxu2 %vm853_vm0, %v948_v20 }
  0x68   : > { %2991 = vmatmul.msk.bf16.vlgmr.msra.gmra.mxu0 %vm853_vm0, %v835_v16 }
  0x73   : > { %3002 = vmatmul.msk.bf16.gmra.mxu1 %vm853_vm0, %v907_v34 }
  0x77   : > { %3012 = vmatmul.msk.bf16.gmra.mxu2 %vm853_vm0, %v949_v35  ;;  %v1529_v35 = vpack.c.bf16 %v1526_v32, %v1525_v31 }
  0x78   : > { %2992 = vmatmul.msk.bf16.gmra.mxu0 %vm853_vm0, %v836_v33 }
  0xe0   : > { %v938_v37 = vpop.f32.mrf.mxu1 }
  0xe1   : > { %v939_v57 = vadd.f32 %v4020_v46, %v938_v37 }
  0xe5   : > { %v869_v36 = vpop.f32.mrf.mxu0 }
  0xe6   : > { %v870_v39 = vadd.f32 %v3226_v38, %v869_v36 }
  0xe8   : > { %v940_v41 = vpop.f32.mrf.mxu1 }
  0xe9   : > { %v941_v55 = vadd.f32 %v4020_v46, %v940_v41  ;;  %v1523_v41 = vld [vmem:[%s3952_s26 + $0x30] sm:$0xff] }
  0xea   : > { %v980_v60 = vpop.f32.mrf.mxu2 }
  0xeb   : > { %v992_v58 = vpack.c.bf16 %v941_v55, %v939_v57  ;;  %v981_v4 = vadd.f32 %v4049_v63, %v980_v60 }
  0xed   : > { %v871_v40 = vpop.f32.mrf.mxu0  ;;  %v1002_v59 = vsel %vm994_vm1, %v992_v58, 0 }
  0xee   : > { %v872_v42 = vadd.f32 %v3226_v38, %v871_v40  ;;  %v4103_v40 = vld [vmem:[%s3946_s16 + $0x38] sm:$0xff] }
  0xf0   : > { %v4013_v43 = vpack.c.bf16 %v872_v42, %v870_v39  ;;  %v943_v45 = vpop.f32.mrf.mxu1  ;;  %v4100_v39 = vld [vmem:[%s3946_s16 + $0x30] sm:$0xff]  ;;  %v1524_v42 = vld [vmem:[%s3952_s26 + $0x38] sm:$0xff]  ;;  %s3647_s16 = smov 8   ;;  %s3648_s26 = smov 16  }
  0xf1   : > { %v944_v50 = vadd.f32 %v4020_v46, %v943_v45  ;;  %v1527_v45 = vadd.f32 %v1523_v41, %v4100_v39 }
  0xf2   : > { %1253 = vrot.lane.b32.xlu1 %v4013_v43, %s3644_s20  ;;  %v982_v61 = vpop.f32.mrf.mxu2 }
  0xf3   : > { %v983_v5 = vadd.f32 %v4049_v63, %v982_v61 }
  0xf5   : > { %v874_v44 = vpop.f32.mrf.mxu0  ;;  %v4057_v8 = vpack.c.bf16 %v983_v5, %v981_v4 }
  0xf6   : > { %v875_v47 = vadd.f32 %v3226_v38, %v874_v44 }
  0xf8   : > { %v945_v49 = vpop.f32.mrf.mxu1 }
  0xf9   : > { %v946_v52 = vadd.f32 %v4020_v46, %v945_v49 }
  0xfa   : > { %v985_v62 = vpop.f32.mrf.mxu2 }
  0xfb   : > { %v993_v54 = vpack.c.bf16 %v946_v52, %v944_v50  ;;  %v986_v0 = vadd.f32 %v4049_v63, %v985_v62 }
  0xfd   : > { %v876_v48 = vpop.f32.mrf.mxu0  ;;  %1259 = vrot.lane.b32.xlu0 %v993_v54, %s3644_s20  ;;  %v1005_v56 = vsel %vm994_vm1, %v993_v54, 0 }
  0xfe   : > { %v877_v51 = vadd.f32 %v3226_v38, %v876_v48  ;;  %1013 = vmatpush.bf16.xpose.msra.mxu3 %v1005_v56 }
 0x100   : > { %v4024_v53 = vpack.c.bf16 %v877_v51, %v875_v47  ;;  %v1528_v47 = vadd.f32 %v1524_v42, %v4103_v40 }
 0x102   : > { %1119 = vrot.lane.b32.xlu2 %v4024_v53, %s3645_s11  ;;  %1255 = vrot.lane.b32.xlu1 %v4024_v53, %s3644_s20  ;;  %v987_v2 = vpop.f32.mrf.mxu2  ;;  %v1530_v49 = vpack.c.bf16 %v1528_v47, %v1527_v45 }
 0x103   : > { %v988_v6 = vadd.f32 %v4049_v63, %v987_v2 }
 0x105   : > { %1257 = vrot.lane.b32.xlu0 %v992_v58, %s3644_s20  ;;  %v4055_v7 = vpack.c.bf16 %v988_v6, %v986_v0 }
 0x106   : > { %1014 = vmatpush.bf16.xpose.msra.mxu3 %v1002_v59 }
 0x107   : > { %1098 = vmatpush.bf16.msrb.mxu0 %v4055_v7 }
 0x10a   : > { %1391 = vrot.lane.b32.xlu2 %v993_v54, %s3646_s14  ;;  %1123 = vrot.lane.b32.xlu1 %v992_v58, %s3645_s11 }
 0x10b   : > { %1099 = vmatpush.bf16.msrb.mxu0 %v4057_v8 }
 0x10d   : > { %1389 = vrot.lane.b32.xlu0 %v992_v58, %s3646_s14  ;;  %3013 = vmatmul.msk.bf16.vlgmr.msra.gmra.mxu3 %vm994_vm1, %v4013_v43 }
 0x112   : > { %1117 = vrot.lane.b32.xlu1 %v4013_v43, %s3645_s11  ;;  %1352 = vrot.lane.b32.xlu2 %v4055_v7, %s3644_s20 }
 0x115   : > { %1125 = vrot.lane.b32.xlu0 %v993_v54, %s3645_s11 }
 0x11d   : > { %3014 = vmatmul.msk.bf16.gmra.mxu3 %vm994_vm1, %v4024_v53 }
 0x15c   : > { %v4073_v16 = vpop.permute.xlu2 %1119 }
 0x164   : > { %v4065_v13 = vpop.permute.xlu1 %1253 }
 0x16f   : > { %v1260_v9 = vpop.permute.xlu0 %1259 }
 0x170   : > { %v1271_v10 = vsel %vm994_vm1, %v1260_v9, 0 }
 0x171   : > { %1279 = vmatpush.bf16.xpose.msrb.mxu3 %v1271_v10 }
 0x174   : > { %v4071_v15 = vpop.permute.xlu1 %1255 }
 0x177   : > { %v1258_v11 = vpop.permute.xlu0 %1257 }
 0x178   : > { %v1268_v12 = vsel %vm994_vm1, %v1258_v11, 0 }
 0x179   : > { %1280 = vmatpush.bf16.xpose.msrb.mxu3 %v1268_v12 }
 0x17c   : > { %v1124_v21 = vpop.permute.xlu1 %1123 }
 0x17f   : > { %v1390_v14 = vpop.permute.xlu0 %1389 }
 0x180   : > { %3021 = vmatmul.msk.bf16.vlgmr.msrb.gmra.mxu3 %vm994_vm1, %v4065_v13  ;;  %v1400_v33 = vsel %vm994_vm1, %v1390_v14, 0 }
 0x181   : > { %1543 = vmatpush.bf16.msra.mxu3 %v3964_v1  ;;  %v1392_v1 = vpop.permute.xlu2 %1391 }
 0x182   : > { %v1403_v23 = vsel %vm994_vm1, %v1392_v1, 0 }
 0x184   : > { %v4089_v29 = vpop.permute.xlu1 %1117 }
 0x185   : > { %1544 = vmatpush.bf16.msra.mxu3 %v3972_v3  ;;  %v1134_v3 = vsel %vm994_vm1, %v1124_v21, 0 }
 0x187   : > { %v1126_v17 = vpop.permute.xlu0 %1125 }
 0x188   : > { %v1137_v20 = vsel %vm994_vm1, %v1126_v17, 0 }
 0x189   : > { %1145 = vmatpush.bf16.xpose.msrb.mxu1 %v1137_v20  ;;  %v1353_v36 = vpop.permute.xlu2 %1352 }
 0x18a   : > { %1368 = vmatpush.bf16.msra.mxu0 %v1353_v36 }
 0x190   : > { %v1016_v22 = vpop.f32.mrf.mxu3  ;;  %3022 = vmatmul.msk.bf16.gmra.mxu3 %vm994_vm1, %v4071_v15 }
 0x191   : > { %1146 = vmatpush.bf16.xpose.msrb.mxu1 %v1134_v3  ;;  %v1026_v24 = vsel %vm853_vm0, %v1016_v22, -inf }
 0x192   : > { %1027 = vmax.xlane.f32.xlu2 %v1026_v24 }
 0x198   : > { %v1018_v30 = vpop.f32.mrf.mxu3  ;;  %3017 = vmatmul.msk.bf16.vlgmr.msrb.gmra.mxu1 %vm994_vm1, %v4089_v29 }
 0x199   : > { %1411 = vmatpush.bf16.xpose.msra.mxu1 %v1403_v23  ;;  %v1029_v34 = vsel %vm853_vm0, %v1018_v30, -inf }
 0x19a   : > { %1030 = vmax.xlane.f32.xlu2 %v1029_v34 }
 0x1a0   : > { %v1021_v37 = vpop.f32.mrf.mxu3  ;;  %3029 = vmatmul.msk.bf16.vlgmr.msra.gmra.mxu3 %vm853_vm0, %v1529_v35 }
 0x1a1   : > { %1412 = vmatpush.bf16.xpose.msra.mxu1 %v1400_v33  ;;  %v1032_v38 = vsel %vm853_vm0, %v1021_v37, -inf }
 0x1a2   : > { %1033 = vmax.xlane.f32.xlu2 %v1032_v38 }
 0x1a8   : > { %v1023_v44 = vpop.f32.mrf.mxu3  ;;  %3018 = vmatmul.msk.bf16.gmra.mxu1 %vm994_vm1, %v4073_v16 }
 0x1a9   : > { %v1035_v48 = vsel %vm853_vm0, %v1023_v44, -inf }
 0x1aa   : > { %1036 = vmax.xlane.f32.xlu0 %v1035_v48 }
 0x1b0   : > { %3030 = vmatmul.msk.bf16.gmra.mxu3 %vm853_vm0, %v1530_v49 }
 0x1be   : > { %1387 = vrot.lane.b32.xlu0 %v4024_v53, %s3646_s14 }
 0x203   : > { %v4115_v50 = vpop.f32.mrf.mxu3 }
 0x204   : > { %v1292_v51 = vsel %vm853_vm0, %v4115_v50, -inf }
 0x205   : > { %v4119_v52 = vpop.xlane.xlu2 %1027  ;;  %1293 = vmax.xlane.f32.xlu2 %v1292_v51 }
 0x206   : > { %v1050_v54 = vsub.f32 %v1016_v22, %v4119_v52 }
 0x208   : > { %v1054_v57 = vmul.f32 1.442695, %v1050_v54 }
 0x20a   : > { %3236 = vpow2.f32 %v1054_v57 }
 0x20b   : > { %v4122_v55 = vpop.f32.mrf.mxu3 }
 0x20c   : > { %v1295_v56 = vsel %vm853_vm0, %v4122_v55, -inf }
 0x20d   : > { %v4126_v58 = vpop.xlane.xlu2 %1030  ;;  %1296 = vmax.xlane.f32.xlu1 %v1295_v56 }
 0x20e   : > { %v1051_v59 = vsub.f32 %v1018_v30, %v4126_v58 }
 0x210   : > { %v1056_v60 = vmul.f32 1.442695, %v1051_v59  ;;  %v4135_v2 = vpop.eup %3236 }
 0x212   : > { %3238 = vpow2.f32 %v1056_v60 }
 0x213   : > { %v4129_v61 = vpop.f32.mrf.mxu3 }
 0x214   : > { %v1298_v62 = vsel %vm853_vm0, %v4129_v61, -inf }
 0x215   : > { %1299 = vmax.xlane.f32.xlu1 %v1298_v62  ;;  %v4133_v0 = vpop.xlane.xlu2 %1033  ;;  %v4171_v36 = vpop.f32.mrf.mxu1 }
 0x216   : > { %v1052_v5 = vsub.f32 %v1021_v37, %v4133_v0 }
 0x218   : > { %v4137_v4 = vpop.eup %3238  ;;  %v1058_v10 = vmul.f32 1.442695, %v1052_v5 }
 0x219   : > { %v1082_v6 = vpack.c.bf16 %v4137_v4, %v4135_v2 }
 0x21a   : > { %3240 = vpow2.f32 %v1058_v10 }
 0x21b   : > { %3015 = vmatmul.msk.bf16.vlgmr.msrb.gmra.mxu0 %vm853_vm0, %v1082_v6  ;;  %v4143_v9 = vpop.f32.mrf.mxu3 }
 0x21c   : > { %v1301_v34 = vsel %vm853_vm0, %v4143_v9, -inf }
 0x21d   : > { %1350 = vrot.lane.b32.xlu2 %v4057_v8, %s3644_s20  ;;  %v4147_v11 = vpop.xlane.xlu0 %1036  ;;  %v4179_v37 = vpop.f32.mrf.mxu1 }
 0x21e   : > { %v1053_v12 = vsub.f32 %v1023_v44, %v4147_v11  ;;  %v1161_v38 = vsel %vm853_vm0, %v4179_v37, -inf }
 0x220   : > { %v1060_v14 = vmul.f32 1.442695, %v1053_v12  ;;  %v4150_v20 = vpop.eup %3240 }
 0x222   : > { %3242 = vpow2.f32 %v1060_v14 }
 0x223   : > { %v1546_v17 = vpop.f32.mrf.mxu3 }
 0x224   : > { %v1547_v3 = vadd.f32 %v4020_v46, %v1546_v17 }
 0x225   : > { %v4191_v48 = vpop.f32.mrf.mxu1 }
 0x228   : > { %v4152_v21 = vpop.eup %3242 }
 0x229   : > { %5200 = vst [vmem:[#allocation23_spill] sm:$0xff] %v4152_v21  ;;  %v1083_v1 = vpack.c.bf16 %v4152_v21, %v4150_v20 }
 0x22b   : > { %3016 = vmatmul.msk.bf16.gmra.mxu0 %vm853_vm0, %v1083_v1  ;;  %v1548_v22 = vpop.f32.mrf.mxu3 }
 0x22c   : > { %v1549_v23 = vadd.f32 %v4020_v46, %v1548_v22 }
 0x22d   : > { %v4203_v57 = vpop.f32.mrf.mxu1 }
 0x22e   : > { %1385 = vrot.lane.b32.xlu1 %v4013_v43, %s3646_s14  ;;  %v1583_v24 = vpack.c.bf16 %v1549_v23, %v1547_v3 }
 0x230   : > { %v1586_v35 = vsel %vm994_vm1, %v1583_v24, 0  ;;  %v1388_v62 = vpop.permute.xlu0 %1387 }
 0x233   : > { %v1551_v27 = vpop.f32.mrf.mxu3 }
 0x234   : > { %v1552_v28 = vadd.f32 %v4020_v46, %v1551_v27 }
 0x236   : > { %1841 = vrot.lane.b32.xlu1 %v1583_v24, %s3644_s20 }
 0x23b   : > { %v1553_v30 = vpop.f32.mrf.mxu3 }
 0x23c   : > { %v1554_v31 = vadd.f32 %v4020_v46, %v1553_v30  ;;  %v1158_v46 = vsel %vm853_vm0, %v4171_v36, -inf }
 0x23e   : > { %v1584_v32 = vpack.c.bf16 %v1554_v31, %v1552_v28 }
 0x240   : > { %1843 = vrot.lane.b32.xlu1 %v1584_v32, %s3644_s20  ;;  %1711 = vrot.lane.b32.xlu0 %v1584_v32, %s3645_s11  ;;  %v1589_v33 = vsel %vm994_vm1, %v1584_v32, 0 }
 0x241   : > { %1597 = vmatpush.bf16.xpose.msrb.mxu1 %v1589_v33 }
 0x246   : > { %1302 = vmax.xlane.f32.xlu2 %v1301_v34 }
 0x248   : > { %1709 = vrot.lane.b32.xlu0 %v1583_v24, %s3645_s11 }
 0x249   : > { %1598 = vmatpush.bf16.xpose.msrb.mxu1 %v1586_v35 }
 0x24e   : > { %1159 = vmax.xlane.f32.xlu2 %v1158_v46 }
 0x250   : > { %1971 = vrot.lane.b32.xlu0 %v1583_v24, %s3646_s14 }
 0x258   : > { %1220 = vrot.lane.b32.xlu0 %v4055_v7, %s3645_s11 }
 0x260   : > { %1973 = vrot.lane.b32.xlu0 %v1584_v32, %s3646_s14 }
 0x266   : > { %1218 = vrot.lane.b32.xlu2 %v4057_v8, %s3645_s11 }
 0x26a   : > { %1162 = vmax.xlane.f32.xlu1 %v1161_v38 }
 0x278   : > { %v4185_v41 = vpop.xlane.xlu2 %1293 }
 0x279   : > { %v1316_v42 = vsub.f32 %v4115_v50, %v4185_v41  ;;  %v1164_v50 = vsel %vm853_vm0, %v4191_v48, -inf }
 0x27b   : > { %v1320_v44 = vmul.f32 1.442695, %v1316_v42 }
 0x27d   : > { %3244 = vpow2.f32 %v1320_v44 }
 0x280   : > { %v1351_v45 = vpop.permute.xlu2 %1350  ;;  %v4189_v47 = vpop.xlane.xlu1 %1296 }
 0x281   : > { %v1317_v49 = vsub.f32 %v4122_v55, %v4189_v47  ;;  %1369 = vmatpush.bf16.msra.mxu0 %v1351_v45 }
 0x283   : > { %v1322_v51 = vmul.f32 1.442695, %v1317_v49  ;;  %v4199_v54 = vpop.eup %3244 }
 0x285   : > { %1570 = vmatpush.bf16.msrb.mxu0 %v3987_v18  ;;  %3246 = vpow2.f32 %v1322_v51  ;;  %v1167_v18 = vsel %vm853_vm0, %v4203_v57, -inf }
 0x289   : > { %1571 = vmatpush.bf16.msrb.mxu0 %v3992_v19  ;;  %v4210_v19 = vpop.xlane.xlu1 %1299 }
 0x28a   : > { %1165 = vmax.xlane.f32.xlu0 %v1164_v50  ;;  %v1318_v14 = vsub.f32 %v4129_v61, %v4210_v19 }
 0x28b   : > { %v4201_v56 = vpop.eup %3246 }
 0x28c   : > { %v1348_v55 = vpack.c.bf16 %v4201_v56, %v4199_v54  ;;  %v1324_v17 = vmul.f32 1.442695, %v1318_v14 }
 0x28e   : > { %3023 = vmatmul.msk.bf16.vlgmr.msra.gmra.mxu0 %vm853_vm0, %v1348_v55  ;;  %3248 = vpow2.f32 %v1324_v17 }
 0x28f   : > { %1168 = vmax.xlane.f32.xlu2 %v1167_v18 }
 0x294   : > { %v4228_v27 = vpop.eup %3248 }
 0x298   : > { %v4280_v51 = vpop.f32.mrf.mxu0 }
 0x29e   : > { %1484 = vrot.lane.b32.xlu0 %v4055_v7, %s3646_s14 }
 0x2a0   : > { %v1386_v59 = vpop.permute.xlu1 %1385  ;;  %v4287_v55 = vpop.f32.mrf.mxu0 }
 0x2a1   : > { %3025 = vmatmul.msk.bf16.vlgmr.msra.gmra.mxu1 %vm994_vm1, %v1386_v59 }
 0x2a8   : > { %v1842_v60 = vpop.permute.xlu1 %1841 }
 0x2a9   : > { %v1846_v1 = vsel %vm994_vm1, %v1842_v60, 0 }
 0x2b1   : > { %3026 = vmatmul.msk.bf16.gmra.mxu1 %vm994_vm1, %v1388_v62 }
 0x2b2   : > { %v1712_v5 = vpop.permute.xlu0 %1711  ;;  %v1844_v6 = vpop.permute.xlu1 %1843 }
 0x2b3   : > { %v1717_v10 = vsel %vm994_vm1, %v1712_v5, 0  ;;  %v1849_v12 = vsel %vm994_vm1, %v1844_v6, 0 }
 0x2b4   : > { %1725 = vmatpush.bf16.xpose.msrb.mxu3 %v1717_v10  ;;  %1857 = vmatpush.bf16.xpose.msra.mxu1 %v1849_v12 }
 0x2b9   : > { %v4220_v7 = vpop.xlane.xlu2 %1302 }
 0x2ba   : > { %v1319_v22 = vsub.f32 %v4143_v9, %v4220_v7  ;;  %v1710_v3 = vpop.permute.xlu0 %1709 }
 0x2bb   : > { %v1714_v23 = vsel %vm994_vm1, %v1710_v3, 0 }
 0x2bc   : > { %v1326_v24 = vmul.f32 1.442695, %v1319_v22  ;;  %1726 = vmatpush.bf16.xpose.msrb.mxu3 %v1714_v23  ;;  %1858 = vmatpush.bf16.xpose.msra.mxu1 %v1846_v1 }
 0x2be   : > { %3250 = vpow2.f32 %v1326_v24 }
 0x2c1   : > { %3033 = vmatmul.msk.bf16.vlgmr.msrb.gmra.mxu1 %vm994_vm1, %v4013_v43  ;;  %v4234_v9 = vpop.xlane.xlu2 %1159 }
 0x2c2   : > { %v1972_v61 = vpop.permute.xlu0 %1971  ;;  %v1182_v34 = vsub.f32 %v4171_v36, %v4234_v9 }
 0x2c3   : > { %3037 = vmatmul.msk.bf16.vlgmr.msrb.gmra.mxu3 %vm994_vm1, %v4089_v29  ;;  %v1556_v29 = vpack.c.bf16 %v4085_v26, %v4082_v25  ;;  %v1976_v35 = vsel %vm994_vm1, %v1972_v61, 0 }
 0x2c4   : > { %v4232_v28 = vpop.eup %3250  ;;  %v1186_v46 = vmul.f32 1.442695, %v1182_v34 }
 0x2c5   : > { %v1349_v30 = vpack.c.bf16 %v4232_v28, %v4228_v27 }
 0x2c6   : > { %3252 = vpow2.f32 %v1186_v46 }
 0x2c7   : > { %3024 = vmatmul.msk.bf16.gmra.mxu0 %vm853_vm0, %v1349_v30 }
 0x2c9   : > { %v1219_v32 = vpop.permute.xlu2 %1218 }
 0x2ca   : > { %v1221_v31 = vpop.permute.xlu0 %1220 }
 0x2cb   : > { %1236 = vmatpush.bf16.msrb.mxu2 %v1221_v31 }
 0x2cc   : > { %v4259_v25 = vpop.eup %3252 }
 0x2cf   : > { %1237 = vmatpush.bf16.msrb.mxu2 %v1219_v32 }
 0x2d1   : > { %3034 = vmatmul.msk.bf16.gmra.mxu1 %vm994_vm1, %v4024_v53 }
 0x2d2   : > { %v1974_v43 = vpop.permute.xlu0 %1973 }
 0x2d3   : > { %v1979_v33 = vsel %vm994_vm1, %v1974_v43, 0  ;;  %3038 = vmatmul.msk.bf16.gmra.mxu3 %vm994_vm1, %v4073_v16  ;;  %v1557_v16 = vpack.c.bf16 %v4103_v40, %v4100_v39 }
 0x2d4   : > { %1987 = vmatpush.bf16.xpose.msra.mxu3 %v1979_v33 }
 0x2d7   : > { %3031 = vmatmul.msk.bf16.vlgmr.msrb.gmra.mxu0 %vm853_vm0, %v1556_v29 }
 0x2dc   : > { %1988 = vmatpush.bf16.xpose.msra.mxu3 %v1976_v35 }
 0x2dd   : > { %v4250_v53 = vpop.xlane.xlu1 %1162 }
 0x2de   : > { %v1183_v38 = vsub.f32 %v4179_v37, %v4250_v53 }
 0x2e0   : > { %v1188_v42 = vmul.f32 1.442695, %v1183_v38 }
 0x2e1   : > { %3041 = vmatmul.msk.bf16.vlgmr.msra.gmra.mxu1 %vm994_vm1, %v4065_v13 }
 0x2e2   : > { %3254 = vpow2.f32 %v1188_v42 }
 0x2e3   : > { %3045 = vmatmul.msk.bf16.vlgmr.msra.gmra.mxu3 %vm994_vm1, %v1386_v59  ;;  %v4293_v59 = vpop.f32.mrf.mxu0 }
 0x2e7   : > { %3032 = vmatmul.msk.bf16.gmra.mxu0 %vm853_vm0, %v1557_v16 }
 0x2e8   : > { %v4262_v26 = vpop.eup %3254 }
 0x2e9   : > { %v1214_v36 = vpack.c.bf16 %v4262_v26, %v4259_v25 }
 0x2eb   : > { %3019 = vmatmul.msk.bf16.vlgmr.msrb.gmra.mxu2 %vm853_vm0, %v1214_v36  ;;  %v4299_v5 = vpop.f32.mrf.mxu0 }
 0x2ec   : > { %5201 = vst [vmem:[#allocation24_spill] sm:$0xff] %v4299_v5 }
 0x2f1   : > { %3042 = vmatmul.msk.bf16.gmra.mxu1 %vm994_vm1, %v4071_v15 }
 0x2f3   : > { %3046 = vmatmul.msk.bf16.gmra.mxu3 %vm994_vm1, %v1388_v62 }
 0x2fd   : > { %v4270_v13 = vpop.xlane.xlu0 %1165 }
 0x2fe   : > { %v1184_v39 = vsub.f32 %v4191_v48, %v4270_v13 }
 0x300   : > { %v1190_v40 = vmul.f32 1.442695, %v1184_v39 }
 0x302   : > { %v4274_v37 = vpop.xlane.xlu2 %1168  ;;  %3256 = vpow2.f32 %v1190_v40 }
 0x303   : > { %v1185_v44 = vsub.f32 %v4203_v57, %v4274_v37 }
 0x305   : > { %v1192_v45 = vmul.f32 1.442695, %v1185_v44 }
 0x307   : > { %3258 = vpow2.f32 %v1192_v45 }
 0x308   : > { %v4278_v49 = vpop.eup %3256 }
 0x30b   : > { %v4305_v12 = vpop.f32.mrf.mxu0 }
 0x30d   : > { %v4282_v15 = vpop.eup %3258 }
 0x30e   : > { %v1215_v50 = vpack.c.bf16 %v4282_v15, %v4278_v49 }
 0x310   : > { %3020 = vmatmul.msk.bf16.gmra.mxu2 %vm853_vm0, %v1215_v50  ;;  %v1485_v48 = vpop.permute.xlu0 %1484 }
 0x311   : > { %1500 = vmatpush.bf16.msra.mxu2 %v1485_v48 }
 0x313   : > { %v4311_v1 = vpop.f32.mrf.mxu0 }
 0x31e   : > { %v4289_v18 = vpop.f32.mrf.mxu1 }
 0x31f   : > { %v1424_v57 = vsel %vm853_vm0, %v4289_v18, -inf }
 0x320   : > { %1425 = vmax.xlane.f32.xlu1 %v1424_v57 }
 0x326   : > { %v4295_v60 = vpop.f32.mrf.mxu1 }
 0x327   : > { %v1427_v62 = vsel %vm853_vm0, %v4295_v60, -inf }
 0x328   : > { %1428 = vmax.xlane.f32.xlu1 %v1427_v62 }
 0x32e   : > { %v4301_v6 = vpop.f32.mrf.mxu1 }
 0x32f   : > { %v1430_v10 = vsel %vm853_vm0, %v4301_v6, -inf }
 0x330   : > { %1431 = vmax.xlane.f32.xlu2 %v1430_v10 }
 0x336   : > { %v4307_v14 = vpop.f32.mrf.mxu1 }
 0x337   : > { %v1433_v17 = vsel %vm853_vm0, %v4307_v14, -inf }
 0x338   : > { %1434 = vmax.xlane.f32.xlu0 %v1433_v17 }
 0x33e   : > { %v4313_v22 = vpop.f32.mrf.mxu1 }
 0x33f   : > { %v1610_v3 = vsel %vm853_vm0, %v4313_v22, -inf }
 0x340   : > { %1611 = vmax.xlane.f32.xlu2 %v1610_v3 }
 0x341   : > { %1482 = vrot.lane.b32.xlu1 %v4057_v8, %s3646_s14 }
 0x344   : > { %v4319_v23 = vpop.f32.mrf.mxu0 }
 0x346   : > { %v4321_v24 = vpop.f32.mrf.mxu1  ;;  %v4329_v43 = vpop.f32.mrf.mxu3 }
 0x347   : > { %v1613_v36 = vsel %vm853_vm0, %v4321_v24, -inf }
 0x34c   : > { %v4323_v61 = vpop.f32.mrf.mxu0 }
 0x34e   : > { %v4325_v30 = vpop.f32.mrf.mxu1  ;;  %v4335_v34 = vpop.f32.mrf.mxu3 }
 0x34f   : > { %v1616_v31 = vsel %vm853_vm0, %v4325_v30, -inf }
 0x350   : > { %1617 = vmax.xlane.f32.xlu2 %v1616_v31 }
 0x354   : > { %v1573_v32 = vpop.f32.mrf.mxu0 }
 0x355   : > { %v1574_v42 = vadd.f32 %v4049_v63, %v1573_v32 }
 0x356   : > { %v4331_v33 = vpop.f32.mrf.mxu1  ;;  %v4339_v38 = vpop.f32.mrf.mxu3 }
 0x357   : > { %v1619_v8 = vsel %vm853_vm0, %v4331_v33, -inf  ;;  %v1744_v10 = vsel %vm853_vm0, %v4339_v38, -inf }
 0x358   : > { %1620 = vmax.xlane.f32.xlu2 %v1619_v8  ;;  %v1738_v8 = vsel %vm853_vm0, %v4329_v43, -inf }
 0x35c   : > { %v1575_v29 = vpop.f32.mrf.mxu0 }
 0x35d   : > { %v1576_v16 = vadd.f32 %v4049_v63, %v1575_v29 }
 0x35e   : > { %v4337_v46 = vpop.f32.mrf.mxu1  ;;  %v4356_v62 = vpop.f32.mrf.mxu3 }
 0x35f   : > { %v1676_v45 = vpack.c.bf16 %v1576_v16, %v1574_v42  ;;  %v1747_v17 = vsel %vm853_vm0, %v4356_v62, -inf  ;;  %v1870_v29 = vsel %vm853_vm0, %v4337_v46, -inf }
 0x364   : > { %v1578_v35 = vpop.f32.mrf.mxu0 }
 0x365   : > { %v1579_v39 = vadd.f32 %v4049_v63, %v1578_v35  ;;  %v1741_v35 = vsel %vm853_vm0, %v4335_v34, -inf }
 0x366   : > { %v4347_v50 = vpop.f32.mrf.mxu1 }
 0x367   : > { %v1873_v57 = vsel %vm853_vm0, %v4347_v50, -inf }
 0x36b   : > { %1614 = vmax.xlane.f32.xlu1 %v1613_v36 }
 0x36c   : > { %v1580_v40 = vpop.f32.mrf.mxu0 }
 0x36d   : > { %v1581_v44 = vadd.f32 %v4049_v63, %v1580_v40  ;;  %v4360_v63 = vpop.f32.mrf.mxu3 }
 0x36e   : > { %v4378_v16 = vpop.f32.mrf.mxu1 }
 0x36f   : > { %v4349_v48 = vpack.c.bf16 %v1581_v44, %v1579_v39  ;;  %v2000_v44 = vsel %vm853_vm0, %v4360_v63, -inf }
 0x370   : > { %1806 = vrot.lane.b32.xlu2 %v1676_v45, %s3645_s11 }
 0x371   : > { %1808 = vrot.lane.b32.xlu0 %v4349_v48, %s3645_s11  ;;  %s5232_s11 = sld [smem:[#allocation42_spill]] }
 0x373   : > { %1874 = vmax.xlane.f32.xlu1 %v1873_v57 }
 0x375   : > { %v4364_v3 = vpop.f32.mrf.mxu3 }
 0x376   : > { %v2003_v31 = vsel %vm853_vm0, %v4364_v3, -inf }
 0x37b   : > { %1745 = vmax.xlane.f32.xlu1 %v1744_v10 }
 0x383   : > { %1748 = vmax.xlane.f32.xlu1 %v1747_v17  ;;  %v1038_v17 = vsub.f32 -inf, %v4119_v52 }
 0x38b   : > { %2004 = vmax.xlane.f32.xlu1 %v2003_v31  ;;  %v4391_v31 = vpop.f32.mrf.mxu1 }
 0x393   : > { %v4368_v32 = vpop.xlane.xlu1 %1425 }
 0x394   : > { %v1448_v39 = vsub.f32 %v4289_v18, %v4368_v32  ;;  %v1879_v18 = vsel %vm853_vm0, %v4391_v31, -inf }
 0x396   : > { %v1452_v57 = vmul.f32 1.442695, %v1448_v39 }
 0x399   : > { %1739 = vmax.xlane.f32.xlu2 %v1738_v8 }
 0x39b   : > { %1871 = vmax.xlane.f32.xlu0 %v1870_v29  ;;  %v4376_v42 = vpop.xlane.xlu1 %1428 }
 0x39c   : > { %v1449_v36 = vsub.f32 %v4295_v60, %v4376_v42  ;;  %v1042_v60 = vmul.f32 1.442695, %v1038_v17 }
 0x39e   : > { %v1454_v40 = vmul.f32 1.442695, %v1449_v36 }
 0x3a0   : > { %3260 = vpow2.f32 %v1454_v40 }
 0x3a1   : > { %1742 = vmax.xlane.f32.xlu2 %v1741_v35  ;;  %3262 = vpow2.f32 %v1452_v57 }
 0x3a2   : > { %3264 = vpow2.f32 %v1042_v60 }
 0x3a3   : > { %v4388_v10 = vpop.xlane.xlu2 %1431 }
 0x3a4   : > { %1938 = vrot.lane.b32.xlu1 %v4349_v48, %s3644_s20  ;;  %v1450_v17 = vsub.f32 %v4301_v6, %v4388_v10 }
 0x3a6   : > { %v4398_v29 = vpop.eup %3260 }
 0x3a7   : > { %v4400_v39 = vpop.eup %3262 }
 0x3a8   : > { %v1480_v57 = vpack.c.bf16 %v4398_v29, %v4400_v39 }
 0x3a9   : > { %2001 = vmax.xlane.f32.xlu2 %v2000_v44 }
 0x3ab   : > { %v4396_v8 = vpop.xlane.xlu0 %1434 }
 0x3ac   : > { %5202 = vst [vmem:[#allocation25_spill] sm:$0xff] %v4396_v8  ;;  %v1451_v40 = vsub.f32 %v4307_v14, %v4396_v8  ;;  %v3265_v14 = vpop.eup %3264 }
 0x3ad   : > { %v4414_v21 = vmul.f32 0.0, %v3265_v14 }
 0x3ae   : > { %v1458_v60 = vmul.f32 1.442695, %v1451_v40 }
 0x3af   : > { %1936 = vrot.lane.b32.xlu0 %v1676_v45, %s3644_s20  ;;  %v1111_v6 = vadd.f32 %v4280_v51, %v4414_v21  ;;  %s5231_s20 = sld [smem:[#allocation40_spill]] }
 0x3b1   : > { %1880 = vmax.xlane.f32.xlu2 %v1879_v18 }
 0x3b3   : > { %v1483_v35 = vpop.permute.xlu1 %1482  ;;  %v1612_v36 = vpop.xlane.xlu2 %1611 }
 0x3b4   : > { %v1622_v44 = vmax.f32 %v4119_v52, %v1612_v36  ;;  %1501 = vmatpush.bf16.msra.mxu2 %v1483_v35  ;;  %v1456_v36 = vmul.f32 1.442695, %v1450_v17  ;;  %v1040_v35 = vsub.f32 -inf, %v4133_v0 }
 0x3b6   : > { %v1626_v18 = vsub.f32 %v4119_v52, %v1622_v44  ;;  %v1046_v8 = vmul.f32 1.442695, %v1040_v35 }
 0x3b7   : > { %2066 = vrot.lane.b32.xlu0 %v1676_v45, %s3646_s14  ;;  %3027 = vmatmul.msk.bf16.vlgmr.msra.gmra.mxu2 %vm853_vm0, %v1480_v57 }
 0x3b8   : > { %1690 = vmatpush.bf16.msrb.mxu2 %v4349_v48  ;;  %v1630_v5 = vmul.f32 1.442695, %v1626_v18 }
 0x3ba   : > { %3266 = vpow2.f32 %v1630_v5 }
 0x3bb   : > { %3268 = vpow2.f32 %v1458_v60 }
 0x3bc   : > { %1691 = vmatpush.bf16.msrb.mxu2 %v1676_v45  ;;  %3270 = vpow2.f32 %v1456_v36 }
 0x3bd   : > { %3272 = vpow2.f32 %v1046_v8  ;;  %v1876_v8 = vsel %vm853_vm0, %v4378_v16, -inf }
 0x3c0   : > { %v4418_v52 = vpop.eup %3266 }
 0x3c1   : > { %v4421_v57 = vmul.f32 %v4418_v52, %v1111_v6  ;;  %v4423_v40 = vpop.eup %3268 }
 0x3c2   : > { %v4425_v17 = vpop.eup %3270 }
 0x3c3   : > { %v1618_v45 = vpop.xlane.xlu2 %1617  ;;  %v1481_v18 = vpack.c.bf16 %v4423_v40, %v4425_v17  ;;  %v3273_v14 = vpop.eup %3272 }
 0x3c4   : > { %v4428_v5 = vmax.f32 %v4133_v0, %v1618_v45  ;;  %v4437_v36 = vmul.f32 0.0, %v3273_v14  ;;  %v1198_v45 = vsel %vm853_vm0, %v4259_v25, 0.0 }
 0x3c6   : > { %v1628_v51 = vsub.f32 %v4133_v0, %v4428_v5  ;;  %5203 = vst [vmem:[#allocation26_spill] sm:$0xff] %v4437_v36  ;;  %v1113_v35 = vadd.f32 %v4293_v59, %v4437_v36  ;;  %v1201_v59 = vsel %vm853_vm0, %v4262_v26, 0.0 }
 0x3c7   : > { %3028 = vmatmul.msk.bf16.gmra.mxu2 %vm853_vm0, %v1481_v18 }
 0x3c8   : > { %v1634_v60 = vmul.f32 1.442695, %v1628_v51  ;;  %v1638_v51 = vsub.f32 %v4313_v22, %v1622_v44 }
 0x3c9   : > { %2068 = vrot.lane.b32.xlu2 %v4349_v48, %s3646_s14  ;;  %v1039_v48 = vsub.f32 -inf, %v4126_v58  ;;  %s5227_s14 = sld [smem:[#allocation37_spill]] }
 0x3ca   : > { %3274 = vpow2.f32 %v1634_v60  ;;  %v4452_v60 = vpop.f32.mrf.mxu3  ;;  %v1642_v25 = vmul.f32 1.442695, %v1638_v51  ;;  %v1332_v51 = vsel %vm853_vm0, %v4199_v54, 0.0 }
 0x3cb   : > { %v1044_v18 = vmul.f32 1.442695, %v1039_v48  ;;  %v1621_v14 = vpop.xlane.xlu2 %1620 }
 0x3cd   : > { %3276 = vpow2.f32 %v1044_v18 }
 0x3ce   : > { %1877 = vmax.xlane.f32.xlu1 %v1876_v8  ;;  %3278 = vpow2.f32 %v1642_v25  ;;  %v4473_v25 = vmax.f32 %v4147_v11, %v1621_v14 }
 0x3d0   : > { %v4443_v6 = vpop.eup %3274  ;;  %v1641_v14 = vsub.f32 %v4331_v33, %v4473_v25 }
 0x3d1   : > { %5204 = vst [vmem:[#allocation27_spill] sm:$0xff] %v4443_v6  ;;  %v4446_v0 = vmul.f32 %v4443_v6, %v1113_v35  ;;  %v1305_v35 = vsub.f32 -inf, %v4189_v47 }
 0x3d3   : > { %5205 = vst [vmem:[#allocation28_spill] sm:$0xff] %v4446_v0  ;;  %v1310_v44 = vmul.f32 1.442695, %v1305_v35  ;;  %v3277_v18 = vpop.eup %3276 }
 0x3d4   : > { %v4470_v35 = vmul.f32 0.0, %v3277_v18 }
 0x3d6   : > { %1199 = vadd.xlane.f32.xlu1 %v1198_v45  ;;  %v2006_v45 = vsel %vm853_vm0, %v4452_v60, -inf }
 0x3de   : > { %v1615_v8 = vpop.xlane.xlu1 %1614  ;;  %1202 = vadd.xlane.f32.xlu1 %v1201_v59  ;;  %v4462_v59 = vpop.f32.mrf.mxu2 }
 0x3df   : > { %v1623_v0 = vmax.f32 %v4126_v58, %v1615_v8 }
 0x3e1   : > { %v1627_v48 = vsub.f32 %v4126_v58, %v1623_v0  ;;  %v1639_v22 = vsub.f32 %v4321_v24, %v1623_v0  ;;  %2007 = vmax.xlane.f32.xlu0 %v2006_v45  ;;  %v1172_v58 = vsub.f32 -inf, %v4270_v13  ;;  %v1807_v24 = vpop.permute.xlu2 %1806  ;;  %v1112_v45 = vadd.f32 %v4287_v55, %v4470_v35  ;;  %v4493_v55 = vpop.f32.mrf.mxu3 }
 0x3e3   : > { %v1632_v6 = vmul.f32 1.442695, %v1627_v48  ;;  %v1644_v36 = vmul.f32 1.442695, %v1639_v22  ;;  %v1809_v26 = vpop.permute.xlu0 %1808  ;;  %v1178_v22 = vmul.f32 1.442695, %v1172_v58 }
 0x3e4   : > { %1824 = vmatpush.bf16.msra.mxu0 %v1809_v26 }
 0x3e5   : > { %3280 = vpow2.f32 %v1632_v6  ;;  %v1335_v6 = vsel %vm853_vm0, %v4201_v56, 0.0 }
 0x3e6   : > { %3282 = vpow2.f32 %v1644_v36  ;;  %v1875_v8 = vpop.xlane.xlu1 %1874  ;;  %1333 = vadd.xlane.f32.xlu1 %v1332_v51  ;;  %v3279_v36 = vpop.eup %3278  ;;  %v1464_v51 = vsel %vm853_vm0, %v4400_v39, 0.0  ;;  %v1467_v39 = vsel %vm853_vm0, %v4398_v29, 0.0 }
 0x3e7   : > { %3284 = vpow2.f32 %v1310_v44  ;;  %v4468_v0 = vmax.f32 %v4189_v47, %v1875_v8  ;;  %v1640_v8 = vsub.f32 %v4325_v30, %v4428_v5  ;;  %v2009_v30 = vsel %vm853_vm0, %v4493_v55, -inf }
 0x3e8   : > { %1825 = vmatpush.bf16.msra.mxu0 %v1807_v24  ;;  %v4497_v24 = vpop.f32.mrf.mxu2 }
 0x3e9   : > { %v1887_v54 = vsub.f32 %v4189_v47, %v4468_v0  ;;  %1336 = vadd.xlane.f32.xlu0 %v1335_v6 }
 0x3eb   : > { %v4481_v48 = vpop.eup %3280  ;;  %v1892_v44 = vmul.f32 1.442695, %v1887_v54  ;;  %v1648_v54 = vmul.f32 1.442695, %v1641_v14 }
 0x3ec   : > { %v4483_v26 = vpop.eup %3282  ;;  %v4488_v18 = vmul.f32 %v4481_v48, %v1112_v45 }
 0x3ed   : > { %v3285_v56 = vpop.eup %3284  ;;  %v1674_v47 = vpack.c.bf16 %v4483_v26, %v3279_v36  ;;  %3286 = vpow2.f32 %v1892_v44 }
 0x3ee   : > { %v1746_v58 = vpop.xlane.xlu1 %1745  ;;  %1465 = vadd.xlane.f32.xlu1 %v1464_v51  ;;  %3288 = vpow2.f32 %v1178_v22  ;;  %v4503_v6 = vmul.f32 0.0, %v3285_v56  ;;  %v1646_v22 = vmul.f32 1.442695, %v1640_v8  ;;  %v1207_v8 = vsel %vm853_vm0, %v4282_v15, 0.0 }
 0x3ef   : > { %v4500_v33 = vmax.f32 %v4270_v13, %v1746_v58  ;;  %3035 = vmatmul.msk.bf16.vlgmr.msrb.gmra.mxu2 %vm853_vm0, %v1674_v47  ;;  %3290 = vpow2.f32 %v1648_v54  ;;  %v1473_v15 = vsel %vm853_vm0, %v4423_v40, 0.0  ;;  %v1069_v40 = vsel %vm853_vm0, %v4137_v4, 0.0 }
 0x3f0   : > { %v1382_v5 = vadd.f32 %v4311_v1, %v4503_v6  ;;  %v1244_v47 = vpop.f32.mrf.mxu2  ;;  %v1338_v1 = vsel %vm853_vm0, %v4228_v27, 0.0 }
 0x3f1   : > { %v1756_v45 = vsub.f32 %v4270_v13, %v4500_v33  ;;  %1468 = vadd.xlane.f32.xlu0 %v1467_v39  ;;  %v1204_v13 = vsel %vm853_vm0, %v4278_v49, 0.0 }
 0x3f2   : > { %2010 = vmax.xlane.f32.xlu2 %v2009_v30  ;;  %v1341_v30 = vsel %vm853_vm0, %v4232_v28, 0.0  ;;  %v1066_v28 = vsel %vm853_vm0, %v4135_v2, 0.0  ;;  %v1657_v2 = vsel %vm853_vm0, %v4483_v26, 0.0 }
 0x3f3   : > { %v4513_v44 = vpop.eup %3286  ;;  %v1762_v56 = vmul.f32 1.442695, %v1756_v45 }
 0x3f4   : > { %v4516_v14 = vmul.f32 %v4513_v44, %v1382_v5  ;;  %v3289_v29 = vpop.eup %3288  ;;  %v1470_v5 = vsel %vm853_vm0, %v4425_v17, 0.0 }
 0x3f5   : > { %3292 = vpow2.f32 %v1762_v56  ;;  %v4520_v51 = vmul.f32 0.0, %v3289_v29  ;;  %v4526_v58 = vpop.eup %3290  ;;  %v1170_v56 = vsub.f32 -inf, %v4234_v9  ;;  %v1304_v29 = vsub.f32 -inf, %v4185_v41 }
 0x3f6   : > { %3294 = vpow2.f32 %v1646_v22  ;;  %1205 = vadd.xlane.f32.xlu1 %v1204_v13  ;;  %v1749_v22 = vpop.xlane.xlu1 %1748  ;;  %v1654_v13 = vsel %vm853_vm0, %v3279_v36, 0.0 }
 0x3f7   : > { %v1251_v54 = vadd.f32 %v1244_v47, %v4520_v51  ;;  %v1174_v47 = vmul.f32 1.442695, %v1170_v56  ;;  %v1308_v17 = vmul.f32 1.442695, %v1304_v29  ;;  %v1072_v56 = vsel %vm853_vm0, %v4150_v20, 0.0 }
 0x3f9   : > { %1339 = vadd.xlane.f32.xlu0 %v1338_v1  ;;  %v1171_v1 = vsub.f32 -inf, %v4250_v53  ;;  %3296 = vpow2.f32 %v1174_v47  ;;  %v1899_v47 = vsub.f32 %v4347_v50, %v4468_v0 }
 0x3fa   : > { %1208 = vadd.xlane.f32.xlu2 %v1207_v8  ;;  %3298 = vpow2.f32 %v1308_v17 }
 0x3fb   : > { %v4529_v39 = vpop.eup %3292 }
 0x3fc   : > { %v4531_v49 = vpop.eup %3294  ;;  %v4534_v45 = vmul.f32 %v4529_v39, %v1251_v54 }
 0x3fd   : > { %v1675_v27 = vpack.c.bf16 %v4526_v58, %v4531_v49 }
 0x3fe   : > { %1342 = vadd.xlane.f32.xlu1 %v1341_v30  ;;  %v1176_v30 = vmul.f32 1.442695, %v1171_v1 }
 0x3ff   : > { %3036 = vmatmul.msk.bf16.gmra.mxu2 %vm853_vm0, %v1675_v27  ;;  %v4556_v27 = vpop.xlane.xlu1 %2004 }
 0x400   : > { %3300 = vpow2.f32 %v1176_v30 }
 0x401   : > { %1474 = vadd.xlane.f32.xlu0 %v1473_v15 }
 0x402   : > { %1471 = vadd.xlane.f32.xlu2 %v1470_v5 }
 0x406   : > { %1067 = vadd.xlane.f32.xlu1 %v1066_v28 }
 0x409   : > { %1655 = vadd.xlane.f32.xlu0 %v1654_v13 }
 0x40a   : > { %1070 = vadd.xlane.f32.xlu2 %v1069_v40  ;;  %v3297_v40 = vpop.eup %3296 }
 0x40b   : > { %v3299_v17 = vpop.eup %3298 }
 0x40c   : > { %v1740_v8 = vpop.xlane.xlu2 %1739  ;;  %v4575_v30 = vmul.f32 0.0, %v3299_v17 }
 0x40d   : > { %v1750_v54 = vmax.f32 %v4234_v9, %v1740_v8  ;;  %v4568_v8 = vmul.f32 0.0, %v3297_v40 }
 0x40e   : > { %1658 = vadd.xlane.f32.xlu1 %v1657_v2  ;;  %v1872_v36 = vpop.xlane.xlu0 %1871  ;;  %v3301_v2 = vpop.eup %3300 }
 0x40f   : > { %v1754_v15 = vsub.f32 %v4234_v9, %v1750_v54  ;;  %v1766_v4 = vsub.f32 %v4329_v43, %v1750_v54  ;;  %v1882_v5 = vmax.f32 %v4185_v41, %v1872_v36  ;;  %v1249_v36 = vadd.f32 %v4462_v59, %v4568_v8 }
 0x411   : > { %v1758_v28 = vmul.f32 1.442695, %v1754_v15  ;;  %v1770_v29 = vmul.f32 1.442695, %v1766_v4  ;;  %v1886_v13 = vsub.f32 %v4185_v41, %v1882_v5  ;;  %v1898_v26 = vsub.f32 %v4337_v46, %v1882_v5 }
 0x412   : > { %1073 = vadd.xlane.f32.xlu2 %v1072_v56  ;;  %v1904_v41 = vmul.f32 1.442695, %v1899_v47  ;;  %v4571_v46 = vmax.f32 %v4274_v37, %v1749_v22  ;;  %v1768_v4 = vsub.f32 %v4339_v38, %v4500_v33  ;;  %v4598_v47 = vmul.f32 0.0, %v3301_v2 }
 0x413   : > { %3302 = vpow2.f32 %v1758_v28  ;;  %v1890_v9 = vmul.f32 1.442695, %v1886_v13  ;;  %v1902_v43 = vmul.f32 1.442695, %v1898_v26 }
 0x414   : > { %3304 = vpow2.f32 %v1770_v29  ;;  %v1743_v1 = vpop.xlane.xlu2 %1742  ;;  %v1774_v26 = vmul.f32 1.442695, %v1768_v4 }
 0x415   : > { %3306 = vpow2.f32 %v1890_v9  ;;  %v1751_v20 = vmax.f32 %v4250_v53, %v1743_v1  ;;  %v1250_v1 = vadd.f32 %v4497_v24, %v4598_v47 }
 0x416   : > { %3308 = vpow2.f32 %v1902_v43  ;;  %v1939_v54 = vpop.permute.xlu1 %1938 }
 0x417   : > { %v1755_v50 = vsub.f32 %v4250_v53, %v1751_v20  ;;  %v1767_v0 = vsub.f32 %v4335_v34, %v1751_v20  ;;  %1954 = vmatpush.bf16.msra.mxu2 %v1939_v54  ;;  %v1381_v53 = vadd.f32 %v4305_v12, %v4575_v30  ;;  %3310 = vpow2.f32 %v1904_v41 }
 0x418   : > { %v1769_v34 = vsub.f32 %v4356_v62, %v4571_v46  ;;  %v1307_v12 = vsub.f32 -inf, %v4220_v7 }
 0x419   : > { %v4579_v15 = vpop.eup %3302  ;;  %v1760_v22 = vmul.f32 1.442695, %v1755_v50  ;;  %v1772_v5 = vmul.f32 1.442695, %v1767_v0 }
 0x41a   : > { %v3305_v56 = vpop.eup %3304  ;;  %v4588_v28 = vmul.f32 %v4579_v15, %v1249_v36  ;;  %v1776_v40 = vmul.f32 1.442695, %v1769_v34  ;;  %v1314_v20 = vmul.f32 1.442695, %v1307_v12 }
 0x41b   : > { %v4590_v29 = vpop.eup %3306  ;;  %3312 = vpow2.f32 %v1760_v22  ;;  %v1782_v59 = vsel %vm853_vm0, %v3305_v56, 0.0 }
 0x41c   : > { %v3309_v13 = vpop.eup %3308  ;;  %3314 = vpow2.f32 %v1772_v5  ;;  %1783 = vadd.xlane.f32.xlu1 %v1782_v59  ;;  %v2002_v38 = vpop.xlane.xlu2 %2001  ;;  %v4594_v33 = vmul.f32 %v4590_v29, %v1381_v53 }
 0x41d   : > { %v1914_v62 = vsel %vm853_vm0, %v3309_v13, 0.0  ;;  %v2012_v9 = vmax.f32 %v4368_v32, %v2002_v38  ;;  %v3311_v43 = vpop.eup %3310  ;;  %3316 = vpow2.f32 %v1774_v26 }
 0x41e   : > { %1915 = vadd.xlane.f32.xlu0 %v1914_v62  ;;  %3318 = vpow2.f32 %v1776_v40  ;;  %v1934_v2 = vpack.c.bf16 %v3311_v43, %v3309_v13  ;;  %v1917_v22 = vsel %vm853_vm0, %v3311_v43, 0.0  ;;  %v1436_v13 = vsub.f32 -inf, %v4368_v32 }
 0x41f   : > { %v2028_v50 = vsub.f32 %v4360_v63, %v2012_v9  ;;  %3320 = vpow2.f32 %v1314_v20 }
 0x421   : > { %v4603_v17 = vpop.eup %3312  ;;  %v1937_v41 = vpop.permute.xlu0 %1936  ;;  %v2032_v63 = vmul.f32 1.442695, %v2028_v50 }
 0x422   : > { %v3315_v54 = vpop.eup %3314  ;;  %1955 = vmatpush.bf16.msra.mxu2 %v1937_v41  ;;  %v4607_v0 = vmul.f32 %v4603_v17, %v1250_v1  ;;  %v1440_v1 = vmul.f32 1.442695, %v1436_v13 }
 0x423   : > { %v1802_v36 = vpack.c.bf16 %v3315_v54, %v3305_v56  ;;  %v1785_v4 = vsel %vm853_vm0, %v3315_v54, 0.0  ;;  %v3317_v53 = vpop.eup %3316  ;;  %3322 = vpow2.f32 %v2032_v63  ;;  %v2013_v54 = vmax.f32 %v4376_v42, %v4556_v27 }
 0x424   : > { %1786 = vadd.xlane.f32.xlu2 %v1785_v4  ;;  %1918 = vadd.xlane.f32.xlu1 %v1917_v22  ;;  %v1881_v24 = vpop.xlane.xlu2 %1880  ;;  %v3319_v59 = vpop.eup %3318  ;;  %v1788_v40 = vsel %vm853_vm0, %v3317_v53, 0.0 }
 0x425   : > { %v1885_v5 = vmax.f32 %v4220_v7, %v1881_v24  ;;  %3039 = vmatmul.msk.bf16.vlgmr.msra.gmra.mxu0 %vm853_vm0, %v1802_v36  ;;  %3043 = vmatmul.msk.bf16.vlgmr.msra.gmra.mxu2 %vm853_vm0, %v1934_v2  ;;  %v3321_v26 = vpop.eup %3320  ;;  %v1791_v62 = vsel %vm853_vm0, %v3319_v59, 0.0  ;;  %v1437_v2 = vsub.f32 -inf, %v4376_v42  ;;  %v4631_v22 = vpop.f32.mrf.mxu2 }
 0x427   : > { %v1889_v34 = vsub.f32 %v4220_v7, %v1885_v5  ;;  %v1901_v56 = vsub.f32 %v4391_v31, %v1885_v5  ;;  %v4619_v7 = vmul.f32 0.0, %v3321_v26  ;;  %v2016_v31 = vsub.f32 %v4368_v32, %v2012_v9 }
 0x428   : > { %v1803_v9 = vpack.c.bf16 %v3319_v59, %v3317_v53  ;;  %v2029_v5 = vsub.f32 %v4364_v3, %v2013_v54  ;;  %v1442_v63 = vmul.f32 1.442695, %v1437_v2  ;;  %v1663_v3 = vsel %vm853_vm0, %v4526_v58, 0.0 }
 0x429   : > { %v1896_v38 = vmul.f32 1.442695, %v1889_v34  ;;  %v1908_v12 = vmul.f32 1.442695, %v1901_v56  ;;  %v3323_v20 = vpop.eup %3322  ;;  %v1384_v41 = vadd.f32 %v4323_v61, %v4619_v7  ;;  %v2067_v50 = vpop.permute.xlu0 %2066  ;;  %v2020_v24 = vmul.f32 1.442695, %v2016_v31 }
 0x42a   : > { %v2044_v61 = vsel %vm853_vm0, %v3323_v20, 0.0  ;;  %v2017_v56 = vsub.f32 %v4376_v42, %v2013_v54  ;;  %v2034_v13 = vmul.f32 1.442695, %v2029_v5  ;;  %v1660_v59 = vsel %vm853_vm0, %v4531_v49, 0.0 }
 0x42b   : > { %3324 = vpow2.f32 %v1896_v38 }
 0x42c   : > { %3326 = vpow2.f32 %v1908_v12  ;;  %1792 = vadd.xlane.f32.xlu2 %v1791_v62  ;;  %1789 = vadd.xlane.f32.xlu1 %v1788_v40  ;;  %v2069_v43 = vpop.permute.xlu2 %2068  ;;  %v1306_v12 = vsub.f32 -inf, %v4210_v19  ;;  %v2022_v26 = vmul.f32 1.442695, %v2017_v56 }
 0x42d   : > { %2084 = vmatpush.bf16.msrb.mxu0 %v2069_v43  ;;  %3328 = vpow2.f32 %v1440_v1 }
 0x42e   : > { %3330 = vpow2.f32 %v2020_v24  ;;  %v1312_v1 = vmul.f32 1.442695, %v1306_v12 }
 0x42f   : > { %3332 = vpow2.f32 %v1442_v63 }
 0x430   : > { %3334 = vpow2.f32 %v2034_v13 }
 0x431   : > { %v4627_v36 = vpop.eup %3324  ;;  %2085 = vmatpush.bf16.msrb.mxu0 %v2067_v50  ;;  %3336 = vpow2.f32 %v2022_v26 }
 0x432   : > { %v4629_v4 = vpop.eup %3326  ;;  %v4634_v32 = vmul.f32 %v4627_v36, %v1384_v41  ;;  %3338 = vpow2.f32 %v1312_v1 }
 0x433   : > { %v1923_v27 = vsel %vm853_vm0, %v4629_v4, 0.0  ;;  %v3329_v34 = vpop.eup %3328 }
 0x434   : > { %2045 = vadd.xlane.f32.xlu2 %v2044_v61  ;;  %1924 = vadd.xlane.f32.xlu1 %v1923_v27  ;;  %v4642_v38 = vmul.f32 0.0, %v3329_v34  ;;  %v4650_v40 = vpop.eup %3330 }
 0x435   : > { %3040 = vmatmul.msk.bf16.gmra.mxu0 %vm853_vm0, %v1803_v9  ;;  %v3333_v43 = vpop.eup %3332 }
 0x436   : > { %v4655_v41 = vmul.f32 0.0, %v3333_v43  ;;  %v3335_v54 = vpop.eup %3334 }
 0x437   : > { %v2064_v49 = vpack.c.bf16 %v3335_v54, %v3323_v20  ;;  %v4659_v24 = vpop.eup %3336 }
 0x438   : > { %v3339_v34 = vpop.eup %3338 }
 0x439   : > { %v4668_v13 = vmul.f32 0.0, %v3339_v34  ;;  %v5206_v34 = vld [vmem:[#allocation25_spill] sm:$0xff] }
 0x43a   : > { %v1503_v62 = vpop.f32.mrf.mxu2 }
 0x43b   : > { %v1513_v53 = vadd.f32 %v1503_v62, %v4642_v38 }
 0x43c   : > { %1664 = vadd.xlane.f32.xlu2 %v1663_v3  ;;  %1661 = vadd.xlane.f32.xlu1 %v1660_v59 }
 0x43d   : > { %v4653_v42 = vmul.f32 %v4650_v40, %v1513_v53 }
 0x441   : > { %v1878_v31 = vpop.xlane.xlu1 %1877 }
 0x442   : > { %v1884_v58 = vmax.f32 %v4210_v19, %v1878_v31  ;;  %v1505_v50 = vpop.f32.mrf.mxu2 }
 0x443   : > { %v1514_v2 = vadd.f32 %v1505_v50, %v4655_v41 }
 0x444   : > { %v1888_v61 = vsub.f32 %v4210_v19, %v1884_v58  ;;  %v1900_v27 = vsub.f32 %v4378_v16, %v1884_v58  ;;  %v1383_v19 = vadd.f32 %v4319_v23, %v4668_v13  ;;  %v1438_v16 = vsub.f32 -inf, %v4388_v10 }
 0x445   : > { %3047 = vmatmul.msk.bf16.vlgmr.msrb.gmra.mxu0 %vm853_vm0, %v2064_v49  ;;  %v4665_v9 = vmul.f32 %v4659_v24, %v1514_v2 }
 0x446   : > { %v1894_v5 = vmul.f32 1.442695, %v1888_v61  ;;  %v1906_v63 = vmul.f32 1.442695, %v1900_v27  ;;  %v1444_v59 = vmul.f32 1.442695, %v1438_v16  ;;  %v1757_v16 = vsub.f32 %v4274_v37, %v4571_v46 }
 0x447   : > { %v1173_v27 = vsub.f32 -inf, %v4274_v37 }
 0x448   : > { %3340 = vpow2.f32 %v1894_v5 }
 0x449   : > { %3342 = vpow2.f32 %v1906_v63  ;;  %v1200_v56 = vpop.xlane.xlu1 %1199 }
 0x44a   : > { %v1210_v20 = vadd.f32 %v1200_v56, %v4568_v8  ;;  %3344 = vpow2.f32 %v1444_v59  ;;  %v1508_v5 = vpop.f32.mrf.mxu2  ;;  %v1180_v56 = vmul.f32 1.442695, %v1173_v27 }
 0x44c   : > { %v4671_v12 = vmul.f32 %v4579_v15, %v1210_v20  ;;  %v5207_v20 = vld [vmem:[#allocation23_spill] sm:$0xff] }
 0x44e   : > { %v4676_v26 = vpop.eup %3340 }
 0x44f   : > { %v3343_v62 = vpop.eup %3342  ;;  %v4679_v53 = vmul.f32 %v4676_v26, %v1383_v19 }
 0x450   : > { %v1920_v3 = vsel %vm853_vm0, %v3343_v62, 0.0  ;;  %v1935_v8 = vpack.c.bf16 %v4629_v4, %v3343_v62  ;;  %v2047_v4 = vsel %vm853_vm0, %v3335_v54, 0.0  ;;  %v1075_v54 = vsel %vm853_vm0, %v5207_v20, 0.0 }
 0x451   : > { %1921 = vadd.xlane.f32.xlu0 %v1920_v3  ;;  %v1203_v43 = vpop.xlane.xlu1 %1202 }
 0x452   : > { %v1211_v15 = vadd.f32 %v1203_v43, %v4598_v47  ;;  %3044 = vmatmul.msk.bf16.gmra.mxu2 %vm853_vm0, %v1935_v8  ;;  %v3345_v47 = vpop.eup %3344 }
 0x453   : > { %v1462_v63 = vmul.f32 0.0, %v3345_v47 }
 0x454   : > { %v2008_v23 = vpop.xlane.xlu0 %2007  ;;  %v4686_v1 = vmul.f32 %v4603_v17, %v1211_v15 }
 0x455   : > { %v2014_v31 = vmax.f32 %v4388_v10, %v2008_v23 }
 0x457   : > { %v2018_v58 = vsub.f32 %v4388_v10, %v2014_v31  ;;  %v2030_v50 = vsub.f32 %v4452_v60, %v2014_v31  ;;  %v1439_v10 = vsub.f32 -inf, %v5206_v34  ;;  %v1515_v60 = vadd.f32 %v1508_v5, %v1462_v63 }
 0x459   : > { %v2024_v49 = vmul.f32 1.442695, %v2018_v58  ;;  %v2036_v2 = vmul.f32 1.442695, %v2030_v50  ;;  %2048 = vadd.xlane.f32.xlu0 %v2047_v4  ;;  %v4692_v61 = vpop.xlane.xlu1 %1333  ;;  %v1446_v8 = vmul.f32 1.442695, %v1439_v10 }
 0x45a   : > { %v1764_v58 = vmul.f32 1.442695, %v1757_v16 }
 0x45b   : > { %3346 = vpow2.f32 %v2024_v49 }
 0x45c   : > { %3348 = vpow2.f32 %v2036_v2  ;;  %v4695_v17 = vpop.xlane.xlu0 %1336 }
 0x45d   : > { %3350 = vpow2.f32 %v1180_v56 }
 0x45e   : > { %3352 = vpow2.f32 %v1446_v8 }
 0x45f   : > { %3354 = vpow2.f32 %v1764_v58 }
 0x461   : > { %v3347_v19 = vpop.eup %3346  ;;  %1076 = vadd.xlane.f32.xlu0 %v1075_v54  ;;  %v1466_v62 = vpop.xlane.xlu1 %1465 }
 0x462   : > { %v3349_v3 = vpop.eup %3348  ;;  %v1476_v59 = vadd.f32 %v1466_v62, %v4642_v38  ;;  %v4703_v43 = vmul.f32 %v3347_v19, %v1515_v60 }
 0x463   : > { %v2050_v15 = vsel %vm853_vm0, %v3349_v3, 0.0  ;;  %v3351_v2 = vpop.eup %3350 }
 0x464   : > { %2051 = vadd.xlane.f32.xlu2 %v2050_v15  ;;  %v1469_v23 = vpop.xlane.xlu0 %1468  ;;  %v4707_v31 = vmul.f32 %v4650_v40, %v1476_v59  ;;  %v1510_v40 = vpop.f32.mrf.mxu2 }
 0x465   : > { %v1477_v50 = vadd.f32 %v1469_v23, %v4655_v41  ;;  %v2011_v37 = vpop.xlane.xlu2 %2010  ;;  %v3353_v10 = vpop.eup %3352  ;;  %v4718_v41 = vmul.f32 0.0, %v3351_v2 }
 0x466   : > { %v2015_v46 = vmax.f32 %v5206_v34, %v2011_v37  ;;  %v4722_v20 = vpop.eup %3354 }
 0x467   : > { %v4712_v4 = vmul.f32 %v4659_v24, %v1477_v50  ;;  %v1041_v50 = vsub.f32 -inf, %v4147_v11 }
 0x468   : > { %v2019_v38 = vsub.f32 %v5206_v34, %v2015_v46  ;;  %v2031_v49 = vsub.f32 %v4493_v55, %v2015_v46  ;;  %v1463_v55 = vmul.f32 0.0, %v3353_v10 }
 0x469   : > { %v4716_v47 = vpop.xlane.xlu1 %1205 }
 0x46a   : > { %v2026_v27 = vmul.f32 1.442695, %v2019_v38  ;;  %v2038_v5 = vmul.f32 1.442695, %v2031_v49  ;;  %v1516_v62 = vadd.f32 %v1510_v40, %v1463_v55 }
 0x46c   : > { %3356 = vpow2.f32 %v2026_v27  ;;  %v1340_v56 = vpop.xlane.xlu0 %1339 }
 0x46d   : > { %3358 = vpow2.f32 %v2038_v5  ;;  %v1346_v24 = vadd.f32 %v1340_v56, %v4668_v13  ;;  %v1209_v60 = vpop.xlane.xlu2 %1208  ;;  %v1048_v5 = vmul.f32 1.442695, %v1041_v50 }
 0x46e   : > { %v1213_v34 = vadd.f32 %v1209_v60, %v4718_v41 }
 0x46f   : > { %v4725_v54 = vmul.f32 %v4676_v26, %v1346_v24  ;;  %3360 = vpow2.f32 %v1048_v5 }
 0x470   : > { %v4728_v16 = vmul.f32 %v4722_v20, %v1213_v34 }
 0x471   : > { %v1343_v8 = vpop.xlane.xlu1 %1342 }
 0x472   : > { %v3357_v59 = vpop.eup %3356  ;;  %v1347_v15 = vadd.f32 %v1343_v8, %v4619_v7  ;;  %v1693_v23 = vpop.f32.mrf.mxu2  ;;  %v1629_v7 = vsub.f32 %v4147_v11, %v4473_v25 }
 0x473   : > { %v3359_v58 = vpop.eup %3358  ;;  %v4731_v13 = vmul.f32 %v3357_v59, %v1516_v62 }
 0x474   : > { %v2053_v37 = vsel %vm853_vm0, %v3359_v58, 0.0  ;;  %v1475_v46 = vpop.xlane.xlu0 %1474  ;;  %v2065_v38 = vpack.c.bf16 %v3359_v58, %v3349_v3  ;;  %v4736_v26 = vmul.f32 %v4627_v36, %v1347_v15  ;;  %v1636_v36 = vmul.f32 1.442695, %v1629_v7  ;;  %v5208_v58 = vld [vmem:[#allocation24_spill] sm:$0xff] }
 0x475   : > { %2054 = vadd.xlane.f32.xlu0 %v2053_v37  ;;  %v1479_v49 = vadd.f32 %v1475_v46, %v1463_v55  ;;  %v1472_v2 = vpop.xlane.xlu2 %1471 }
 0x476   : > { %v1478_v40 = vadd.f32 %v1472_v2, %v1462_v63  ;;  %3048 = vmatmul.msk.bf16.gmra.mxu0 %vm853_vm0, %v2065_v38  ;;  %3362 = vpow2.f32 %v1636_v36 }
 0x477   : > { %v4741_v27 = vmul.f32 %v3357_v59, %v1479_v49 }
 0x478   : > { %v4743_v10 = vmul.f32 %v3347_v19, %v1478_v40  ;;  %v3361_v19 = vpop.eup %3360 }
 0x479   : > { %v1068_v56 = vpop.xlane.xlu1 %1067  ;;  %v4753_v15 = vmul.f32 0.0, %v3361_v19 }
 0x47a   : > { %v1078_v3 = vadd.f32 %v1068_v56, %v4414_v21  ;;  %v1695_v24 = vpop.f32.mrf.mxu2 }
 0x47b   : > { %v1114_v50 = vadd.f32 %v5208_v58, %v4753_v15 }
 0x47c   : > { %v1650_v60 = vmul.f32 %v4418_v52, %v1078_v3  ;;  %v1656_v34 = vpop.xlane.xlu0 %1655  ;;  %v4751_v21 = vpop.eup %3362 }
 0x47d   : > { %v1071_v63 = vpop.xlane.xlu2 %1070  ;;  %v1673_v46 = vmul.f32 %v4751_v21, %v1114_v50 }
 0x47e   : > { %v1666_v55 = vadd.f32 %v1656_v34, %v1650_v60  ;;  %v1079_v62 = vadd.f32 %v1071_v63, %v4470_v35  ;;  %v1703_v34 = vadd.f32 %v1693_v23, %v4421_v57 }
 0x480   : > { %3364 = vrcp.f32 %v1666_v55  ;;  %v1651_v11 = vmul.f32 %v4481_v48, %v1079_v62  ;;  %v1344_v48 = vadd.f32 %v4692_v61, %v4575_v30  ;;  %v2112_v38 = vand.u32 2147483648, %v1666_v55 }
 0x481   : > { %v1659_v25 = vpop.xlane.xlu1 %1658  ;;  %v2110_v7 = vand.u32 2147483647, %v1666_v55  ;;  %vm2106_vm3 = vweird.f32 %v1666_v55 }
 0x482   : > { %v4749_v8 = vpop.f32.mrf.mxu2  ;;  %v1667_v59 = vadd.f32 %v1659_v25, %v1651_v11  ;;  %v2113_v36 = vor.u32 1.1754944e-38, %v2112_v38  ;;  %v1910_v61 = vmul.f32 %v4590_v29, %v1344_v48 }
 0x483   : > { %vm2111_vm5 = vcmp.eq.f32.partialorder %v2110_v7, 8.507059e+37 }
 0x484   : > { %3366 = vrcp.f32 %v1667_v59  ;;  %v2127_v25 = vand.u32 2147483648, %v1667_v59  ;;  %v2125_v50 = vand.u32 2147483647, %v1667_v59  ;;  %vm2121_vm7 = vweird.f32 %v1667_v59 }
 0x485   : > { %v4763_v63 = vpop.xlane.xlu2 %1073 }
 0x486   : > { %v3365_v52 = vpop.eup %3364  ;;  %v2128_v29 = vor.u32 1.1754944e-38, %v2127_v25  ;;  %vm2126_vm9 = vcmp.eq.f32.partialorder %v2125_v50, 8.507059e+37 }
 0x487   : > { %v2102_v37 = vmul.f32 %v3365_v52, %v1666_v55  ;;  %vm2107_vm2 = vweird.f32 %v3365_v52 }
 0x488   : > { %vm2108_vm4 = vmor %vm2106_vm3, %vm2107_vm2 }
 0x489   : > { %v2103_v35 = vsub.f32 1.0, %v2102_v37 }
 0x48a   : > { %v1700_v49 = vpop.f32.mrf.mxu2  ;;  %v3367_v2 = vpop.eup %3366 }
 0x48b   : > { %v2104_v40 = vmul.f32 %v3365_v52, %v2103_v35  ;;  %v4760_v5 = vadd.f32 %v1700_v49, %v1673_v46  ;;  %v2117_v56 = vmul.f32 %v3367_v2, %v1667_v59  ;;  %vm2122_vm6 = vweird.f32 %v3367_v2 }
 0x48c   : > { %v1345_v35 = vadd.f32 %v4695_v17, %v4503_v6  ;;  %vm2123_vm8 = vmor %vm2121_vm7, %vm2122_vm6 }
 0x48d   : > { %v2105_v3 = vadd.f32 %v3365_v52, %v2104_v40  ;;  %v2118_v60 = vsub.f32 1.0, %v2117_v56 }
 0x48e   : > { %v1911_v46 = vmul.f32 %v4513_v44, %v1345_v35 }
 0x48f   : > { %v1784_v30 = vpop.xlane.xlu1 %1783  ;;  %v2109_v62 = vsel %vm2108_vm4, %v3365_v52, %v2105_v3  ;;  %v2119_v11 = vmul.f32 %v3367_v2, %v2118_v60 }
 0x490   : > { %v1794_v19 = vadd.f32 %v1784_v30, %v4671_v12  ;;  %v2114_v58 = vsel %vm2111_vm5, %v2113_v36, %v2109_v62  ;;  %v1704_v12 = vadd.f32 %v1695_v24, %v4488_v18  ;;  %v1212_v18 = vadd.f32 %v4716_v47, %v4520_v51 }
 0x491   : > { %v1916_v55 = vpop.xlane.xlu0 %1915  ;;  %v2115_v37 = vmul.f32 %v2114_v58, %v1703_v34  ;;  %v2120_v57 = vadd.f32 %v3367_v2, %v2119_v11 }
 0x492   : > { %3368 = vrcp.f32 %v1794_v19  ;;  %v4769_v23 = vadd.f32 %v1916_v55, %v1910_v61  ;;  %v2174_v3 = vand.u32 2147483647, %v1794_v19  ;;  %v1780_v36 = vmul.f32 %v4529_v39, %v1212_v18 }
 0x493   : > { %2161 = vst.msk [vmem:[#allocation2] sm:$0xff] %vm994_vm1, %v2115_v37  ;;  %v2124_v52 = vsel %vm2123_vm8, %v3367_v2, %v2120_v57  ;;  %v2176_v60 = vand.u32 2147483648, %v1794_v19  ;;  %vm2170_vm11 = vweird.f32 %v1794_v19 }
 0x494   : > { %3370 = vrcp.f32 %v4769_v23  ;;  %v2129_v48 = vsel %vm2126_vm9, %v2128_v29, %v2124_v52  ;;  %vm2251_vm13 = vweird.f32 %v4769_v23  ;;  %vm2175_vm14 = vcmp.eq.f32.partialorder %v2174_v3, 8.507059e+37 }
 0x495   : > { %v2130_v17 = vmul.f32 %v2129_v48, %v1704_v12  ;;  %v2255_v50 = vand.u32 2147483647, %v4769_v23  ;;  %v2177_v37 = vor.u32 1.1754944e-38, %v2176_v60 }
 0x497   : > { %v1787_v38 = vpop.xlane.xlu2 %1786  ;;  %v1919_v6 = vpop.xlane.xlu1 %1918  ;;  %2162 = vst.msk [vmem:[#allocation2 + $0x8] sm:$0xff] %vm994_vm1, %v2130_v17  ;;  %vm2256_vm5 = vcmp.eq.f32.partialorder %v2255_v50, 8.507059e+37 }
 0x498   : > { %v3369_v49 = vpop.eup %3368  ;;  %v4776_v40 = vadd.f32 %v1787_v38, %v4686_v1  ;;  %v4778_v59 = vadd.f32 %v1919_v6, %v1911_v46  ;;  %v2257_v46 = vand.u32 2147483648, %v4769_v23 }
 0x499   : > { %v2166_v7 = vmul.f32 %v3369_v49, %v1794_v19  ;;  %vm2171_vm10 = vweird.f32 %v3369_v49 }
 0x49a   : > { %v4781_v56 = vpop.eup %3370  ;;  %3372 = vrcp.f32 %v4776_v40  ;;  %vm4796_vm12 = vmor %vm2170_vm11, %vm2171_vm10  ;;  %v2189_v48 = vand.u32 2147483647, %v4776_v40  ;;  %v2191_v17 = vand.u32 2147483648, %v4776_v40  ;;  %vm2185_vm4 = vweird.f32 %v4776_v40 }
 0x49b   : > { %v2167_v44 = vsub.f32 1.0, %v2166_v7  ;;  %v2247_v24 = vmul.f32 %v4781_v56, %v4769_v23  ;;  %3374 = vrcp.f32 %v4778_v59  ;;  %vm2252_vm15 = vweird.f32 %v4781_v56 }
 0x49c   : > { %vm4821_vm3 = vmor %vm2251_vm13, %vm2252_vm15  ;;  %vm4843_vm7 = vcmp.eq.f32.partialorder %v2189_v48, 8.507059e+37  ;;  %vm2266_vm9 = vweird.f32 %v4778_v59 }
 0x49d   : > { %v2248_v1 = vsub.f32 1.0, %v2247_v24  ;;  %v2168_v2 = vmul.f32 %v3369_v49, %v2167_v44 }
 0x49f   : > { %v1793_v34 = vpop.xlane.xlu2 %1792  ;;  %v1790_v30 = vpop.xlane.xlu1 %1789  ;;  %v2169_v61 = vadd.f32 %v3369_v49, %v2168_v2  ;;  %v2249_v51 = vmul.f32 %v4781_v56, %v2248_v1 }
 0x4a0   : > { %v3373_v47 = vpop.eup %3372  ;;  %v4792_v62 = vadd.f32 %v1793_v34, %v4728_v16  ;;  %v4794_v11 = vadd.f32 %v1790_v30, %v1780_v36  ;;  %v2258_v36 = vor.u32 1.1754944e-38, %v2257_v46 }
 0x4a1   : > { %v4801_v39 = vpop.eup %3374  ;;  %v2181_v58 = vmul.f32 %v3373_v47, %v4776_v40  ;;  %v2173_v19 = vsel %vm4796_vm12, %v3369_v49, %v2169_v61  ;;  %v2250_v29 = vadd.f32 %v4781_v56, %v2249_v51  ;;  %vm2186_vm2 = vweird.f32 %v3373_v47  ;;  %v5211_v49 = vld [vmem:[#allocation26_spill] sm:$0xff] }
 0x4a2   : > { %v2262_v16 = vmul.f32 %v4801_v39, %v4778_v59  ;;  %3376 = vrcp.f32 %v4792_v62  ;;  %v1827_v55 = vpop.f32.mrf.mxu0  ;;  %v2178_v52 = vsel %vm2175_vm14, %v2177_v37, %v2173_v19  ;;  %v1080_v7 = vadd.f32 %v4763_v63, %v5211_v49  ;;  %vm4839_vm6 = vmor %vm2185_vm4, %vm2186_vm2 }
 0x4a3   : > { %v2182_v35 = vsub.f32 1.0, %v2181_v58  ;;  %3378 = vrcp.f32 %v4794_v11  ;;  %v1837_v57 = vadd.f32 %v1827_v55, %v4588_v28  ;;  %v2254_v24 = vsel %vm4821_vm3, %v4781_v56, %v2250_v29  ;;  %v5218_v29 = vld [vmem:[#allocation27_spill] sm:$0xff] }
 0x4a4   : > { %v2263_v12 = vsub.f32 1.0, %v2262_v16  ;;  %v2192_v61 = vor.u32 1.1754944e-38, %v2191_v17  ;;  %v2259_v25 = vsel %vm2256_vm5, %v2258_v36, %v2254_v24  ;;  %v2272_v19 = vand.u32 2147483648, %v4778_v59 }
 0x4a5   : > { %v2179_v38 = vmul.f32 %v2178_v52, %v1837_v57  ;;  %v2183_v6 = vmul.f32 %v3373_v47, %v2182_v35  ;;  %vm2267_vm8 = vweird.f32 %v4801_v39  ;;  %v2270_v57 = vand.u32 2147483647, %v4778_v59 }
 0x4a6   : > { %v2264_v63 = vmul.f32 %v4801_v39, %v2263_v12  ;;  %v1652_v12 = vmul.f32 %v5218_v29, %v1080_v7  ;;  %vm4864_vm10 = vmor %vm2266_vm9, %vm2267_vm8  ;;  %v2204_v28 = vand.u32 2147483647, %v4794_v11  ;;  %vm2200_vm13 = vweird.f32 %v4794_v11 }
 0x4a7   : > { %v2046_v18 = vpop.xlane.xlu2 %2045  ;;  %v4825_v44 = vpop.xlane.xlu1 %1924  ;;  %2229 = vrot.lane.b32.xlu0 %v2179_v38, %s3647_s16  ;;  %v2184_v1 = vadd.f32 %v3373_v47, %v2183_v6  ;;  %v2273_v38 = vor.u32 1.1754944e-38, %v2272_v19  ;;  %v2206_v6 = vand.u32 2147483648, %v4794_v11  ;;  %vm2271_vm12 = vcmp.eq.f32.partialorder %v2270_v57, 8.507059e+37 }
 0x4a8   : > { %v4833_v23 = vpop.eup %3376  ;;  %v4836_v2 = vadd.f32 %v2046_v18, %v4707_v31  ;;  %v1957_v3 = vpop.f32.mrf.mxu2  ;;  %v2265_v55 = vadd.f32 %v4801_v39, %v2264_v63  ;;  %vm2205_vm15 = vcmp.eq.f32.partialorder %v2204_v28, 8.507059e+37  ;;  %vm2215_vm3 = vweird.f32 %v4792_v62 }
 0x4a9   : > { %v3379_v40 = vpop.eup %3378  ;;  %v2211_v34 = vmul.f32 %v4833_v23, %v4792_v62  ;;  %v1967_v30 = vadd.f32 %v1957_v3, %v4594_v33  ;;  %v2188_v31 = vsel %vm4839_vm6, %v3373_v47, %v2184_v1  ;;  %v2207_v60 = vor.u32 1.1754944e-38, %v2206_v6 }
 0x4aa   : > { %v2196_v51 = vmul.f32 %v3379_v40, %v4794_v11  ;;  %3380 = vrcp.f32 %v4836_v2  ;;  %v1829_v58 = vpop.f32.mrf.mxu0  ;;  %v2193_v47 = vsel %vm4843_vm7, %v2192_v61, %v2188_v31  ;;  %v2269_v48 = vsel %vm4864_vm10, %v4801_v39, %v2265_v55 }
 0x4ab   : > { %v2260_v50 = vmul.f32 %v2259_v25, %v1967_v30  ;;  %v1838_v16 = vadd.f32 %v1829_v58, %v4607_v0  ;;  %v2212_v37 = vsub.f32 1.0, %v2211_v34  ;;  %vm2201_vm11 = vweird.f32 %v3379_v40 }
 0x4ac   : > { %v2197_v33 = vsub.f32 1.0, %v2196_v51  ;;  %v2274_v39 = vsel %vm2271_vm12, %v2273_v38, %v2269_v48  ;;  %vm2202_vm14 = vmor %vm2200_vm13, %vm2201_vm11  ;;  %vm2216_vm2 = vweird.f32 %v4833_v23  ;;  %v2221_v61 = vand.u32 2147483648, %v4792_v62 }
 0x4ad   : > { %v2194_v35 = vmul.f32 %v2193_v47, %v1838_v16  ;;  %2310 = vrot.lane.b32.xlu2 %v2260_v50, %s3648_s26  ;;  %v2213_v1 = vmul.f32 %v4833_v23, %v2212_v37  ;;  %v1252_v11 = vadd.f32 %v4631_v22, %v4718_v41  ;;  %vm2217_vm4 = vmor %vm2215_vm3, %vm2216_vm2  ;;  %vm2332_vm8 = vweird.f32 %v4836_v2 }
 0x4ae   : > { %v2198_v52 = vmul.f32 %v3379_v40, %v2197_v33  ;;  %v2222_v16 = vor.u32 1.1754944e-38, %v2221_v61 }
 0x4af   : > { %v1662_v46 = vpop.xlane.xlu1 %1661  ;;  %2231 = vrot.lane.b32.xlu1 %v2194_v35, %s3647_s16  ;;  %v1801_v25 = vmul.f32 %v4722_v20, %v1252_v11  ;;  %v4900_v35 = vadd.f32 %v4825_v44, %v4736_v26 }
 0x4b0   : > { %v4873_v17 = vpop.eup %3380  ;;  %v1668_v59 = vadd.f32 %v1662_v46, %v1652_v12  ;;  %v1959_v49 = vpop.f32.mrf.mxu2  ;;  %v2199_v7 = vadd.f32 %v3379_v40, %v2198_v52  ;;  %v2336_v12 = vand.u32 2147483647, %v4836_v2  ;;  %v5223_v52 = vld [vmem:[#allocation28_spill] sm:$0xff] }
 0x4b1   : > { %v2328_v18 = vmul.f32 %v4873_v17, %v4836_v2  ;;  %v1968_v24 = vadd.f32 %v1959_v49, %v4516_v14  ;;  %v2214_v14 = vadd.f32 %v4833_v23, %v2213_v1  ;;  %vm2333_vm6 = vweird.f32 %v4873_v17 }
 0x4b2   : > { %3382 = vrcp.f32 %v1668_v59  ;;  %v1832_v63 = vpop.f32.mrf.mxu0  ;;  %v2203_v56 = vsel %vm2202_vm14, %v3379_v40, %v2199_v7  ;;  %v2140_v47 = vand.u32 2147483647, %v1668_v59  ;;  %v2142_v22 = vand.u32 2147483648, %v1668_v59  ;;  %vm4902_vm10 = vmor %vm2332_vm8, %vm2333_vm6 }
 0x4b3   : > { %v2275_v3 = vmul.f32 %v2274_v39, %v1968_v24  ;;  %v1839_v36 = vadd.f32 %v1832_v63, %v4534_v45  ;;  %v2329_v34 = vsub.f32 1.0, %v2328_v18  ;;  %v2208_v30 = vsel %vm2205_vm15, %v2207_v60, %v2203_v56  ;;  %v1665_v63 = vpop.xlane.xlu2 %1664 }
 0x4b4   : > { %v2219_v45 = vand.u32 2147483647, %v4792_v62  ;;  %v2218_v58 = vsel %vm2217_vm4, %v4833_v23, %v2214_v14  ;;  %v2338_v23 = vand.u32 2147483648, %v4836_v2  ;;  %vm2136_vm9 = vweird.f32 %v1668_v59 }
 0x4b5   : > { %2312 = vrot.lane.b32.xlu0 %v2275_v3, %s3648_s26  ;;  %v2209_v31 = vmul.f32 %v2208_v30, %v1839_v36  ;;  %v2330_v19 = vmul.f32 %v4873_v17, %v2329_v34  ;;  %v2143_v0 = vor.u32 1.1754944e-38, %v2142_v22  ;;  %v1705_v46 = vadd.f32 %v4749_v8, %v5223_v52 }
 0x4b6   : > { %vm2220_vm5 = vcmp.eq.f32.partialorder %v2219_v45, 8.507059e+37  ;;  %vm2141_vm12 = vcmp.eq.f32.partialorder %v2140_v47, 8.507059e+37  ;;  %v2339_v38 = vor.u32 1.1754944e-38, %v2338_v23  ;;  %3384 = vrcp.f32 %v4900_v35 }
 0x4b7   : > { %v2223_v41 = vsel %vm2220_vm5, %v2222_v16, %v2218_v58  ;;  %v2331_v20 = vadd.f32 %v4873_v17, %v2330_v19  ;;  %vm2337_vm13 = vcmp.eq.f32.partialorder %v2336_v12, 8.507059e+37  ;;  %vm2296_vm4 = vweird.f32 %v4900_v35 }
 0x4b8   : > { %v3383_v40 = vpop.eup %3382  ;;  %v2300_v47 = vand.u32 2147483647, %v4900_v35 }
 0x4b9   : > { %v2132_v51 = vmul.f32 %v3383_v40, %v1668_v59  ;;  %vm2137_vm7 = vweird.f32 %v3383_v40  ;;  %v2335_v48 = vsel %vm4902_vm10, %v4873_v17, %v2331_v20 }
 0x4ba   : > { %v1834_v50 = vpop.f32.mrf.mxu0  ;;  %vm2138_vm11 = vmor %vm2136_vm9, %vm2137_vm7  ;;  %v2340_v49 = vsel %vm2337_vm13, %v2339_v38, %v2335_v48  ;;  %vm2301_vm9 = vcmp.eq.f32.partialorder %v2300_v47, 8.507059e+37 }
 0x4bb   : > { %v2133_v55 = vsub.f32 1.0, %v2132_v51  ;;  %v1840_v33 = vadd.f32 %v1834_v50, %v1801_v25 }
 0x4bc   : > { %v3385_v17 = vpop.eup %3384 }
 0x4bd   : > { %v2134_v62 = vmul.f32 %v3383_v40, %v2133_v55  ;;  %v2224_v37 = vmul.f32 %v2223_v41, %v1840_v33  ;;  %2233 = vrot.lane.b32.xlu0 %v2209_v31, %s3647_s16  ;;  %v2292_v18 = vmul.f32 %v3385_v17, %v4900_v35  ;;  %vm2297_vm5 = vweird.f32 %v3385_v17 }
 0x4be   : > { %vm2298_vm7 = vmor %vm2296_vm4, %vm2297_vm5 }
 0x4bf   : > { %v2135_v57 = vadd.f32 %v3383_v40, %v2134_v62  ;;  %v2293_v3 = vsub.f32 1.0, %v2292_v18 }
 0x4c1   : > { %v2139_v26 = vsel %vm2138_vm11, %v3383_v40, %v2135_v57  ;;  %v2294_v14 = vmul.f32 %v3385_v17, %v2293_v3 }
 0x4c2   : > { %v2087_v44 = vpop.f32.mrf.mxu0  ;;  %v2144_v6 = vsel %vm2141_vm12, %v2143_v0, %v2139_v26 }
 0x4c3   : > { %v2097_v59 = vadd.f32 %v2087_v44, %v4653_v42  ;;  %v2145_v2 = vmul.f32 %v2144_v6, %v1705_v46 }
 0x4c4   : > { %v1922_v7 = vpop.xlane.xlu0 %1921 }
 0x4c5   : > { %v2341_v28 = vmul.f32 %v2340_v49, %v2097_v59  ;;  %v1928_v8 = vadd.f32 %v1922_v7, %v4725_v54  ;;  %2163 = vst.msk [vmem:[#allocation2 + $0x10] sm:$0xff] %vm994_vm1, %v2145_v2 }
 0x4c7   : > { %3386 = vrcp.f32 %v1928_v8  ;;  %2391 = vrot.lane.b32.xlu1 %v2341_v28, %s3649_s3  ;;  %v2287_v36 = vand.u32 2147483648, %v1928_v8  ;;  %v2285_v56 = vand.u32 2147483647, %v1928_v8  ;;  %vm2281_vm15 = vweird.f32 %v1928_v8 }
 0x4c9   : > { %vm2286_vm3 = vcmp.eq.f32.partialorder %v2285_v56, 8.507059e+37 }
 0x4ca   : > { %v2089_v62 = vpop.f32.mrf.mxu0 }
 0x4cb   : > { %v2098_v29 = vadd.f32 %v2089_v62, %v4665_v9 }
 0x4cc   : > { %v2049_v24 = vpop.xlane.xlu0 %2048 }
 0x4cd   : > { %v3387_v1 = vpop.eup %3386  ;;  %v2057_v42 = vadd.f32 %v2049_v24, %v4712_v4  ;;  %v2288_v4 = vor.u32 1.1754944e-38, %v2287_v36 }
 0x4ce   : > { %v2277_v39 = vmul.f32 %v3387_v1, %v1928_v8  ;;  %vm2282_vm14 = vweird.f32 %v3387_v1 }
 0x4cf   : > { %3388 = vrcp.f32 %v2057_v42  ;;  %2235 = vrot.lane.b32.xlu1 %v2224_v37, %s3647_s16  ;;  %vm2283_vm2 = vmor %vm2281_vm15, %vm2282_vm14  ;;  %v2353_v22 = vand.u32 2147483648, %v2057_v42  ;;  %v2351_v41 = vand.u32 2147483647, %v2057_v42  ;;  %vm2347_vm8 = vweird.f32 %v2057_v42 }
 0x4d0   : > { %v2278_v54 = vsub.f32 1.0, %v2277_v39 }
 0x4d1   : > { %v2354_v57 = vor.u32 1.1754944e-38, %v2353_v22  ;;  %vm2352_vm11 = vcmp.eq.f32.partialorder %v2351_v41, 8.507059e+37 }
 0x4d2   : > { %v2279_v60 = vmul.f32 %v3387_v1, %v2278_v54 }
 0x4d4   : > { %v1077_v34 = vpop.xlane.xlu0 %1076  ;;  %v2280_v30 = vadd.f32 %v3387_v1, %v2279_v60 }
 0x4d5   : > { %v3389_v31 = vpop.eup %3388  ;;  %v1081_v61 = vadd.f32 %v1077_v34, %v4753_v15  ;;  %v1962_v11 = vpop.f32.mrf.mxu2  ;;  %v2295_v15 = vadd.f32 %v3385_v17, %v2294_v14 }
 0x4d6   : > { %v2343_v45 = vmul.f32 %v3389_v31, %v2057_v42  ;;  %v1969_v40 = vadd.f32 %v1962_v11, %v4679_v53  ;;  %v2284_v51 = vsel %vm2283_vm2, %v3387_v1, %v2280_v30  ;;  %v2302_v53 = vand.u32 2147483648, %v4900_v35 }
 0x4d7   : > { %v1653_v25 = vmul.f32 %v4751_v21, %v1081_v61  ;;  %v2289_v58 = vsel %vm2286_vm3, %v2288_v4, %v2284_v51  ;;  %v2052_v19 = vpop.xlane.xlu2 %2051  ;;  %vm2348_vm6 = vweird.f32 %v3389_v31 }
 0x4d8   : > { %v2344_v50 = vsub.f32 1.0, %v2343_v45  ;;  %v2290_v16 = vmul.f32 %v2289_v58, %v1969_v40  ;;  %v4925_v55 = vadd.f32 %v2052_v19, %v4743_v10  ;;  %v2299_v10 = vsel %vm2298_vm7, %v3385_v17, %v2295_v15  ;;  %vm2349_vm10 = vmor %vm2347_vm8, %vm2348_vm6 }
 0x4d9   : > { %v1669_v33 = vadd.f32 %v1665_v63, %v1653_v25  ;;  %v2303_v23 = vor.u32 1.1754944e-38, %v2302_v53 }
 0x4da   : > { %3390 = vrcp.f32 %v4925_v55  ;;  %v2345_v21 = vmul.f32 %v3389_v31, %v2344_v50  ;;  %v2368_v63 = vand.u32 2147483648, %v4925_v55  ;;  %vm2362_vm3 = vweird.f32 %v4925_v55 }
 0x4db   : > { %3392 = vrcp.f32 %v1669_v33  ;;  %v2304_v52 = vsel %vm2301_vm9, %v2303_v23, %v2299_v10  ;;  %v2157_v9 = vand.u32 2147483648, %v1669_v33  ;;  %vm2151_vm13 = vweird.f32 %v1669_v33 }
 0x4dc   : > { %v2346_v37 = vadd.f32 %v3389_v31, %v2345_v21  ;;  %v2369_v56 = vor.u32 1.1754944e-38, %v2368_v63  ;;  %vm2241_vm9 = vcmask 130112  }
 0x4dd   : > { %v1964_v20 = vpop.f32.mrf.mxu2  ;;  %v2158_v24 = vor.u32 1.1754944e-38, %v2157_v9 }
 0x4de   : > { %v1970_v12 = vadd.f32 %v1964_v20, %v4634_v32  ;;  %v2350_v0 = vsel %vm2349_vm10, %v3389_v31, %v2346_v37  ;;  %v2155_v32 = vand.u32 2147483647, %v1669_v33  ;;  %vm2322_vm10 = vcmask 195712  }
 0x4df   : > { %v2355_v46 = vsel %vm2352_vm11, %v2354_v57, %v2350_v0  ;;  %vm2403_vm11 = vcmask 261312   ;;  %v3229_v0 = vld [vmem:[%s5225_s13] ss:$0 sm:$0xff] }
 0x4e0   : > { %v3391_v48 = vpop.eup %3390  ;;  %v2305_v26 = vmul.f32 %v2304_v52, %v1970_v12  ;;  %v2356_v35 = vmul.f32 %v2355_v46, %v2098_v29  ;;  %vm2156_vm15 = vcmp.eq.f32.partialorder %v2155_v32, 8.507059e+37  ;;  %v3416_v32 = vld [vmem:[%s3931_s25 + $0x10] sm:$0xff] }
 0x4e1   : > { %v3393_v44 = vpop.eup %3392  ;;  %v2358_v6 = vmul.f32 %v3391_v48, %v4925_v55  ;;  %vm2363_vm2 = vweird.f32 %v3391_v48 }
 0x4e2   : > { %v2147_v38 = vmul.f32 %v3393_v44, %v1669_v33  ;;  %2316 = vrot.lane.b32.xlu0 %v2305_v26, %s3648_s26  ;;  %2393 = vrot.lane.b32.xlu2 %v2356_v35, %s3649_s3  ;;  %vm2152_vm12 = vweird.f32 %v3393_v44  ;;  %vm2364_vm4 = vmor %vm2362_vm3, %vm2363_vm2 }
 0x4e3   : > { %v2359_v49 = vsub.f32 1.0, %v2358_v6  ;;  %vm2153_vm14 = vmor %vm2151_vm13, %vm2152_vm12  ;;  %v3415_v6 = vld [vmem:[%s3931_s25 + $0x8] sm:$0xff] }
 0x4e4   : > { %v2148_v59 = vsub.f32 1.0, %v2147_v38 }
 0x4e5   : > { %v2360_v17 = vmul.f32 %v3391_v48, %v2359_v49 }
 0x4e6   : > { %v2149_v2 = vmul.f32 %v3393_v44, %v2148_v59 }
 0x4e7   : > { %v2361_v39 = vadd.f32 %v3391_v48, %v2360_v17 }
 0x4e8   : > { %v2055_v7 = vpop.xlane.xlu0 %2054  ;;  %v2150_v28 = vadd.f32 %v3393_v44, %v2149_v2 }
 0x4e9   : > { %v2059_v8 = vadd.f32 %v2055_v7, %v4741_v27  ;;  %v2366_v27 = vand.u32 2147483647, %v4925_v55  ;;  %v2365_v36 = vsel %vm2364_vm4, %v3391_v48, %v2361_v39  ;;  %v3414_v48 = vld [vmem:[%s3931_s25] sm:$0xff] }
 0x4ea   : > { %2314 = vrot.lane.b32.xlu2 %v2290_v16, %s3648_s26  ;;  %v2154_v18 = vsel %vm2153_vm14, %v3393_v44, %v2150_v28  ;;  %v3100_v16 = vld [vmem:[%s5224_s18 + $0x8] sm:$0xff] }
 0x4eb   : > { %3394 = vrcp.f32 %v2059_v8  ;;  %v2159_v1 = vsel %vm2156_vm15, %v2158_v24, %v2154_v18  ;;  %vm2367_vm5 = vcmp.eq.f32.partialorder %v2366_v27, 8.507059e+37  ;;  %v2383_v61 = vand.u32 2147483648, %v2059_v8  ;;  %2441 = vmatpush.bf16.msrb.mxu1 %v3100_v16  ;;  %v3417_v18 = vld [vmem:[%s3931_s25 + $0x18] sm:$0xff] }
 0x4ec   : > { %v2160_v42 = vmul.f32 %v2159_v1, %v4760_v5  ;;  %v2370_v5 = vsel %vm2367_vm5, %v2369_v56, %v2365_v36  ;;  %v2381_v4 = vand.u32 2147483647, %v2059_v8 }
 0x4ed   : > { %v2384_v51 = vor.u32 1.1754944e-38, %v2383_v61 }
 0x4ee   : > { %2164 = vst.msk [vmem:[#allocation2 + $0x18] sm:$0xff] %vm994_vm1, %v2160_v42  ;;  %vm2377_vm1 = vweird.f32 %v2059_v8  ;;  %vm2382_vm8 = vcmp.eq.f32.partialorder %v2381_v4, 8.507059e+37  ;;  %v3650_v42 = vmov 32.0  }
 0x4ef   : > { %3396 = vrcp.f32 %v3650_v42 }
 0x4f1   : > { %v3395_v3 = vpop.eup %3394 }
 0x4f2   : > { %v2373_v54 = vmul.f32 %v3395_v3, %v2059_v8  ;;  %vm2378_vm6 = vweird.f32 %v3395_v3 }
 0x4f3   : > { %v2092_v60 = vpop.f32.mrf.mxu0  ;;  %vm2379_vm7 = vmor %vm2377_vm1, %vm2378_vm6 }
 0x4f4   : > { %v2374_v34 = vsub.f32 1.0, %v2373_v54  ;;  %v2099_v30 = vadd.f32 %v2092_v60, %v4703_v43 }
 0x4f5   : > { %v3397_v39 = vpop.eup %3396 }
 0x4f6   : > { %v2371_v14 = vmul.f32 %v2370_v5, %v2099_v30  ;;  %v2375_v31 = vmul.f32 %v3395_v3, %v2374_v34  ;;  %v2473_v63 = vmul.f32 32.0, %v3397_v39  ;;  %vm2477_vm12 = vweird.f32 %v3397_v39 }
 0x4f8   : > { %2395 = vrot.lane.b32.xlu1 %v2371_v14, %s3649_s3  ;;  %v2376_v11 = vadd.f32 %v3395_v3, %v2375_v31  ;;  %v2474_v27 = vsub.f32 1.0, %v2473_v63 }
 0x4fa   : > { %v2380_v45 = vsel %vm2379_vm7, %v3395_v3, %v2376_v11  ;;  %v2475_v3 = vmul.f32 %v3397_v39, %v2474_v27 }
 0x4fb   : > { %v2094_v40 = vpop.f32.mrf.mxu0  ;;  %v2385_v58 = vsel %vm2382_vm8, %v2384_v51, %v2380_v45 }
 0x4fc   : > { %v2100_v25 = vadd.f32 %v2094_v40, %v4731_v13  ;;  %v3099_v13 = vld [vmem:[%s5224_s18] sm:$0xff]  ;;  %v2476_v54 = vadd.f32 %v3397_v39, %v2475_v3 }
 0x4fd   : > { %2442 = vmatpush.bf16.msrb.mxu1 %v3099_v13 }
 0x4fe   : > { %v2386_v43 = vmul.f32 %v2385_v58, %v2100_v25  ;;  %v4980_v36 = vsel %vm2477_vm12, %v3397_v39, %v2476_v54 }
 0x500   : > { %2397 = vrot.lane.b32.xlu2 %v2386_v43, %s3649_s3  ;;  %s5229_s3 = sld [smem:[#allocation41_spill]] }
 0x506   : > { %s5230_s17 = smov %s5229_s3 }
 0x507   : > { %v2311_v50 = vpop.permute.xlu2 %2310 }
 0x519   : > { %v2230_v19 = vpop.permute.xlu0 %2229 }
 0x51a   : > { %2242 = vst.msk [vmem:[#allocation2] sm:$0xff] %vm2241_vm9, %v2230_v19 }
 0x51b   : > { %2323 = vst.msk [vmem:[#allocation2] sm:$0xff] %vm2322_vm10, %v2311_v50 }
 0x521   : > { %v2232_v55 = vpop.permute.xlu1 %2231 }
 0x522   : > { %2243 = vst.msk [vmem:[#allocation2 + $0x8] sm:$0xff] %vm2241_vm9, %v2232_v55 }
 0x527   : > { %v2313_v15 = vpop.permute.xlu0 %2312 }
 0x528   : > { %2324 = vst.msk [vmem:[#allocation2 + $0x8] sm:$0xff] %vm2322_vm10, %v2313_v15 }
 0x52f   : > { %v2234_v33 = vpop.permute.xlu0 %2233 }
 0x530   : > { %2244 = vst.msk [vmem:[#allocation2 + $0x10] sm:$0xff] %vm2241_vm9, %v2234_v33 }
 0x539   : > { %v2392_v47 = vpop.permute.xlu1 %2391 }
 0x53a   : > { %2404 = vst.msk [vmem:[#allocation2] sm:$0xff] %vm2403_vm11, %v2392_v47  ;;  %v3102_v47 = vld [vmem:[%s5226_s19 + $0x8] sm:$0xff] }
 0x53b   : > { %2603 = vmatpush.bf16.msrb.mxu2 %v3102_v47 }
 0x53c   : > { %v2394_v53 = vpop.permute.xlu2 %2393 }
 0x53d   : > { %2405 = vst.msk [vmem:[#allocation2 + $0x8] sm:$0xff] %vm2403_vm11, %v2394_v53  ;;  %v3101_v53 = vld [vmem:[%s5226_s19] sm:$0xff] }
 0x53f   : > { %2604 = vmatpush.bf16.msrb.mxu2 %v3101_v53 }
 0x541   : > { %v2236_v22 = vpop.permute.xlu1 %2235  ;;  %v2408_v41 = vld [vmem:[#allocation2] sm:$0xff] }
 0x542   : > { %2245 = vst.msk [vmem:[#allocation2 + $0x18] sm:$0xff] %vm2241_vm9, %v2236_v22 }
 0x544   : > { %v2315_v21 = vpop.permute.xlu2 %2314  ;;  %v2409_v62 = vld [vmem:[#allocation2 + $0x8] sm:$0xff] }
 0x545   : > { %2325 = vst.msk [vmem:[#allocation2 + $0x10] sm:$0xff] %vm2322_vm10, %v2315_v21  ;;  %v2412_v10 = vpack.c.bf16 %v2409_v62, %v2408_v41 }
 0x547   : > { %3057 = vmatmul.msk.bf16.vlgmr.msrb.gmra.mxu1 %vm853_vm0, %v2412_v10 }
 0x554   : > { %v2317_v37 = vpop.permute.xlu0 %2316 }
 0x555   : > { %2326 = vst.msk [vmem:[#allocation2 + $0x18] sm:$0xff] %vm2322_vm10, %v2317_v37  ;;  %vm2658_vm10 = vcmask 523264  }
 0x55a   : > { %v2398_v20 = vpop.permute.xlu2 %2397 }
 0x55b   : > { %2407 = vst.msk [vmem:[#allocation2 + $0x18] sm:$0xff] %vm2403_vm11, %v2398_v20 }
 0x562   : > { %v2411_v29 = vld [vmem:[#allocation2 + $0x18] sm:$0xff] }
 0x56a   : > { %v2396_v23 = vpop.permute.xlu1 %2395 }
 0x56b   : > { %2406 = vst.msk [vmem:[#allocation2 + $0x10] sm:$0xff] %vm2403_vm11, %v2396_v23 }
 0x572   : > { %v2410_v57 = vld [vmem:[#allocation2 + $0x10] sm:$0xff] }
 0x573   : > { %v2413_v12 = vpack.c.bf16 %v2411_v29, %v2410_v57 }
 0x575   : > { %3058 = vmatmul.msk.bf16.gmra.mxu1 %vm853_vm0, %v2413_v12 }
 0x5c4   : > { %v2444_v52 = vpop.f32.mrf.mxu1 }
 0x5c5   : > { %v2445_v46 = vadd.f32 %v3229_v0, %v2444_v52 }
 0x5c7   : > { %v2454_v26 = vadd.f32 %v3414_v48, %v2445_v46 }
 0x5c9   : > { %v2460_v35 = vsel %vm853_vm0, %v2454_v26, 0.0 }
 0x5ca   : > { %2461 = vadd.xlane.f32.xlu0 %v2460_v35 }
 0x5cc   : > { %v2446_v44 = vpop.f32.mrf.mxu1 }
 0x5cd   : > { %v2447_v38 = vadd.f32 %v3229_v0, %v2446_v44 }
 0x5cf   : > { %v2455_v59 = vadd.f32 %v3415_v6, %v2447_v38  ;;  %v3231_v6 = vld [vmem:[%s5228_s1] ss:$0 sm:$0xff] }
 0x5d1   : > { %v2463_v2 = vsel %vm853_vm0, %v2455_v59, 0.0 }
 0x5d2   : > { %2464 = vadd.xlane.f32.xlu1 %v2463_v2 }
 0x5f2   : > { %v2449_v9 = vpop.f32.mrf.mxu1 }
 0x5f3   : > { %v2450_v49 = vadd.f32 %v3229_v0, %v2449_v9 }
 0x5f5   : > { %v2456_v7 = vadd.f32 %v3416_v32, %v2450_v49 }
 0x5f7   : > { %v2466_v28 = vsel %vm853_vm0, %v2456_v7, 0.0 }
 0x5f8   : > { %2467 = vadd.xlane.f32.xlu2 %v2466_v28 }
 0x5fa   : > { %v2451_v8 = vpop.f32.mrf.mxu1 }
 0x5fb   : > { %v2452_v17 = vadd.f32 %v3229_v0, %v2451_v8 }
 0x5fd   : > { %v2457_v24 = vadd.f32 %v3417_v18, %v2452_v17 }
 0x5ff   : > { %v2469_v1 = vsel %vm853_vm0, %v2457_v24, 0.0 }
 0x600   : > { %2470 = vadd.xlane.f32.xlu0 %v2469_v1 }
 0x63d   : > { %v2462_v60 = vpop.xlane.xlu0 %2461 }
 0x63e   : > { %v2479_v56 = vmul.f32 %v4980_v36, %v2462_v60 }
 0x640   : > { %v2483_v34 = vsub.f32 %v2454_v26, %v2479_v56  ;;  %v3230_v26 = vld [vmem:[%s5227_s14] ss:$0 sm:$0xff]  ;;  %s5233_s14 = sld [smem:[#allocation16_spill]] }
 0x642   : > { %v2487_v30 = vmul.f32 %v2483_v34, %v2483_v34 }
 0x644   : > { %v2491_v5 = vsel %vm853_vm0, %v2487_v30, 0.0 }
 0x645   : > { %v2465_v14 = vpop.xlane.xlu1 %2464  ;;  %2492 = vadd.xlane.f32.xlu2 %v2491_v5 }
 0x646   : > { %v2480_v31 = vmul.f32 %v4980_v36, %v2465_v14  ;;  %s2980_s27 = sshll.u32 %s5233_s14, 1 }
 0x647   : > { %s809_s1 = sadd.s32 %s5234_s24, %s2980_s27 }
 0x648   : > { %v2484_v61 = vsub.f32 %v2455_v59, %v2480_v31  ;;  %s2981_s16 = sshll.u32 %s809_s1, 2 }
 0x649   : > { %p811_p3 = scmp.lt.s32.totalorder %s2981_s16, 15 }
 0x64a   : > { %v2488_v11 = vmul.f32 %v2484_v61, %v2484_v61 }
 0x64b   : > { %s5257_s16 = smov (!%p811_p3, %s2981_s16), 15 }
 0x64c   : > { %v2494_v4 = vsel %vm853_vm0, %v2488_v11, 0.0  ;;  %s2982_s10 = sshll.u32 %s5257_s16, 3 }
 0x64d   : > { %2495 = vadd.xlane.f32.xlu1 %v2494_v4 }
 0x66b   : > { %v2468_v45 = vpop.xlane.xlu2 %2467 }
 0x66c   : > { %v2481_v40 = vmul.f32 %v4980_v36, %v2468_v45 }
 0x66e   : > { %v4987_v51 = vsub.f32 %v2456_v7, %v2481_v40 }
 0x670   : > { %v2489_v25 = vmul.f32 %v4987_v51, %v4987_v51 }
 0x672   : > { %v2497_v58 = vsel %vm853_vm0, %v2489_v25, 0.0 }
 0x673   : > { %2498 = vadd.xlane.f32.xlu0 %v2497_v58  ;;  %v2471_v43 = vpop.xlane.xlu0 %2470 }
 0x674   : > { %v2482_v19 = vmul.f32 %v4980_v36, %v2471_v43 }
 0x676   : > { %v4993_v50 = vsub.f32 %v2457_v24, %v2482_v19  ;;  %v3106_v19 = vld [vmem:[%s5229_s3 + $0x18] sm:$0xff] }
 0x677   : > { %2669 = vmatpush.bf16.msrb.mxu3 %v3106_v19 }
 0x678   : > { %v2490_v16 = vmul.f32 %v4993_v50, %v4993_v50 }
 0x67a   : > { %v2500_v55 = vsel %vm853_vm0, %v2490_v16, 0.0  ;;  %v3103_v16 = vld [vmem:[%s5230_s17] sm:$0xff] }
 0x67b   : > { %2501 = vadd.xlane.f32.xlu2 %v2500_v55 }
 0x6b8   : > { %v2493_v13 = vpop.xlane.xlu2 %2492 }
 0x6b9   : > { %v2503_v15 = vmul.f32 %v2493_v13, %v4980_v36  ;;  %v3232_v13 = vld [vmem:[%s5231_s20] ss:$0 sm:$0xff]  ;;  %s5077_s20 = scalar_lea.vmem %s5237_s28, %s2982_s10 }
 0x6bb   : > { %v2507_v33 = vadd.f32 1e-05, %v2503_v15 }
 0x6bd   : > { %3398 = vrsqrt.f32 %v2507_v33  ;;  %vm2517_vm14 = vweird.f32 %v2507_v33 }
 0x6c0   : > { %v2496_v22 = vpop.xlane.xlu1 %2495 }
 0x6c1   : > { %v2504_v21 = vmul.f32 %v2496_v22, %v4980_v36 }
 0x6c3   : > { %v3399_v41 = vpop.eup %3398  ;;  %v2508_v62 = vadd.f32 1e-05, %v2504_v21 }
 0x6c4   : > { %v2512_v10 = vmul.f32 %v3399_v41, %v2507_v33  ;;  %vm2518_vm13 = vweird.f32 %v3399_v41 }
 0x6c5   : > { %3400 = vrsqrt.f32 %v2508_v62  ;;  %vm2519_vm15 = vmor %vm2517_vm14, %vm2518_vm13  ;;  %vm2527_vm3 = vweird.f32 %v2508_v62 }
 0x6c6   : > { %v2513_v37 = vmul.f32 %v3399_v41, %v2512_v10 }
 0x6c8   : > { %v2514_v20 = vmul.f32 0.5, %v2513_v37 }
 0x6ca   : > { %v2515_v23 = vsub.f32 1.5, %v2514_v20 }
 0x6cb   : > { %v3401_v57 = vpop.eup %3400 }
 0x6cc   : > { %v2516_v29 = vmul.f32 %v3399_v41, %v2515_v23  ;;  %v2522_v12 = vmul.f32 %v3401_v57, %v2508_v62  ;;  %vm2528_vm2 = vweird.f32 %v3401_v57 }
 0x6cd   : > { %vm2529_vm4 = vmor %vm2527_vm3, %vm2528_vm2 }
 0x6ce   : > { %v2523_v0 = vmul.f32 %v3401_v57, %v2522_v12  ;;  %v2520_v52 = vsel %vm2519_vm15, %v3399_v41, %v2516_v29  ;;  %v3233_v29 = vld [vmem:[%s5232_s11] ss:$0 sm:$0xff] }
 0x6cf   : > { %v2551_v35 = vmul.f32 %v2520_v52, %v2483_v34 }
 0x6d0   : > { %v2524_v46 = vmul.f32 0.5, %v2523_v0 }
 0x6d1   : > { %v2558_v59 = vmul.f32 %v3230_v26, %v2551_v35 }
 0x6d2   : > { %v2525_v48 = vsub.f32 1.5, %v2524_v46 }
 0x6d3   : > { %v5012_v49 = vadd.f32 %v3231_v6, %v2558_v59 }
 0x6d4   : > { %v2526_v44 = vmul.f32 %v3401_v57, %v2525_v48 }
 0x6d6   : > { %v2530_v38 = vsel %vm2529_vm4, %v3401_v57, %v2526_v44 }
 0x6d7   : > { %v2552_v2 = vmul.f32 %v2530_v38, %v2484_v61 }
 0x6d9   : > { %v2559_v9 = vmul.f32 %v3230_v26, %v2552_v2 }
 0x6db   : > { %v5014_v32 = vadd.f32 %v3231_v6, %v2559_v9 }
 0x6dd   : > { %v2573_v7 = vpack.c.bf16 %v5014_v32, %v5012_v49 }
 0x6df   : > { %3067 = vmatmul.msk.bf16.vlgmr.msrb.gmra.mxu2 %vm853_vm0, %v2573_v7 }
 0x6e6   : > { %v2499_v28 = vpop.xlane.xlu0 %2498 }
 0x6e7   : > { %v2505_v8 = vmul.f32 %v2499_v28, %v4980_v36 }
 0x6e9   : > { %v2509_v17 = vadd.f32 1e-05, %v2505_v8 }
 0x6eb   : > { %3402 = vrsqrt.f32 %v2509_v17  ;;  %vm2537_vm6 = vweird.f32 %v2509_v17 }
 0x6ee   : > { %v2502_v18 = vpop.xlane.xlu2 %2501 }
 0x6ef   : > { %v2506_v24 = vmul.f32 %v2502_v18, %v4980_v36 }
 0x6f1   : > { %v3403_v1 = vpop.eup %3402  ;;  %v2510_v42 = vadd.f32 1e-05, %v2506_v24 }
 0x6f2   : > { %v2532_v39 = vmul.f32 %v3403_v1, %v2509_v17  ;;  %vm2538_vm5 = vweird.f32 %v3403_v1 }
 0x6f3   : > { %3404 = vrsqrt.f32 %v2510_v42  ;;  %vm2539_vm1 = vmor %vm2537_vm6, %vm2538_vm5  ;;  %vm2547_vm8 = vweird.f32 %v2510_v42 }
 0x6f4   : > { %v2533_v63 = vmul.f32 %v3403_v1, %v2532_v39 }
 0x6f6   : > { %v2534_v27 = vmul.f32 0.5, %v2533_v63 }
 0x6f8   : > { %v2535_v3 = vsub.f32 1.5, %v2534_v27 }
 0x6f9   : > { %v3405_v54 = vpop.eup %3404 }
 0x6fa   : > { %v2536_v60 = vmul.f32 %v3403_v1, %v2535_v3  ;;  %v2542_v56 = vmul.f32 %v3405_v54, %v2510_v42  ;;  %vm2548_vm7 = vweird.f32 %v3405_v54 }
 0x6fb   : > { %vm2549_vm9 = vmor %vm2547_vm8, %vm2548_vm7 }
 0x6fc   : > { %v2543_v34 = vmul.f32 %v3405_v54, %v2542_v56  ;;  %v2540_v30 = vsel %vm2539_vm1, %v3403_v1, %v2536_v60 }
 0x6fd   : > { %v2553_v31 = vmul.f32 %v2540_v30, %v4987_v51  ;;  %v3105_v51 = vld [vmem:[%s5230_s17 + $0x10] sm:$0xff] }
 0x6fe   : > { %v2544_v5 = vmul.f32 0.5, %v2543_v34  ;;  %2670 = vmatpush.bf16.msrb.mxu3 %v3105_v51 }
 0x6ff   : > { %v2560_v45 = vmul.f32 %v3230_v26, %v2553_v31 }
 0x700   : > { %v2545_v14 = vsub.f32 1.5, %v2544_v5 }
 0x701   : > { %v2567_v25 = vadd.f32 %v3231_v6, %v2560_v45 }
 0x702   : > { %v2546_v61 = vmul.f32 %v3405_v54, %v2545_v14 }
 0x704   : > { %v2550_v11 = vsel %vm2549_vm9, %v3405_v54, %v2546_v61 }
 0x705   : > { %v2554_v4 = vmul.f32 %v2550_v11, %v4993_v50  ;;  %v3104_v50 = vld [vmem:[%s5230_s17 + $0x8] sm:$0xff] }
 0x706   : > { %2671 = vmatpush.bf16.msrb.mxu3 %v3104_v50 }
 0x707   : > { %v2561_v40 = vmul.f32 %v3230_v26, %v2554_v4 }
 0x709   : > { %v2568_v58 = vadd.f32 %v3231_v6, %v2561_v40 }
 0x70a   : > { %2672 = vmatpush.bf16.msrb.mxu3 %v3103_v16 }
 0x70b   : > { %v2574_v43 = vpack.c.bf16 %v2568_v58, %v2567_v25 }
 0x70d   : > { %3068 = vmatmul.msk.bf16.gmra.mxu2 %vm853_vm0, %v2574_v43 }
 0x762   : > { %v2606_v55 = vpop.f32.mrf.mxu2 }
 0x763   : > { %v2607_v15 = vadd.f32 %v3232_v13, %v2606_v55 }
 0x765   : > { %v2616_v53 = vmax.f32 %v2607_v15, 0.0 }
 0x76a   : > { %v2608_v33 = vpop.f32.mrf.mxu2 }
 0x76b   : > { %v2609_v47 = vadd.f32 %v3232_v13, %v2608_v33  ;;  %v3234_v33 = vld [vmem:[%s5235_s15] ss:$0 sm:$0xff] }
 0x76d   : > { %v2617_v22 = vmax.f32 %v2609_v47, 0.0 }
 0x76f   : > { %v2628_v21 = vpack.c.bf16 %v2617_v22, %v2616_v53  ;;  %v3235_v22 = vld [vmem:[%s5236_s9] ss:$0 sm:$0xff] }
 0x771   : > { %3085 = vmatmul.msk.bf16.vlgmr.msrb.gmra.mxu3 %vm2658_vm10, %v2628_v21 }
 0x790   : > { %v2611_v41 = vpop.f32.mrf.mxu2 }
 0x791   : > { %v2612_v62 = vadd.f32 %v3232_v13, %v2611_v41 }
 0x793   : > { %v2618_v20 = vmax.f32 %v2612_v62, 0.0 }
 0x798   : > { %v2613_v10 = vpop.f32.mrf.mxu2 }
 0x799   : > { %v2614_v37 = vadd.f32 %v3232_v13, %v2613_v10 }
 0x79b   : > { %v2619_v23 = vmax.f32 %v2614_v37, 0.0 }
 0x79d   : > { %v2629_v57 = vpack.c.bf16 %v2619_v23, %v2618_v20 }
 0x79f   : > { %3086 = vmatmul.msk.bf16.gmra.mxu3 %vm2658_vm10, %v2629_v57 }
 0x7f4   : > { %v2674_v12 = vpop.f32.mrf.mxu3 }
 0x7f5   : > { %v2675_v0 = vadd.f32 %v3233_v29, %v2674_v12 }
 0x7f7   : > { %v2684_v52 = vadd.f32 %v2675_v0, %v5012_v49 }
 0x7f9   : > { %v2690_v46 = vsel %vm853_vm0, %v2684_v52, 0.0 }
 0x7fa   : > { %2691 = vadd.xlane.f32.xlu1 %v2690_v46 }
 0x7fc   : > { %v2676_v48 = vpop.f32.mrf.mxu3 }
 0x7fd   : > { %v2677_v26 = vadd.f32 %v3233_v29, %v2676_v48 }
 0x7ff   : > { %v2685_v35 = vadd.f32 %v2677_v26, %v5014_v32 }
 0x801   : > { %v2693_v44 = vsel %vm853_vm0, %v2685_v35, 0.0 }
 0x802   : > { %2694 = vadd.xlane.f32.xlu0 %v2693_v44 }
 0x822   : > { %v2679_v38 = vpop.f32.mrf.mxu3 }
 0x823   : > { %v2680_v6 = vadd.f32 %v3233_v29, %v2679_v38 }
 0x825   : > { %v2686_v59 = vadd.f32 %v2680_v6, %v2567_v25 }
 0x827   : > { %v2696_v2 = vsel %vm853_vm0, %v2686_v59, 0.0 }
 0x828   : > { %2697 = vadd.xlane.f32.xlu2 %v2696_v2 }
 0x82a   : > { %v2681_v9 = vpop.f32.mrf.mxu3 }
 0x82b   : > { %v2682_v7 = vadd.f32 %v3233_v29, %v2681_v9 }
 0x82d   : > { %v2687_v28 = vadd.f32 %v2682_v7, %v2568_v58 }
 0x82f   : > { %v2699_v49 = vsel %vm853_vm0, %v2687_v28, 0.0 }
 0x830   : > { %2700 = vadd.xlane.f32.xlu1 %v2699_v49 }
 0x86d   : > { %v2692_v8 = vpop.xlane.xlu1 %2691 }
 0x86e   : > { %v2702_v17 = vmul.f32 %v2692_v8, %v4980_v36 }
 0x870   : > { %v2706_v18 = vsub.f32 %v2684_v52, %v2702_v17 }
 0x872   : > { %v2710_v32 = vmul.f32 %v2706_v18, %v2706_v18 }
 0x874   : > { %v2714_v24 = vsel %vm853_vm0, %v2710_v32, 0.0 }
 0x875   : > { %2715 = vadd.xlane.f32.xlu0 %v2714_v24  ;;  %v2695_v1 = vpop.xlane.xlu0 %2694 }
 0x876   : > { %v2703_v42 = vmul.f32 %v2695_v1, %v4980_v36 }
 0x878   : > { %v2707_v39 = vsub.f32 %v2685_v35, %v2703_v42 }
 0x87a   : > { %v2711_v63 = vmul.f32 %v2707_v39, %v2707_v39 }
 0x87c   : > { %v2717_v27 = vsel %vm853_vm0, %v2711_v63, 0.0 }
 0x87d   : > { %2718 = vadd.xlane.f32.xlu2 %v2717_v27 }
 0x89b   : > { %v2698_v3 = vpop.xlane.xlu2 %2697 }
 0x89c   : > { %v2704_v54 = vmul.f32 %v2698_v3, %v4980_v36 }
 0x89e   : > { %v5053_v60 = vsub.f32 %v2686_v59, %v2704_v54 }
 0x8a0   : > { %v2712_v56 = vmul.f32 %v5053_v60, %v5053_v60 }
 0x8a2   : > { %v2720_v34 = vsel %vm853_vm0, %v2712_v56, 0.0 }
 0x8a3   : > { %v2701_v30 = vpop.xlane.xlu1 %2700  ;;  %2721 = vadd.xlane.f32.xlu1 %v2720_v34 }
 0x8a4   : > { %v2705_v5 = vmul.f32 %v2701_v30, %v4980_v36 }
 0x8a6   : > { %v5059_v14 = vsub.f32 %v2687_v28, %v2705_v5 }
 0x8a8   : > { %v2713_v31 = vmul.f32 %v5059_v14, %v5059_v14 }
 0x8aa   : > { %v2723_v61 = vsel %vm853_vm0, %v2713_v31, 0.0 }
 0x8ab   : > { %2724 = vadd.xlane.f32.xlu0 %v2723_v61 }
 0x8e8   : > { %v2716_v11 = vpop.xlane.xlu0 %2715 }
 0x8e9   : > { %v2726_v4 = vmul.f32 %v2716_v11, %v4980_v36 }
 0x8eb   : > { %v2730_v45 = vadd.f32 1e-05, %v2726_v4 }
 0x8ed   : > { %3406 = vrsqrt.f32 %v2730_v45  ;;  %vm2740_vm12 = vweird.f32 %v2730_v45 }
 0x8f0   : > { %v2719_v40 = vpop.xlane.xlu2 %2718 }
 0x8f1   : > { %v2727_v25 = vmul.f32 %v2719_v40, %v4980_v36 }
 0x8f3   : > { %v3407_v58 = vpop.eup %3406  ;;  %v2731_v43 = vadd.f32 1e-05, %v2727_v25 }
 0x8f4   : > { %v2735_v19 = vmul.f32 %v3407_v58, %v2730_v45  ;;  %vm2741_vm11 = vweird.f32 %v3407_v58 }
 0x8f5   : > { %3408 = vrsqrt.f32 %v2731_v43  ;;  %vm2742_vm13 = vmor %vm2740_vm12, %vm2741_vm11  ;;  %vm2750_vm15 = vweird.f32 %v2731_v43 }
 0x8f6   : > { %v2736_v51 = vmul.f32 %v3407_v58, %v2735_v19 }
 0x8f8   : > { %v2737_v50 = vmul.f32 0.5, %v2736_v51 }
 0x8fa   : > { %v2738_v16 = vsub.f32 1.5, %v2737_v50 }
 0x8fb   : > { %v3409_v55 = vpop.eup %3408 }
 0x8fc   : > { %v2739_v13 = vmul.f32 %v3407_v58, %v2738_v16  ;;  %v2745_v15 = vmul.f32 %v3409_v55, %v2731_v43  ;;  %vm2751_vm14 = vweird.f32 %v3409_v55 }
 0x8fd   : > { %vm2752_vm2 = vmor %vm2750_vm15, %vm2751_vm14 }
 0x8fe   : > { %v2743_v47 = vsel %vm2742_vm13, %v3407_v58, %v2739_v13  ;;  %v2746_v53 = vmul.f32 %v3409_v55, %v2745_v15 }
 0x8ff   : > { %v2774_v21 = vmul.f32 %v2743_v47, %v2706_v18 }
 0x900   : > { %v2747_v41 = vmul.f32 0.5, %v2746_v53 }
 0x901   : > { %v2781_v62 = vmul.f32 %v3234_v33, %v2774_v21 }
 0x902   : > { %v2748_v10 = vsub.f32 1.5, %v2747_v41 }
 0x903   : > { %v2788_v37 = vadd.f32 %v3235_v22, %v2781_v62 }
 0x904   : > { %v2749_v20 = vmul.f32 %v3409_v55, %v2748_v10 }
 0x905   : > { %2792 = vst.msk [vmem:[%s5077_s20] sm:$0xff] %vm853_vm0, %v2788_v37 }
 0x906   : > { %v2753_v23 = vsel %vm2752_vm2, %v3409_v55, %v2749_v20 }
 0x907   : > { %v2775_v57 = vmul.f32 %v2753_v23, %v2707_v39 }
 0x909   : > { %v2782_v29 = vmul.f32 %v3234_v33, %v2775_v57 }
 0x90b   : > { %v2789_v12 = vadd.f32 %v3235_v22, %v2782_v29 }
 0x90d   : > { %2793 = vst.msk [vmem:[%s5077_s20 + $0x8] sm:$0xff] %vm853_vm0, %v2789_v12 }
 0x916   : > { %v2722_v0 = vpop.xlane.xlu1 %2721 }
 0x917   : > { %v2728_v52 = vmul.f32 %v2722_v0, %v4980_v36 }
 0x919   : > { %v2732_v46 = vadd.f32 1e-05, %v2728_v52 }
 0x91b   : > { %3410 = vrsqrt.f32 %v2732_v46  ;;  %vm2760_vm4 = vweird.f32 %v2732_v46 }
 0x91e   : > { %v2725_v48 = vpop.xlane.xlu0 %2724 }
 0x91f   : > { %v2729_v26 = vmul.f32 %v2725_v48, %v4980_v36 }
 0x921   : > { %v3411_v35 = vpop.eup %3410  ;;  %v2733_v44 = vadd.f32 1e-05, %v2729_v26 }
 0x922   : > { %v2755_v38 = vmul.f32 %v3411_v35, %v2732_v46  ;;  %vm2761_vm3 = vweird.f32 %v3411_v35 }
 0x923   : > { %3412 = vrsqrt.f32 %v2733_v44  ;;  %vm2762_vm5 = vmor %vm2760_vm4, %vm2761_vm3  ;;  %vm2770_vm1 = vweird.f32 %v2733_v44 }
 0x924   : > { %v2756_v6 = vmul.f32 %v3411_v35, %v2755_v38 }
 0x926   : > { %v2757_v59 = vmul.f32 0.5, %v2756_v6 }
 0x928   : > { %v2758_v2 = vsub.f32 1.5, %v2757_v59 }
 0x929   : > { %v3413_v9 = vpop.eup %3412 }
 0x92a   : > { %v2759_v7 = vmul.f32 %v3411_v35, %v2758_v2  ;;  %v2765_v28 = vmul.f32 %v3413_v9, %v2733_v44  ;;  %vm2771_vm6 = vweird.f32 %v3413_v9 }
 0x92b   : > { %vm2772_vm7 = vmor %vm2770_vm1, %vm2771_vm6 }
 0x92c   : > { %v2763_v49 = vsel %vm2762_vm5, %v3411_v35, %v2759_v7  ;;  %v2766_v8 = vmul.f32 %v3413_v9, %v2765_v28 }
 0x92d   : > { %v2776_v17 = vmul.f32 %v2763_v49, %v5053_v60 }
 0x92e   : > { %v2767_v36 = vmul.f32 0.5, %v2766_v8 }
 0x92f   : > { %v2783_v18 = vmul.f32 %v3234_v33, %v2776_v17 }
 0x930   : > { %v2768_v32 = vsub.f32 1.5, %v2767_v36 }
 0x931   : > { %v2790_v24 = vadd.f32 %v3235_v22, %v2783_v18 }
 0x932   : > { %v2769_v1 = vmul.f32 %v3413_v9, %v2768_v32 }
 0x933   : > { %2794 = vst.msk [vmem:[%s5077_s20 + $0x10] sm:$0xff] %vm853_vm0, %v2790_v24 }
 0x934   : > { %v2773_v42 = vsel %vm2772_vm7, %v3413_v9, %v2769_v1 }
 0x935   : > { %v2777_v39 = vmul.f32 %v2773_v42, %v5059_v14 }
 0x937   : > { %v2784_v63 = vmul.f32 %v3234_v33, %v2777_v39 }
 0x939   : > { %v2791_v27 = vadd.f32 %v3235_v22, %v2784_v63 }
 0x93b   : > { %2795 = vst.msk [vmem:[%s5077_s20 + $0x18] sm:$0xff] %vm853_vm0, %v2791_v27 }
 0x93c PF: > { %s39_s4 = sadd.s32 1, %s3640_s4   ;;  %s5238_s0 = sld [smem:[#allocation22_spill]] }
 0x93d   : > { %p36_p5 = scmp.ge.s32.totalorder %s39_s4, 6   ;;  %s5239_s30 = sld [smem:[#allocation14_spill]] }
 0x93e   : > { %s5240_s25 = sld [smem:[#allocation21_spill]]  ;;  %s5245_s1 = smov %s3604_s22 }
 0x93f   : > { %s5241_s3 = sld [smem:[#allocation17_spill]]  ;;  %s5246_s22 = smov %s3608_s23 }
 0x940   : > { %s5242_s26 = sld [smem:[#allocation18_spill]]  ;;  %s5248_s24 = smov %s3616_s2 }
 0x941   : > { %s5243_s27 = sld [smem:[#allocation19_spill]]  ;;  %38 = sbr.rel (!%p36_p5) target bundleno = 29 (0x1d), region = 177 }
 0x942   : > { %s5244_s28 = sld [smem:[#allocation20_spill]]  ;;  %s5247_s23 = smov %s5238_s0 }
 0x943   : > { %s5249_s2 = smov %s5239_s30 }
 0x946   :  { %2824 = vsyncpa [#allocation4], 1 }
 0x947   :  { %2826 = vsyncpa [#allocation4 + $0x1], 1 }
 0x948   :  { %2827 = vsyncpa [#allocation6], 1 }
 0x949   :  { %2829 = vsyncpa [#allocation6 + $0x1], 1 }
 0x94a   :  { %2830 = vsyncpa [#allocation9], 1 }
 0x94b   :  { %2832 = vsyncpa [#allocation9 + $0x1], 1 }

</bundles_post_ra>
